<compile_context>
chip_gen: v5e
topology: v5e:2x2
jax: 0.10.0
libtpu: 0.0.40
codegen_flags: <defaults>
</compile_context>

<pallas_src>
import jax
import jax.numpy as jnp
from jax.experimental import pallas as pl
from jax.experimental.pallas import tpu as pltpu

X_DIM = 28 * 28        # 784  (multiple of 8 -> no feature padding needed)
HIDDEN_DIM2 = 500
Y_DIM = 10
INIT_VAR = 0.001

# Padded (lane/sublane friendly) dimensions for the hidden / class axes.
H_PAD = 512            # 4 * 128
Y_PAD = 128            # 1 * 128
NEG_BIG = -1e30        # bias for padded classes -> never selected by argmax

TILE_MULT = 128        # batch-tile rows: multiple of 128 (aligned transpose/store)
MAX_TILE_B = 512       # safe on all generations; sweep up to 1024-2048 on v6e


def _softplus(x):
    # matches torch.nn.Softplus (beta=1, threshold=20); computed in f32.
    return jnp.where(x > 20.0, x, jnp.log1p(jnp.exp(jnp.minimum(x, 20.0))))


def m2_forward_kernel(x_ref, w1_ref, b1_ref, w2_ref, b2_ref, w3_ref, b3_ref,
                      out_ref):
    # x tile cast to bf16 once; weights already bf16; accumulate + biases in f32.
    x = x_ref[...].astype(jnp.bfloat16)                              # (TB, 784)

    h1 = _softplus(
        jnp.dot(x, w1_ref[...], preferred_element_type=jnp.float32)
        + b1_ref[...])                                               # (TB, 512) f32
    h2 = _softplus(
        jnp.dot(h1.astype(jnp.bfloat16), w2_ref[...],
                preferred_element_type=jnp.float32) + b2_ref[...])   # (TB, 512) f32
    logits = (jnp.dot(h2.astype(jnp.bfloat16), w3_ref[...],
                      preferred_element_type=jnp.float32)
              + b3_ref[...])                                         # (TB, 128) f32

    # argmax over classes (first index on ties == torch .max(dim=1)[1]),
    # computed on the transposed (classes, batch) tile so the result is a
    # lane-dense (1, TB) row instead of a lane-width-1 column.
    lt = logits.T                                                    # (128, TB)
    maxl = jnp.max(lt, axis=0, keepdims=True)                        # (1, TB)
    cls = jax.lax.broadcasted_iota(jnp.int32, lt.shape, 0)
    cand = jnp.where(lt == maxl, cls, jnp.int32(Y_PAD))
    out_ref[...] = jnp.min(cand, axis=0, keepdims=True).reshape(1, 1, -1)


def pad_params(params):
    """Pad torch-layout params to MXU-friendly shapes (done once, host side).

    Weights -> bf16 (MXU operands), biases stay f32 (added to the f32
    accumulator). Padded class biases are -1e30 so they never win the argmax;
    padded hidden columns feed zero rows of the next weight -> exact math.
    """
    w1, b1, w2, b2, w3, b3 = params
    w1p = (jnp.zeros((X_DIM, H_PAD), jnp.float32)
           .at[:, :HIDDEN_DIM2].set(w1).astype(jnp.bfloat16))
    b1p = jnp.zeros((1, H_PAD), jnp.float32).at[:, :HIDDEN_DIM2].set(b1)
    w2p = (jnp.zeros((H_PAD, H_PAD), jnp.float32)
           .at[:HIDDEN_DIM2, :HIDDEN_DIM2].set(w2).astype(jnp.bfloat16))
    b2p = jnp.zeros((1, H_PAD), jnp.float32).at[:, :HIDDEN_DIM2].set(b2)
    w3p = (jnp.zeros((H_PAD, Y_PAD), jnp.float32)
           .at[:HIDDEN_DIM2, :Y_DIM].set(w3).astype(jnp.bfloat16))
    b3p = jnp.full((1, Y_PAD), NEG_BIG, jnp.float32).at[:, :Y_DIM].set(b3)
    return (w1p, b1p, w2p, b2p, w3p, b3p)


def _compute_tiling(batch):
    """Balanced batch tiling.

    - tile rows are a multiple of 128 (keeps the logits transpose and the
      lane-dense output block aligned),
    - tiles are balanced (B=520 -> 2x384, not 2x512),
    - batches >= 256 always get >= 2 grid steps so the "parallel" axis can
      shard across v7x's two TensorCores.
    """
    num_tiles = max(1, -(-batch // MAX_TILE_B))
    if num_tiles == 1 and batch >= 2 * TILE_MULT:
        num_tiles = 2
    per_tile = -(-batch // num_tiles)
    tile_b = -(-per_tile // TILE_MULT) * TILE_MULT
    return num_tiles, tile_b


def m2_forward(x, padded_params):
    w1p, b1p, w2p, b2p, w3p, b3p = padded_params
    x = x.astype(jnp.float32)
    B = x.shape[0]

    num_tiles, tile_b = _compute_tiling(B)
    b_pad = num_tiles * tile_b
    if b_pad != B:
        x = jnp.pad(x, ((0, b_pad - B), (0, 0)))   # batch pad only; no feature pad

    grid_spec = pltpu.PrefetchScalarGridSpec(
        num_scalar_prefetch=0,
        grid=(num_tiles,),
        in_specs=[
            pl.BlockSpec((tile_b, X_DIM), lambda i: (i, 0)),   # x tile streams
            pl.BlockSpec((X_DIM, H_PAD), lambda i: (0, 0)),    # weights resident
            pl.BlockSpec((1, H_PAD), lambda i: (0, 0)),
            pl.BlockSpec((H_PAD, H_PAD), lambda i: (0, 0)),
            pl.BlockSpec((1, H_PAD), lambda i: (0, 0)),
            pl.BlockSpec((H_PAD, Y_PAD), lambda i: (0, 0)),
            pl.BlockSpec((1, Y_PAD), lambda i: (0, 0)),
        ],
        out_specs=pl.BlockSpec((1, 1, tile_b), lambda i: (i, 0, 0)),
    )

    out = pl.pallas_call(
        m2_forward_kernel,
        out_shape=jax.ShapeDtypeStruct((num_tiles, 1, tile_b), jnp.int32),
        grid_spec=grid_spec,
        compiler_params=pltpu.CompilerParams(
            dimension_semantics=("parallel",),        # dual-TC sharding on v7x
            vmem_limit_bytes=32 * 1024 * 1024),
    )(x, w1p, b1p, w2p, b2p, w3p, b3p)

    # PyTorch returns class indices of shape (B,). (.astype(int64) stays int32
    # unless jax_enable_x64 is enabled; functionally equivalent.)
    return out.reshape(-1)[:B].astype(jnp.int64)


def init_params(key):
    """Deterministic init mirroring M2.__init__: weights ~ N(0, INIT_VAR), biases = 0.

    Weights stored as (in_features, out_features) so x @ W + b == PyTorch x @ W.T + b.
    """
    k1, k2, k3 = jax.random.split(key, 3)
    w1 = jax.random.normal(k1, (X_DIM, HIDDEN_DIM2), jnp.float32) * INIT_VAR
    b1 = jnp.zeros((1, HIDDEN_DIM2), jnp.float32)
    w2 = jax.random.normal(k2, (HIDDEN_DIM2, HIDDEN_DIM2), jnp.float32) * INIT_VAR
    b2 = jnp.zeros((1, HIDDEN_DIM2), jnp.float32)
    w3 = jax.random.normal(k3, (HIDDEN_DIM2, Y_DIM), jnp.float32) * INIT_VAR
    b3 = jnp.zeros((1, Y_DIM), jnp.float32)
    return (w1, b1, w2, b2, w3, b3)


def reference_logits(x, params):
    """Full-f32 reference of encoder_y(x)."""
    w1, b1, w2, b2, w3, b3 = params
    h1 = _softplus(x @ w1 + b1)
    h2 = _softplus(h1 @ w2 + b2)
    return h2 @ w3 + b3


def reference_forward(x, params):
    logits = reference_logits(x, params)
    probs = jax.nn.softmax(logits, axis=1)     # monotone -> same argmax as logits
    return jnp.argmax(probs, axis=1)


if __name__ == "__main__":
    key = jax.random.PRNGKey(0)
    kx, kp = jax.random.split(key)

    B = 8
    x = jax.random.normal(kx, (B, X_DIM), jnp.float32)
    params = init_params(kp)
    padded = pad_params(params)

    out = jax.block_until_ready(m2_forward(x, padded))

    logits = reference_logits(x, params)
    ref = reference_forward(x, params)

    assert out.shape == (B,)
    assert str(out.dtype) in ("int32", "int64")
    out32 = out.astype(jnp.int32)
    assert bool(jnp.all((out32 >= 0) & (out32 < Y_DIM)))

    # Exact agreement with the f32 reference is expected; the bf16 MXU path may
    # only legitimately differ on near-ties, so tolerate disagreement solely
    # when the chosen class's logit is within 1e-3 of the reference maximum.
    chosen = jnp.take_along_axis(logits, out32[:, None], axis=1)[:, 0]
    gap = jnp.max(logits, axis=1) - chosen
    ok = jnp.all((out32 == ref.astype(jnp.int32)) | (gap <= 1e-3))
    assert bool(ok)

    print("KERNEL_OK")
</pallas_src>

<mosaic_0001>
module attributes {stable_mosaic.version = 11 : i64} {
  func.func @m2_forward_kernel(%arg0: i32, %arg1: memref<128x784xf32, #tpu.memory_space<vmem>>, %arg2: memref<784x512xbf16, #tpu.memory_space<vmem>>, %arg3: memref<1x512xf32, #tpu.memory_space<vmem>>, %arg4: memref<512x512xbf16, #tpu.memory_space<vmem>>, %arg5: memref<1x512xf32, #tpu.memory_space<vmem>>, %arg6: memref<512x128xbf16, #tpu.memory_space<vmem>>, %arg7: memref<1x128xf32, #tpu.memory_space<vmem>>, %arg8: memref<1x1x128xi32, #tpu.memory_space<vmem>>) attributes {dimension_semantics = [#tpu.dimension_semantics<parallel>], iteration_bounds = array<i64: 1>, scalar_prefetch = 0 : i64, scratch_operands = 0 : i64, tpu.core_type = #tpu.core_type<tc>, window_params = [{transform_indices = @transform_0, window_bounds = array<i64: 128, 784>}, {pipeline_mode = #tpu.pipeline_mode<synchronous>, transform_indices = @transform_1, window_bounds = array<i64: 784, 512>}, {pipeline_mode = #tpu.pipeline_mode<synchronous>, transform_indices = @transform_2, window_bounds = array<i64: 1, 512>}, {pipeline_mode = #tpu.pipeline_mode<synchronous>, transform_indices = @transform_3, window_bounds = array<i64: 512, 512>}, {pipeline_mode = #tpu.pipeline_mode<synchronous>, transform_indices = @transform_4, window_bounds = array<i64: 1, 512>}, {pipeline_mode = #tpu.pipeline_mode<synchronous>, transform_indices = @transform_5, window_bounds = array<i64: 512, 128>}, {pipeline_mode = #tpu.pipeline_mode<synchronous>, transform_indices = @transform_6, window_bounds = array<i64: 1, 128>}, {transform_indices = @transform_7, window_bounds = array<i64: 1, 1, 128>}]} {
    %c0 = arith.constant 0 : index
    %c0_0 = arith.constant 0 : index
    %0 = vector.load %arg1[%c0, %c0_0] : memref<128x784xf32, #tpu.memory_space<vmem>>, vector<128x784xf32>
    %1 = arith.truncf %0 : vector<128x784xf32> to vector<128x784xbf16>
    %c0_1 = arith.constant 0 : index
    %c0_2 = arith.constant 0 : index
    %2 = vector.load %arg2[%c0_1, %c0_2] : memref<784x512xbf16, #tpu.memory_space<vmem>>, vector<784x512xbf16>
    %cst = arith.constant dense<0.000000e+00> : vector<128x512xf32>
    %3 = tpu.matmul %1, %2, %cst {dimension_numbers = #tpu.dot_dimension_numbers<[1], [0], [0], [1], [0, 0, 1, 1], [], []>} : vector<128x784xbf16>, vector<784x512xbf16>, vector<128x512xf32> -> vector<128x512xf32>
    %c0_3 = arith.constant 0 : index
    %c0_4 = arith.constant 0 : index
    %4 = vector.load %arg3[%c0_3, %c0_4] : memref<1x512xf32, #tpu.memory_space<vmem>>, vector<1x512xf32>
    %5 = vector.broadcast %4 : vector<1x512xf32> to vector<128x512xf32>
    %6 = arith.addf %3, %5 : vector<128x512xf32>
    %cst_5 = arith.constant 2.000000e+01 : f32
    %7 = vector.broadcast %cst_5 : f32 to vector<128x512xf32>
    %8 = arith.cmpf ogt, %6, %7 : vector<128x512xf32>
    %cst_6 = arith.constant 2.000000e+01 : f32
    %9 = vector.broadcast %cst_6 : f32 to vector<128x512xf32>
    %10 = arith.minimumf %6, %9 : vector<128x512xf32>
    %11 = math.exp %10 : vector<128x512xf32>
    %12 = math.log1p %11 : vector<128x512xf32>
    %13 = arith.select %8, %6, %12 : vector<128x512xi1>, vector<128x512xf32>
    %14 = arith.truncf %13 : vector<128x512xf32> to vector<128x512xbf16>
    %c0_7 = arith.constant 0 : index
    %c0_8 = arith.constant 0 : index
    %15 = vector.load %arg4[%c0_7, %c0_8] : memref<512x512xbf16, #tpu.memory_space<vmem>>, vector<512x512xbf16>
    %cst_9 = arith.constant dense<0.000000e+00> : vector<128x512xf32>
    %16 = tpu.matmul %14, %15, %cst_9 {dimension_numbers = #tpu.dot_dimension_numbers<[1], [0], [0], [1], [0, 0, 1, 1], [], []>} : vector<128x512xbf16>, vector<512x512xbf16>, vector<128x512xf32> -> vector<128x512xf32>
    %c0_10 = arith.constant 0 : index
    %c0_11 = arith.constant 0 : index
    %17 = vector.load %arg5[%c0_10, %c0_11] : memref<1x512xf32, #tpu.memory_space<vmem>>, vector<1x512xf32>
    %18 = vector.broadcast %17 : vector<1x512xf32> to vector<128x512xf32>
    %19 = arith.addf %16, %18 : vector<128x512xf32>
    %cst_12 = arith.constant 2.000000e+01 : f32
    %20 = vector.broadcast %cst_12 : f32 to vector<128x512xf32>
    %21 = arith.cmpf ogt, %19, %20 : vector<128x512xf32>
    %cst_13 = arith.constant 2.000000e+01 : f32
    %22 = vector.broadcast %cst_13 : f32 to vector<128x512xf32>
    %23 = arith.minimumf %19, %22 : vector<128x512xf32>
    %24 = math.exp %23 : vector<128x512xf32>
    %25 = math.log1p %24 : vector<128x512xf32>
    %26 = arith.select %21, %19, %25 : vector<128x512xi1>, vector<128x512xf32>
    %27 = arith.truncf %26 : vector<128x512xf32> to vector<128x512xbf16>
    %c0_14 = arith.constant 0 : index
    %c0_15 = arith.constant 0 : index
    %28 = vector.load %arg6[%c0_14, %c0_15] : memref<512x128xbf16, #tpu.memory_space<vmem>>, vector<512x128xbf16>
    %cst_16 = arith.constant dense<0.000000e+00> : vector<128x128xf32>
    %29 = tpu.matmul %27, %28, %cst_16 {dimension_numbers = #tpu.dot_dimension_numbers<[1], [0], [0], [1], [0, 0, 1, 1], [], []>} : vector<128x512xbf16>, vector<512x128xbf16>, vector<128x128xf32> -> vector<128x128xf32>
    %c0_17 = arith.constant 0 : index
    %c0_18 = arith.constant 0 : index
    %30 = vector.load %arg7[%c0_17, %c0_18] : memref<1x128xf32, #tpu.memory_space<vmem>>, vector<1x128xf32>
    %31 = vector.broadcast %30 : vector<1x128xf32> to vector<128x128xf32>
    %32 = arith.addf %29, %31 : vector<128x128xf32>
    %33 = tpu.transpose %32, [1, 0] : vector<128x128xf32> -> vector<128x128xf32>
    %cst_19 = arith.constant dense<0xFF800000> : vector<128xf32>
    %34 = vector.multi_reduction <maximumf>, %33, %cst_19 [0] : vector<128x128xf32> to vector<128xf32>
    %35 = vector.shape_cast %34 : vector<128xf32> to vector<1x128xf32>
    %36 = tpu.iota {dimensions = array<i32: 0>} : vector<128x128xi32>
    %37 = vector.broadcast %35 : vector<1x128xf32> to vector<128x128xf32>
    %38 = arith.cmpf oeq, %33, %37 : vector<128x128xf32>
    %c128_i32 = arith.constant 128 : i32
    %39 = vector.broadcast %c128_i32 : i32 to vector<128x128xi32>
    %40 = arith.select %38, %36, %39 : vector<128x128xi1>, vector<128x128xi32>
    %cst_20 = arith.constant dense<2147483647> : vector<128xi32>
    %41 = vector.multi_reduction <minsi>, %40, %cst_20 [0] : vector<128x128xi32> to vector<128xi32>
    %42 = vector.shape_cast %41 : vector<128xi32> to vector<1x128xi32>
    %43 = vector.shape_cast %42 : vector<1x128xi32> to vector<1x1x128xi32>
    %c0_21 = arith.constant 0 : index
    %c0_22 = arith.constant 0 : index
    %c0_23 = arith.constant 0 : index
    %44 = vector.load %arg8[%c0_21, %c0_22, %c0_23] : memref<1x1x128xi32, #tpu.memory_space<vmem>>, vector<1x1x128xi32>
    tpu.vector_store %arg8[%c0_21, %c0_22, %c0_23], %43 {strides = array<i32>} : memref<1x1x128xi32, #tpu.memory_space<vmem>>, vector<1x1x128xi32>,
    return
  }
  func.func @transform_0(%arg0: i32) -> (i32, i32) {
    %c0_i32 = arith.constant 0 : i32
    %c0_i32_0 = arith.constant 0 : i32
    return %arg0, %c0_i32 : i32, i32
  }
  func.func @transform_1(%arg0: i32) -> (i32, i32) {
    %c0_i32 = arith.constant 0 : i32
    %c0_i32_0 = arith.constant 0 : i32
    %c0_i32_1 = arith.constant 0 : i32
    return %c0_i32, %c0_i32_0 : i32, i32
  }
  func.func @transform_2(%arg0: i32) -> (i32, i32) {
    %c0_i32 = arith.constant 0 : i32
    %c0_i32_0 = arith.constant 0 : i32
    %c0_i32_1 = arith.constant 0 : i32
    return %c0_i32, %c0_i32_0 : i32, i32
  }
  func.func @transform_3(%arg0: i32) -> (i32, i32) {
    %c0_i32 = arith.constant 0 : i32
    %c0_i32_0 = arith.constant 0 : i32
    %c0_i32_1 = arith.constant 0 : i32
    return %c0_i32, %c0_i32_0 : i32, i32
  }
  func.func @transform_4(%arg0: i32) -> (i32, i32) {
    %c0_i32 = arith.constant 0 : i32
    %c0_i32_0 = arith.constant 0 : i32
    %c0_i32_1 = arith.constant 0 : i32
    return %c0_i32, %c0_i32_0 : i32, i32
  }
  func.func @transform_5(%arg0: i32) -> (i32, i32) {
    %c0_i32 = arith.constant 0 : i32
    %c0_i32_0 = arith.constant 0 : i32
    %c0_i32_1 = arith.constant 0 : i32
    return %c0_i32, %c0_i32_0 : i32, i32
  }
  func.func @transform_6(%arg0: i32) -> (i32, i32) {
    %c0_i32 = arith.constant 0 : i32
    %c0_i32_0 = arith.constant 0 : i32
    %c0_i32_1 = arith.constant 0 : i32
    return %c0_i32, %c0_i32_0 : i32, i32
  }
  func.func @transform_7(%arg0: i32) -> (i32, i32, i32) {
    %c0_i32 = arith.constant 0 : i32
    %c0_i32_0 = arith.constant 0 : i32
    %c0_i32_1 = arith.constant 0 : i32
    return %arg0, %c0_i32, %c0_i32_0 : i32, i32, i32
  }
}

</mosaic_0001>

<bundles_post_ra>
// kernel: tpu_custom_call.1
= control target key start
LH: loop header
LB: loop body
LE: loop exit
PB: predicated region body
PF: predicated region fallthrough
CT: control target
= control target key end

     0   :  { %12 = vsyncpa [#allocation3], 0  ;;  %s13867_s0 = inlined_call_operand.vmem [shape: f32[128,784], index: 0, kind: input, shape index: {}]   ;;  %s13868_s1 = inlined_call_operand.vmem [shape: bf16[784,512], index: 1, kind: input, shape index: {}]   ;;  %s13869_s2 = inlined_call_operand.vmem [shape: f32[1,512], index: 2, kind: input, shape index: {}]   ;;  %s13870_s3 = inlined_call_operand.hbm [shape: bf16[512,512], index: 3, kind: input, shape index: {}]   ;;  %s13871_s4 = inlined_call_operand.vmem [shape: f32[1,512], index: 4, kind: input, shape index: {}]   ;;  %s13872_s5 = inlined_call_operand.hbm [shape: bf16[512,128], index: 5, kind: input, shape index: {}]   ;;  %s13873_s6 = inlined_call_operand.vmem [shape: f32[1,128], index: 6, kind: input, shape index: {}]   ;;  %s13874_s7 = inlined_call_operand.hbm [shape: s32[1,1,128], index: 7, kind: output, shape index: {}]  }
   0x1   :  { %13 = vsyncpa [#allocation6], 0 }
   0x2   :  { %14 = vsyncpa [#allocation4], 0  ;;  %s25_s26 = sshll.u32 %s13870_s3, 4  ;;  %s9258_s27 = smov [#allocation2]   ;;  %s26_s26 = int_to_ptr.hbm [resolvable:$true] %s25_s26 }
   0x3   :  { %s27_s28 = sshll.u32 %s9258_s27, 4  ;;  %s40_s8 = sshll.u32 %s13872_s5, 4  ;;  %s28_s28 = int_to_ptr.vmem [resolvable:$true] %s27_s28  ;;  %s41_s8 = int_to_ptr.hbm [resolvable:$true] %s40_s8 }
   0x4   :  { %s9259_s9 = smov 256   ;;  %s9260_s10 = smov 16  }
   0x5   :  { %33 = dma.hbm_to_vmem [thread:$0]  %s26_s26, 16384, %s28_s28, [#allocation3], %s9259_s9, %s9259_s9, %s9260_s10  }
   0x6   :  { %s9261_s11 = smov [#allocation5]   ;;  %s9262_s13 = smov 64  }
   0x7   :  { %s42_s12 = sshll.u32 %s9261_s11, 4  ;;  %s9263_s14 = smov 4   ;;  %s43_s12 = int_to_ptr.vmem [resolvable:$true] %s42_s12 }
   0x8   :  { %48 = dma.hbm_to_vmem [thread:$0]  %s41_s8, 4096, %s43_s12, [#allocation6], %s9262_s13, %s9262_s13, %s9263_s14  }
   0x9   :  { %9252 = dma.done.wait [#allocation3], 16384  }
   0xa   :  { %9253 = vsyncadd [#allocation3], 4294950912 }
   0xb   :  { %9254 = dma.done.wait [#allocation6], 4096  }
   0xc   :  { %9255 = vsyncadd [#allocation6], 4294963200  ;;  %v6959_v0 = vld [vmem:[%s13868_s1 + $0xe0] sm:$0xf]  ;;  %v8331_v1 = vld [vmem:[%s13868_s1 + $0xec] sm:$0xf0] }
   0xd   :  { %v7087_v2 = vld [vmem:[%s13868_s1 + $0x1e0] sm:$0xf]  ;;  %v6960_v3 = vor.u32 %v8331_v1, %v6959_v0  ;;  %v8363_v4 = vld [vmem:[%s13868_s1 + $0x1ec] sm:$0xf0]  ;;  %vm1414_vm0 = vcmask 130048   ;;  %s6834_s5 = sshll.u32 %s13874_s7, 4  ;;  %s6835_s5 = int_to_ptr.hbm [resolvable:$true] %s6834_s5 }
   0xe   :  { %v7215_v5 = vld [vmem:[%s13868_s1 + $0x2e0] sm:$0xf]  ;;  %v8395_v6 = vld [vmem:[%s13868_s1 + $0x2ec] sm:$0xf0]  ;;  %v7088_v7 = vor.u32 %v8363_v4, %v7087_v2 }
   0xf   :  { %v7216_v8 = vor.u32 %v8395_v6, %v7215_v5  ;;  %v7343_v9 = vld [vmem:[%s13868_s1 + $0x3e0] sm:$0xf]  ;;  %v8427_v10 = vld [vmem:[%s13868_s1 + $0x3ec] sm:$0xf0]  ;;  %1439 = vmatpush.bf16.msra.mxu0 %v6960_v3 }
  0x10   :  { %v6943_v11 = vld [vmem:[%s13868_s1 + $0xc0] sm:$0xf]  ;;  %v7344_v12 = vor.u32 %v8427_v10, %v7343_v9  ;;  %v8327_v13 = vld [vmem:[%s13868_s1 + $0xcc] sm:$0xf0]  ;;  %1488 = vmatpush.bf16.msra.mxu1 %v7088_v7 }
  0x11   :  { %v7071_v14 = vld [vmem:[%s13868_s1 + $0x1c0] sm:$0xf]  ;;  %v8359_v15 = vld [vmem:[%s13868_s1 + $0x1cc] sm:$0xf0]  ;;  %1537 = vmatpush.bf16.msra.mxu2 %v7216_v8  ;;  %v6944_v16 = vor.u32 %v8327_v13, %v6943_v11 }
  0x12   :  { %v7072_v17 = vor.u32 %v8359_v15, %v7071_v14  ;;  %v7199_v18 = vld [vmem:[%s13868_s1 + $0x2c0] sm:$0xf]  ;;  %v8391_v19 = vld [vmem:[%s13868_s1 + $0x2cc] sm:$0xf0]  ;;  %1586 = vmatpush.bf16.msra.mxu3 %v7344_v12 }
  0x13   :  { %v7327_v20 = vld [vmem:[%s13868_s1 + $0x3c0] sm:$0xf]  ;;  %v7200_v21 = vor.u32 %v8391_v19, %v7199_v18  ;;  %v8423_v22 = vld [vmem:[%s13868_s1 + $0x3cc] sm:$0xf0]  ;;  %1440 = vmatpush.bf16.msra.mxu0 %v6944_v16 }
  0x14   :  { %v6927_v23 = vld [vmem:[%s13868_s1 + $0xa0] sm:$0xf]  ;;  %v8323_v24 = vld [vmem:[%s13868_s1 + $0xac] sm:$0xf0]  ;;  %v7328_v25 = vor.u32 %v8423_v22, %v7327_v20  ;;  %1489 = vmatpush.bf16.msra.mxu1 %v7072_v17 }
  0x15   :  { %v7055_v26 = vld [vmem:[%s13868_s1 + $0x1a0] sm:$0xf]  ;;  %v8355_v27 = vld [vmem:[%s13868_s1 + $0x1ac] sm:$0xf0]  ;;  %v6928_v29 = vor.u32 %v8323_v24, %v6927_v23  ;;  %1538 = vmatpush.bf16.msra.mxu2 %v7200_v21 }
  0x16   :  { %v7183_v28 = vld [vmem:[%s13868_s1 + $0x2a0] sm:$0xf]  ;;  %v8387_v30 = vld [vmem:[%s13868_s1 + $0x2ac] sm:$0xf0]  ;;  %v7056_v33 = vor.u32 %v8355_v27, %v7055_v26  ;;  %1587 = vmatpush.bf16.msra.mxu3 %v7328_v25 }
  0x17   :  { %v7311_v31 = vld [vmem:[%s13868_s1 + $0x3a0] sm:$0xf]  ;;  %v8419_v32 = vld [vmem:[%s13868_s1 + $0x3ac] sm:$0xf0]  ;;  %v7184_v34 = vor.u32 %v8387_v30, %v7183_v28  ;;  %1441 = vmatpush.bf16.msra.mxu0 %v6928_v29  ;;  %v67_v29 = vld [vmem:[%s13867_s0 + $0x38] sm:$0xff] }
  0x18   :  { %v6911_v35 = vld [vmem:[%s13868_s1 + $0x80] sm:$0xf]  ;;  %v8319_v36 = vld [vmem:[%s13868_s1 + $0x8c] sm:$0xf0]  ;;  %v7312_v38 = vor.u32 %v8419_v32, %v7311_v31  ;;  %1490 = vmatpush.bf16.msra.mxu1 %v7056_v33  ;;  %v61_v30 = vld [vmem:[%s13867_s0 + $0x8] sm:$0xff] }
  0x19   :  { %v7039_v37 = vld [vmem:[%s13868_s1 + $0x180] sm:$0xf]  ;;  %v8351_v39 = vld [vmem:[%s13868_s1 + $0x18c] sm:$0xf0]  ;;  %v6912_v44 = vor.u32 %v8319_v36, %v6911_v35  ;;  %1539 = vmatpush.bf16.msra.mxu2 %v7184_v34  ;;  %v8329_v35 = vld [vmem:[%s13868_s1 + $0xe4] sm:$0xf] }
  0x1a   :  { %v7167_v40 = vld [vmem:[%s13868_s1 + $0x280] sm:$0xf]  ;;  %v8383_v41 = vld [vmem:[%s13868_s1 + $0x28c] sm:$0xf0]  ;;  %v7040_v45 = vor.u32 %v8351_v39, %v7039_v37  ;;  %1588 = vmatpush.bf16.msra.mxu3 %v7312_v38  ;;  %v6961_v36 = vld [vmem:[%s13868_s1 + $0xf0] sm:$0xf0] }
  0x1b   :  { %v7295_v42 = vld [vmem:[%s13868_s1 + $0x380] sm:$0xf]  ;;  %v8415_v43 = vld [vmem:[%s13868_s1 + $0x38c] sm:$0xf0]  ;;  %v7168_v46 = vor.u32 %v8383_v41, %v7167_v40  ;;  %1442 = vmatpush.bf16.msra.mxu0 %v6912_v44  ;;  %v69_v40 = vld [vmem:[%s13867_s0 + $0x48] sm:$0xff] }
  0x1c   :  { %v6895_v47 = vld [vmem:[%s13868_s1 + $0x60] sm:$0xf]  ;;  %v8315_v48 = vld [vmem:[%s13868_s1 + $0x6c] sm:$0xf0]  ;;  %v7296_v50 = vor.u32 %v8415_v43, %v7295_v42  ;;  %1491 = vmatpush.bf16.msra.mxu1 %v7040_v45  ;;  %v63_v41 = vld [vmem:[%s13867_s0 + $0x18] sm:$0xff] }
  0x1d   :  { %v7023_v49 = vld [vmem:[%s13868_s1 + $0x160] sm:$0xf]  ;;  %v8347_v51 = vld [vmem:[%s13868_s1 + $0x16c] sm:$0xf0]  ;;  %v6896_v56 = vor.u32 %v8315_v48, %v6895_v47  ;;  %1540 = vmatpush.bf16.msra.mxu2 %v7168_v46  ;;  %v6964_v48 = vor.u32 %v8329_v35, %v6961_v36  ;;  %v97_v36 = vld [vmem:[%s13867_s0 + $0x128] sm:$0xff] }
  0x1e   :  { %v7151_v52 = vld [vmem:[%s13868_s1 + $0x260] sm:$0xf]  ;;  %v8379_v53 = vld [vmem:[%s13868_s1 + $0x26c] sm:$0xf0]  ;;  %v7024_v57 = vor.u32 %v8347_v51, %v7023_v49  ;;  %1589 = vmatpush.bf16.msra.mxu3 %v7296_v50 }
  0x1f   :  { %v7279_v54 = vld [vmem:[%s13868_s1 + $0x360] sm:$0xf]  ;;  %v8411_v55 = vld [vmem:[%s13868_s1 + $0x36c] sm:$0xf0]  ;;  %v7152_v58 = vor.u32 %v8379_v53, %v7151_v52  ;;  %1443 = vmatpush.bf16.msra.mxu0 %v6896_v56  ;;  %v8325_v53 = vld [vmem:[%s13868_s1 + $0xc4] sm:$0xf] }
  0x20   :  { %v6879_v59 = vld [vmem:[%s13868_s1 + $0x40] sm:$0xf]  ;;  %v8311_v60 = vld [vmem:[%s13868_s1 + $0x4c] sm:$0xf0]  ;;  %v7280_v62 = vor.u32 %v8411_v55, %v7279_v54  ;;  %1492 = vmatpush.bf16.msra.mxu1 %v7024_v57  ;;  %v6945_v54 = vld [vmem:[%s13868_s1 + $0xd0] sm:$0xf0] }
  0x21   :  { %v7007_v61 = vld [vmem:[%s13868_s1 + $0x140] sm:$0xf]  ;;  %v8343_v63 = vld [vmem:[%s13868_s1 + $0x14c] sm:$0xf0]  ;;  %v6880_v4 = vor.u32 %v8311_v60, %v6879_v59  ;;  %1541 = vmatpush.bf16.msra.mxu2 %v7152_v58  ;;  %v6948_v60 = vor.u32 %v8325_v53, %v6945_v54 }
  0x22   :  { %v7135_v0 = vld [vmem:[%s13868_s1 + $0x240] sm:$0xf]  ;;  %v8375_v1 = vld [vmem:[%s13868_s1 + $0x24c] sm:$0xf0]  ;;  %v7008_v5 = vor.u32 %v8343_v63, %v7007_v61  ;;  %1590 = vmatpush.bf16.msra.mxu3 %v7280_v62 }
  0x23   :  { %v7263_v2 = vld [vmem:[%s13868_s1 + $0x340] sm:$0xf]  ;;  %v8407_v3 = vld [vmem:[%s13868_s1 + $0x34c] sm:$0xf0]  ;;  %v7136_v6 = vor.u32 %v8375_v1, %v7135_v0  ;;  %1444 = vmatpush.bf16.msra.mxu0 %v6880_v4  ;;  %v8321_v0 = vld [vmem:[%s13868_s1 + $0xa4] sm:$0xf] }
  0x24   :  { %v6863_v7 = vld [vmem:[%s13868_s1 + $0x20] sm:$0xf]  ;;  %v8307_v8 = vld [vmem:[%s13868_s1 + $0x2c] sm:$0xf0]  ;;  %v7264_v10 = vor.u32 %v8407_v3, %v7263_v2  ;;  %1493 = vmatpush.bf16.msra.mxu1 %v7008_v5  ;;  %v6929_v4 = vld [vmem:[%s13868_s1 + $0xb0] sm:$0xf0] }
  0x25   :  { %v6991_v9 = vld [vmem:[%s13868_s1 + $0x120] sm:$0xf]  ;;  %v8339_v11 = vld [vmem:[%s13868_s1 + $0x12c] sm:$0xf0]  ;;  %v6864_v17 = vor.u32 %v8307_v8, %v6863_v7  ;;  %1542 = vmatpush.bf16.msra.mxu2 %v7136_v6  ;;  %v6932_v5 = vor.u32 %v8321_v0, %v6929_v4 }
  0x26   :  { %v7119_v12 = vld [vmem:[%s13868_s1 + $0x220] sm:$0xf]  ;;  %v8371_v13 = vld [vmem:[%s13868_s1 + $0x22c] sm:$0xf0]  ;;  %v6992_v21 = vor.u32 %v8339_v11, %v6991_v9  ;;  %1591 = vmatpush.bf16.msra.mxu3 %v7264_v10  ;;  %v81_v11 = vld [vmem:[%s13867_s0 + $0xa8] sm:$0xff] }
  0x27   :  { %v7247_v14 = vld [vmem:[%s13868_s1 + $0x320] sm:$0xf]  ;;  %v8403_v15 = vld [vmem:[%s13868_s1 + $0x32c] sm:$0xf0]  ;;  %v7120_v22 = vor.u32 %v8371_v13, %v7119_v12  ;;  %1445 = vmatpush.bf16.msra.mxu0 %v6864_v17  ;;  %v75_v12 = vld [vmem:[%s13867_s0 + $0x78] sm:$0xff] }
  0x28   :  { %v6847_v16 = vld [vmem:[%s13868_s1] sm:$0xf]  ;;  %v8303_v18 = vld [vmem:[%s13868_s1 + $0xc] sm:$0xf0]  ;;  %v7248_v26 = vor.u32 %v8403_v15, %v7247_v14  ;;  %1494 = vmatpush.bf16.msra.mxu1 %v6992_v21  ;;  %v83_v15 = vld [vmem:[%s13867_s0 + $0xb8] sm:$0xff] }
  0x29   :  { %v6975_v19 = vld [vmem:[%s13868_s1 + $0x100] sm:$0xf]  ;;  %v8335_v20 = vld [vmem:[%s13868_s1 + $0x10c] sm:$0xf0]  ;;  %v6848_v33 = vor.u32 %v8303_v18, %v6847_v16  ;;  %1543 = vmatpush.bf16.msra.mxu2 %v7120_v22  ;;  %v77_v16 = vld [vmem:[%s13867_s0 + $0x88] sm:$0xff] }
  0x2a   :  { %v7103_v23 = vld [vmem:[%s13868_s1 + $0x200] sm:$0xf]  ;;  %v8367_v24 = vld [vmem:[%s13868_s1 + $0x20c] sm:$0xf0]  ;;  %v6976_v37 = vor.u32 %v8335_v20, %v6975_v19  ;;  %1592 = vmatpush.bf16.msra.mxu3 %v7248_v26  ;;  %v6913_v26 = vld [vmem:[%s13868_s1 + $0x90] sm:$0xf0] }
  0x2b   :  { %v7231_v25 = vld [vmem:[%s13868_s1 + $0x300] sm:$0xf]  ;;  %v8399_v27 = vld [vmem:[%s13868_s1 + $0x30c] sm:$0xf0]  ;;  %v7104_v38 = vor.u32 %v8367_v24, %v7103_v23  ;;  %1446 = vmatpush.bf16.msra.mxu0 %v6848_v33  ;;  %v8317_v24 = vld [vmem:[%s13868_s1 + $0x84] sm:$0xf] }
  0x2c   :  { %v60_v28 = vld [vmem:[%s13867_s0] sm:$0xff]  ;;  %v8495_v32 = vld [vmem:[%s13868_s1 + $0x60c] sm:$0xf0]  ;;  %v7232_v42 = vor.u32 %v8399_v27, %v7231_v25  ;;  %1495 = vmatpush.bf16.msra.mxu1 %v6976_v37  ;;  %v89_v33 = vld [vmem:[%s13867_s0 + $0xe8] sm:$0xff] }
  0x2d   :  { %v7615_v31 = vld [vmem:[%s13868_s1 + $0x600] sm:$0xf]  ;;  %v62_v39 = vld [vmem:[%s13867_s0 + $0x10] sm:$0xff]  ;;  %v9545_v47 = vpack.c.bf16 %v67_v29, %v60_v28  ;;  %1544 = vmatpush.bf16.msra.mxu2 %v7104_v38  ;;  %v6916_v29 = vor.u32 %v8317_v24, %v6913_v26  ;;  %v91_v37 = vld [vmem:[%s13867_s0 + $0xf8] sm:$0xff] }
  0x2e   :  { %v68_v34 = vld [vmem:[%s13867_s0 + $0x40] sm:$0xff]  ;;  %v70_v43 = vld [vmem:[%s13867_s0 + $0x50] sm:$0xff]  ;;  %v7616_v44 = vor.u32 %v8495_v32, %v7615_v31  ;;  %v9555_v52 = vpack.c.bf16 %v69_v40, %v62_v39  ;;  %1593 = vmatpush.bf16.msra.mxu3 %v7232_v42  ;;  %v95_v32 = vld [vmem:[%s13867_s0 + $0x118] sm:$0xff] }
  0x2f   :  { %v7471_v45 = vld [vmem:[%s13868_s1 + $0x4e0] sm:$0xf]  ;;  %v8459_v46 = vld [vmem:[%s13868_s1 + $0x4ec] sm:$0xf0]  ;;  %14019 = vst [vmem:[#allocation11_spill] sm:$0xff] %v9545_v47  ;;  %v9553_v51 = vpack.c.bf16 %v68_v34, %v61_v30  ;;  %v9563_v55 = vpack.c.bf16 %v70_v43, %v63_v41  ;;  %1447 = vmatmul.bf16.vlgmr.msra.gmra.mxu0 %v9545_v47 }
  0x30   :  { %v7599_v49 = vld [vmem:[%s13868_s1 + $0x5e0] sm:$0xf]  ;;  %v8491_v50 = vld [vmem:[%s13868_s1 + $0x5ec] sm:$0xf0]  ;;  %14020 = vst [vmem:[#allocation12_spill] sm:$0xff] %v9555_v52  ;;  %v7472_v56 = vor.u32 %v8459_v46, %v7471_v45  ;;  %1545 = vmatmul.bf16.vlgmr.msra.gmra.mxu2 %v9555_v52 }
  0x31   :  { %14021 = vst [vmem:[#allocation13_spill] sm:$0xff] %v9563_v55  ;;  %1740 = vmatpush.bf16.msrb.mxu2 %v7616_v44  ;;  %v7600_v57 = vor.u32 %v8491_v50, %v7599_v49  ;;  %v7455_v58 = vld [vmem:[%s13868_s1 + $0x4c0] sm:$0xf]  ;;  %v8455_v59 = vld [vmem:[%s13868_s1 + $0x4cc] sm:$0xf0]  ;;  %1496 = vmatmul.bf16.vlgmr.msra.gmra.mxu1 %v9553_v51 }
  0x32   :  { %1782 = vmatpush.bf16.msrb.mxu3 %v6964_v48  ;;  %v7583_v61 = vld [vmem:[%s13868_s1 + $0x5c0] sm:$0xf]  ;;  %v8487_v62 = vld [vmem:[%s13868_s1 + $0x5cc] sm:$0xf0]  ;;  %1635 = vmatpush.bf16.msrb.mxu0 %v7472_v56  ;;  %v7456_v63 = vor.u32 %v8455_v59, %v7455_v58  ;;  %v8313_v45 = vld [vmem:[%s13868_s1 + $0x64] sm:$0xf] }
  0x33   :  { %1594 = vmatmul.bf16.vlgmr.msra.gmra.mxu3 %v9563_v55  ;;  %1684 = vmatpush.bf16.msrb.mxu1 %v7600_v57  ;;  %v7584_v1 = vor.u32 %v8487_v62, %v7583_v61  ;;  %v7439_v2 = vld [vmem:[%s13868_s1 + $0x4a0] sm:$0xf]  ;;  %v8451_v3 = vld [vmem:[%s13868_s1 + $0x4ac] sm:$0xf0]  ;;  %v6897_v48 = vld [vmem:[%s13868_s1 + $0x70] sm:$0xf0] }
  0x34   :  { %v7567_v6 = vld [vmem:[%s13868_s1 + $0x5a0] sm:$0xf]  ;;  %v8483_v7 = vld [vmem:[%s13868_s1 + $0x5ac] sm:$0xf0]  ;;  %v7440_v8 = vor.u32 %v8451_v3, %v7439_v2  ;;  %v6900_v53 = vor.u32 %v8313_v45, %v6897_v48  ;;  %v109_v57 = vld [vmem:[%s13867_s0 + $0x188] sm:$0xff] }
  0x35   :  { %v7568_v9 = vor.u32 %v8483_v7, %v7567_v6  ;;  %v74_v10 = vld [vmem:[%s13867_s0 + $0x70] sm:$0xff]  ;;  %v76_v14 = vld [vmem:[%s13867_s0 + $0x80] sm:$0xff]  ;;  %v103_v58 = vld [vmem:[%s13867_s0 + $0x158] sm:$0xff] }
  0x36   :  { %1783 = vmatpush.bf16.msrb.mxu3 %v6948_v60  ;;  %1636 = vmatpush.bf16.msrb.mxu0 %v7456_v63  ;;  %v82_v13 = vld [vmem:[%s13867_s0 + $0xb0] sm:$0xff]  ;;  %v84_v17 = vld [vmem:[%s13867_s0 + $0xc0] sm:$0xff]  ;;  %v9623_v18 = vpack.c.bf16 %v81_v11, %v74_v10  ;;  %v9627_v20 = vpack.c.bf16 %v83_v15, %v76_v14  ;;  %v111_v61 = vld [vmem:[%s13867_s0 + $0x198] sm:$0xff] }
  0x37   :  { %1685 = vmatpush.bf16.msrb.mxu1 %v7584_v1  ;;  %v9625_v19 = vpack.c.bf16 %v82_v13, %v75_v12  ;;  %v9629_v21 = vpack.c.bf16 %v84_v17, %v77_v16  ;;  %v7423_v22 = vld [vmem:[%s13868_s1 + $0x480] sm:$0xf]  ;;  %v8447_v23 = vld [vmem:[%s13868_s1 + $0x48c] sm:$0xf0]  ;;  %v105_v62 = vld [vmem:[%s13867_s0 + $0x168] sm:$0xff] }
  0x38   :  { %14022 = vst [vmem:[#allocation14_spill] sm:$0xff] %v9623_v18  ;;  %v7424_v25 = vor.u32 %v8447_v23, %v7423_v22  ;;  %v7551_v27 = vld [vmem:[%s13868_s1 + $0x580] sm:$0xf]  ;;  %v8479_v28 = vld [vmem:[%s13868_s1 + $0x58c] sm:$0xf0]  ;;  %v123_v14 = vld [vmem:[%s13867_s0 + $0x1f8] sm:$0xff] }
  0x39   :  { %14023 = vst [vmem:[#allocation15_spill] sm:$0xff] %v9625_v19  ;;  %v7552_v30 = vor.u32 %v8479_v28, %v7551_v27  ;;  %v88_v31 = vld [vmem:[%s13867_s0 + $0xe0] sm:$0xff]  ;;  %v90_v35 = vld [vmem:[%s13867_s0 + $0xf0] sm:$0xff]  ;;  %v117_v15 = vld [vmem:[%s13867_s0 + $0x1c8] sm:$0xff] }
  0x3a   :  { %1784 = vmatpush.bf16.msrb.mxu3 %v6932_v5  ;;  %1637 = vmatpush.bf16.msrb.mxu0 %v7440_v8  ;;  %14024 = vst [vmem:[#allocation16_spill] sm:$0xff] %v9627_v20  ;;  %v96_v34 = vld [vmem:[%s13867_s0 + $0x120] sm:$0xff]  ;;  %v98_v38 = vld [vmem:[%s13867_s0 + $0x130] sm:$0xff]  ;;  %v9677_v39 = vpack.c.bf16 %v95_v32, %v88_v31  ;;  %v9681_v41 = vpack.c.bf16 %v97_v36, %v90_v35  ;;  %v125_v22 = vld [vmem:[%s13867_s0 + $0x208] sm:$0xff] }
  0x3b   :  { %1686 = vmatpush.bf16.msrb.mxu1 %v7568_v9  ;;  %14025 = vst [vmem:[#allocation17_spill] sm:$0xff] %v9629_v21  ;;  %v9679_v40 = vpack.c.bf16 %v96_v34, %v89_v33  ;;  %v9683_v42 = vpack.c.bf16 %v98_v38, %v91_v37  ;;  %v7407_v43 = vld [vmem:[%s13868_s1 + $0x460] sm:$0xf]  ;;  %v8443_v44 = vld [vmem:[%s13868_s1 + $0x46c] sm:$0xf0]  ;;  %v119_v23 = vld [vmem:[%s13867_s0 + $0x1d8] sm:$0xff] }
  0x3c   :  { %14026 = vst [vmem:[#allocation18_spill] sm:$0xff] %v9677_v39  ;;  %v7408_v46 = vor.u32 %v8443_v44, %v7407_v43  ;;  %v7535_v49 = vld [vmem:[%s13868_s1 + $0x560] sm:$0xf]  ;;  %v8475_v50 = vld [vmem:[%s13868_s1 + $0x56c] sm:$0xf0]  ;;  %v137_v43 = vld [vmem:[%s13867_s0 + $0x268] sm:$0xff] }
  0x3d   :  { %14027 = vst [vmem:[#allocation19_spill] sm:$0xff] %v9679_v40  ;;  %v7536_v54 = vor.u32 %v8475_v50, %v7535_v49  ;;  %v102_v56 = vld [vmem:[%s13867_s0 + $0x150] sm:$0xff]  ;;  %v104_v60 = vld [vmem:[%s13867_s0 + $0x160] sm:$0xff]  ;;  %v131_v44 = vld [vmem:[%s13867_s0 + $0x238] sm:$0xff] }
  0x3e   :  { %1638 = vmatpush.bf16.msrb.mxu0 %v7424_v25  ;;  %1785 = vmatpush.bf16.msrb.mxu3 %v6916_v29  ;;  %v110_v59 = vld [vmem:[%s13867_s0 + $0x190] sm:$0xff]  ;;  %v112_v63 = vld [vmem:[%s13867_s0 + $0x1a0] sm:$0xff]  ;;  %v9731_v0 = vpack.c.bf16 %v109_v57, %v102_v56  ;;  %v9735_v2 = vpack.c.bf16 %v111_v61, %v104_v60  ;;  %v139_v48 = vld [vmem:[%s13867_s0 + $0x278] sm:$0xff] }
  0x3f   :  { %1452 = vmatmul.bf16.gmra.mxu0 %v9623_v18  ;;  %1687 = vmatpush.bf16.msrb.mxu1 %v7552_v30  ;;  %v9733_v1 = vpack.c.bf16 %v110_v59, %v103_v58  ;;  %v9737_v3 = vpack.c.bf16 %v112_v63, %v105_v62  ;;  %v7391_v4 = vld [vmem:[%s13868_s1 + $0x440] sm:$0xf]  ;;  %v8439_v5 = vld [vmem:[%s13868_s1 + $0x44c] sm:$0xf0]  ;;  %v8309_v6 = vld [vmem:[%s13868_s1 + $0x44] sm:$0xf] }
  0x40   :  { %1550 = vmatmul.bf16.gmra.mxu2 %v9627_v20  ;;  %14028 = vst [vmem:[#allocation20_spill] sm:$0xff] %v9731_v0  ;;  %v7392_v7 = vor.u32 %v8439_v5, %v7391_v4  ;;  %v6881_v8 = vld [vmem:[%s13868_s1 + $0x50] sm:$0xf0]  ;;  %v7519_v9 = vld [vmem:[%s13868_s1 + $0x540] sm:$0xf]  ;;  %v133_v49 = vld [vmem:[%s13867_s0 + $0x248] sm:$0xff] }
  0x41   :  { %1501 = vmatmul.bf16.gmra.mxu1 %v9625_v19  ;;  %14029 = vst [vmem:[#allocation21_spill] sm:$0xff] %v9733_v1  ;;  %v8471_v10 = vld [vmem:[%s13868_s1 + $0x54c] sm:$0xf0]  ;;  %v6884_v11 = vor.u32 %v8309_v6, %v6881_v8  ;;  %v116_v13 = vld [vmem:[%s13867_s0 + $0x1c0] sm:$0xff]  ;;  %v6865_v33 = vld [vmem:[%s13868_s1 + $0x30] sm:$0xf0] }
  0x42   :  { %1639 = vmatpush.bf16.msrb.mxu0 %v7408_v46  ;;  %1786 = vmatpush.bf16.msrb.mxu3 %v6900_v53  ;;  %v7520_v12 = vor.u32 %v8471_v10, %v7519_v9  ;;  %v124_v16 = vld [vmem:[%s13867_s0 + $0x200] sm:$0xff]  ;;  %v118_v17 = vld [vmem:[%s13867_s0 + $0x1d0] sm:$0xff]  ;;  %v9785_v25 = vpack.c.bf16 %v123_v14, %v116_v13  ;;  %v151_v8 = vld [vmem:[%s13867_s0 + $0x2d8] sm:$0xff] }
  0x43   :  { %1599 = vmatmul.bf16.gmra.mxu3 %v9629_v21  ;;  %1688 = vmatpush.bf16.msrb.mxu1 %v7536_v54  ;;  %v126_v24 = vld [vmem:[%s13867_s0 + $0x210] sm:$0xff]  ;;  %v9787_v26 = vpack.c.bf16 %v124_v16, %v117_v15  ;;  %v9789_v27 = vpack.c.bf16 %v125_v22, %v118_v17  ;;  %v7375_v29 = vld [vmem:[%s13868_s1 + $0x420] sm:$0xf]  ;;  %v8305_v31 = vld [vmem:[%s13868_s1 + $0x24] sm:$0xf] }
  0x44   :  { %14030 = vst [vmem:[#allocation22_spill] sm:$0xff] %v9785_v25  ;;  %v9791_v28 = vpack.c.bf16 %v126_v24, %v119_v23  ;;  %v8435_v30 = vld [vmem:[%s13868_s1 + $0x42c] sm:$0xf0]  ;;  %v7503_v34 = vld [vmem:[%s13868_s1 + $0x520] sm:$0xf]  ;;  %v6868_v36 = vor.u32 %v8305_v31, %v6865_v33  ;;  %v145_v9 = vld [vmem:[%s13867_s0 + $0x2a8] sm:$0xff] }
  0x45   :  { %14031 = vst [vmem:[#allocation23_spill] sm:$0xff] %v9787_v26  ;;  %v7376_v32 = vor.u32 %v8435_v30, %v7375_v29  ;;  %v8467_v35 = vld [vmem:[%s13868_s1 + $0x52c] sm:$0xf0]  ;;  %v132_v46 = vld [vmem:[%s13867_s0 + $0x240] sm:$0xff]  ;;  %v6849_v62 = vld [vmem:[%s13868_s1 + $0x10] sm:$0xf0] }
  0x46   :  { %1640 = vmatpush.bf16.msrb.mxu0 %v7392_v7  ;;  %1787 = vmatpush.bf16.msrb.mxu3 %v6884_v11  ;;  %v7504_v37 = vor.u32 %v8467_v35, %v7503_v34  ;;  %v130_v38 = vld [vmem:[%s13867_s0 + $0x230] sm:$0xff]  ;;  %v140_v50 = vld [vmem:[%s13867_s0 + $0x280] sm:$0xff]  ;;  %v9843_v56 = vpack.c.bf16 %v139_v48, %v132_v46  ;;  %v147_v13 = vld [vmem:[%s13867_s0 + $0x2b8] sm:$0xff] }
  0x47   :  { %1689 = vmatpush.bf16.msrb.mxu1 %v7520_v12  ;;  %v138_v45 = vld [vmem:[%s13867_s0 + $0x270] sm:$0xff]  ;;  %v9839_v53 = vpack.c.bf16 %v137_v43, %v130_v38  ;;  %v9845_v57 = vpack.c.bf16 %v140_v50, %v133_v49  ;;  %v7359_v58 = vld [vmem:[%s13868_s1 + $0x400] sm:$0xf]  ;;  %v8301_v60 = vld [vmem:[%s13868_s1 + $0x4] sm:$0xf] }
  0x48   :  { %v9841_v54 = vpack.c.bf16 %v138_v45, %v131_v44  ;;  %14034 = vst [vmem:[#allocation26_spill] sm:$0xff] %v9843_v56  ;;  %v8431_v59 = vld [vmem:[%s13868_s1 + $0x40c] sm:$0xf0]  ;;  %v7487_v63 = vld [vmem:[%s13868_s1 + $0x500] sm:$0xf]  ;;  %v6852_v5 = vor.u32 %v8301_v60, %v6849_v62  ;;  %v153_v12 = vld [vmem:[%s13867_s0 + $0x2e8] sm:$0xff] }
  0x49   :  { %14032 = vst [vmem:[#allocation24_spill] sm:$0xff] %v9839_v53  ;;  %v7360_v61 = vor.u32 %v8431_v59, %v7359_v58  ;;  %v8463_v4 = vld [vmem:[%s13868_s1 + $0x50c] sm:$0xf0]  ;;  %v144_v7 = vld [vmem:[%s13867_s0 + $0x2a0] sm:$0xff]  ;;  %v7345_v24 = vld [vmem:[%s13868_s1 + $0x3f0] sm:$0xf0] }
  0x4a   :  { %1641 = vmatpush.bf16.msrb.mxu0 %v7376_v32  ;;  %1788 = vmatpush.bf16.msrb.mxu3 %v6868_v36  ;;  %14033 = vst [vmem:[#allocation25_spill] sm:$0xff] %v9841_v54  ;;  %v7488_v6 = vor.u32 %v8463_v4, %v7487_v63  ;;  %v152_v10 = vld [vmem:[%s13867_s0 + $0x2e0] sm:$0xff]  ;;  %v146_v11 = vld [vmem:[%s13867_s0 + $0x2b0] sm:$0xff]  ;;  %v9893_v15 = vpack.c.bf16 %v151_v8, %v144_v7  ;;  %v165_v44 = vld [vmem:[%s13867_s0 + $0x348] sm:$0xff] }
  0x4b   :  { %1690 = vmatpush.bf16.msrb.mxu1 %v7504_v37  ;;  %14035 = vst [vmem:[#allocation27_spill] sm:$0xff] %v9845_v57  ;;  %v154_v14 = vld [vmem:[%s13867_s0 + $0x2f0] sm:$0xff]  ;;  %v9895_v16 = vpack.c.bf16 %v152_v10, %v145_v9  ;;  %v9897_v17 = vpack.c.bf16 %v153_v12, %v146_v11  ;;  %v8425_v23 = vld [vmem:[%s13868_s1 + $0x3e4] sm:$0xf]  ;;  %v159_v45 = vld [vmem:[%s13867_s0 + $0x318] sm:$0xff] }
  0x4c   :  { %14036 = vst [vmem:[#allocation28_spill] sm:$0xff] %v9893_v15  ;;  %v9899_v22 = vpack.c.bf16 %v154_v14, %v147_v13  ;;  %v8361_v29 = vld [vmem:[%s13868_s1 + $0x1e4] sm:$0xf]  ;;  %v7348_v30 = vor.u32 %v8425_v23, %v7345_v24  ;;  %v7089_v31 = vld [vmem:[%s13868_s1 + $0x1f0] sm:$0xf0]  ;;  %v167_v49 = vld [vmem:[%s13867_s0 + $0x358] sm:$0xff] }
  0x4d   :  { %14037 = vst [vmem:[#allocation29_spill] sm:$0xff] %v9895_v16  ;;  %v8457_v32 = vld [vmem:[%s13868_s1 + $0x4e4] sm:$0xf]  ;;  %v7473_v33 = vld [vmem:[%s13868_s1 + $0x4f0] sm:$0xf0]  ;;  %v7092_v34 = vor.u32 %v8361_v29, %v7089_v31  ;;  %v161_v50 = vld [vmem:[%s13867_s0 + $0x328] sm:$0xff] }
  0x4e   :  { %1642 = vmatpush.bf16.msrb.mxu0 %v7360_v61  ;;  %1789 = vmatpush.bf16.msrb.mxu3 %v6852_v5  ;;  %v7476_v35 = vor.u32 %v8457_v32, %v7473_v33  ;;  %v8393_v36 = vld [vmem:[%s13868_s1 + $0x2e4] sm:$0xf]  ;;  %v7217_v37 = vld [vmem:[%s13868_s1 + $0x2f0] sm:$0xf0]  ;;  %v424_v12 = vld [vmem:[%s13869_s2] sm:$0xf] }
  0x4f   :  { %1457 = vmatmul.bf16.gmra.mxu0 %v9677_v39  ;;  %1691 = vmatpush.bf16.msrb.mxu1 %v7488_v6  ;;  %v7220_v38 = vor.u32 %v8393_v36, %v7217_v37  ;;  %v158_v43 = vld [vmem:[%s13867_s0 + $0x310] sm:$0xff]  ;;  %v160_v48 = vld [vmem:[%s13867_s0 + $0x320] sm:$0xff]  ;;  %v71_v29 = vld [vmem:[%s13867_s0 + $0x58] sm:$0xff]  ;;  %v10001_v31 = vperm.slane %v424_v12, 0 }
  0x50   :  { %1555 = vmatmul.bf16.gmra.mxu2 %v9681_v41  ;;  %v166_v46 = vld [vmem:[%s13867_s0 + $0x350] sm:$0xff]  ;;  %v168_v58 = vld [vmem:[%s13867_s0 + $0x360] sm:$0xff]  ;;  %v9953_v59 = vpack.c.bf16 %v165_v44, %v158_v43  ;;  %v9957_v61 = vpack.c.bf16 %v167_v49, %v160_v48 }
  0x51   :  { %1506 = vmatmul.bf16.gmra.mxu1 %v9679_v40  ;;  %1929 = vmatpush.bf16.msra.mxu2 %v7348_v30  ;;  %v9955_v60 = vpack.c.bf16 %v166_v46, %v159_v45  ;;  %v9959_v62 = vpack.c.bf16 %v168_v58, %v161_v50  ;;  %v8421_v63 = vld [vmem:[%s13868_s1 + $0x3c4] sm:$0xf]  ;;  %v7329_v4 = vld [vmem:[%s13868_s1 + $0x3d0] sm:$0xf0]  ;;  %v65_v30 = vld [vmem:[%s13867_s0 + $0x28] sm:$0xff] }
  0x52   :  { %1831 = vmatpush.bf16.msra.mxu0 %v7092_v34  ;;  %1978 = vmatpush.bf16.msra.mxu3 %v7476_v35  ;;  %14038 = vst [vmem:[#allocation30_spill] sm:$0xff] %v9953_v59  ;;  %v8357_v5 = vld [vmem:[%s13868_s1 + $0x1c4] sm:$0xf]  ;;  %v7332_v6 = vor.u32 %v8421_v63, %v7329_v4  ;;  %v7073_v7 = vld [vmem:[%s13868_s1 + $0x1d0] sm:$0xf0]  ;;  %v73_v34 = vld [vmem:[%s13867_s0 + $0x68] sm:$0xff] }
  0x53   :  { %1604 = vmatmul.bf16.gmra.mxu3 %v9683_v42  ;;  %1880 = vmatpush.bf16.msra.mxu1 %v7220_v38  ;;  %14039 = vst [vmem:[#allocation31_spill] sm:$0xff] %v9955_v60  ;;  %v8453_v8 = vld [vmem:[%s13868_s1 + $0x4c4] sm:$0xf]  ;;  %v7457_v9 = vld [vmem:[%s13868_s1 + $0x4d0] sm:$0xf0]  ;;  %v7076_v10 = vor.u32 %v8357_v5, %v7073_v7 }
  0x54   :  { %14040 = vst [vmem:[#allocation32_spill] sm:$0xff] %v9957_v61  ;;  %v7460_v11 = vor.u32 %v8453_v8, %v7457_v9  ;;  %v8389_v13 = vld [vmem:[%s13868_s1 + $0x2c4] sm:$0xf]  ;;  %v7201_v14 = vld [vmem:[%s13868_s1 + $0x2d0] sm:$0xf0] }
  0x55   :  { %14041 = vst [vmem:[#allocation33_spill] sm:$0xff] %v9959_v62  ;;  %1930 = vmatpush.bf16.msra.mxu2 %v7332_v6  ;;  %v7204_v23 = vor.u32 %v8389_v13, %v7201_v14  ;;  %v64_v24 = vld [vmem:[%s13867_s0 + $0x20] sm:$0xff]  ;;  %v66_v33 = vld [vmem:[%s13867_s0 + $0x30] sm:$0xff] }
  0x56   :  { %1832 = vmatpush.bf16.msra.mxu0 %v7076_v10  ;;  %1979 = vmatpush.bf16.msra.mxu3 %v7460_v11  ;;  %v72_v32 = vld [vmem:[%s13867_s0 + $0x60] sm:$0xff]  ;;  %v10012_v35 = vpack.c.bf16 %v71_v29, %v64_v24  ;;  %v10016_v38 = vpack.c.bf16 %v73_v34, %v66_v33  ;;  %v7313_v48 = vld [vmem:[%s13868_s1 + $0x3b0] sm:$0xf0]  ;;  %v79_v33 = vld [vmem:[%s13867_s0 + $0x98] sm:$0xff] }
  0x57   :  { %1881 = vmatpush.bf16.msra.mxu1 %v7204_v23  ;;  %v10014_v37 = vpack.c.bf16 %v72_v32, %v65_v30  ;;  %v8417_v46 = vld [vmem:[%s13868_s1 + $0x3a4] sm:$0xf]  ;;  %v7057_v58 = vld [vmem:[%s13868_s1 + $0x1b0] sm:$0xf0]  ;;  %v85_v32 = vld [vmem:[%s13867_s0 + $0xc8] sm:$0xff] }
  0x58   :  { %14042 = vst [vmem:[#allocation34_spill] sm:$0xff] %v10012_v35  ;;  %v8353_v49 = vld [vmem:[%s13868_s1 + $0x1a4] sm:$0xf]  ;;  %v7316_v50 = vor.u32 %v8417_v46, %v7313_v48  ;;  %v7441_v4 = vld [vmem:[%s13868_s1 + $0x4b0] sm:$0xf0] }
  0x59   :  { %14043 = vst [vmem:[#allocation35_spill] sm:$0xff] %v10014_v37  ;;  %v8449_v63 = vld [vmem:[%s13868_s1 + $0x4a4] sm:$0xf]  ;;  %v7060_v6 = vor.u32 %v8353_v49, %v7057_v58  ;;  %v7185_v23 = vld [vmem:[%s13868_s1 + $0x2b0] sm:$0xf0] }
  0x5a   :  { %14044 = vst [vmem:[#allocation36_spill] sm:$0xff] %v10016_v38  ;;  %v7444_v7 = vor.u32 %v8449_v63, %v7441_v4  ;;  %1931 = vmatpush.bf16.msra.mxu2 %v7316_v50  ;;  %v8385_v14 = vld [vmem:[%s13868_s1 + $0x2a4] sm:$0xf]  ;;  %v78_v30 = vld [vmem:[%s13867_s0 + $0x90] sm:$0xff] }
  0x5b   :  { %1833 = vmatpush.bf16.msra.mxu0 %v7060_v6  ;;  %v7188_v29 = vor.u32 %v8385_v14, %v7185_v23  ;;  %v86_v34 = vld [vmem:[%s13867_s0 + $0xd0] sm:$0xff] }
  0x5c   :  { %1980 = vmatpush.bf16.msra.mxu3 %v7444_v7  ;;  %v10071_v50 = vpack.c.bf16 %v86_v34, %v79_v33  ;;  %v8413_v7 = vld [vmem:[%s13868_s1 + $0x384] sm:$0xf]  ;;  %v7425_v14 = vld [vmem:[%s13868_s1 + $0x490] sm:$0xf0] }
  0x5d   :  { %1882 = vmatpush.bf16.msra.mxu1 %v7188_v29 }
  0x5e   :  { %14046 = vst [vmem:[#allocation38_spill] sm:$0xff] %v10071_v50 }
  0x5f   :  { %1462 = vmatmul.bf16.gmra.mxu0 %v9731_v0 }
  0x60   :  { %1560 = vmatmul.bf16.gmra.mxu2 %v9735_v2 }
  0x61   :  { %1511 = vmatmul.bf16.gmra.mxu1 %v9733_v1 }
  0x63   :  { %1609 = vmatmul.bf16.gmra.mxu3 %v9737_v3 }
  0x6f   :  { %1467 = vmatmul.bf16.gmra.mxu0 %v9785_v25 }
  0x70   :  { %1565 = vmatmul.bf16.gmra.mxu2 %v9789_v27 }
  0x71   :  { %1516 = vmatmul.bf16.gmra.mxu1 %v9787_v26 }
  0x73   :  { %1614 = vmatmul.bf16.gmra.mxu3 %v9791_v28 }
  0x7f   :  { %1472 = vmatmul.bf16.gmra.mxu0 %v9839_v53 }
  0x80   :  { %1570 = vmatmul.bf16.gmra.mxu2 %v9843_v56 }
  0x81   :  { %1521 = vmatmul.bf16.gmra.mxu1 %v9841_v54 }
  0x83   :  { %1619 = vmatmul.bf16.gmra.mxu3 %v9845_v57 }
  0x8f   :  { %1477 = vmatmul.bf16.gmra.mxu0 %v9893_v15 }
  0x90   :  { %1575 = vmatmul.bf16.gmra.mxu2 %v9897_v17 }
  0x91   :  { %1526 = vmatmul.bf16.gmra.mxu1 %v9895_v16 }
  0x93   :  { %1624 = vmatmul.bf16.gmra.mxu3 %v9899_v22 }
  0x9f   :  { %1482 = vmatmul.bf16.gmra.mxu0 %v9953_v59 }
  0xa0   :  { %1580 = vmatmul.bf16.gmra.mxu2 %v9957_v61 }
  0xa1   :  { %1531 = vmatmul.bf16.gmra.mxu1 %v9955_v60 }
  0xa3   :  { %1629 = vmatmul.bf16.gmra.mxu3 %v9959_v62 }
  0xac   :  { %v1448_v36 = vpop.f32.mrf.mxu0 }
  0xad   :  { %v1449_v43 = vadd.f32 %v1448_v36, %v10001_v31  ;;  %v80_v36 = vld [vmem:[%s13867_s0 + $0xa0] sm:$0xff] }
  0xae   :  { %v1497_v44 = vpop.f32.mrf.mxu1 }
  0xaf   :  { %v1498_v45 = vadd.f32 %v1497_v44, %v1449_v43  ;;  %1643 = vmatmul.bf16.vlgmr.msrb.gmra.mxu0 %v10012_v35  ;;  %v87_v43 = vld [vmem:[%s13867_s0 + $0xd8] sm:$0xff] }
  0xb0   :  { %7629 = vmatmul.msk.bf16.vlgmr.msrb.gmra.mxu2 %vm1414_vm0, %v10016_v38  ;;  %v10073_v58 = vpack.c.bf16 %v87_v43, %v80_v36 }
  0xb1   :  { %1692 = vmatmul.bf16.vlgmr.msrb.gmra.mxu1 %v10014_v37 }
  0xb2   :  { %14047 = vst [vmem:[#allocation39_spill] sm:$0xff] %v10073_v58 }
  0xb3   :  { %1790 = vmatmul.bf16.vlgmr.msrb.gmra.mxu3 %v9545_v47  ;;  %v1546_v5 = vpop.f32.mrf.mxu2 }
  0xb4   :  { %v1547_v8 = vadd.f32 %v1546_v5, %v1498_v45  ;;  %v1450_v10 = vpop.f32.mrf.mxu0  ;;  %v10069_v45 = vpack.c.bf16 %v85_v32, %v78_v30 }
  0xb5   :  { %v1451_v11 = vadd.f32 %v1450_v10, %v10001_v31 }
  0xb6   :  { %v1595_v9 = vpop.f32.mrf.mxu3  ;;  %v1499_v12 = vpop.f32.mrf.mxu1  ;;  %14045 = vst [vmem:[#allocation37_spill] sm:$0xff] %v10069_v45 }
  0xb7   :  { %v10043_v13 = vadd.f32 %v1595_v9, %v1547_v8  ;;  %v1500_v24 = vadd.f32 %v1499_v12, %v1451_v11  ;;  %v7297_v8 = vld [vmem:[%s13868_s1 + $0x390] sm:$0xf0]  ;;  %v8349_v9 = vld [vmem:[%s13868_s1 + $0x184] sm:$0xf] }
  0xb8   :  { %v7300_v10 = vor.u32 %v8413_v7, %v7297_v8  ;;  %v7041_v11 = vld [vmem:[%s13868_s1 + $0x190] sm:$0xf0]  ;;  %v8445_v12 = vld [vmem:[%s13868_s1 + $0x484] sm:$0xf] }
  0xb9   :  { %v7428_v29 = vor.u32 %v8445_v12, %v7425_v14  ;;  %v100_v7 = vld [vmem:[%s13867_s0 + $0x140] sm:$0xff]  ;;  %v94_v8 = vld [vmem:[%s13867_s0 + $0x110] sm:$0xff] }
  0xba   :  { %1932 = vmatpush.bf16.msra.mxu2 %v7300_v10 }
  0xbb   :  { %v1548_v44 = vpop.f32.mrf.mxu2  ;;  %1981 = vmatpush.bf16.msra.mxu3 %v7428_v29 }
  0xbc   :  { %v1549_v46 = vadd.f32 %v1548_v44, %v1500_v24  ;;  %v1453_v49 = vpop.f32.mrf.mxu0  ;;  %v7044_v24 = vor.u32 %v8349_v9, %v7041_v11  ;;  %v8381_v44 = vld [vmem:[%s13868_s1 + $0x284] sm:$0xf]  ;;  %v101_v9 = vld [vmem:[%s13867_s0 + $0x148] sm:$0xff] }
  0xbd   :  { %v1454_v63 = vadd.f32 %v1453_v49, %v10001_v31  ;;  %v10132_v29 = vpack.c.bf16 %v101_v9, %v94_v8 }
  0xbe   :  { %v1597_v48 = vpop.f32.mrf.mxu3  ;;  %v1502_v4 = vpop.f32.mrf.mxu1  ;;  %1834 = vmatpush.bf16.msra.mxu0 %v7044_v24 }
  0xbf   :  { %v10076_v5 = vadd.f32 %v1597_v48, %v1549_v46  ;;  %v1503_v6 = vadd.f32 %v1502_v4, %v1454_v63  ;;  %1648 = vmatmul.bf16.gmra.mxu0 %v10069_v45  ;;  %v7169_v46 = vld [vmem:[%s13868_s1 + $0x290] sm:$0xf0]  ;;  %v92_v63 = vld [vmem:[%s13867_s0 + $0x100] sm:$0xff]  ;;  %v99_v4 = vld [vmem:[%s13867_s0 + $0x138] sm:$0xff]  ;;  %14049 = vst [vmem:[#allocation41_spill] sm:$0xff] %v10132_v29 }
  0xc0   :  { %7630 = vmatmul.msk.bf16.gmra.mxu2 %vm1414_vm0, %v10073_v58  ;;  %v7172_v49 = vor.u32 %v8381_v44, %v7169_v46  ;;  %v10128_v11 = vpack.c.bf16 %v99_v4, %v92_v63  ;;  %v7281_v44 = vld [vmem:[%s13868_s1 + $0x370] sm:$0xf0]  ;;  %v8345_v46 = vld [vmem:[%s13868_s1 + $0x164] sm:$0xf] }
  0xc1   :  { %1697 = vmatmul.bf16.gmra.mxu1 %v10071_v50  ;;  %v8441_v63 = vld [vmem:[%s13868_s1 + $0x464] sm:$0xf]  ;;  %v7409_v4 = vld [vmem:[%s13868_s1 + $0x470] sm:$0xf0] }
  0xc2   :  { %1883 = vmatpush.bf16.msra.mxu1 %v7172_v49  ;;  %v7025_v49 = vld [vmem:[%s13868_s1 + $0x170] sm:$0xf0]  ;;  %v7412_v8 = vor.u32 %v8441_v63, %v7409_v4  ;;  %v108_v4 = vld [vmem:[%s13867_s0 + $0x180] sm:$0xff] }
  0xc3   :  { %1795 = vmatmul.bf16.gmra.mxu3 %v9623_v18  ;;  %v1551_v23 = vpop.f32.mrf.mxu2  ;;  %v114_v63 = vld [vmem:[%s13867_s0 + $0x1b0] sm:$0xff] }
  0xc4   :  { %v1552_v30 = vadd.f32 %v1551_v23, %v1503_v6  ;;  %v1455_v33 = vpop.f32.mrf.mxu0  ;;  %v93_v6 = vld [vmem:[%s13867_s0 + $0x108] sm:$0xff]  ;;  %1982 = vmatpush.bf16.msra.mxu3 %v7412_v8 }
  0xc5   :  { %v1456_v34 = vadd.f32 %v1455_v33, %v10001_v31  ;;  %v10130_v24 = vpack.c.bf16 %v100_v7, %v93_v6  ;;  %v7028_v7 = vor.u32 %v8345_v46, %v7025_v49  ;;  %v106_v46 = vld [vmem:[%s13867_s0 + $0x170] sm:$0xff]  ;;  %v107_v49 = vld [vmem:[%s13867_s0 + $0x178] sm:$0xff] }
  0xc6   :  { %v1600_v32 = vpop.f32.mrf.mxu3  ;;  %v1504_v36 = vpop.f32.mrf.mxu1 }
  0xc7   :  { %v10102_v43 = vadd.f32 %v1600_v32, %v1552_v30  ;;  %v1505_v48 = vadd.f32 %v1504_v36, %v1456_v34  ;;  %14048 = vst [vmem:[#allocation40_spill] sm:$0xff] %v10130_v24  ;;  %v8409_v36 = vld [vmem:[%s13868_s1 + $0x364] sm:$0xf]  ;;  %1835 = vmatpush.bf16.msra.mxu0 %v7028_v7 }
  0xcb   :  { %v1553_v10 = vpop.f32.mrf.mxu2 }
  0xcc   :  { %v1554_v12 = vadd.f32 %v1553_v10, %v1505_v48  ;;  %v1458_v23 = vpop.f32.mrf.mxu0  ;;  %v7284_v48 = vor.u32 %v8409_v36, %v7281_v44  ;;  %v7153_v36 = vld [vmem:[%s13868_s1 + $0x270] sm:$0xf0] }
  0xcd   :  { %v1459_v30 = vadd.f32 %v1458_v23, %v10001_v31 }
  0xce   :  { %v1602_v14 = vpop.f32.mrf.mxu3  ;;  %v1507_v32 = vpop.f32.mrf.mxu1  ;;  %1933 = vmatpush.bf16.msra.mxu2 %v7284_v48  ;;  %v113_v48 = vld [vmem:[%s13867_s0 + $0x1a8] sm:$0xff] }
  0xcf   :  { %v10135_v33 = vadd.f32 %v1602_v14, %v1554_v12  ;;  %v1508_v34 = vadd.f32 %v1507_v32, %v1459_v30  ;;  %1653 = vmatmul.bf16.gmra.mxu0 %v10128_v11  ;;  %v8377_v32 = vld [vmem:[%s13868_s1 + $0x264] sm:$0xf]  ;;  %v10187_v8 = vpack.c.bf16 %v113_v48, %v106_v46 }
  0xd0   :  { %7631 = vmatmul.msk.bf16.gmra.mxu2 %vm1414_vm0, %v10132_v29  ;;  %v8341_v46 = vld [vmem:[%s13868_s1 + $0x144] sm:$0xf] }
  0xd1   :  { %1702 = vmatmul.bf16.gmra.mxu1 %v10130_v24 }
  0xd3   :  { %1800 = vmatmul.bf16.gmra.mxu3 %v9677_v39  ;;  %v1556_v6 = vpop.f32.mrf.mxu2 }
  0xd4   :  { %v1557_v9 = vadd.f32 %v1556_v6, %v1508_v34  ;;  %v1460_v12 = vpop.f32.mrf.mxu0  ;;  %v7156_v34 = vor.u32 %v8377_v32, %v7153_v36  ;;  %v115_v6 = vld [vmem:[%s13867_s0 + $0x1b8] sm:$0xff] }
  0xd5   :  { %v1461_v14 = vadd.f32 %v1460_v12, %v10001_v31 }
  0xd6   :  { %v1605_v10 = vpop.f32.mrf.mxu3  ;;  %v1509_v23 = vpop.f32.mrf.mxu1  ;;  %1884 = vmatpush.bf16.msra.mxu1 %v7156_v34  ;;  %v7265_v34 = vld [vmem:[%s13868_s1 + $0x350] sm:$0xf0] }
  0xd7   :  { %v10161_v30 = vadd.f32 %v1605_v10, %v1557_v9  ;;  %v1510_v44 = vadd.f32 %v1509_v23, %v1461_v14  ;;  %v10189_v14 = vpack.c.bf16 %v114_v63, %v107_v49  ;;  %v10191_v23 = vpack.c.bf16 %v115_v6, %v108_v4  ;;  %v7009_v49 = vld [vmem:[%s13868_s1 + $0x150] sm:$0xf0]  ;;  %v8437_v63 = vld [vmem:[%s13868_s1 + $0x444] sm:$0xf] }
  0xd8   :  { %v7393_v4 = vld [vmem:[%s13868_s1 + $0x450] sm:$0xf0] }
  0xd9   :  { %14050 = vst [vmem:[#allocation42_spill] sm:$0xff] %v10189_v14 }
  0xda   :  { %14051 = vst [vmem:[#allocation43_spill] sm:$0xff] %v10191_v23 }
  0xdb   :  { %v1558_v7 = vpop.f32.mrf.mxu2 }
  0xdc   :  { %v1559_v9 = vadd.f32 %v1558_v7, %v1510_v44  ;;  %v1463_v12 = vpop.f32.mrf.mxu0  ;;  %v8405_v44 = vld [vmem:[%s13868_s1 + $0x344] sm:$0xf]  ;;  %v7012_v7 = vor.u32 %v8341_v46, %v7009_v49  ;;  %v7137_v46 = vld [vmem:[%s13868_s1 + $0x250] sm:$0xf0] }
  0xdd   :  { %v1464_v32 = vadd.f32 %v1463_v12, %v10001_v31  ;;  %v7268_v48 = vor.u32 %v8405_v44, %v7265_v34 }
  0xde   :  { %v1607_v10 = vpop.f32.mrf.mxu3  ;;  %v1512_v36 = vpop.f32.mrf.mxu1  ;;  %1836 = vmatpush.bf16.msra.mxu0 %v7012_v7  ;;  %v129_v7 = vld [vmem:[%s13867_s0 + $0x228] sm:$0xff] }
  0xdf   :  { %v10194_v39 = vadd.f32 %v1607_v10, %v1559_v9  ;;  %v1513_v29 = vadd.f32 %v1512_v36, %v1464_v32  ;;  %1658 = vmatmul.bf16.gmra.mxu0 %v10187_v8  ;;  %v7396_v9 = vor.u32 %v8437_v63, %v7393_v4  ;;  %1934 = vmatpush.bf16.msra.mxu2 %v7268_v48  ;;  %v120_v48 = vld [vmem:[%s13867_s0 + $0x1e0] sm:$0xff]  ;;  %v127_v63 = vld [vmem:[%s13867_s0 + $0x218] sm:$0xff]  ;;  %v121_v4 = vld [vmem:[%s13867_s0 + $0x1e8] sm:$0xff] }
  0xe0   :  { %7632 = vmatmul.msk.bf16.gmra.mxu2 %vm1414_vm0, %v10191_v23 }
  0xe1   :  { %1707 = vmatmul.bf16.gmra.mxu1 %v10189_v14  ;;  %1983 = vmatpush.bf16.msra.mxu3 %v7396_v9 }
  0xe3   :  { %1805 = vmatmul.bf16.gmra.mxu3 %v9731_v0  ;;  %v1561_v6 = vpop.f32.mrf.mxu2  ;;  %v8373_v0 = vld [vmem:[%s13868_s1 + $0x244] sm:$0xf] }
  0xe4   :  { %v1562_v10 = vadd.f32 %v1561_v6, %v1513_v29  ;;  %v1465_v32 = vpop.f32.mrf.mxu0  ;;  %v7140_v29 = vor.u32 %v8373_v0, %v7137_v46  ;;  %v128_v6 = vld [vmem:[%s13867_s0 + $0x220] sm:$0xff]  ;;  %v122_v0 = vld [vmem:[%s13867_s0 + $0x1f0] sm:$0xff] }
  0xe5   :  { %v1466_v36 = vadd.f32 %v1465_v32, %v10001_v31  ;;  %v10250_v46 = vpack.c.bf16 %v129_v7, %v122_v0 }
  0xe6   :  { %v1610_v12 = vpop.f32.mrf.mxu3  ;;  %v1514_v44 = vpop.f32.mrf.mxu1  ;;  %1885 = vmatpush.bf16.msra.mxu1 %v7140_v29  ;;  %v7249_v29 = vld [vmem:[%s13868_s1 + $0x330] sm:$0xf0] }
  0xe7   :  { %v10220_v34 = vadd.f32 %v1610_v12, %v1562_v10  ;;  %v1515_v49 = vadd.f32 %v1514_v44, %v1466_v36  ;;  %v10246_v10 = vpack.c.bf16 %v127_v63, %v120_v48  ;;  %v10248_v44 = vpack.c.bf16 %v128_v6, %v121_v4  ;;  %14054 = vst [vmem:[#allocation46_spill] sm:$0xff] %v10250_v46  ;;  %v6993_v48 = vld [vmem:[%s13868_s1 + $0x130] sm:$0xf0]  ;;  %v8433_v63 = vld [vmem:[%s13868_s1 + $0x424] sm:$0xf] }
  0xe8   :  { %v7377_v4 = vld [vmem:[%s13868_s1 + $0x430] sm:$0xf0] }
  0xe9   :  { %14052 = vst [vmem:[#allocation44_spill] sm:$0xff] %v10246_v10  ;;  %v7380_v7 = vor.u32 %v8433_v63, %v7377_v4  ;;  %v141_v63 = vld [vmem:[%s13867_s0 + $0x288] sm:$0xff]  ;;  %v135_v4 = vld [vmem:[%s13867_s0 + $0x258] sm:$0xff] }
  0xea   :  { %14053 = vst [vmem:[#allocation45_spill] sm:$0xff] %v10248_v44 }
  0xeb   :  { %v1563_v9 = vpop.f32.mrf.mxu2  ;;  %1984 = vmatpush.bf16.msra.mxu3 %v7380_v7 }
  0xec   :  { %v1564_v12 = vadd.f32 %v1563_v9, %v1515_v49  ;;  %v1468_v36 = vpop.f32.mrf.mxu0  ;;  %v8401_v49 = vld [vmem:[%s13868_s1 + $0x324] sm:$0xf] }
  0xed   :  { %v1469_v23 = vadd.f32 %v1468_v36, %v10001_v31 }
  0xee   :  { %v1612_v32 = vpop.f32.mrf.mxu3  ;;  %v1517_v14 = vpop.f32.mrf.mxu1 }
  0xef   :  { %v10253_v24 = vadd.f32 %v1612_v32, %v1564_v12  ;;  %v1518_v18 = vadd.f32 %v1517_v14, %v1469_v23  ;;  %1663 = vmatmul.bf16.gmra.mxu0 %v10246_v10  ;;  %v8337_v14 = vld [vmem:[%s13868_s1 + $0x124] sm:$0xf]  ;;  %v7252_v23 = vor.u32 %v8401_v49, %v7249_v29 }
  0xf0   :  { %7633 = vmatmul.msk.bf16.gmra.mxu2 %vm1414_vm0, %v10250_v46  ;;  %v6996_v0 = vor.u32 %v8337_v14, %v6993_v48  ;;  %v7121_v14 = vld [vmem:[%s13868_s1 + $0x230] sm:$0xf0] }
  0xf1   :  { %1712 = vmatmul.bf16.gmra.mxu1 %v10248_v44  ;;  %1935 = vmatpush.bf16.msra.mxu2 %v7252_v23  ;;  %v134_v23 = vld [vmem:[%s13867_s0 + $0x250] sm:$0xff] }
  0xf2   :  { %1837 = vmatpush.bf16.msra.mxu0 %v6996_v0  ;;  %v143_v0 = vld [vmem:[%s13867_s0 + $0x298] sm:$0xff] }
  0xf3   :  { %1810 = vmatmul.bf16.gmra.mxu3 %v9785_v25  ;;  %v1566_v6 = vpop.f32.mrf.mxu2  ;;  %v8369_v25 = vld [vmem:[%s13868_s1 + $0x224] sm:$0xf] }
  0xf4   :  { %v1567_v9 = vadd.f32 %v1566_v6, %v1518_v18  ;;  %v1470_v32 = vpop.f32.mrf.mxu0  ;;  %v7124_v18 = vor.u32 %v8369_v25, %v7121_v14  ;;  %v142_v6 = vld [vmem:[%s13867_s0 + $0x290] sm:$0xff]  ;;  %v136_v25 = vld [vmem:[%s13867_s0 + $0x260] sm:$0xff] }
  0xf5   :  { %v1471_v36 = vadd.f32 %v1470_v32, %v10001_v31  ;;  %v10309_v14 = vpack.c.bf16 %v143_v0, %v136_v25 }
  0xf6   :  { %v1615_v12 = vpop.f32.mrf.mxu3  ;;  %v1519_v49 = vpop.f32.mrf.mxu1  ;;  %1886 = vmatpush.bf16.msra.mxu1 %v7124_v18  ;;  %v7233_v18 = vld [vmem:[%s13868_s1 + $0x310] sm:$0xf0] }
  0xf7   :  { %v10279_v29 = vadd.f32 %v1615_v12, %v1567_v9  ;;  %v1520_v48 = vadd.f32 %v1519_v49, %v1471_v36  ;;  %v10305_v9 = vpack.c.bf16 %v141_v63, %v134_v23  ;;  %v10307_v49 = vpack.c.bf16 %v142_v6, %v135_v4  ;;  %14057 = vst [vmem:[#allocation49_spill] sm:$0xff] %v10309_v14  ;;  %v6977_v23 = vld [vmem:[%s13868_s1 + $0x110] sm:$0xf0]  ;;  %v8429_v63 = vld [vmem:[%s13868_s1 + $0x404] sm:$0xf] }
  0xf8   :  { %v7361_v4 = vld [vmem:[%s13868_s1 + $0x410] sm:$0xf0] }
  0xf9   :  { %14055 = vst [vmem:[#allocation47_spill] sm:$0xff] %v10305_v9  ;;  %v7364_v0 = vor.u32 %v8429_v63, %v7361_v4  ;;  %v155_v63 = vld [vmem:[%s13867_s0 + $0x2f8] sm:$0xff]  ;;  %v149_v4 = vld [vmem:[%s13867_s0 + $0x2c8] sm:$0xff] }
  0xfa   :  { %14056 = vst [vmem:[#allocation48_spill] sm:$0xff] %v10307_v49 }
  0xfb   :  { %v1568_v7 = vpop.f32.mrf.mxu2  ;;  %1985 = vmatpush.bf16.msra.mxu3 %v7364_v0 }
  0xfc   :  { %v1569_v12 = vadd.f32 %v1568_v7, %v1520_v48  ;;  %v1473_v36 = vpop.f32.mrf.mxu0  ;;  %v8397_v48 = vld [vmem:[%s13868_s1 + $0x304] sm:$0xf] }
  0xfd   :  { %v1474_v46 = vadd.f32 %v1473_v36, %v10001_v31 }
  0xfe   :  { %v1617_v32 = vpop.f32.mrf.mxu3  ;;  %v1522_v44 = vpop.f32.mrf.mxu1 }
  0xff   :  { %v10312_v58 = vadd.f32 %v1617_v32, %v1569_v12  ;;  %v1523_v50 = vadd.f32 %v1522_v44, %v1474_v46  ;;  %1668 = vmatmul.bf16.gmra.mxu0 %v10305_v9  ;;  %v8333_v44 = vld [vmem:[%s13868_s1 + $0x104] sm:$0xf]  ;;  %v7236_v46 = vor.u32 %v8397_v48, %v7233_v18 }
 0x100   :  { %7634 = vmatmul.msk.bf16.gmra.mxu2 %vm1414_vm0, %v10309_v14  ;;  %v6980_v25 = vor.u32 %v8333_v44, %v6977_v23  ;;  %v7105_v44 = vld [vmem:[%s13868_s1 + $0x210] sm:$0xf0] }
 0x101   :  { %1717 = vmatmul.bf16.gmra.mxu1 %v10307_v49  ;;  %1936 = vmatpush.bf16.msra.mxu2 %v7236_v46  ;;  %v148_v46 = vld [vmem:[%s13867_s0 + $0x2c0] sm:$0xff] }
 0x102   :  { %1838 = vmatpush.bf16.msra.mxu0 %v6980_v25  ;;  %v157_v25 = vld [vmem:[%s13867_s0 + $0x308] sm:$0xff] }
 0x103   :  { %1815 = vmatmul.bf16.gmra.mxu3 %v9839_v53  ;;  %v1571_v6 = vpop.f32.mrf.mxu2  ;;  %v8365_v53 = vld [vmem:[%s13868_s1 + $0x204] sm:$0xf] }
 0x104   :  { %v1572_v7 = vadd.f32 %v1571_v6, %v1523_v50  ;;  %v1475_v32 = vpop.f32.mrf.mxu0  ;;  %v7108_v50 = vor.u32 %v8365_v53, %v7105_v44  ;;  %v156_v6 = vld [vmem:[%s13867_s0 + $0x300] sm:$0xff]  ;;  %v150_v53 = vld [vmem:[%s13867_s0 + $0x2d0] sm:$0xff] }
 0x105   :  { %v1476_v36 = vadd.f32 %v1475_v32, %v10001_v31  ;;  %v10368_v44 = vpack.c.bf16 %v157_v25, %v150_v53 }
 0x106   :  { %v1620_v12 = vpop.f32.mrf.mxu3  ;;  %v1524_v48 = vpop.f32.mrf.mxu1  ;;  %1887 = vmatpush.bf16.msra.mxu1 %v7108_v50  ;;  %v8332_v50 = vld [vmem:[%s13868_s1 + $0xf4] sm:$0xf0] }
 0x107   :  { %v10338_v18 = vadd.f32 %v1620_v12, %v1572_v7  ;;  %v1525_v23 = vadd.f32 %v1524_v48, %v1476_v36  ;;  %v10364_v7 = vpack.c.bf16 %v155_v63, %v148_v46  ;;  %v10366_v48 = vpack.c.bf16 %v156_v6, %v149_v4  ;;  %14059 = vst [vmem:[#allocation51_spill] sm:$0xff] %v10368_v44  ;;  %v7601_v46 = vld [vmem:[%s13868_s1 + $0x5f0] sm:$0xf0]  ;;  %v7095_v63 = vld [vmem:[%s13868_s1 + $0x1e8] sm:$0xf] }
 0x108   :  { %v8364_v4 = vld [vmem:[%s13868_s1 + $0x1f4] sm:$0xf0] }
 0x109   :  { %14058 = vst [vmem:[#allocation50_spill] sm:$0xff] %v10366_v48  ;;  %v7096_v25 = vor.u32 %v8364_v4, %v7095_v63  ;;  %v171_v63 = vld [vmem:[%s13867_s0 + $0x378] sm:$0xff] }
 0x10b   :  { %v1573_v0 = vpop.f32.mrf.mxu2  ;;  %2174 = vmatpush.bf16.msrb.mxu3 %v7096_v25 }
 0x10c   :  { %v1574_v12 = vadd.f32 %v1573_v0, %v1525_v23  ;;  %v1478_v36 = vpop.f32.mrf.mxu0  ;;  %v6967_v23 = vld [vmem:[%s13868_s1 + $0xe8] sm:$0xf] }
 0x10d   :  { %v1479_v14 = vadd.f32 %v1478_v36, %v10001_v31 }
 0x10e   :  { %v1622_v32 = vpop.f32.mrf.mxu3  ;;  %v1527_v49 = vpop.f32.mrf.mxu1 }
 0x10f   :  { %v10371_v47 = vadd.f32 %v1622_v32, %v1574_v12  ;;  %v1528_v38 = vadd.f32 %v1527_v49, %v1479_v14  ;;  %1673 = vmatmul.bf16.gmra.mxu0 %v10364_v7  ;;  %v8489_v49 = vld [vmem:[%s13868_s1 + $0x5e4] sm:$0xf]  ;;  %v6968_v14 = vor.u32 %v8332_v50, %v6967_v23 }
 0x110   :  { %7635 = vmatmul.msk.bf16.gmra.mxu2 %vm1414_vm0, %v10368_v44  ;;  %v7604_v53 = vor.u32 %v8489_v49, %v7601_v46  ;;  %v162_v44 = vld [vmem:[%s13867_s0 + $0x330] sm:$0xff]  ;;  %v169_v49 = vld [vmem:[%s13867_s0 + $0x368] sm:$0xff]  ;;  %v164_v46 = vld [vmem:[%s13867_s0 + $0x340] sm:$0xff] }
 0x111   :  { %1722 = vmatmul.bf16.gmra.mxu1 %v10366_v48  ;;  %2125 = vmatpush.bf16.msrb.mxu2 %v6968_v14  ;;  %v170_v14 = vld [vmem:[%s13867_s0 + $0x370] sm:$0xff] }
 0x112   :  { %2027 = vmatpush.bf16.msrb.mxu0 %v7604_v53 }
 0x113   :  { %1820 = vmatmul.bf16.gmra.mxu3 %v9893_v15  ;;  %v1576_v6 = vpop.f32.mrf.mxu2 }
 0x114   :  { %v1577_v0 = vadd.f32 %v1576_v6, %v1528_v38  ;;  %v1480_v32 = vpop.f32.mrf.mxu0  ;;  %v163_v38 = vld [vmem:[%s13867_s0 + $0x338] sm:$0xff]  ;;  %v10417_v6 = vpack.c.bf16 %v169_v49, %v162_v44 }
 0x115   :  { %v1481_v36 = vadd.f32 %v1480_v32, %v10001_v31  ;;  %v10421_v32 = vpack.c.bf16 %v171_v63, %v164_v46 }
 0x116   :  { %v1625_v12 = vpop.f32.mrf.mxu3  ;;  %v1529_v23 = vpop.f32.mrf.mxu1  ;;  %14060 = vst [vmem:[#allocation52_spill] sm:$0xff] %v10417_v6 }
 0x117   :  { %v10397_v50 = vadd.f32 %v1625_v12, %v1577_v0  ;;  %v1530_v15 = vadd.f32 %v1529_v23, %v1481_v36  ;;  %v10419_v12 = vpack.c.bf16 %v170_v14, %v163_v38  ;;  %14062 = vst [vmem:[#allocation54_spill] sm:$0xff] %v10421_v32 }
 0x119   :  { %14061 = vst [vmem:[#allocation53_spill] sm:$0xff] %v10419_v12 }
 0x11b   :  { %v1578_v4 = vpop.f32.mrf.mxu2 }
 0x11c   :  { %v1579_v53 = vadd.f32 %v1578_v4, %v1530_v15  ;;  %v1483_v0 = vpop.f32.mrf.mxu0 }
 0x11d   :  { %v1484_v36 = vadd.f32 %v1483_v0, %v10001_v31 }
 0x11e   :  { %v1627_v25 = vpop.f32.mrf.mxu3  ;;  %v1532_v23 = vpop.f32.mrf.mxu1 }
 0x11f   :  { %v10424_v48 = vadd.f32 %v1627_v25, %v1579_v53  ;;  %v1533_v37 = vadd.f32 %v1532_v23, %v1484_v36  ;;  %1678 = vmatmul.bf16.gmra.mxu0 %v10417_v6 }
 0x120   :  { %7636 = vmatmul.msk.bf16.gmra.mxu2 %vm1414_vm0, %v10421_v32 }
 0x121   :  { %1727 = vmatmul.bf16.gmra.mxu1 %v10419_v12 }
 0x123   :  { %1825 = vmatmul.bf16.gmra.mxu3 %v9953_v59  ;;  %v1581_v15 = vpop.f32.mrf.mxu2  ;;  %v8493_v59 = vld [vmem:[%s13868_s1 + $0x604] sm:$0xf] }
 0x124   :  { %v1582_v44 = vadd.f32 %v1581_v15, %v1533_v37  ;;  %v1485_v38 = vpop.f32.mrf.mxu0  ;;  %v7617_v37 = vld [vmem:[%s13868_s1 + $0x610] sm:$0xf0] }
 0x125   :  { %v1486_v14 = vadd.f32 %v1485_v38, %v10001_v31  ;;  %v7620_v15 = vor.u32 %v8493_v59, %v7617_v37 }
 0x126   :  { %v1630_v49 = vpop.f32.mrf.mxu3  ;;  %v1534_v46 = vpop.f32.mrf.mxu1 }
 0x127   :  { %v10432_v63 = vadd.f32 %v1630_v49, %v1582_v44  ;;  %v1535_v4 = vadd.f32 %v1534_v46, %v1486_v14  ;;  %2083 = vmatpush.bf16.msrb.mxu1 %v7620_v15 }
 0x12b   :  { %v1583_v53 = vpop.f32.mrf.mxu2 }
 0x12c   :  { %v1584_v25 = vadd.f32 %v1583_v53, %v1535_v4  ;;  %v1644_v36 = vpop.f32.mrf.mxu0  ;;  %v8328_v53 = vld [vmem:[%s13868_s1 + $0xd4] sm:$0xf0] }
 0x12d   :  { %v1645_v23 = vadd.f32 %v1644_v36, %v10043_v13  ;;  %v8485_v36 = vld [vmem:[%s13868_s1 + $0x5c4] sm:$0xf] }
 0x12e   :  { %v1632_v0 = vpop.f32.mrf.mxu3  ;;  %v1693_v12 = vpop.f32.mrf.mxu1 }
 0x12f   :  { %v10441_v31 = vadd.f32 %v1632_v0, %v1584_v25  ;;  %v1694_v44 = vadd.f32 %v1693_v12, %v1645_v23  ;;  %1839 = vmatmul.bf16.vlgmr.msra.gmra.mxu0 %v9553_v51  ;;  %v6951_v12 = vld [vmem:[%s13868_s1 + $0xc8] sm:$0xf] }
 0x130   :  { %1937 = vmatmul.bf16.vlgmr.msra.gmra.mxu2 %v9563_v55  ;;  %v6952_v0 = vor.u32 %v8328_v53, %v6951_v12  ;;  %v7079_v23 = vld [vmem:[%s13868_s1 + $0x1c8] sm:$0xf] }
 0x131   :  { %1888 = vmatmul.bf16.vlgmr.msra.gmra.mxu1 %v9555_v52 }
 0x132   :  { %2126 = vmatpush.bf16.msrb.mxu2 %v6952_v0 }
 0x133   :  { %1986 = vmatmul.bf16.vlgmr.msra.gmra.mxu3 %v10012_v35  ;;  %v1742_v13 = vpop.f32.mrf.mxu2 }
 0x134   :  { %v10447_v49 = vadd.f32 %v1742_v13, %v1694_v44  ;;  %v1646_v14 = vpop.f32.mrf.mxu0  ;;  %v8360_v44 = vld [vmem:[%s13868_s1 + $0x1d4] sm:$0xf0] }
 0x135   :  { %v1647_v46 = vadd.f32 %v1646_v14, %v10076_v5  ;;  %v7585_v5 = vld [vmem:[%s13868_s1 + $0x5d0] sm:$0xf0]  ;;  %v7080_v13 = vor.u32 %v8360_v44, %v7079_v23 }
 0x136   :  { %v10449_v38 = vpop.f32.mrf.mxu3  ;;  %v1695_v4 = vpop.f32.mrf.mxu1  ;;  %v2875_v59 = vmin.f32 %v10447_v49, 20.0  ;;  %v7588_v15 = vor.u32 %v8485_v36, %v7585_v5  ;;  %vm2811_vm3 = vcmp.gt.f32.partialorder %v10447_v49, 20.0 }
 0x137   :  { %v1696_v25 = vadd.f32 %v1695_v4, %v1647_v46  ;;  %2175 = vmatpush.bf16.msrb.mxu3 %v7080_v13 }
 0x138   :  { %v2939_v37 = vmul.f32 1.442695, %v2875_v59  ;;  %2028 = vmatpush.bf16.msrb.mxu0 %v7588_v15 }
 0x13a   :  { %8665 = vpow2.f32 %v2939_v37 }
 0x13b   :  { %v1744_v14 = vpop.f32.mrf.mxu2 }
 0x13c   :  { %v10471_v46 = vadd.f32 %v1744_v14, %v1696_v25  ;;  %v1649_v12 = vpop.f32.mrf.mxu0  ;;  %v6935_v14 = vld [vmem:[%s13868_s1 + $0xa8] sm:$0xf] }
 0x13d   :  { %v1650_v53 = vadd.f32 %v1649_v12, %v10102_v43  ;;  %v8324_v12 = vld [vmem:[%s13868_s1 + $0xb4] sm:$0xf0] }
 0x13e   :  { %v10473_v4 = vpop.f32.mrf.mxu3  ;;  %v1698_v35 = vpop.f32.mrf.mxu1  ;;  %v2879_v59 = vmin.f32 %v10471_v46, 20.0  ;;  %vm2815_vm4 = vcmp.gt.f32.partialorder %v10471_v46, 20.0 }
 0x13f   :  { %v1699_v36 = vadd.f32 %v1698_v35, %v1650_v53  ;;  %1844 = vmatmul.bf16.gmra.mxu0 %v9625_v19 }
 0x140   :  { %v8666_v5 = vpop.eup %8665  ;;  %v2947_v0 = vmul.f32 1.442695, %v2879_v59  ;;  %1942 = vmatmul.bf16.gmra.mxu2 %v9629_v21  ;;  %v6936_v59 = vor.u32 %v8324_v12, %v6935_v14 }
 0x141   :  { %1893 = vmatmul.bf16.gmra.mxu1 %v9627_v20  ;;  %v3067_v23 = vadd.f32 1.0, %v8666_v5 }
 0x142   :  { %8667 = vpow2.f32 %v2947_v0  ;;  %v7063_v0 = vld [vmem:[%s13868_s1 + $0x1a8] sm:$0xf]  ;;  %2127 = vmatpush.bf16.msrb.mxu2 %v6936_v59 }
 0x143   :  { %1991 = vmatmul.bf16.gmra.mxu3 %v10069_v45  ;;  %v1747_v25 = vpop.f32.mrf.mxu2  ;;  %8669 = vlog2.f32 %v3067_v23 }
 0x144   :  { %v10481_v37 = vadd.f32 %v1747_v25, %v1699_v36  ;;  %v1651_v15 = vpop.f32.mrf.mxu0  ;;  %v8481_v36 = vld [vmem:[%s13868_s1 + $0x5a4] sm:$0xf]  ;;  %v3070_v25 = vmul.f32 -0.5, %v8666_v5 }
 0x145   :  { %v1652_v35 = vadd.f32 %v1651_v15, %v10135_v33  ;;  %v7569_v33 = vld [vmem:[%s13868_s1 + $0x5b0] sm:$0xf0] }
 0x146   :  { %v10483_v43 = vpop.f32.mrf.mxu3  ;;  %v1700_v44 = vpop.f32.mrf.mxu1  ;;  %v2883_v13 = vmin.f32 %v10481_v37, 20.0  ;;  %v7572_v45 = vor.u32 %v8481_v36, %v7569_v33  ;;  %v3071_v55 = vadd.f32 1.0, %v3070_v25  ;;  %v3073_v36 = vand.u32 2147483647, %v8666_v5 }
 0x147   :  { %14063 = vst [vmem:[#allocation55_spill] sm:$0xff] %v10483_v43  ;;  %v1701_v53 = vadd.f32 %v1700_v44, %v1652_v35  ;;  %v8356_v35 = vld [vmem:[%s13868_s1 + $0x1b4] sm:$0xf0]  ;;  %vm2819_vm7 = vcmp.gt.f32.partialorder %v10481_v37, 20.0 }
 0x148   :  { %v8668_v23 = vpop.eup %8667  ;;  %v2955_v15 = vmul.f32 1.442695, %v2883_v13  ;;  %v7064_v14 = vor.u32 %v8356_v35, %v7063_v0  ;;  %2029 = vmatpush.bf16.msrb.mxu0 %v7572_v45  ;;  %v3072_v25 = vmul.f32 %v8666_v5, %v3071_v55  ;;  %vm10516_vm1 = vcmp.lt.f32.partialorder %v3073_v36, 0.0004427343 }
 0x149   :  { %v3103_v44 = vadd.f32 1.0, %v8668_v23  ;;  %v3106_v12 = vmul.f32 -0.5, %v8668_v23  ;;  %v8670_v21 = vpop.eup %8669 }
 0x14a   :  { %8671 = vpow2.f32 %v2955_v15  ;;  %2176 = vmatpush.bf16.msrb.mxu3 %v7064_v14  ;;  %v3069_v43 = vmul.f32 0.6931472, %v8670_v21  ;;  %v3109_v15 = vand.u32 2147483647, %v8668_v23 }
 0x14b   :  { %8673 = vlog2.f32 %v3103_v44  ;;  %v1749_v20 = vpop.f32.mrf.mxu2  ;;  %v3107_v59 = vadd.f32 1.0, %v3106_v12 }
 0x14c   :  { %v10505_v52 = vadd.f32 %v1749_v20, %v1701_v53  ;;  %v1654_v13 = vpop.f32.mrf.mxu0  ;;  %vm3110_vm2 = vcmp.lt.f32.partialorder %v3109_v15, 0.0004427343 }
 0x14d   :  { %v1655_v33 = vadd.f32 %v1654_v13, %v10161_v30  ;;  %v3108_v14 = vmul.f32 %v8668_v23, %v3107_v59 }
 0x14e   :  { %v10507_v32 = vpop.f32.mrf.mxu3  ;;  %v1703_v19 = vpop.f32.mrf.mxu1  ;;  %v2887_v0 = vmin.f32 %v10505_v52, 20.0  ;;  %vm2823_vm8 = vcmp.gt.f32.partialorder %v10505_v52, 20.0 }
 0x14f   :  { %v1704_v45 = vadd.f32 %v1703_v19, %v1655_v33  ;;  %1849 = vmatmul.bf16.gmra.mxu0 %v9679_v40  ;;  %v3075_v19 = vsel %vm10516_vm1, %v3072_v25, %v3069_v43  ;;  %v8320_v25 = vld [vmem:[%s13868_s1 + $0x94] sm:$0xf0] }
 0x150   :  { %v10512_v35 = vpop.eup %8671  ;;  %v2963_v20 = vmul.f32 1.442695, %v2887_v0  ;;  %1947 = vmatmul.bf16.gmra.mxu2 %v9683_v42  ;;  %v3643_v33 = vsel %vm2811_vm3, %v10447_v49, %v3075_v19 }
 0x151   :  { %1898 = vmatmul.bf16.gmra.mxu1 %v9681_v41  ;;  %v8674_v53 = vpop.eup %8673  ;;  %v3139_v21 = vadd.f32 1.0, %v10512_v35 }
 0x152   :  { %v3105_v44 = vmul.f32 0.6931472, %v8674_v53  ;;  %8675 = vpow2.f32 %v2963_v20  ;;  %v7047_v53 = vld [vmem:[%s13868_s1 + $0x188] sm:$0xf] }
 0x153   :  { %1996 = vmatmul.bf16.gmra.mxu3 %v10128_v11  ;;  %v1752_v55 = vpop.f32.mrf.mxu2  ;;  %8677 = vlog2.f32 %v3139_v21  ;;  %v3142_v21 = vmul.f32 -0.5, %v10512_v35 }
 0x154   :  { %v3111_v5 = vsel %vm3110_vm2, %v3108_v14, %v3105_v44  ;;  %v10526_v12 = vadd.f32 %v1752_v55, %v1704_v45  ;;  %v1656_v36 = vpop.f32.mrf.mxu0  ;;  %v6919_v45 = vld [vmem:[%s13868_s1 + $0x88] sm:$0xf]  ;;  %v8352_v14 = vld [vmem:[%s13868_s1 + $0x194] sm:$0xf0] }
 0x155   :  { %v3647_v0 = vsel %vm2815_vm4, %v10471_v46, %v3111_v5  ;;  %v1657_v43 = vadd.f32 %v1656_v36, %v10194_v39  ;;  %v6920_v49 = vor.u32 %v8320_v25, %v6919_v45  ;;  %v8477_v46 = vld [vmem:[%s13868_s1 + $0x584] sm:$0xf]  ;;  %v7553_v39 = vld [vmem:[%s13868_s1 + $0x590] sm:$0xf0]  ;;  %v7048_v5 = vor.u32 %v8352_v14, %v7047_v53 }
 0x156   :  { %v10528_v13 = vpop.f32.mrf.mxu3  ;;  %v1705_v23 = vpop.f32.mrf.mxu1  ;;  %v10533_v59 = vpack.c.bf16 %v3647_v0, %v3643_v33  ;;  %v2891_v15 = vmin.f32 %v10526_v12, 20.0  ;;  %v7556_v44 = vor.u32 %v8477_v46, %v7553_v39  ;;  %v3145_v25 = vand.u32 2147483647, %v10512_v35 }
 0x157   :  { %v1706_v20 = vadd.f32 %v1705_v23, %v1657_v43  ;;  %2128 = vmatpush.bf16.msrb.mxu2 %v6920_v49  ;;  %2177 = vmatpush.bf16.msrb.mxu3 %v7048_v5  ;;  %v3143_v43 = vadd.f32 1.0, %v3142_v21  ;;  %vm2827_vm11 = vcmp.gt.f32.partialorder %v10526_v12, 20.0 }
 0x158   :  { %14066 = vst [vmem:[#allocation56_spill] sm:$0xff] %v10533_v59  ;;  %v8676_v30 = vpop.eup %8675  ;;  %v2971_v19 = vmul.f32 1.442695, %v2891_v15  ;;  %2030 = vmatpush.bf16.msrb.mxu0 %v7556_v44  ;;  %vm10568_vm5 = vcmp.lt.f32.partialorder %v3145_v25, 0.0004427343 }
 0x159   :  { %v3175_v55 = vadd.f32 1.0, %v8676_v30  ;;  %v3178_v36 = vmul.f32 -0.5, %v8676_v30  ;;  %v8678_v33 = vpop.eup %8677  ;;  %v3181_v44 = vand.u32 2147483647, %v8676_v30 }
 0x15a   :  { %8679 = vpow2.f32 %v2971_v19  ;;  %v3141_v49 = vmul.f32 0.6931472, %v8678_v33 }
 0x15b   :  { %8681 = vlog2.f32 %v3175_v55  ;;  %v1754_v0 = vpop.f32.mrf.mxu2  ;;  %v3179_v53 = vadd.f32 1.0, %v3178_v36  ;;  %vm3182_vm6 = vcmp.lt.f32.partialorder %v3181_v44, 0.0004427343 }
 0x15c   :  { %v10555_v23 = vadd.f32 %v1754_v0, %v1706_v20  ;;  %v1659_v15 = vpop.f32.mrf.mxu0  ;;  %v3144_v20 = vmul.f32 %v10512_v35, %v3143_v43 }
 0x15d   :  { %v1660_v46 = vadd.f32 %v1659_v15, %v10220_v34  ;;  %v3180_v15 = vmul.f32 %v8676_v30, %v3179_v53 }
 0x15e   :  { %v10557_v45 = vpop.f32.mrf.mxu3  ;;  %v1708_v39 = vpop.f32.mrf.mxu1  ;;  %v2895_v19 = vmin.f32 %v10555_v23, 20.0  ;;  %v3147_v33 = vsel %vm10568_vm5, %v3144_v20, %v3141_v49  ;;  %v8316_v20 = vld [vmem:[%s13868_s1 + $0x74] sm:$0xf0]  ;;  %vm2831_vm12 = vcmp.gt.f32.partialorder %v10555_v23, 20.0 }
 0x15f   :  { %v1709_v14 = vadd.f32 %v1708_v39, %v1660_v46  ;;  %1854 = vmatmul.bf16.gmra.mxu0 %v9733_v1 }
 0x160   :  { %v10563_v55 = vpop.eup %8679  ;;  %v2979_v21 = vmul.f32 1.442695, %v2895_v19  ;;  %1952 = vmatmul.bf16.gmra.mxu2 %v9737_v3  ;;  %v3651_v19 = vsel %vm2819_vm7, %v10481_v37, %v3147_v33 }
 0x161   :  { %1903 = vmatmul.bf16.gmra.mxu1 %v9735_v2  ;;  %v8682_v5 = vpop.eup %8681  ;;  %v3211_v36 = vadd.f32 1.0, %v10563_v55  ;;  %v3214_v33 = vmul.f32 -0.5, %v10563_v55 }
 0x162   :  { %v3177_v0 = vmul.f32 0.6931472, %v8682_v5  ;;  %8683 = vpow2.f32 %v2979_v21  ;;  %v7031_v5 = vld [vmem:[%s13868_s1 + $0x168] sm:$0xf] }
 0x163   :  { %2001 = vmatmul.bf16.gmra.mxu3 %v10187_v8  ;;  %v1757_v35 = vpop.f32.mrf.mxu2  ;;  %8685 = vlog2.f32 %v3211_v36 }
 0x164   :  { %v3183_v43 = vsel %vm3182_vm6, %v3180_v15, %v3177_v0  ;;  %v10578_v25 = vadd.f32 %v1757_v35, %v1709_v14  ;;  %v1661_v39 = vpop.f32.mrf.mxu0  ;;  %v6903_v14 = vld [vmem:[%s13868_s1 + $0x68] sm:$0xf]  ;;  %v8348_v35 = vld [vmem:[%s13868_s1 + $0x174] sm:$0xf0] }
 0x165   :  { %v3655_v34 = vsel %vm2823_vm8, %v10505_v52, %v3183_v43  ;;  %v1662_v30 = vadd.f32 %v1661_v39, %v10253_v24  ;;  %v6904_v37 = vor.u32 %v8316_v20, %v6903_v14  ;;  %v8473_v52 = vld [vmem:[%s13868_s1 + $0x564] sm:$0xf]  ;;  %v7537_v24 = vld [vmem:[%s13868_s1 + $0x570] sm:$0xf0]  ;;  %v7032_v39 = vor.u32 %v8348_v35, %v7031_v5 }
 0x166   :  { %v10580_v46 = vpop.f32.mrf.mxu3  ;;  %v1710_v49 = vpop.f32.mrf.mxu1  ;;  %v10585_v53 = vpack.c.bf16 %v3655_v34, %v3651_v19  ;;  %v2899_v44 = vmin.f32 %v10578_v25, 20.0  ;;  %v7540_v15 = vor.u32 %v8473_v52, %v7537_v24  ;;  %v3217_v52 = vand.u32 2147483647, %v10563_v55 }
 0x167   :  { %v1711_v21 = vadd.f32 %v1710_v49, %v1662_v30  ;;  %2129 = vmatpush.bf16.msrb.mxu2 %v6904_v37  ;;  %2178 = vmatpush.bf16.msrb.mxu3 %v7032_v39  ;;  %v3215_v49 = vadd.f32 1.0, %v3214_v33  ;;  %vm2835_vm14 = vcmp.gt.f32.partialorder %v10578_v25, 20.0 }
 0x168   :  { %14069 = vst [vmem:[#allocation57_spill] sm:$0xff] %v10585_v53  ;;  %v8684_v36 = vpop.eup %8683  ;;  %v2987_v0 = vmul.f32 1.442695, %v2899_v44  ;;  %2031 = vmatpush.bf16.msrb.mxu0 %v7540_v15  ;;  %vm10620_vm9 = vcmp.lt.f32.partialorder %v3217_v52, 0.0004427343 }
 0x169   :  { %v3247_v43 = vadd.f32 1.0, %v8684_v36  ;;  %v3250_v19 = vmul.f32 -0.5, %v8684_v36  ;;  %v8686_v34 = vpop.eup %8685  ;;  %v3253_v15 = vand.u32 2147483647, %v8684_v36 }
 0x16a   :  { %8687 = vpow2.f32 %v2987_v0  ;;  %v3213_v37 = vmul.f32 0.6931472, %v8686_v34 }
 0x16b   :  { %8689 = vlog2.f32 %v3247_v43  ;;  %v1759_v30 = vpop.f32.mrf.mxu2  ;;  %v3251_v5 = vadd.f32 1.0, %v3250_v19  ;;  %vm3254_vm10 = vcmp.lt.f32.partialorder %v3253_v15, 0.0004427343 }
 0x16c   :  { %v10607_v14 = vadd.f32 %v1759_v30, %v1711_v21  ;;  %v1664_v44 = vpop.f32.mrf.mxu0  ;;  %v3216_v21 = vmul.f32 %v10563_v55, %v3215_v49 }
 0x16d   :  { %v1665_v24 = vadd.f32 %v1664_v44, %v10279_v29  ;;  %v3252_v30 = vmul.f32 %v8684_v36, %v3251_v5 }
 0x16e   :  { %v10609_v20 = vpop.f32.mrf.mxu3  ;;  %v1713_v53 = vpop.f32.mrf.mxu1  ;;  %v2903_v0 = vmin.f32 %v10607_v14, 20.0  ;;  %vm2839_vm1 = vcmp.gt.f32.partialorder %v10607_v14, 20.0 }
 0x16f   :  { %v1714_v35 = vadd.f32 %v1713_v53, %v1665_v24  ;;  %1859 = vmatmul.bf16.gmra.mxu0 %v9787_v26  ;;  %v3219_v53 = vsel %vm10620_vm9, %v3216_v21, %v3213_v37  ;;  %v8312_v21 = vld [vmem:[%s13868_s1 + $0x54] sm:$0xf0] }
 0x170   :  { %v10615_v43 = vpop.eup %8687  ;;  %v2995_v33 = vmul.f32 1.442695, %v2903_v0  ;;  %1957 = vmatmul.bf16.gmra.mxu2 %v9791_v28  ;;  %v3659_v0 = vsel %vm2827_vm11, %v10526_v12, %v3219_v53 }
 0x171   :  { %1908 = vmatmul.bf16.gmra.mxu1 %v9789_v27  ;;  %v8690_v39 = vpop.eup %8689  ;;  %v3283_v19 = vadd.f32 1.0, %v10615_v43  ;;  %v3286_v53 = vmul.f32 -0.5, %v10615_v43 }
 0x172   :  { %v3249_v34 = vmul.f32 0.6931472, %v8690_v39  ;;  %8691 = vpow2.f32 %v2995_v33  ;;  %v7015_v39 = vld [vmem:[%s13868_s1 + $0x148] sm:$0xf] }
 0x173   :  { %2006 = vmatmul.bf16.gmra.mxu3 %v10246_v10  ;;  %v1762_v55 = vpop.f32.mrf.mxu2  ;;  %8693 = vlog2.f32 %v3283_v19 }
 0x174   :  { %v3255_v49 = vsel %vm3254_vm10, %v3252_v30, %v3249_v34  ;;  %v10630_v44 = vadd.f32 %v1762_v55, %v1714_v35  ;;  %v1666_v24 = vpop.f32.mrf.mxu0  ;;  %v6887_v35 = vld [vmem:[%s13868_s1 + $0x48] sm:$0xf]  ;;  %v8344_v55 = vld [vmem:[%s13868_s1 + $0x154] sm:$0xf0] }
 0x175   :  { %v3663_v29 = vsel %vm2831_vm12, %v10555_v23, %v3255_v49  ;;  %v1667_v36 = vadd.f32 %v1666_v24, %v10312_v58  ;;  %v6888_v12 = vor.u32 %v8312_v21, %v6887_v35  ;;  %v8469_v23 = vld [vmem:[%s13868_s1 + $0x544] sm:$0xf]  ;;  %v7521_v58 = vld [vmem:[%s13868_s1 + $0x550] sm:$0xf0]  ;;  %v7016_v24 = vor.u32 %v8344_v55, %v7015_v39 }
 0x176   :  { %v10632_v52 = vpop.f32.mrf.mxu3  ;;  %v1715_v37 = vpop.f32.mrf.mxu1  ;;  %v10637_v5 = vpack.c.bf16 %v3663_v29, %v3659_v0  ;;  %v2907_v15 = vmin.f32 %v10630_v44, 20.0  ;;  %v7524_v30 = vor.u32 %v8469_v23, %v7521_v58  ;;  %v3289_v23 = vand.u32 2147483647, %v10615_v43 }
 0x177   :  { %v1716_v33 = vadd.f32 %v1715_v37, %v1667_v36  ;;  %2130 = vmatpush.bf16.msrb.mxu2 %v6888_v12  ;;  %2179 = vmatpush.bf16.msrb.mxu3 %v7016_v24  ;;  %v3287_v37 = vadd.f32 1.0, %v3286_v53  ;;  %vm2843_vm4 = vcmp.gt.f32.partialorder %v10630_v44, 20.0 }
 0x178   :  { %14072 = vst [vmem:[#allocation58_spill] sm:$0xff] %v10637_v5  ;;  %v8692_v19 = vpop.eup %8691  ;;  %v3003_v34 = vmul.f32 1.442695, %v2907_v15  ;;  %2032 = vmatpush.bf16.msrb.mxu0 %v7524_v30  ;;  %vm10672_vm13 = vcmp.lt.f32.partialorder %v3289_v23, 0.0004427343 }
 0x179   :  { %v3319_v49 = vadd.f32 1.0, %v8692_v19  ;;  %v3322_v0 = vmul.f32 -0.5, %v8692_v19  ;;  %v8694_v29 = vpop.eup %8693  ;;  %v3325_v30 = vand.u32 2147483647, %v8692_v19 }
 0x17a   :  { %8695 = vpow2.f32 %v3003_v34  ;;  %v3285_v12 = vmul.f32 0.6931472, %v8694_v29 }
 0x17b   :  { %8697 = vlog2.f32 %v3319_v49  ;;  %v1764_v36 = vpop.f32.mrf.mxu2  ;;  %v3323_v39 = vadd.f32 1.0, %v3322_v0  ;;  %vm3326_vm15 = vcmp.lt.f32.partialorder %v3325_v30, 0.0004427343 }
 0x17c   :  { %v10659_v35 = vadd.f32 %v1764_v36, %v1716_v33  ;;  %v1669_v15 = vpop.f32.mrf.mxu0  ;;  %v3288_v33 = vmul.f32 %v10615_v43, %v3287_v37 }
 0x17d   :  { %v1670_v58 = vadd.f32 %v1669_v15, %v10338_v18  ;;  %v3324_v36 = vmul.f32 %v8692_v19, %v3323_v39 }
 0x17e   :  { %v10661_v21 = vpop.f32.mrf.mxu3  ;;  %v1718_v5 = vpop.f32.mrf.mxu1  ;;  %v2911_v34 = vmin.f32 %v10659_v35, 20.0  ;;  %vm2847_vm5 = vcmp.gt.f32.partialorder %v10659_v35, 20.0 }
 0x17f   :  { %v1719_v55 = vadd.f32 %v1718_v5, %v1670_v58  ;;  %1864 = vmatmul.bf16.gmra.mxu0 %v9841_v54  ;;  %v3291_v5 = vsel %vm10672_vm13, %v3288_v33, %v3285_v12 }
 0x180   :  { %v10667_v49 = vpop.eup %8695  ;;  %v3011_v53 = vmul.f32 1.442695, %v2911_v34  ;;  %1962 = vmatmul.bf16.gmra.mxu2 %v9845_v57  ;;  %v3667_v34 = vsel %vm2835_vm14, %v10578_v25, %v3291_v5 }
 0x181   :  { %1913 = vmatmul.bf16.gmra.mxu1 %v9843_v56  ;;  %v8698_v24 = vpop.eup %8697  ;;  %v3355_v0 = vadd.f32 1.0, %v10667_v49  ;;  %v3358_v30 = vmul.f32 -0.5, %v10667_v49 }
 0x182   :  { %v3321_v29 = vmul.f32 0.6931472, %v8698_v24  ;;  %8699 = vpow2.f32 %v3011_v53  ;;  %v8308_v24 = vld [vmem:[%s13868_s1 + $0x34] sm:$0xf0] }
 0x183   :  { %2011 = vmatmul.bf16.gmra.mxu3 %v10305_v9  ;;  %v1767_v43 = vpop.f32.mrf.mxu2  ;;  %8701 = vlog2.f32 %v3355_v0  ;;  %v6999_v0 = vld [vmem:[%s13868_s1 + $0x128] sm:$0xf] }
 0x184   :  { %v3327_v37 = vsel %vm3326_vm15, %v3324_v36, %v3321_v29  ;;  %v10682_v15 = vadd.f32 %v1767_v43, %v1719_v55  ;;  %v1671_v58 = vpop.f32.mrf.mxu0  ;;  %v6871_v55 = vld [vmem:[%s13868_s1 + $0x28] sm:$0xf]  ;;  %v8340_v43 = vld [vmem:[%s13868_s1 + $0x134] sm:$0xf0] }
 0x185   :  { %v3671_v12 = vsel %vm2839_vm1, %v10607_v14, %v3327_v37  ;;  %v1672_v19 = vadd.f32 %v1671_v58, %v10371_v47  ;;  %v6872_v18 = vor.u32 %v8308_v24, %v6871_v55  ;;  %v8465_v47 = vld [vmem:[%s13868_s1 + $0x524] sm:$0xf]  ;;  %v7505_v14 = vld [vmem:[%s13868_s1 + $0x530] sm:$0xf0]  ;;  %v7000_v58 = vor.u32 %v8340_v43, %v6999_v0  ;;  %v6983_v43 = vld [vmem:[%s13868_s1 + $0x108] sm:$0xf] }
 0x186   :  { %v10684_v23 = vpop.f32.mrf.mxu3  ;;  %v1720_v39 = vpop.f32.mrf.mxu1  ;;  %v10689_v33 = vpack.c.bf16 %v3671_v12, %v3667_v34  ;;  %v2915_v53 = vmin.f32 %v10682_v15, 20.0  ;;  %v7508_v36 = vor.u32 %v8465_v47, %v7505_v14  ;;  %v8304_v14 = vld [vmem:[%s13868_s1 + $0x14] sm:$0xf0]  ;;  %v7489_v0 = vld [vmem:[%s13868_s1 + $0x510] sm:$0xf0]  ;;  %vm2851_vm7 = vcmp.gt.f32.partialorder %v10682_v15, 20.0 }
 0x187   :  { %v1721_v25 = vadd.f32 %v1720_v39, %v1672_v19  ;;  %2131 = vmatpush.bf16.msrb.mxu2 %v6872_v18  ;;  %v3359_v19 = vadd.f32 1.0, %v3358_v30  ;;  %v3361_v39 = vand.u32 2147483647, %v10667_v49  ;;  %2180 = vmatpush.bf16.msrb.mxu3 %v7000_v58  ;;  %v8461_v30 = vld [vmem:[%s13868_s1 + $0x504] sm:$0xf] }
 0x188   :  { %14075 = vst [vmem:[#allocation59_spill] sm:$0xff] %v10689_v33  ;;  %v8700_v5 = vpop.eup %8699  ;;  %v3019_v29 = vmul.f32 1.442695, %v2915_v53  ;;  %2033 = vmatpush.bf16.msrb.mxu0 %v7508_v36  ;;  %v6855_v53 = vld [vmem:[%s13868_s1 + $0x8] sm:$0xf]  ;;  %v7492_v59 = vor.u32 %v8461_v30, %v7489_v0 }
 0x189   :  { %v3391_v37 = vadd.f32 1.0, %v8700_v5  ;;  %v8702_v34 = vpop.eup %8701  ;;  %v3394_v12 = vmul.f32 -0.5, %v8700_v5  ;;  %v6856_v33 = vor.u32 %v8304_v14, %v6855_v53  ;;  %v3397_v9 = vand.u32 2147483647, %v8700_v5 }
 0x18a   :  { %8703 = vpow2.f32 %v3019_v29  ;;  %v3357_v29 = vmul.f32 0.6931472, %v8702_v34  ;;  %vm10740_vm2 = vcmp.lt.f32.partialorder %v3361_v39, 0.0004427343 }
 0x18b   :  { %8705 = vlog2.f32 %v3391_v37  ;;  %v1769_v55 = vpop.f32.mrf.mxu2  ;;  %v8336_v37 = vld [vmem:[%s13868_s1 + $0x114] sm:$0xf0]  ;;  %v3395_v58 = vadd.f32 1.0, %v3394_v12  ;;  %2132 = vmatpush.bf16.msrb.mxu2 %v6856_v33  ;;  %vm3398_vm3 = vcmp.lt.f32.partialorder %v3397_v9, 0.0004427343 }
 0x18c   :  { %v10715_v24 = vadd.f32 %v1769_v55, %v1721_v25  ;;  %v1674_v18 = vpop.f32.mrf.mxu0  ;;  %v6984_v34 = vor.u32 %v8336_v37, %v6983_v43  ;;  %2034 = vmatpush.bf16.msrb.mxu0 %v7492_v59 }
 0x18d   :  { %v1675_v36 = vadd.f32 %v1674_v18, %v10397_v50  ;;  %v3360_v18 = vmul.f32 %v10667_v49, %v3359_v19  ;;  %v3396_v0 = vmul.f32 %v8700_v5, %v3395_v58 }
 0x18e   :  { %v10717_v47 = vpop.f32.mrf.mxu3  ;;  %v1723_v25 = vpop.f32.mrf.mxu1  ;;  %v2919_v55 = vmin.f32 %v10715_v24, 20.0  ;;  %2181 = vmatpush.bf16.msrb.mxu3 %v6984_v34  ;;  %vm2855_vm9 = vcmp.gt.f32.partialorder %v10715_v24, 20.0 }
 0x18f   :  { %v1724_v57 = vadd.f32 %v1723_v25, %v1675_v36  ;;  %1869 = vmatmul.bf16.gmra.mxu0 %v9895_v16  ;;  %v3363_v14 = vsel %vm10740_vm2, %v3360_v18, %v3357_v29 }
 0x190   :  { %v8704_v50 = vpop.eup %8703  ;;  %v3027_v56 = vmul.f32 1.442695, %v2919_v55  ;;  %1967 = vmatmul.bf16.gmra.mxu2 %v9899_v22  ;;  %v3675_v25 = vsel %vm2843_vm4, %v10630_v44, %v3363_v14 }
 0x191   :  { %1918 = vmatmul.bf16.gmra.mxu1 %v9897_v17  ;;  %v8706_v10 = vpop.eup %8705  ;;  %v3427_v53 = vadd.f32 1.0, %v8704_v50  ;;  %v3430_v37 = vmul.f32 -0.5, %v8704_v50 }
 0x192   :  { %v3393_v30 = vmul.f32 0.6931472, %v8706_v10  ;;  %8707 = vpow2.f32 %v3027_v56 }
 0x193   :  { %2016 = vmatmul.bf16.gmra.mxu3 %v10364_v7  ;;  %v1772_v49 = vpop.f32.mrf.mxu2  ;;  %8709 = vlog2.f32 %v3427_v53  ;;  %v3431_v18 = vadd.f32 1.0, %v3430_v37  ;;  %v3433_v53 = vand.u32 2147483647, %v8704_v50 }
 0x194   :  { %v3399_v19 = vsel %vm3398_vm3, %v3396_v0, %v3393_v30  ;;  %v10749_v39 = vadd.f32 %v1772_v49, %v1724_v57  ;;  %v1676_v33 = vpop.f32.mrf.mxu0 }
 0x195   :  { %v3679_v10 = vsel %vm2847_vm5, %v10659_v35, %v3399_v19  ;;  %v1677_v56 = vadd.f32 %v1676_v33, %v10424_v48  ;;  %vm10770_vm6 = vcmp.lt.f32.partialorder %v3433_v53, 0.0004427343 }
 0x196   :  { %v10751_v36 = vpop.f32.mrf.mxu3  ;;  %v1725_v59 = vpop.f32.mrf.mxu1  ;;  %v10756_v9 = vpack.c.bf16 %v3679_v10, %v3675_v25  ;;  %v2923_v5 = vmin.f32 %v10749_v39, 20.0  ;;  %vm2859_vm11 = vcmp.gt.f32.partialorder %v10749_v39, 20.0 }
 0x197   :  { %v1726_v29 = vadd.f32 %v1725_v59, %v1677_v56  ;;  %v3432_v56 = vmul.f32 %v8704_v50, %v3431_v18 }
 0x198   :  { %14078 = vst [vmem:[#allocation60_spill] sm:$0xff] %v10756_v9  ;;  %v8708_v43 = vpop.eup %8707  ;;  %v3035_v57 = vmul.f32 1.442695, %v2923_v5 }
 0x199   :  { %v3463_v58 = vadd.f32 1.0, %v8708_v43  ;;  %v3466_v55 = vmul.f32 -0.5, %v8708_v43  ;;  %v8710_v34 = vpop.eup %8709  ;;  %v3469_v33 = vand.u32 2147483647, %v8708_v43 }
 0x19a   :  { %8711 = vpow2.f32 %v3035_v57  ;;  %v3429_v0 = vmul.f32 0.6931472, %v8710_v34 }
 0x19b   :  { %8713 = vlog2.f32 %v3463_v58  ;;  %v1774_v44 = vpop.f32.mrf.mxu2  ;;  %v3467_v49 = vadd.f32 1.0, %v3466_v55  ;;  %vm3470_vm8 = vcmp.lt.f32.partialorder %v3469_v33, 0.0004427343 }
 0x19c   :  { %v10759_v35 = vadd.f32 %v1774_v44, %v1726_v29  ;;  %v1679_v48 = vpop.f32.mrf.mxu0  ;;  %v3435_v37 = vsel %vm10770_vm6, %v3432_v56, %v3429_v0  ;;  %v8460_v56 = vld [vmem:[%s13868_s1 + $0x4f4] sm:$0xf0] }
 0x19d   :  { %v1680_v14 = vadd.f32 %v1679_v48, %v10432_v63  ;;  %v3468_v58 = vmul.f32 %v8708_v43, %v3467_v49  ;;  %v10787_v48 = vld [vmem:[%s13869_s2] sm:$0xf]  ;;  %v3683_v53 = vsel %vm2851_vm7, %v10682_v15, %v3435_v37 }
 0x19e   :  { %v10761_v12 = vpop.f32.mrf.mxu3  ;;  %v1728_v30 = vpop.f32.mrf.mxu1  ;;  %v2927_v19 = vmin.f32 %v10759_v35, 20.0  ;;  %v10790_v43 = vperm.slane %v10787_v48, 1  ;;  %vm2863_vm12 = vcmp.gt.f32.partialorder %v10759_v35, 20.0 }
 0x19f   :  { %v1729_v25 = vadd.f32 %v1728_v30, %v1680_v14  ;;  %1874 = vmatmul.bf16.gmra.mxu0 %v9955_v60 }
 0x1a0   :  { %v10766_v10 = vpop.eup %8711  ;;  %v3043_v59 = vmul.f32 1.442695, %v2927_v19  ;;  %1972 = vmatmul.bf16.gmra.mxu2 %v9959_v62  ;;  %v8452_v62 = vld [vmem:[%s13868_s1 + $0x4b4] sm:$0xf0] }
 0x1a1   :  { %1923 = vmatmul.bf16.gmra.mxu1 %v9957_v61  ;;  %v8714_v5 = vpop.eup %8713  ;;  %v3499_v29 = vadd.f32 1.0, %v10766_v10  ;;  %v3502_v19 = vmul.f32 -0.5, %v10766_v10 }
 0x1a2   :  { %v3465_v57 = vmul.f32 0.6931472, %v8714_v5  ;;  %8715 = vpow2.f32 %v3043_v59  ;;  %v7607_v5 = vld [vmem:[%s13868_s1 + $0x5e8] sm:$0xf] }
 0x1a3   :  { %2021 = vmatmul.bf16.gmra.mxu3 %v10417_v6  ;;  %v1777_v50 = vpop.f32.mrf.mxu2  ;;  %8717 = vlog2.f32 %v3499_v29 }
 0x1a4   :  { %v3471_v55 = vsel %vm3470_vm8, %v3468_v58, %v3465_v57  ;;  %v10780_v34 = vadd.f32 %v1777_v50, %v1729_v25  ;;  %v1681_v18 = vpop.f32.mrf.mxu0  ;;  %v7479_v25 = vld [vmem:[%s13868_s1 + $0x4e8] sm:$0xf]  ;;  %v8492_v57 = vld [vmem:[%s13868_s1 + $0x5f4] sm:$0xf0] }
 0x1a5   :  { %v3687_v14 = vsel %vm2855_vm9, %v10715_v24, %v3471_v55  ;;  %v1682_v30 = vadd.f32 %v1681_v18, %v10441_v31  ;;  %v7480_v59 = vor.u32 %v8460_v56, %v7479_v25  ;;  %v7223_v31 = vld [vmem:[%s13868_s1 + $0x2e8] sm:$0xf]  ;;  %v8396_v24 = vld [vmem:[%s13868_s1 + $0x2f4] sm:$0xf0]  ;;  %v7608_v55 = vor.u32 %v8492_v57, %v7607_v5 }
 0x1a6   :  { %v10782_v44 = vpop.f32.mrf.mxu3  ;;  %v1730_v0 = vpop.f32.mrf.mxu1  ;;  %v10795_v49 = vpack.c.bf16 %v3687_v14, %v3683_v53  ;;  %v2931_v33 = vmin.f32 %v10780_v34, 20.0  ;;  %v7224_v37 = vor.u32 %v8396_v24, %v7223_v31  ;;  %v7351_v58 = vld [vmem:[%s13868_s1 + $0x3e8] sm:$0xf]  ;;  %v8428_v18 = vld [vmem:[%s13868_s1 + $0x3f4] sm:$0xf0]  ;;  %v1792_v14 = vadd.f32 %v10449_v38, %v10790_v43 }
 0x1a7   :  { %v1731_v15 = vadd.f32 %v1730_v0, %v1682_v30  ;;  %2321 = vmatpush.bf16.msra.mxu2 %v7480_v59  ;;  %v7352_v0 = vor.u32 %v8428_v18, %v7351_v58  ;;  %v8456_v25 = vld [vmem:[%s13868_s1 + $0x4d4] sm:$0xf0]  ;;  %v3503_v56 = vadd.f32 1.0, %v3502_v19  ;;  %v3505_v59 = vand.u32 2147483647, %v10766_v10  ;;  %2370 = vmatpush.bf16.msra.mxu3 %v7608_v55 }
 0x1a8   :  { %14081 = vst [vmem:[#allocation61_spill] sm:$0xff] %v10795_v49  ;;  %v10814_v63 = vpop.eup %8715  ;;  %v3051_v29 = vmul.f32 1.442695, %v2931_v33  ;;  %2223 = vmatpush.bf16.msra.mxu0 %v7224_v37  ;;  %v7463_v33 = vld [vmem:[%s13868_s1 + $0x4c8] sm:$0xf]  ;;  %vm2867_vm15 = vcmp.gt.f32.partialorder %v10780_v34, 20.0 }
 0x1a9   :  { %v3535_v50 = vadd.f32 1.0, %v10814_v63  ;;  %v8718_v53 = vpop.eup %8717  ;;  %v3538_v30 = vmul.f32 -0.5, %v10814_v63  ;;  %v7464_v38 = vor.u32 %v8456_v25, %v7463_v33  ;;  %v7207_v24 = vld [vmem:[%s13868_s1 + $0x2c8] sm:$0xf]  ;;  %2272 = vmatpush.bf16.msra.mxu1 %v7352_v0  ;;  %v8392_v19 = vld [vmem:[%s13868_s1 + $0x2d4] sm:$0xf0]  ;;  %v3504_v9 = vmul.f32 %v10766_v10, %v3503_v56 }
 0x1aa   :  { %8719 = vpow2.f32 %v3051_v29  ;;  %v7591_v57 = vld [vmem:[%s13868_s1 + $0x5c8] sm:$0xf]  ;;  %v8488_v58 = vld [vmem:[%s13868_s1 + $0x5d4] sm:$0xf0]  ;;  %vm10864_vm10 = vcmp.lt.f32.partialorder %v3505_v59, 0.0004427343 }
 0x1ab   :  { %8721 = vlog2.f32 %v3535_v50  ;;  %v1779_v31 = vpop.f32.mrf.mxu2  ;;  %v3501_v50 = vmul.f32 0.6931472, %v8718_v53  ;;  %2322 = vmatpush.bf16.msra.mxu2 %v7464_v38  ;;  %v7335_v18 = vld [vmem:[%s13868_s1 + $0x3c8] sm:$0xf]  ;;  %v8424_v0 = vld [vmem:[%s13868_s1 + $0x3d4] sm:$0xf0]  ;;  %v7592_v49 = vor.u32 %v8488_v58, %v7591_v57  ;;  %v1794_v57 = vadd.f32 %v10473_v4, %v10790_v43 }
 0x1ac   :  { %v10839_v5 = vadd.f32 %v1779_v31, %v1731_v15  ;;  %v1840_v37 = vpop.f32.mrf.mxu0  ;;  %v3539_v33 = vadd.f32 1.0, %v3538_v30  ;;  %v7208_v31 = vor.u32 %v8392_v19, %v7207_v24  ;;  %v3541_v53 = vand.u32 2147483647, %v10814_v63  ;;  %v14085_v30 = vld [vmem:[#allocation36_spill] sm:$0xff]  ;;  %v14086_v24 = vld [vmem:[#allocation11_spill] sm:$0xff] }
 0x1ad   :  { %v1841_v55 = vadd.f32 %v1840_v37, %v1792_v14  ;;  %v14082_v37 = vld [vmem:[#allocation35_spill] sm:$0xff]  ;;  %v7336_v38 = vor.u32 %v8424_v0, %v7335_v18  ;;  %v3507_v10 = vsel %vm10864_vm10, %v3504_v9, %v3501_v50  ;;  %2371 = vmatpush.bf16.msra.mxu3 %v7592_v49 }
 0x1ae   :  { %v10841_v29 = vpop.f32.mrf.mxu3  ;;  %v1889_v15 = vpop.f32.mrf.mxu1  ;;  %v2935_v25 = vmin.f32 %v10839_v5, 20.0  ;;  %2224 = vmatpush.bf16.msra.mxu0 %v7208_v31  ;;  %v7447_v59 = vld [vmem:[%s13868_s1 + $0x4a8] sm:$0xf]  ;;  %vm3542_vm13 = vcmp.lt.f32.partialorder %v3541_v53, 0.0004427343  ;;  %v3691_v49 = vsel %vm2859_vm11, %v10749_v39, %v3507_v10  ;;  %vm2871_vm2 = vcmp.gt.f32.partialorder %v10839_v5, 20.0 }
 0x1af   :  { %v1890_v14 = vadd.f32 %v1889_v15, %v1841_v55  ;;  %2035 = vmatmul.bf16.vlgmr.msrb.gmra.mxu0 %v14082_v37  ;;  %v3540_v55 = vmul.f32 %v10814_v63, %v3539_v33  ;;  %2273 = vmatpush.bf16.msra.mxu1 %v7336_v38  ;;  %v7191_v9 = vld [vmem:[%s13868_s1 + $0x2a8] sm:$0xf]  ;;  %v7448_v50 = vor.u32 %v8452_v62, %v7447_v59  ;;  %v8484_v31 = vld [vmem:[%s13868_s1 + $0x5b4] sm:$0xf0] }
 0x1b0   :  { %v10862_v6 = vpop.eup %8719  ;;  %v3059_v61 = vmul.f32 1.442695, %v2935_v25  ;;  %2133 = vmatmul.bf16.vlgmr.msrb.gmra.mxu2 %v14086_v24  ;;  %v7575_v25 = vld [vmem:[%s13868_s1 + $0x5a8] sm:$0xf] }
 0x1b1   :  { %7637 = vmatmul.msk.bf16.vlgmr.msrb.gmra.mxu1 %vm1414_vm0, %v14085_v30  ;;  %v8722_v19 = vpop.eup %8721  ;;  %v3571_v56 = vadd.f32 1.0, %v10862_v6  ;;  %2323 = vmatpush.bf16.msra.mxu2 %v7448_v50  ;;  %v7576_v39 = vor.u32 %v8484_v31, %v7575_v25  ;;  %v7319_v59 = vld [vmem:[%s13868_s1 + $0x3a8] sm:$0xf] }
 0x1b2   :  { %v3537_v58 = vmul.f32 0.6931472, %v8722_v19  ;;  %8723 = vpow2.f32 %v3059_v61  ;;  %v8388_v61 = vld [vmem:[%s13868_s1 + $0x2b4] sm:$0xf0]  ;;  %v14088_v50 = vld [vmem:[#allocation55_spill] sm:$0xff] }
 0x1b3   :  { %2182 = vmatmul.bf16.vlgmr.msrb.gmra.mxu3 %v9553_v51  ;;  %v1938_v4 = vpop.f32.mrf.mxu2  ;;  %v7192_v33 = vor.u32 %v8388_v61, %v7191_v9  ;;  %8725 = vlog2.f32 %v3571_v56  ;;  %v1797_v61 = vadd.f32 %v14088_v50, %v10790_v43 }
 0x1b4   :  { %v3543_v63 = vsel %vm3542_vm13, %v3540_v55, %v3537_v58  ;;  %v1939_v15 = vadd.f32 %v1938_v4, %v1890_v14  ;;  %v1842_v0 = vpop.f32.mrf.mxu0  ;;  %v8420_v58 = vld [vmem:[%s13868_s1 + $0x3b4] sm:$0xf0]  ;;  %2372 = vmatpush.bf16.msra.mxu3 %v7576_v39 }
 0x1b5   :  { %v3695_v53 = vsel %vm2863_vm12, %v10759_v35, %v3543_v63  ;;  %v1843_v38 = vadd.f32 %v1842_v0, %v1794_v57  ;;  %2225 = vmatpush.bf16.msra.mxu0 %v7192_v33  ;;  %v7320_v35 = vor.u32 %v8420_v58, %v7319_v59  ;;  %v3574_v57 = vmul.f32 -0.5, %v10862_v6  ;;  %v14089_v58 = vld [vmem:[#allocation38_spill] sm:$0xff] }
 0x1b6   :  { %v1987_v18 = vpop.f32.mrf.mxu3  ;;  %v1891_v19 = vpop.f32.mrf.mxu1  ;;  %v10900_v10 = vpack.c.bf16 %v3695_v53, %v3691_v49 }
 0x1b7   :  { %v10902_v14 = vadd.f32 %v1987_v18, %v1939_v15  ;;  %v1892_v55 = vadd.f32 %v1891_v19, %v1843_v38  ;;  %2274 = vmatpush.bf16.msra.mxu1 %v7320_v35  ;;  %v3575_v63 = vadd.f32 1.0, %v3574_v57  ;;  %v3577_v15 = vand.u32 2147483647, %v10862_v6  ;;  %v14092_v57 = vld [vmem:[#allocation39_spill] sm:$0xff] }
 0x1b8   :  { %14087 = vst [vmem:[#allocation36_spill] sm:$0xff] %v10900_v10  ;;  %v8724_v56 = vpop.eup %8723 }
 0x1b9   :  { %v3607_v62 = vadd.f32 1.0, %v8724_v56  ;;  %v3610_v9 = vmul.f32 -0.5, %v8724_v56  ;;  %v8726_v4 = vpop.eup %8725  ;;  %v3613_v39 = vand.u32 2147483647, %v8724_v56  ;;  %v3576_v35 = vmul.f32 %v10862_v6, %v3575_v63  ;;  %v8448_v6 = vld [vmem:[%s13868_s1 + $0x494] sm:$0xf0] }
 0x1ba   :  { %v3573_v53 = vmul.f32 0.6931472, %v8726_v4  ;;  %vm10918_vm14 = vcmp.lt.f32.partialorder %v3577_v15, 0.0004427343  ;;  %v14094_v4 = vld [vmem:[#allocation15_spill] sm:$0xff] }
 0x1bb   :  { %8727 = vlog2.f32 %v3607_v62  ;;  %v1940_v49 = vpop.f32.mrf.mxu2  ;;  %v3611_v38 = vadd.f32 1.0, %v3610_v9  ;;  %v7431_v9 = vld [vmem:[%s13868_s1 + $0x488] sm:$0xf]  ;;  %vm3614_vm1 = vcmp.lt.f32.partialorder %v3613_v39, 0.0004427343 }
 0x1bc   :  { %v1941_v18 = vadd.f32 %v1940_v49, %v1892_v55  ;;  %v1845_v33 = vpop.f32.mrf.mxu0  ;;  %v14093_v55 = vld [vmem:[#allocation14_spill] sm:$0xff]  ;;  %v3579_v49 = vsel %vm10918_vm14, %v3576_v35, %v3573_v53 }
 0x1bd   :  { %v1846_v25 = vadd.f32 %v1845_v33, %v1797_v61  ;;  %v7175_v61 = vld [vmem:[%s13868_s1 + $0x288] sm:$0xf]  ;;  %v3612_v15 = vmul.f32 %v8724_v56, %v3611_v38  ;;  %v8480_v56 = vld [vmem:[%s13868_s1 + $0x594] sm:$0xf0] }
 0x1be   :  { %v1989_v0 = vpop.f32.mrf.mxu3  ;;  %v1894_v31 = vpop.f32.mrf.mxu1  ;;  %v7559_v33 = vld [vmem:[%s13868_s1 + $0x588] sm:$0xf] }
 0x1bf   :  { %v10914_v19 = vadd.f32 %v1989_v0, %v1941_v18  ;;  %v1895_v59 = vadd.f32 %v1894_v31, %v1846_v25  ;;  %2040 = vmatmul.bf16.gmra.mxu0 %v14089_v58  ;;  %v7432_v18 = vor.u32 %v8448_v6, %v7431_v9  ;;  %v8384_v0 = vld [vmem:[%s13868_s1 + $0x294] sm:$0xf0]  ;;  %v1799_v25 = vadd.f32 %v10507_v32, %v10790_v43 }
 0x1c0   :  { %2138 = vmatmul.bf16.gmra.mxu2 %v14093_v55  ;;  %v7176_v62 = vor.u32 %v8384_v0, %v7175_v61  ;;  %v7560_v9 = vor.u32 %v8480_v56, %v7559_v33  ;;  %v3699_v6 = vsel %vm2867_vm15, %v10780_v34, %v3579_v49 }
 0x1c1   :  { %7638 = vmatmul.msk.bf16.gmra.mxu1 %vm1414_vm0, %v14092_v57  ;;  %v8728_v50 = vpop.eup %8727  ;;  %2324 = vmatpush.bf16.msra.mxu2 %v7432_v18 }
 0x1c2   :  { %v3609_v63 = vmul.f32 0.6931472, %v8728_v50  ;;  %2226 = vmatpush.bf16.msra.mxu0 %v7176_v62  ;;  %2373 = vmatpush.bf16.msra.mxu3 %v7560_v9  ;;  %v7159_v9 = vld [vmem:[%s13868_s1 + $0x268] sm:$0xf] }
 0x1c3   :  { %2187 = vmatmul.bf16.gmra.mxu3 %v14094_v4  ;;  %v1943_v31 = vpop.f32.mrf.mxu2 }
 0x1c4   :  { %v3615_v53 = vsel %vm3614_vm1, %v3612_v15, %v3609_v63  ;;  %v1944_v38 = vadd.f32 %v1943_v31, %v1895_v59  ;;  %v1847_v50 = vpop.f32.mrf.mxu0  ;;  %v7303_v59 = vld [vmem:[%s13868_s1 + $0x388] sm:$0xf]  ;;  %v8416_v63 = vld [vmem:[%s13868_s1 + $0x394] sm:$0xf0] }
 0x1c5   :  { %v3703_v32 = vsel %vm2871_vm2, %v10839_v5, %v3615_v53  ;;  %v1848_v10 = vadd.f32 %v1847_v50, %v1799_v25  ;;  %v7304_v34 = vor.u32 %v8416_v63, %v7303_v59  ;;  %v1802_v5 = vadd.f32 %v10528_v13, %v10790_v43  ;;  %v7415_v13 = vld [vmem:[%s13868_s1 + $0x468] sm:$0xf]  ;;  %v8444_v50 = vld [vmem:[%s13868_s1 + $0x474] sm:$0xf0] }
 0x1c6   :  { %v1992_v35 = vpop.f32.mrf.mxu3  ;;  %v1896_v39 = vpop.f32.mrf.mxu1  ;;  %v10952_v61 = vpack.c.bf16 %v3703_v32, %v3699_v6  ;;  %v7416_v6 = vor.u32 %v8444_v50, %v7415_v13  ;;  %v8380_v32 = vld [vmem:[%s13868_s1 + $0x274] sm:$0xf0]  ;;  %v1804_v63 = vadd.f32 %v10557_v45, %v10790_v43  ;;  %v7287_v13 = vld [vmem:[%s13868_s1 + $0x368] sm:$0xf] }
 0x1c7   :  { %v10954_v0 = vadd.f32 %v1992_v35, %v1944_v38  ;;  %v1897_v15 = vadd.f32 %v1896_v39, %v1848_v10  ;;  %2275 = vmatpush.bf16.msra.mxu1 %v7304_v34  ;;  %v14096_v38 = vld [vmem:[#allocation40_spill] sm:$0xff]  ;;  %v14097_v35 = vld [vmem:[#allocation41_spill] sm:$0xff]  ;;  %v14098_v10 = vld [vmem:[#allocation18_spill] sm:$0xff]  ;;  %v7160_v34 = vor.u32 %v8380_v32, %v7159_v9 }
 0x1c8   :  { %14095 = vst [vmem:[#allocation11_spill] sm:$0xff] %v10952_v61  ;;  %v7543_v39 = vld [vmem:[%s13868_s1 + $0x568] sm:$0xf]  ;;  %v8476_v59 = vld [vmem:[%s13868_s1 + $0x574] sm:$0xf0]  ;;  %2325 = vmatpush.bf16.msra.mxu2 %v7416_v6 }
 0x1c9   :  { %2227 = vmatpush.bf16.msra.mxu0 %v7160_v34  ;;  %v8412_v45 = vld [vmem:[%s13868_s1 + $0x374] sm:$0xf0] }
 0x1ca   :  { %v7288_v9 = vor.u32 %v8412_v45, %v7287_v13  ;;  %v8376_v45 = vld [vmem:[%s13868_s1 + $0x254] sm:$0xf0] }
 0x1cb   :  { %v1945_v49 = vpop.f32.mrf.mxu2 }
 0x1cc   :  { %v1946_v18 = vadd.f32 %v1945_v49, %v1897_v15  ;;  %v1850_v25 = vpop.f32.mrf.mxu0  ;;  %2276 = vmatpush.bf16.msra.mxu1 %v7288_v9  ;;  %v8472_v9 = vld [vmem:[%s13868_s1 + $0x554] sm:$0xf0] }
 0x1cd   :  { %v1851_v31 = vadd.f32 %v1850_v25, %v1802_v5  ;;  %v7544_v5 = vor.u32 %v8476_v59, %v7543_v39 }
 0x1ce   :  { %v1994_v33 = vpop.f32.mrf.mxu3  ;;  %v1899_v62 = vpop.f32.mrf.mxu1 }
 0x1cf   :  { %v10964_v56 = vadd.f32 %v1994_v33, %v1946_v18  ;;  %v1900_v53 = vadd.f32 %v1899_v62, %v1851_v31  ;;  %2045 = vmatmul.bf16.gmra.mxu0 %v14096_v38  ;;  %2374 = vmatpush.bf16.msra.mxu3 %v7544_v5 }
 0x1d0   :  { %2143 = vmatmul.bf16.gmra.mxu2 %v14098_v10 }
 0x1d1   :  { %7639 = vmatmul.msk.bf16.gmra.mxu1 %vm1414_vm0, %v14097_v35 }
 0x1d3   :  { %2192 = vmatmul.bf16.gmra.mxu3 %v9679_v40  ;;  %v1948_v15 = vpop.f32.mrf.mxu2 }
 0x1d4   :  { %v1949_v49 = vadd.f32 %v1948_v15, %v1900_v53  ;;  %v1852_v33 = vpop.f32.mrf.mxu0  ;;  %v1807_v53 = vadd.f32 %v10580_v46, %v10790_v43  ;;  %v7399_v46 = vld [vmem:[%s13868_s1 + $0x448] sm:$0xf] }
 0x1d5   :  { %v1853_v25 = vadd.f32 %v1852_v33, %v1804_v63  ;;  %v14101_v33 = vld [vmem:[#allocation20_spill] sm:$0xff] }
 0x1d6   :  { %v1997_v18 = vpop.f32.mrf.mxu3  ;;  %v1901_v31 = vpop.f32.mrf.mxu1 }
 0x1d7   :  { %v10991_v62 = vadd.f32 %v1997_v18, %v1949_v49  ;;  %v1902_v50 = vadd.f32 %v1901_v31, %v1853_v25  ;;  %v14099_v49 = vld [vmem:[#allocation42_spill] sm:$0xff]  ;;  %v14100_v18 = vld [vmem:[#allocation43_spill] sm:$0xff] }
 0x1d8   :  { %v8440_v25 = vld [vmem:[%s13868_s1 + $0x454] sm:$0xf0]  ;;  %v7143_v31 = vld [vmem:[%s13868_s1 + $0x248] sm:$0xf] }
 0x1d9   :  { %v7400_v13 = vor.u32 %v8440_v25, %v7399_v46 }
 0x1db   :  { %v1950_v6 = vpop.f32.mrf.mxu2  ;;  %2326 = vmatpush.bf16.msra.mxu2 %v7400_v13 }
 0x1dc   :  { %v1951_v32 = vadd.f32 %v1950_v6, %v1902_v50  ;;  %v1855_v59 = vpop.f32.mrf.mxu0  ;;  %v7527_v50 = vld [vmem:[%s13868_s1 + $0x548] sm:$0xf] }
 0x1dd   :  { %v1856_v63 = vadd.f32 %v1855_v59, %v1807_v53  ;;  %v1809_v53 = vadd.f32 %v10609_v20, %v10790_v43  ;;  %v8408_v20 = vld [vmem:[%s13868_s1 + $0x354] sm:$0xf0] }
 0x1de   :  { %v1999_v39 = vpop.f32.mrf.mxu3  ;;  %v1904_v15 = vpop.f32.mrf.mxu1 }
 0x1df   :  { %v11001_v34 = vadd.f32 %v1999_v39, %v1951_v32  ;;  %v1905_v5 = vadd.f32 %v1904_v15, %v1856_v63  ;;  %2050 = vmatmul.bf16.gmra.mxu0 %v14099_v49  ;;  %v7144_v32 = vor.u32 %v8376_v45, %v7143_v31  ;;  %v7528_v39 = vor.u32 %v8472_v9, %v7527_v50 }
 0x1e0   :  { %2148 = vmatmul.bf16.gmra.mxu2 %v14101_v33 }
 0x1e1   :  { %7640 = vmatmul.msk.bf16.gmra.mxu1 %vm1414_vm0, %v14100_v18  ;;  %2228 = vmatpush.bf16.msra.mxu0 %v7144_v32 }
 0x1e2   :  { %2375 = vmatpush.bf16.msra.mxu3 %v7528_v39 }
 0x1e3   :  { %2197 = vmatmul.bf16.gmra.mxu3 %v9733_v1  ;;  %v1953_v6 = vpop.f32.mrf.mxu2  ;;  %v7271_v1 = vld [vmem:[%s13868_s1 + $0x348] sm:$0xf] }
 0x1e4   :  { %v1954_v59 = vadd.f32 %v1953_v6, %v1905_v5  ;;  %v1857_v15 = vpop.f32.mrf.mxu0  ;;  %v7272_v45 = vor.u32 %v8408_v20, %v7271_v1  ;;  %v1812_v5 = vadd.f32 %v10632_v52, %v10790_v43  ;;  %v7383_v1 = vld [vmem:[%s13868_s1 + $0x428] sm:$0xf]  ;;  %v8436_v52 = vld [vmem:[%s13868_s1 + $0x434] sm:$0xf0] }
 0x1e5   :  { %v1858_v46 = vadd.f32 %v1857_v15, %v1809_v53  ;;  %v14103_v15 = vld [vmem:[#allocation46_spill] sm:$0xff]  ;;  %v7384_v20 = vor.u32 %v8436_v52, %v7383_v1 }
 0x1e6   :  { %v2002_v63 = vpop.f32.mrf.mxu3  ;;  %v1906_v25 = vpop.f32.mrf.mxu1  ;;  %2277 = vmatpush.bf16.msra.mxu1 %v7272_v45  ;;  %v7511_v45 = vld [vmem:[%s13868_s1 + $0x528] sm:$0xf] }
 0x1e7   :  { %v11028_v61 = vadd.f32 %v2002_v63, %v1954_v59  ;;  %v1907_v31 = vadd.f32 %v1906_v25, %v1858_v46  ;;  %v14102_v63 = vld [vmem:[#allocation45_spill] sm:$0xff]  ;;  %v14104_v46 = vld [vmem:[#allocation22_spill] sm:$0xff]  ;;  %v7127_v25 = vld [vmem:[%s13868_s1 + $0x228] sm:$0xf]  ;;  %2327 = vmatpush.bf16.msra.mxu2 %v7384_v20 }
 0x1eb   :  { %v1955_v13 = vpop.f32.mrf.mxu2 }
 0x1ec   :  { %v1956_v50 = vadd.f32 %v1955_v13, %v1907_v31  ;;  %v1860_v53 = vpop.f32.mrf.mxu0  ;;  %v8372_v31 = vld [vmem:[%s13868_s1 + $0x234] sm:$0xf0]  ;;  %v1814_v13 = vadd.f32 %v10661_v21, %v10790_v43 }
 0x1ed   :  { %v1861_v6 = vadd.f32 %v1860_v53, %v1812_v5  ;;  %v8468_v5 = vld [vmem:[%s13868_s1 + $0x534] sm:$0xf0] }
 0x1ee   :  { %v2004_v9 = vpop.f32.mrf.mxu3  ;;  %v1909_v32 = vpop.f32.mrf.mxu1  ;;  %v7512_v53 = vor.u32 %v8468_v5, %v7511_v45  ;;  %v8404_v21 = vld [vmem:[%s13868_s1 + $0x334] sm:$0xf0] }
 0x1ef   :  { %v11038_v39 = vadd.f32 %v2004_v9, %v1956_v50  ;;  %v1910_v59 = vadd.f32 %v1909_v32, %v1861_v6  ;;  %2055 = vmatmul.bf16.gmra.mxu0 %v14102_v63  ;;  %v7128_v9 = vor.u32 %v8372_v31, %v7127_v25 }
 0x1f0   :  { %2153 = vmatmul.bf16.gmra.mxu2 %v14104_v46  ;;  %2376 = vmatpush.bf16.msra.mxu3 %v7512_v53 }
 0x1f1   :  { %7641 = vmatmul.msk.bf16.gmra.mxu1 %vm1414_vm0, %v14103_v15  ;;  %2229 = vmatpush.bf16.msra.mxu0 %v7128_v9  ;;  %v7255_v15 = vld [vmem:[%s13868_s1 + $0x328] sm:$0xf] }
 0x1f2   :  { %v7256_v31 = vor.u32 %v8404_v21, %v7255_v15  ;;  %v8432_v15 = vld [vmem:[%s13868_s1 + $0x414] sm:$0xf0] }
 0x1f3   :  { %2202 = vmatmul.bf16.gmra.mxu3 %v9787_v26  ;;  %v1958_v50 = vpop.f32.mrf.mxu2 }
 0x1f4   :  { %v1959_v6 = vadd.f32 %v1958_v50, %v1910_v59  ;;  %v1862_v1 = vpop.f32.mrf.mxu0  ;;  %2278 = vmatpush.bf16.msra.mxu1 %v7256_v31  ;;  %v1817_v59 = vadd.f32 %v10684_v23, %v10790_v43  ;;  %v7367_v23 = vld [vmem:[%s13868_s1 + $0x408] sm:$0xf] }
 0x1f5   :  { %v1863_v52 = vadd.f32 %v1862_v1, %v1814_v13  ;;  %v14106_v1 = vld [vmem:[#allocation49_spill] sm:$0xff]  ;;  %v7368_v21 = vor.u32 %v8432_v15, %v7367_v23  ;;  %v7495_v31 = vld [vmem:[%s13868_s1 + $0x508] sm:$0xf] }
 0x1f6   :  { %v2007_v32 = vpop.f32.mrf.mxu3  ;;  %v1911_v26 = vpop.f32.mrf.mxu1 }
 0x1f7   :  { %v11065_v46 = vadd.f32 %v2007_v32, %v1959_v6  ;;  %v1912_v25 = vadd.f32 %v1911_v26, %v1863_v52  ;;  %v14105_v32 = vld [vmem:[#allocation48_spill] sm:$0xff]  ;;  %2328 = vmatpush.bf16.msra.mxu2 %v7368_v21 }
 0x1f8   :  { %v14107_v26 = vld [vmem:[#allocation24_spill] sm:$0xff] }
 0x1f9   :  { %v7111_v52 = vld [vmem:[%s13868_s1 + $0x208] sm:$0xf] }
 0x1fb   :  { %v1960_v20 = vpop.f32.mrf.mxu2 }
 0x1fc   :  { %v1961_v45 = vadd.f32 %v1960_v20, %v1912_v25  ;;  %v1865_v13 = vpop.f32.mrf.mxu0  ;;  %v8368_v25 = vld [vmem:[%s13868_s1 + $0x214] sm:$0xf0]  ;;  %v1819_v20 = vadd.f32 %v10717_v47, %v10790_v43 }
 0x1fd   :  { %v1866_v50 = vadd.f32 %v1865_v13, %v1817_v59  ;;  %v8464_v59 = vld [vmem:[%s13868_s1 + $0x514] sm:$0xf0] }
 0x1fe   :  { %v2009_v5 = vpop.f32.mrf.mxu3  ;;  %v1914_v9 = vpop.f32.mrf.mxu1  ;;  %v7496_v13 = vor.u32 %v8464_v59, %v7495_v31  ;;  %v8400_v47 = vld [vmem:[%s13868_s1 + $0x314] sm:$0xf0] }
 0x1ff   :  { %v11075_v53 = vadd.f32 %v2009_v5, %v1961_v45  ;;  %v1915_v6 = vadd.f32 %v1914_v9, %v1866_v50  ;;  %2060 = vmatmul.bf16.gmra.mxu0 %v14105_v32  ;;  %v7112_v5 = vor.u32 %v8368_v25, %v7111_v52 }
 0x200   :  { %2158 = vmatmul.bf16.gmra.mxu2 %v14107_v26  ;;  %2377 = vmatpush.bf16.msra.mxu3 %v7496_v13 }
 0x201   :  { %7642 = vmatmul.msk.bf16.gmra.mxu1 %vm1414_vm0, %v14106_v1  ;;  %2230 = vmatpush.bf16.msra.mxu0 %v7112_v5  ;;  %v7239_v1 = vld [vmem:[%s13868_s1 + $0x308] sm:$0xf] }
 0x202   :  { %v7240_v25 = vor.u32 %v8400_v47, %v7239_v1 }
 0x203   :  { %2207 = vmatmul.bf16.gmra.mxu3 %v9841_v54  ;;  %v1963_v45 = vpop.f32.mrf.mxu2 }
 0x204   :  { %v1964_v50 = vadd.f32 %v1963_v45, %v1915_v6  ;;  %v1867_v23 = vpop.f32.mrf.mxu0  ;;  %2279 = vmatpush.bf16.msra.mxu1 %v7240_v25  ;;  %v1822_v6 = vadd.f32 %v10751_v36, %v10790_v43  ;;  %v1824_v36 = vadd.f32 %v10761_v12, %v10790_v43 }
 0x205   :  { %v1868_v15 = vadd.f32 %v1867_v23, %v1819_v20  ;;  %v14109_v23 = vld [vmem:[#allocation51_spill] sm:$0xff] }
 0x206   :  { %v2012_v9 = vpop.f32.mrf.mxu3  ;;  %v1916_v54 = vpop.f32.mrf.mxu1 }
 0x207   :  { %v11102_v26 = vadd.f32 %v2012_v9, %v1964_v50  ;;  %v1917_v52 = vadd.f32 %v1916_v54, %v1868_v15  ;;  %v14108_v9 = vld [vmem:[#allocation50_spill] sm:$0xff]  ;;  %v14110_v54 = vld [vmem:[#allocation28_spill] sm:$0xff] }
 0x20b   :  { %v1965_v21 = vpop.f32.mrf.mxu2 }
 0x20c   :  { %v1966_v31 = vadd.f32 %v1965_v21, %v1917_v52  ;;  %v1870_v20 = vpop.f32.mrf.mxu0 }
 0x20d   :  { %v1871_v45 = vadd.f32 %v1870_v20, %v1822_v6 }
 0x20e   :  { %v2014_v59 = vpop.f32.mrf.mxu3  ;;  %v1919_v5 = vpop.f32.mrf.mxu1 }
 0x20f   :  { %v11112_v13 = vadd.f32 %v2014_v59, %v1966_v31  ;;  %v1920_v50 = vadd.f32 %v1919_v5, %v1871_v45  ;;  %2065 = vmatmul.bf16.gmra.mxu0 %v14108_v9  ;;  %v1827_v59 = vadd.f32 %v10782_v44, %v10790_v43  ;;  %v1829_v44 = vadd.f32 %v10841_v29, %v10790_v43  ;;  %v7623_v43 = vld [vmem:[%s13868_s1 + $0x608] sm:$0xf] }
 0x210   :  { %2163 = vmatmul.bf16.gmra.mxu2 %v14110_v54 }
 0x211   :  { %7643 = vmatmul.msk.bf16.gmra.mxu1 %vm1414_vm0, %v14109_v23 }
 0x213   :  { %2212 = vmatmul.bf16.gmra.mxu3 %v9895_v16  ;;  %v1968_v1 = vpop.f32.mrf.mxu2 }
 0x214   :  { %v1969_v15 = vadd.f32 %v1968_v1, %v1920_v50  ;;  %v1872_v52 = vpop.f32.mrf.mxu0  ;;  %v14111_v50 = vld [vmem:[#allocation53_spill] sm:$0xff]  ;;  %v14112_v1 = vld [vmem:[#allocation54_spill] sm:$0xff] }
 0x215   :  { %v1873_v25 = vadd.f32 %v1872_v52, %v1824_v36  ;;  %v14113_v36 = vld [vmem:[#allocation30_spill] sm:$0xff] }
 0x216   :  { %v2017_v47 = vpop.f32.mrf.mxu3  ;;  %v1921_v6 = vpop.f32.mrf.mxu1 }
 0x217   :  { %v11121_v21 = vadd.f32 %v2017_v47, %v1969_v15  ;;  %v1922_v31 = vadd.f32 %v1921_v6, %v1873_v25 }
 0x21b   :  { %v1970_v20 = vpop.f32.mrf.mxu2 }
 0x21c   :  { %v1971_v45 = vadd.f32 %v1970_v20, %v1922_v31  ;;  %v1875_v54 = vpop.f32.mrf.mxu0  ;;  %v8496_v20 = vld [vmem:[%s13868_s1 + $0x614] sm:$0xf0] }
 0x21d   :  { %v1876_v16 = vadd.f32 %v1875_v54, %v1827_v59  ;;  %v7097_v59 = vld [vmem:[%s13868_s1 + $0x1f8] sm:$0xf0] }
 0x21e   :  { %v2019_v5 = vpop.f32.mrf.mxu3  ;;  %v1924_v23 = vpop.f32.mrf.mxu1 }
 0x21f   :  { %v11125_v33 = vadd.f32 %v2019_v5, %v1971_v45  ;;  %v1925_v12 = vadd.f32 %v1924_v23, %v1876_v16  ;;  %2070 = vmatmul.bf16.gmra.mxu0 %v14111_v50  ;;  %v8362_v23 = vld [vmem:[%s13868_s1 + $0x1ec] sm:$0xf]  ;;  %v7225_v5 = vld [vmem:[%s13868_s1 + $0x2f8] sm:$0xf0] }
 0x220   :  { %2168 = vmatmul.bf16.gmra.mxu2 %v14113_v36  ;;  %v7100_v29 = vor.u32 %v8362_v23, %v7097_v59  ;;  %v8394_v45 = vld [vmem:[%s13868_s1 + $0x2ec] sm:$0xf]  ;;  %v14116_v36 = vld [vmem:[#allocation34_spill] sm:$0xff] }
 0x221   :  { %7644 = vmatmul.msk.bf16.gmra.mxu1 %vm1414_vm0, %v14112_v1 }
 0x222   :  { %2517 = vmatpush.bf16.msrb.mxu2 %v7100_v29 }
 0x223   :  { %2217 = vmatmul.bf16.gmra.mxu3 %v9955_v60  ;;  %v1973_v15 = vpop.f32.mrf.mxu2  ;;  %v14115_v60 = vld [vmem:[#allocation13_spill] sm:$0xff] }
 0x224   :  { %v1974_v47 = vadd.f32 %v1973_v15, %v1925_v12  ;;  %v1877_v54 = vpop.f32.mrf.mxu0  ;;  %v7624_v12 = vor.u32 %v8496_v20, %v7623_v43  ;;  %v8330_v15 = vld [vmem:[%s13868_s1 + $0xec] sm:$0xf] }
 0x225   :  { %v1878_v25 = vadd.f32 %v1877_v54, %v1829_v44  ;;  %v7228_v44 = vor.u32 %v8394_v45, %v7225_v5  ;;  %v14114_v5 = vld [vmem:[#allocation12_spill] sm:$0xff] }
 0x226   :  { %v2022_v52 = vpop.f32.mrf.mxu3  ;;  %v1926_v6 = vpop.f32.mrf.mxu1  ;;  %2426 = vmatpush.bf16.msrb.mxu0 %v7624_v12 }
 0x227   :  { %v11134_v31 = vadd.f32 %v2022_v52, %v1974_v47  ;;  %v1927_v16 = vadd.f32 %v1926_v6, %v1878_v25  ;;  %v6969_v47 = vld [vmem:[%s13868_s1 + $0xf8] sm:$0xf0]  ;;  %2566 = vmatpush.bf16.msrb.mxu3 %v7228_v44 }
 0x228   :  { %v6972_v54 = vor.u32 %v8330_v15, %v6969_v47 }
 0x22a   :  { %2468 = vmatpush.bf16.msrb.mxu1 %v6972_v54 }
 0x22b   :  { %v1975_v52 = vpop.f32.mrf.mxu2 }
 0x22c   :  { %v1976_v25 = vadd.f32 %v1975_v52, %v1927_v16  ;;  %v2036_v23 = vpop.f32.mrf.mxu0  ;;  %v11169_v16 = vperm.slane %v10787_v48, 2  ;;  %v8358_v48 = vld [vmem:[%s13868_s1 + $0x1cc] sm:$0xf] }
 0x22d   :  { %v2037_v59 = vadd.f32 %v2036_v23, %v10902_v14  ;;  %v7081_v23 = vld [vmem:[%s13868_s1 + $0x1d8] sm:$0xf0] }
 0x22e   :  { %v2024_v6 = vpop.f32.mrf.mxu3  ;;  %v2085_v43 = vpop.f32.mrf.mxu1 }
 0x22f   :  { %v11161_v20 = vadd.f32 %v2024_v6, %v1976_v25  ;;  %v11163_v45 = vadd.f32 %v2085_v43, %v2037_v59  ;;  %2231 = vmatmul.bf16.vlgmr.msra.gmra.mxu0 %v14114_v5  ;;  %v8390_v59 = vld [vmem:[%s13868_s1 + $0x2cc] sm:$0xf] }
 0x230   :  { %2329 = vmatmul.bf16.vlgmr.msra.gmra.mxu2 %v14116_v36 }
 0x231   :  { %2280 = vmatmul.bf16.vlgmr.msra.gmra.mxu1 %v14115_v60  ;;  %v2876_v29 = vmin.f32 %v11163_v45, 20.0  ;;  %vm2812_vm5 = vcmp.gt.f32.partialorder %v11163_v45, 20.0 }
 0x233   :  { %2378 = vmatmul.bf16.vlgmr.msra.gmra.mxu3 %v14082_v37  ;;  %v2941_v14 = vmul.f32 1.442695, %v2876_v29  ;;  %v2134_v12 = vpop.f32.mrf.mxu2  ;;  %v7209_v29 = vld [vmem:[%s13868_s1 + $0x2d8] sm:$0xf0] }
 0x234   :  { %v2135_v44 = vadd.f32 %v2134_v12, %v11169_v16  ;;  %v2038_v47 = vpop.f32.mrf.mxu0  ;;  %v7212_v12 = vor.u32 %v8390_v59, %v7209_v29 }
 0x235   :  { %8729 = vpow2.f32 %v2941_v14  ;;  %v2039_v52 = vadd.f32 %v2038_v47, %v10914_v19  ;;  %v7084_v19 = vor.u32 %v8358_v48, %v7081_v23  ;;  %v8326_v14 = vld [vmem:[%s13868_s1 + $0xcc] sm:$0xf] }
 0x236   :  { %v2183_v15 = vpop.f32.mrf.mxu3  ;;  %v2087_v54 = vpop.f32.mrf.mxu1  ;;  %2567 = vmatpush.bf16.msrb.mxu3 %v7212_v12 }
 0x237   :  { %v11175_v25 = vadd.f32 %v2183_v15, %v2135_v44  ;;  %v11177_v6 = vadd.f32 %v2087_v54, %v2039_v52  ;;  %v6953_v44 = vld [vmem:[%s13868_s1 + $0xd8] sm:$0xf0]  ;;  %2518 = vmatpush.bf16.msrb.mxu2 %v7084_v19  ;;  %v14118_v19 = vld [vmem:[#allocation17_spill] sm:$0xff] }
 0x238   :  { %v6956_v54 = vor.u32 %v8326_v14, %v6953_v44  ;;  %v14119_v14 = vld [vmem:[#allocation37_spill] sm:$0xff] }
 0x239   :  { %v2880_v43 = vmin.f32 %v11177_v6, 20.0  ;;  %vm2816_vm6 = vcmp.gt.f32.partialorder %v11177_v6, 20.0 }
 0x23a   :  { %2469 = vmatpush.bf16.msrb.mxu1 %v6956_v54 }
 0x23b   :  { %v8730_v15 = vpop.eup %8729  ;;  %v2949_v47 = vmul.f32 1.442695, %v2880_v43  ;;  %v2136_v52 = vpop.f32.mrf.mxu2  ;;  %v14117_v43 = vld [vmem:[#allocation16_spill] sm:$0xff] }
 0x23c   :  { %v3076_v37 = vadd.f32 1.0, %v8730_v15  ;;  %v2137_v48 = vadd.f32 %v2136_v52, %v11169_v16  ;;  %v2041_v36 = vpop.f32.mrf.mxu0  ;;  %v3079_v12 = vmul.f32 -0.5, %v8730_v15  ;;  %v3082_v40 = vand.u32 2147483647, %v8730_v15 }
 0x23d   :  { %8731 = vpow2.f32 %v2949_v47  ;;  %v2042_v60 = vadd.f32 %v2041_v36, %v10954_v0 }
 0x23e   :  { %v2185_v23 = vpop.f32.mrf.mxu3  ;;  %v2090_v1 = vpop.f32.mrf.mxu1  ;;  %8733 = vlog2.f32 %v3076_v37  ;;  %vm11236_vm3 = vcmp.lt.f32.partialorder %v3082_v40, 0.0004427343 }
 0x23f   :  { %v11200_v59 = vadd.f32 %v2185_v23, %v2137_v48  ;;  %v11202_v29 = vadd.f32 %v2090_v1, %v2042_v60  ;;  %2236 = vmatmul.bf16.gmra.mxu0 %v14117_v43 }
 0x240   :  { %2334 = vmatmul.bf16.gmra.mxu2 %v14119_v14  ;;  %v3080_v14 = vadd.f32 1.0, %v3079_v12 }
 0x241   :  { %2285 = vmatmul.bf16.gmra.mxu1 %v14118_v19  ;;  %v2884_v44 = vmin.f32 %v11202_v29, 20.0  ;;  %vm2820_vm9 = vcmp.gt.f32.partialorder %v11202_v29, 20.0 }
 0x243   :  { %2383 = vmatmul.bf16.gmra.mxu3 %v14089_v58  ;;  %v8732_v47 = vpop.eup %8731  ;;  %v2957_v0 = vmul.f32 1.442695, %v2884_v44  ;;  %v2139_v36 = vpop.f32.mrf.mxu2  ;;  %v8354_v44 = vld [vmem:[%s13868_s1 + $0x1ac] sm:$0xf] }
 0x244   :  { %v8734_v52 = vpop.eup %8733  ;;  %v3112_v37 = vadd.f32 1.0, %v8732_v47  ;;  %v2140_v54 = vadd.f32 %v2139_v36, %v11169_v16  ;;  %v2043_v1 = vpop.f32.mrf.mxu0  ;;  %v3115_v48 = vmul.f32 -0.5, %v8732_v47  ;;  %v7065_v36 = vld [vmem:[%s13868_s1 + $0x1b8] sm:$0xf0] }
 0x245   :  { %8735 = vpow2.f32 %v2957_v0  ;;  %v2044_v23 = vadd.f32 %v2043_v1, %v10964_v56  ;;  %v3078_v58 = vmul.f32 0.6931472, %v8734_v52  ;;  %v8386_v56 = vld [vmem:[%s13868_s1 + $0x2ac] sm:$0xf] }
 0x246   :  { %v2188_v60 = vpop.f32.mrf.mxu3  ;;  %v2092_v19 = vpop.f32.mrf.mxu1  ;;  %8737 = vlog2.f32 %v3112_v37  ;;  %v3116_v12 = vadd.f32 1.0, %v3115_v48  ;;  %v7068_v37 = vor.u32 %v8354_v44, %v7065_v36  ;;  %v8322_v52 = vld [vmem:[%s13868_s1 + $0xac] sm:$0xf] }
 0x247   :  { %v11211_v18 = vadd.f32 %v2188_v60, %v2140_v54  ;;  %v11213_v10 = vadd.f32 %v2092_v19, %v2044_v23  ;;  %v7193_v19 = vld [vmem:[%s13868_s1 + $0x2b8] sm:$0xf0]  ;;  %v3081_v54 = vmul.f32 %v8730_v15, %v3080_v14  ;;  %v3118_v60 = vand.u32 2147483647, %v8732_v47 }
 0x248   :  { %v7196_v1 = vor.u32 %v8386_v56, %v7193_v19  ;;  %v6937_v23 = vld [vmem:[%s13868_s1 + $0xb8] sm:$0xf0]  ;;  %2519 = vmatpush.bf16.msrb.mxu2 %v7068_v37  ;;  %v3117_v40 = vmul.f32 %v8732_v47, %v3116_v12 }
 0x249   :  { %14120 = vst [vmem:[#allocation55_spill] sm:$0xff] %v11211_v18  ;;  %v2888_v0 = vmin.f32 %v11213_v10, 20.0  ;;  %v6940_v43 = vor.u32 %v8322_v52, %v6937_v23  ;;  %v3084_v15 = vsel %vm11236_vm3, %v3081_v54, %v3078_v58  ;;  %vm3119_vm4 = vcmp.lt.f32.partialorder %v3118_v60, 0.0004427343 }
 0x24a   :  { %2568 = vmatpush.bf16.msrb.mxu3 %v7196_v1  ;;  %vm2824_vm10 = vcmp.gt.f32.partialorder %v11213_v10, 20.0 }
 0x24b   :  { %v11234_v35 = vpop.eup %8735  ;;  %v2965_v44 = vmul.f32 1.442695, %v2888_v0  ;;  %v2141_v36 = vpop.f32.mrf.mxu2  ;;  %2470 = vmatpush.bf16.msrb.mxu1 %v6940_v43 }
 0x24c   :  { %v8738_v4 = vpop.eup %8737  ;;  %v3148_v14 = vadd.f32 1.0, %v11234_v35  ;;  %v2142_v56 = vadd.f32 %v2141_v36, %v11169_v16  ;;  %v2046_v55 = vpop.f32.mrf.mxu0 }
 0x24d   :  { %v3114_v57 = vmul.f32 0.6931472, %v8738_v4  ;;  %8739 = vpow2.f32 %v2965_v44  ;;  %v2047_v18 = vadd.f32 %v2046_v55, %v10991_v62  ;;  %v3644_v4 = vsel %vm2812_vm5, %v11163_v45, %v3084_v15 }
 0x24e   :  { %v2190_v19 = vpop.f32.mrf.mxu3  ;;  %v2095_v0 = vpop.f32.mrf.mxu1  ;;  %8741 = vlog2.f32 %v3148_v14 }
 0x24f   :  { %v11245_v37 = vadd.f32 %v2190_v19, %v2142_v56  ;;  %v3120_v58 = vsel %vm3119_vm4, %v3117_v40, %v3114_v57  ;;  %v11249_v52 = vadd.f32 %v2095_v0, %v2047_v18  ;;  %2241 = vmatmul.bf16.gmra.mxu0 %v9681_v41  ;;  %v3151_v57 = vmul.f32 -0.5, %v11234_v35  ;;  %v8350_v40 = vld [vmem:[%s13868_s1 + $0x18c] sm:$0xf]  ;;  %v7049_v0 = vld [vmem:[%s13868_s1 + $0x198] sm:$0xf0] }
 0x250   :  { %v3648_v47 = vsel %vm2816_vm6, %v11177_v6, %v3120_v58  ;;  %2339 = vmatmul.bf16.gmra.mxu2 %v10128_v11  ;;  %v3154_v56 = vand.u32 2147483647, %v11234_v35 }
 0x251   :  { %2290 = vmatmul.bf16.gmra.mxu1 %v9683_v42  ;;  %v11256_v55 = vpack.c.bf16 %v3648_v47, %v3644_v4  ;;  %v2892_v62 = vmin.f32 %v11249_v52, 20.0  ;;  %v3152_v36 = vadd.f32 1.0, %v3151_v57  ;;  %v7052_v47 = vor.u32 %v8350_v40, %v7049_v0  ;;  %v8318_v57 = vld [vmem:[%s13868_s1 + $0x8c] sm:$0xf] }
 0x252   :  { %vm11290_vm7 = vcmp.lt.f32.partialorder %v3154_v56, 0.0004427343  ;;  %vm2828_vm13 = vcmp.gt.f32.partialorder %v11249_v52, 20.0 }
 0x253   :  { %14123 = vst [vmem:[#allocation40_spill] sm:$0xff] %v11256_v55  ;;  %2388 = vmatmul.bf16.gmra.mxu3 %v14096_v38  ;;  %v8740_v18 = vpop.eup %8739  ;;  %v2973_v43 = vmul.f32 1.442695, %v2892_v62  ;;  %v2144_v12 = vpop.f32.mrf.mxu2  ;;  %v7177_v62 = vld [vmem:[%s13868_s1 + $0x298] sm:$0xf0]  ;;  %2520 = vmatpush.bf16.msrb.mxu2 %v7052_v47 }
 0x254   :  { %v8742_v54 = vpop.eup %8741  ;;  %v3184_v60 = vadd.f32 1.0, %v8740_v18  ;;  %v2145_v45 = vadd.f32 %v2144_v12, %v11169_v16  ;;  %v2048_v1 = vpop.f32.mrf.mxu0  ;;  %v3187_v23 = vmul.f32 -0.5, %v8740_v18  ;;  %v3190_v12 = vand.u32 2147483647, %v8740_v18 }
 0x255   :  { %8743 = vpow2.f32 %v2973_v43  ;;  %v2049_v48 = vadd.f32 %v2048_v1, %v11001_v34  ;;  %v3150_v14 = vmul.f32 0.6931472, %v8742_v54  ;;  %v8382_v34 = vld [vmem:[%s13868_s1 + $0x28c] sm:$0xf]  ;;  %v3153_v43 = vmul.f32 %v11234_v35, %v3152_v36 }
 0x256   :  { %v2193_v6 = vpop.f32.mrf.mxu3  ;;  %v2097_v44 = vpop.f32.mrf.mxu1  ;;  %8745 = vlog2.f32 %v3184_v60  ;;  %v3188_v58 = vadd.f32 1.0, %v3187_v23  ;;  %v7180_v54 = vor.u32 %v8382_v34, %v7177_v62  ;;  %v6921_v60 = vld [vmem:[%s13868_s1 + $0x98] sm:$0xf0]  ;;  %vm3191_vm8 = vcmp.lt.f32.partialorder %v3190_v12, 0.0004427343 }
 0x257   :  { %v11263_v15 = vadd.f32 %v2193_v6, %v2145_v45  ;;  %v11266_v19 = vadd.f32 %v2097_v44, %v2049_v48  ;;  %v6924_v48 = vor.u32 %v8318_v57, %v6921_v60  ;;  %v3156_v35 = vsel %vm11290_vm7, %v3153_v43, %v3150_v14 }
 0x258   :  { %2569 = vmatpush.bf16.msrb.mxu3 %v7180_v54  ;;  %v3189_v56 = vmul.f32 %v8740_v18, %v3188_v58  ;;  %v3652_v18 = vsel %vm2820_vm9, %v11202_v29, %v3156_v35 }
 0x259   :  { %v2896_v4 = vmin.f32 %v11266_v19, 20.0  ;;  %2471 = vmatpush.bf16.msrb.mxu1 %v6924_v48  ;;  %vm2832_vm14 = vcmp.gt.f32.partialorder %v11266_v19, 20.0 }
 0x25b   :  { %v11288_v45 = vpop.eup %8743  ;;  %v2981_v1 = vmul.f32 1.442695, %v2896_v4  ;;  %v2146_v23 = vpop.f32.mrf.mxu2 }
 0x25c   :  { %v8746_v44 = vpop.eup %8745  ;;  %v3220_v36 = vadd.f32 1.0, %v11288_v45  ;;  %v2147_v40 = vadd.f32 %v2146_v23, %v11169_v16  ;;  %v2051_v34 = vpop.f32.mrf.mxu0  ;;  %v3223_v12 = vmul.f32 -0.5, %v11288_v45 }
 0x25d   :  { %v3186_v62 = vmul.f32 0.6931472, %v8746_v44  ;;  %8747 = vpow2.f32 %v2981_v1  ;;  %v2052_v55 = vadd.f32 %v2051_v34, %v11028_v61  ;;  %v3226_v34 = vand.u32 2147483647, %v11288_v45 }
 0x25e   :  { %v2195_v0 = vpop.f32.mrf.mxu3  ;;  %v2100_v4 = vpop.f32.mrf.mxu1  ;;  %8749 = vlog2.f32 %v3220_v36  ;;  %v3224_v36 = vadd.f32 1.0, %v3223_v12  ;;  %v8314_v12 = vld [vmem:[%s13868_s1 + $0x6c] sm:$0xf] }
 0x25f   :  { %v11299_v47 = vadd.f32 %v2195_v0, %v2147_v40  ;;  %v3192_v14 = vsel %vm3191_vm8, %v3189_v56, %v3186_v62  ;;  %v11303_v57 = vadd.f32 %v2100_v4, %v2052_v55  ;;  %2246 = vmatmul.bf16.gmra.mxu0 %v9735_v2  ;;  %v8346_v56 = vld [vmem:[%s13868_s1 + $0x16c] sm:$0xf]  ;;  %v7033_v4 = vld [vmem:[%s13868_s1 + $0x178] sm:$0xf0]  ;;  %vm11344_vm11 = vcmp.lt.f32.partialorder %v3226_v34, 0.0004427343 }
 0x260   :  { %v3656_v58 = vsel %vm2824_vm10, %v11213_v10, %v3192_v14  ;;  %2344 = vmatmul.bf16.gmra.mxu2 %v10187_v8 }
 0x261   :  { %2295 = vmatmul.bf16.gmra.mxu1 %v9737_v3  ;;  %v11310_v61 = vpack.c.bf16 %v3656_v58, %v3652_v18  ;;  %v2900_v43 = vmin.f32 %v11303_v57, 20.0  ;;  %v7036_v58 = vor.u32 %v8346_v56, %v7033_v4  ;;  %vm2836_vm2 = vcmp.gt.f32.partialorder %v11303_v57, 20.0 }
 0x263   :  { %14126 = vst [vmem:[#allocation42_spill] sm:$0xff] %v11310_v61  ;;  %2393 = vmatmul.bf16.gmra.mxu3 %v14099_v49  ;;  %v8748_v55 = vpop.eup %8747  ;;  %v2989_v54 = vmul.f32 1.442695, %v2900_v43  ;;  %v2149_v60 = vpop.f32.mrf.mxu2  ;;  %v7161_v43 = vld [vmem:[%s13868_s1 + $0x278] sm:$0xf0]  ;;  %2521 = vmatpush.bf16.msrb.mxu2 %v7036_v58 }
 0x264   :  { %v8750_v6 = vpop.eup %8749  ;;  %v3256_v1 = vadd.f32 1.0, %v8748_v55  ;;  %v2150_v29 = vadd.f32 %v2149_v60, %v11169_v16  ;;  %v2053_v23 = vpop.f32.mrf.mxu0  ;;  %v3259_v48 = vmul.f32 -0.5, %v8748_v55  ;;  %v3262_v60 = vand.u32 2147483647, %v8748_v55 }
 0x265   :  { %8751 = vpow2.f32 %v2989_v54  ;;  %v2054_v44 = vadd.f32 %v2053_v23, %v11038_v39  ;;  %v3222_v0 = vmul.f32 0.6931472, %v8750_v6  ;;  %v8378_v39 = vld [vmem:[%s13868_s1 + $0x26c] sm:$0xf]  ;;  %v3225_v54 = vmul.f32 %v11288_v45, %v3224_v36 }
 0x266   :  { %v2198_v10 = vpop.f32.mrf.mxu3  ;;  %v2102_v35 = vpop.f32.mrf.mxu1  ;;  %8753 = vlog2.f32 %v3256_v1  ;;  %v3260_v14 = vadd.f32 1.0, %v3259_v48  ;;  %v7164_v6 = vor.u32 %v8378_v39, %v7161_v43  ;;  %v6905_v1 = vld [vmem:[%s13868_s1 + $0x78] sm:$0xf0]  ;;  %vm3263_vm12 = vcmp.lt.f32.partialorder %v3262_v60, 0.0004427343 }
 0x267   :  { %v11317_v40 = vadd.f32 %v2198_v10, %v2150_v29  ;;  %v11320_v62 = vadd.f32 %v2102_v35, %v2054_v44  ;;  %v6908_v44 = vor.u32 %v8314_v12, %v6905_v1  ;;  %v3228_v45 = vsel %vm11344_vm11, %v3225_v54, %v3222_v0 }
 0x268   :  { %2570 = vmatpush.bf16.msrb.mxu3 %v7164_v6  ;;  %v3261_v34 = vmul.f32 %v8748_v55, %v3260_v14  ;;  %v3660_v55 = vsel %vm2828_vm13, %v11249_v52, %v3228_v45 }
 0x269   :  { %v2904_v18 = vmin.f32 %v11320_v62, 20.0  ;;  %2472 = vmatpush.bf16.msrb.mxu1 %v6908_v44  ;;  %vm2840_vm3 = vcmp.gt.f32.partialorder %v11320_v62, 20.0 }
 0x26b   :  { %v11342_v29 = vpop.eup %8751  ;;  %v2997_v23 = vmul.f32 1.442695, %v2904_v18  ;;  %v2151_v48 = vpop.f32.mrf.mxu2 }
 0x26c   :  { %v8754_v35 = vpop.eup %8753  ;;  %v3292_v36 = vadd.f32 1.0, %v11342_v29  ;;  %v2152_v56 = vadd.f32 %v2151_v48, %v11169_v16  ;;  %v2056_v39 = vpop.f32.mrf.mxu0  ;;  %v3295_v6 = vmul.f32 -0.5, %v11342_v29 }
 0x26d   :  { %v3258_v43 = vmul.f32 0.6931472, %v8754_v35  ;;  %8755 = vpow2.f32 %v2997_v23  ;;  %v2057_v61 = vadd.f32 %v2056_v39, %v11065_v46  ;;  %v14129_v46 = vld [vmem:[#allocation44_spill] sm:$0xff] }
 0x26e   :  { %v2200_v4 = vpop.f32.mrf.mxu3  ;;  %v2105_v18 = vpop.f32.mrf.mxu1  ;;  %8757 = vlog2.f32 %v3292_v36 }
 0x26f   :  { %v11353_v58 = vadd.f32 %v2200_v4, %v2152_v56  ;;  %v3264_v0 = vsel %vm3263_vm12, %v3261_v34, %v3258_v43  ;;  %v11357_v12 = vadd.f32 %v2105_v18, %v2057_v61  ;;  %2251 = vmatmul.bf16.gmra.mxu0 %v9789_v27  ;;  %v3296_v56 = vadd.f32 1.0, %v3295_v6  ;;  %v8342_v18 = vld [vmem:[%s13868_s1 + $0x14c] sm:$0xf]  ;;  %v7145_v6 = vld [vmem:[%s13868_s1 + $0x258] sm:$0xf0] }
 0x270   :  { %v3664_v14 = vsel %vm2832_vm14, %v11266_v19, %v3264_v0  ;;  %2349 = vmatmul.bf16.gmra.mxu2 %v14129_v46  ;;  %v3298_v43 = vand.u32 2147483647, %v11342_v29  ;;  %v7017_v0 = vld [vmem:[%s13868_s1 + $0x158] sm:$0xf0] }
 0x271   :  { %2300 = vmatmul.bf16.gmra.mxu1 %v9791_v28  ;;  %v11364_v54 = vpack.c.bf16 %v3664_v14, %v3660_v55  ;;  %v2908_v60 = vmin.f32 %v11357_v12, 20.0  ;;  %vm2844_vm5 = vcmp.gt.f32.partialorder %v11357_v12, 20.0 }
 0x272   :  { %vm11398_vm15 = vcmp.lt.f32.partialorder %v3298_v43, 0.0004427343 }
 0x273   :  { %14130 = vst [vmem:[#allocation50_spill] sm:$0xff] %v11364_v54  ;;  %2398 = vmatmul.bf16.gmra.mxu3 %v14102_v63  ;;  %v8756_v61 = vpop.eup %8755  ;;  %v3005_v1 = vmul.f32 1.442695, %v2908_v60  ;;  %v2154_v10 = vpop.f32.mrf.mxu2  ;;  %v7020_v60 = vor.u32 %v8342_v18, %v7017_v0 }
 0x274   :  { %v8758_v23 = vpop.eup %8757  ;;  %v3328_v48 = vadd.f32 1.0, %v8756_v61  ;;  %v2155_v52 = vadd.f32 %v2154_v10, %v11169_v16  ;;  %v2058_v44 = vpop.f32.mrf.mxu0  ;;  %v3331_v35 = vmul.f32 -0.5, %v8756_v61  ;;  %v3297_v10 = vmul.f32 %v11342_v29, %v3296_v56 }
 0x275   :  { %8759 = vpow2.f32 %v3005_v1  ;;  %v2059_v45 = vadd.f32 %v2058_v44, %v11075_v53  ;;  %v3294_v39 = vmul.f32 0.6931472, %v8758_v23  ;;  %v8374_v53 = vld [vmem:[%s13868_s1 + $0x24c] sm:$0xf]  ;;  %v3334_v23 = vand.u32 2147483647, %v8756_v61  ;;  %2522 = vmatpush.bf16.msrb.mxu2 %v7020_v60 }
 0x276   :  { %v2203_v19 = vpop.f32.mrf.mxu3  ;;  %v2107_v36 = vpop.f32.mrf.mxu1  ;;  %8761 = vlog2.f32 %v3328_v48  ;;  %v3332_v55 = vadd.f32 1.0, %v3331_v35  ;;  %v8310_v1 = vld [vmem:[%s13868_s1 + $0x4c] sm:$0xf]  ;;  %v7148_v48 = vor.u32 %v8374_v53, %v7145_v6 }
 0x277   :  { %v11371_v4 = vadd.f32 %v2203_v19, %v2155_v52  ;;  %v11374_v34 = vadd.f32 %v2107_v36, %v2059_v45  ;;  %v6889_v52 = vld [vmem:[%s13868_s1 + $0x58] sm:$0xf0]  ;;  %v3300_v29 = vsel %vm11398_vm15, %v3297_v10, %v3294_v39  ;;  %vm3335_vm1 = vcmp.lt.f32.partialorder %v3334_v23, 0.0004427343 }
 0x278   :  { %v6892_v36 = vor.u32 %v8310_v1, %v6889_v52  ;;  %2571 = vmatpush.bf16.msrb.mxu3 %v7148_v48  ;;  %v3333_v43 = vmul.f32 %v8756_v61, %v3332_v55  ;;  %v14133_v10 = vld [vmem:[#allocation26_spill] sm:$0xff]  ;;  %v3668_v61 = vsel %vm2836_vm2, %v11303_v57, %v3300_v29  ;;  %v14135_v48 = vld [vmem:[#allocation47_spill] sm:$0xff] }
 0x279   :  { %v2912_v14 = vmin.f32 %v11374_v34, 20.0  ;;  %vm2848_vm6 = vcmp.gt.f32.partialorder %v11374_v34, 20.0 }
 0x27a   :  { %2473 = vmatpush.bf16.msrb.mxu1 %v6892_v36 }
 0x27b   :  { %v11396_v19 = vpop.eup %8759  ;;  %v3013_v35 = vmul.f32 1.442695, %v2912_v14  ;;  %v2156_v45 = vpop.f32.mrf.mxu2 }
 0x27c   :  { %v8762_v18 = vpop.eup %8761  ;;  %v3364_v56 = vadd.f32 1.0, %v11396_v19  ;;  %v2157_v0 = vadd.f32 %v2156_v45, %v11169_v16  ;;  %v2061_v6 = vpop.f32.mrf.mxu0  ;;  %v3367_v52 = vmul.f32 -0.5, %v11396_v19 }
 0x27d   :  { %v3330_v54 = vmul.f32 0.6931472, %v8762_v18  ;;  %8763 = vpow2.f32 %v3013_v35  ;;  %v2062_v63 = vadd.f32 %v2061_v6, %v11102_v26  ;;  %v14134_v26 = vld [vmem:[#allocation27_spill] sm:$0xff] }
 0x27e   :  { %v2205_v53 = vpop.f32.mrf.mxu3  ;;  %v2110_v14 = vpop.f32.mrf.mxu1  ;;  %8765 = vlog2.f32 %v3364_v56  ;;  %v3368_v56 = vadd.f32 1.0, %v3367_v52  ;;  %v7001_v52 = vld [vmem:[%s13868_s1 + $0x138] sm:$0xf0] }
 0x27f   :  { %v11407_v60 = vadd.f32 %v2205_v53, %v2157_v0  ;;  %v3336_v39 = vsel %vm3335_vm1, %v3333_v43, %v3330_v54  ;;  %v11411_v1 = vadd.f32 %v2110_v14, %v2062_v63  ;;  %2256 = vmatmul.bf16.gmra.mxu0 %v14133_v10  ;;  %v3370_v0 = vand.u32 2147483647, %v11396_v19 }
 0x280   :  { %v3672_v55 = vsel %vm2840_vm3, %v11320_v62, %v3336_v39  ;;  %2354 = vmatmul.bf16.gmra.mxu2 %v14135_v48 }
 0x281   :  { %2305 = vmatmul.bf16.gmra.mxu1 %v14134_v26  ;;  %v11418_v23 = vpack.c.bf16 %v3672_v55, %v3668_v61  ;;  %v2916_v44 = vmin.f32 %v11411_v1, 20.0  ;;  %v8338_v55 = vld [vmem:[%s13868_s1 + $0x12c] sm:$0xf]  ;;  %vm11450_vm4 = vcmp.lt.f32.partialorder %v3370_v0, 0.0004427343  ;;  %vm2852_vm9 = vcmp.gt.f32.partialorder %v11411_v1, 20.0 }
 0x283   :  { %14136 = vst [vmem:[#allocation12_spill] sm:$0xff] %v11418_v23  ;;  %2403 = vmatmul.bf16.gmra.mxu3 %v14105_v32  ;;  %v8764_v63 = vpop.eup %8763  ;;  %v3021_v54 = vmul.f32 1.442695, %v2916_v44  ;;  %v2159_v35 = vpop.f32.mrf.mxu2  ;;  %v7004_v44 = vor.u32 %v8338_v55, %v7001_v52  ;;  %v8334_v23 = vld [vmem:[%s13868_s1 + $0x10c] sm:$0xf] }
 0x284   :  { %v8766_v45 = vpop.eup %8765  ;;  %v3400_v36 = vadd.f32 1.0, %v8764_v63  ;;  %v3403_v57 = vmul.f32 -0.5, %v8764_v63  ;;  %v2160_v62 = vadd.f32 %v2159_v35, %v11169_v16  ;;  %v2063_v29 = vpop.f32.mrf.mxu0  ;;  %v8306_v35 = vld [vmem:[%s13868_s1 + $0x2c] sm:$0xf] }
 0x285   :  { %8767 = vpow2.f32 %v3021_v54  ;;  %v2064_v53 = vadd.f32 %v2063_v29, %v11112_v13  ;;  %v3366_v43 = vmul.f32 0.6931472, %v8766_v45  ;;  %v8370_v13 = vld [vmem:[%s13868_s1 + $0x22c] sm:$0xf]  ;;  %v7129_v54 = vld [vmem:[%s13868_s1 + $0x238] sm:$0xf0]  ;;  %2523 = vmatpush.bf16.msrb.mxu2 %v7004_v44 }
 0x286   :  { %v2208_v18 = vpop.f32.mrf.mxu3  ;;  %v2112_v6 = vpop.f32.mrf.mxu1  ;;  %8769 = vlog2.f32 %v3400_v36  ;;  %v3404_v14 = vadd.f32 1.0, %v3403_v57  ;;  %v6873_v45 = vld [vmem:[%s13868_s1 + $0x38] sm:$0xf0]  ;;  %v7132_v57 = vor.u32 %v8370_v13, %v7129_v54 }
 0x287   :  { %v11426_v39 = vadd.f32 %v2208_v18, %v2160_v62  ;;  %v11428_v61 = vadd.f32 %v2112_v6, %v2064_v53  ;;  %v6876_v62 = vor.u32 %v8306_v35, %v6873_v45  ;;  %v3369_v18 = vmul.f32 %v11396_v19, %v3368_v56  ;;  %v6985_v19 = vld [vmem:[%s13868_s1 + $0x118] sm:$0xf0] }
 0x288   :  { %v3406_v53 = vand.u32 2147483647, %v8764_v63  ;;  %2572 = vmatpush.bf16.msrb.mxu3 %v7132_v57  ;;  %v3405_v13 = vmul.f32 %v8764_v63, %v3404_v14  ;;  %v6988_v48 = vor.u32 %v8334_v23, %v6985_v19  ;;  %v7113_v63 = vld [vmem:[%s13868_s1 + $0x218] sm:$0xf0] }
 0x289   :  { %v2920_v36 = vmin.f32 %v11428_v61, 20.0  ;;  %2474 = vmatpush.bf16.msrb.mxu1 %v6876_v62  ;;  %v3372_v0 = vsel %vm11450_vm4, %v3369_v18, %v3366_v43  ;;  %v8302_v43 = vld [vmem:[%s13868_s1 + $0xc] sm:$0xf]  ;;  %vm2856_vm11 = vcmp.gt.f32.partialorder %v11428_v61, 20.0 }
 0x28a   :  { %vm3407_vm7 = vcmp.lt.f32.partialorder %v3406_v53, 0.0004427343  ;;  %2524 = vmatpush.bf16.msrb.mxu2 %v6988_v48 }
 0x28b   :  { %v11454_v6 = vpop.eup %8767  ;;  %v3029_v55 = vmul.f32 1.442695, %v2920_v36  ;;  %v2161_v52 = vpop.f32.mrf.mxu2  ;;  %v8366_v36 = vld [vmem:[%s13868_s1 + $0x20c] sm:$0xf] }
 0x28c   :  { %v8770_v56 = vpop.eup %8769  ;;  %v3436_v44 = vadd.f32 1.0, %v11454_v6  ;;  %v2162_v54 = vadd.f32 %v2161_v52, %v11169_v16  ;;  %v2066_v45 = vpop.f32.mrf.mxu0  ;;  %v7116_v29 = vor.u32 %v8366_v36, %v7113_v63 }
 0x28d   :  { %v3402_v57 = vmul.f32 0.6931472, %v8770_v56  ;;  %8771 = vpow2.f32 %v3029_v55  ;;  %v2067_v62 = vadd.f32 %v2066_v45, %v11121_v21  ;;  %v6857_v21 = vld [vmem:[%s13868_s1 + $0x18] sm:$0xf0]  ;;  %v3676_v55 = vsel %vm2844_vm5, %v11357_v12, %v3372_v0 }
 0x28e   :  { %v2210_v35 = vpop.f32.mrf.mxu3  ;;  %v2115_v32 = vpop.f32.mrf.mxu1  ;;  %8773 = vlog2.f32 %v3436_v44  ;;  %v6860_v53 = vor.u32 %v8302_v43, %v6857_v21  ;;  %2573 = vmatpush.bf16.msrb.mxu3 %v7116_v29  ;;  %v3442_v43 = vand.u32 2147483647, %v11454_v6 }
 0x28f   :  { %v11478_v14 = vadd.f32 %v2210_v35, %v2162_v54  ;;  %v3408_v23 = vsel %vm3407_vm7, %v3405_v13, %v3402_v57  ;;  %v11483_v18 = vadd.f32 %v2115_v32, %v2067_v62  ;;  %2261 = vmatmul.bf16.gmra.mxu0 %v9897_v17  ;;  %v3439_v32 = vmul.f32 -0.5, %v11454_v6 }
 0x290   :  { %v3680_v52 = vsel %vm2848_vm6, %v11374_v34, %v3408_v23  ;;  %2359 = vmatmul.bf16.gmra.mxu2 %v10364_v7  ;;  %2475 = vmatpush.bf16.msrb.mxu1 %v6860_v53  ;;  %vm11506_vm8 = vcmp.lt.f32.partialorder %v3442_v43, 0.0004427343 }
 0x291   :  { %2310 = vmatmul.bf16.gmra.mxu1 %v9899_v22  ;;  %v11490_v19 = vpack.c.bf16 %v3680_v52, %v3676_v55  ;;  %v2924_v56 = vmin.f32 %v11483_v18, 20.0  ;;  %v3440_v62 = vadd.f32 1.0, %v3439_v32  ;;  %vm2860_vm14 = vcmp.gt.f32.partialorder %v11483_v18, 20.0 }
 0x293   :  { %14139 = vst [vmem:[#allocation44_spill] sm:$0xff] %v11490_v19  ;;  %2408 = vmatmul.bf16.gmra.mxu3 %v14108_v9  ;;  %v8772_v48 = vpop.eup %8771  ;;  %v3037_v13 = vmul.f32 1.442695, %v2924_v56  ;;  %v2164_v12 = vpop.f32.mrf.mxu2  ;;  %v3441_v52 = vmul.f32 %v11454_v6, %v3440_v62 }
 0x294   :  { %v3472_v0 = vadd.f32 1.0, %v8772_v48  ;;  %v2165_v34 = vadd.f32 %v2164_v12, %v11169_v16  ;;  %v2068_v54 = vpop.f32.mrf.mxu0  ;;  %v8774_v35 = vpop.eup %8773  ;;  %v3475_v45 = vmul.f32 -0.5, %v8772_v48  ;;  %v3478_v53 = vand.u32 2147483647, %v8772_v48 }
 0x295   :  { %8775 = vpow2.f32 %v3037_v13  ;;  %v2069_v36 = vadd.f32 %v2068_v54, %v11125_v33  ;;  %v3438_v23 = vmul.f32 0.6931472, %v8774_v35 }
 0x296   :  { %v2213_v44 = vpop.f32.mrf.mxu3  ;;  %v2117_v57 = vpop.f32.mrf.mxu1  ;;  %8777 = vlog2.f32 %v3472_v0  ;;  %v3476_v29 = vadd.f32 1.0, %v3475_v45  ;;  %vm3479_vm10 = vcmp.lt.f32.partialorder %v3478_v53, 0.0004427343 }
 0x297   :  { %v11497_v63 = vadd.f32 %v2213_v44, %v2165_v34  ;;  %v11500_v21 = vadd.f32 %v2117_v57, %v2069_v36  ;;  %v3444_v0 = vsel %vm11506_vm8, %v3441_v52, %v3438_v23 }
 0x298   :  { %v3477_v45 = vmul.f32 %v8772_v48, %v3476_v29  ;;  %v3684_v52 = vsel %vm2852_vm9, %v11411_v1, %v3444_v0  ;;  %v14143_v29 = vld [vmem:[#allocation33_spill] sm:$0xff]  ;;  %v7609_v1 = vld [vmem:[%s13868_s1 + $0x5f8] sm:$0xf0] }
 0x299   :  { %v2928_v55 = vmin.f32 %v11500_v21, 20.0  ;;  %v7353_v0 = vld [vmem:[%s13868_s1 + $0x3f8] sm:$0xf0]  ;;  %vm2864_vm15 = vcmp.gt.f32.partialorder %v11500_v21, 20.0 }
 0x29b   :  { %v11504_v56 = vpop.eup %8775  ;;  %v3045_v32 = vmul.f32 1.442695, %v2928_v55  ;;  %v2166_v13 = vpop.f32.mrf.mxu2  ;;  %v14142_v55 = vld [vmem:[#allocation32_spill] sm:$0xff] }
 0x29c   :  { %v8778_v12 = vpop.eup %8777  ;;  %v3508_v34 = vadd.f32 1.0, %v11504_v56  ;;  %v2167_v44 = vadd.f32 %v2166_v13, %v11169_v16  ;;  %v2071_v35 = vpop.f32.mrf.mxu0  ;;  %v3511_v53 = vmul.f32 -0.5, %v11504_v56  ;;  %v8490_v13 = vld [vmem:[%s13868_s1 + $0x5ec] sm:$0xf] }
 0x29d   :  { %v3474_v6 = vmul.f32 0.6931472, %v8778_v12  ;;  %8779 = vpow2.f32 %v3045_v32  ;;  %v2072_v36 = vadd.f32 %v2071_v35, %v11134_v31  ;;  %v14144_v31 = vld [vmem:[#allocation52_spill] sm:$0xff] }
 0x29e   :  { %v2215_v54 = vpop.f32.mrf.mxu3  ;;  %v2120_v57 = vpop.f32.mrf.mxu1  ;;  %8781 = vlog2.f32 %v3508_v34  ;;  %v8426_v12 = vld [vmem:[%s13868_s1 + $0x3ec] sm:$0xf]  ;;  %v3512_v19 = vadd.f32 1.0, %v3511_v53 }
 0x29f   :  { %v11516_v62 = vadd.f32 %v2215_v54, %v2167_v44  ;;  %v3480_v43 = vsel %vm3479_vm10, %v3477_v45, %v3474_v6  ;;  %v11519_v23 = vadd.f32 %v2120_v57, %v2072_v36  ;;  %2266 = vmatmul.bf16.gmra.mxu0 %v14142_v55  ;;  %v8494_v34 = vld [vmem:[%s13868_s1 + $0x60c] sm:$0xf]  ;;  %v7356_v6 = vor.u32 %v8426_v12, %v7353_v0  ;;  %v7625_v45 = vld [vmem:[%s13868_s1 + $0x618] sm:$0xf0] }
 0x2a0   :  { %v3688_v48 = vsel %vm2856_vm11, %v11428_v61, %v3480_v43  ;;  %2364 = vmatmul.bf16.gmra.mxu2 %v14144_v31  ;;  %v7612_v61 = vor.u32 %v8490_v13, %v7609_v1  ;;  %v8454_v53 = vld [vmem:[%s13868_s1 + $0x4cc] sm:$0xf] }
 0x2a1   :  { %2315 = vmatmul.bf16.gmra.mxu1 %v14143_v29  ;;  %v11526_v33 = vpack.c.bf16 %v3688_v48, %v3684_v52  ;;  %v2932_v32 = vmin.f32 %v11519_v23, 20.0  ;;  %v8458_v48 = vld [vmem:[%s13868_s1 + $0x4ec] sm:$0xf]  ;;  %2615 = vmatpush.bf16.msra.mxu0 %v7356_v6  ;;  %vm2868_vm3 = vcmp.gt.f32.partialorder %v11519_v23, 20.0 }
 0x2a2   :  { %2713 = vmatpush.bf16.msra.mxu2 %v7612_v61  ;;  %v8486_v61 = vld [vmem:[%s13868_s1 + $0x5cc] sm:$0xf] }
 0x2a3   :  { %14145 = vst [vmem:[#allocation26_spill] sm:$0xff] %v11526_v33  ;;  %2413 = vmatmul.bf16.gmra.mxu3 %v14111_v50  ;;  %v8780_v44 = vpop.eup %8779  ;;  %v3053_v54 = vmul.f32 1.442695, %v2932_v32  ;;  %v2169_v35 = vpop.f32.mrf.mxu2  ;;  %v7481_v32 = vld [vmem:[%s13868_s1 + $0x4f8] sm:$0xf0]  ;;  %v7628_v33 = vor.u32 %v8494_v34, %v7625_v45 }
 0x2a4   :  { %v3544_v36 = vadd.f32 1.0, %v8780_v44  ;;  %v2170_v57 = vadd.f32 %v2169_v35, %v11169_v16  ;;  %v2073_v52 = vpop.f32.mrf.mxu0  ;;  %v8782_v13 = vpop.eup %8781  ;;  %v3547_v1 = vmul.f32 -0.5, %v8780_v44  ;;  %v7593_v35 = vld [vmem:[%s13868_s1 + $0x5d8] sm:$0xf0]  ;;  %v3514_v50 = vand.u32 2147483647, %v11504_v56 }
 0x2a5   :  { %8783 = vpow2.f32 %v3053_v54  ;;  %v2074_v12 = vadd.f32 %v2073_v52, %v11161_v20  ;;  %v8422_v20 = vld [vmem:[%s13868_s1 + $0x3cc] sm:$0xf]  ;;  %2769 = vmatpush.bf16.msra.mxu3 %v7628_v33  ;;  %v7484_v34 = vor.u32 %v8458_v48, %v7481_v32  ;;  %v7596_v6 = vor.u32 %v8486_v61, %v7593_v35  ;;  %v7337_v45 = vld [vmem:[%s13868_s1 + $0x3d8] sm:$0xf0] }
 0x2a6   :  { %v2218_v43 = vpop.f32.mrf.mxu3  ;;  %v2122_v0 = vpop.f32.mrf.mxu1  ;;  %8785 = vlog2.f32 %v3544_v36  ;;  %v7465_v36 = vld [vmem:[%s13868_s1 + $0x4d8] sm:$0xf0]  ;;  %v3548_v52 = vadd.f32 1.0, %v3547_v1  ;;  %v3513_v48 = vmul.f32 %v11504_v56, %v3512_v19  ;;  %v3550_v32 = vand.u32 2147483647, %v8780_v44 }
 0x2a7   :  { %v11564_v31 = vadd.f32 %v2218_v43, %v2170_v57  ;;  %v11569_v54 = vadd.f32 %v2122_v0, %v2074_v12  ;;  %v3510_v57 = vmul.f32 0.6931472, %v8782_v13  ;;  %v7340_v43 = vor.u32 %v8422_v20, %v7337_v45  ;;  %2664 = vmatpush.bf16.msra.mxu1 %v7484_v34  ;;  %2714 = vmatpush.bf16.msra.mxu2 %v7596_v6 }
 0x2a8   :  { %v7468_v33 = vor.u32 %v8454_v53, %v7465_v36  ;;  %vm11584_vm12 = vcmp.lt.f32.partialorder %v3514_v50, 0.0004427343  ;;  %v3549_v45 = vmul.f32 %v8780_v44, %v3548_v52  ;;  %vm3551_vm13 = vcmp.lt.f32.partialorder %v3550_v32, 0.0004427343  ;;  %v8482_v44 = vld [vmem:[%s13868_s1 + $0x5ac] sm:$0xf] }
 0x2a9   :  { %v2936_v12 = vmin.f32 %v11569_v54, 20.0  ;;  %2616 = vmatpush.bf16.msra.mxu0 %v7340_v43  ;;  %v3516_v1 = vsel %vm11584_vm12, %v3513_v48, %v3510_v57  ;;  %v7577_v52 = vld [vmem:[%s13868_s1 + $0x5b8] sm:$0xf0]  ;;  %vm2872_vm4 = vcmp.gt.f32.partialorder %v11569_v54, 20.0 }
 0x2ab   :  { %v11582_v0 = vpop.eup %8783  ;;  %v3061_v35 = vmul.f32 1.442695, %v2936_v12  ;;  %v2171_v29 = vpop.f32.mrf.mxu2  ;;  %2665 = vmatpush.bf16.msra.mxu1 %v7468_v33 }
 0x2ac   :  { %v8786_v13 = vpop.eup %8785  ;;  %v3580_v20 = vadd.f32 1.0, %v11582_v0  ;;  %v2172_v34 = vadd.f32 %v2171_v29, %v11169_v16  ;;  %v2232_v19 = vpop.f32.mrf.mxu0  ;;  %v3692_v16 = vsel %vm2860_vm14, %v11483_v18, %v3516_v1  ;;  %v8418_v18 = vld [vmem:[%s13868_s1 + $0x3ac] sm:$0xf] }
 0x2ad   :  { %v3546_v56 = vmul.f32 0.6931472, %v8786_v13  ;;  %8787 = vpow2.f32 %v3061_v35  ;;  %v2233_v50 = vadd.f32 %v2232_v19, %v11175_v25  ;;  %v8450_v19 = vld [vmem:[%s13868_s1 + $0x4ac] sm:$0xf] }
 0x2ae   :  { %v2220_v6 = vpop.f32.mrf.mxu3  ;;  %v2281_v53 = vpop.f32.mrf.mxu1  ;;  %8789 = vlog2.f32 %v3580_v20 }
 0x2af   :  { %v11593_v36 = vadd.f32 %v2220_v6, %v2172_v34  ;;  %v3552_v57 = vsel %vm3551_vm13, %v3549_v45, %v3546_v56  ;;  %v2282_v43 = vadd.f32 %v2281_v53, %v2233_v50  ;;  %7645 = vmatmul.msk.bf16.vlgmr.msrb.gmra.mxu0 %vm1414_vm0, %v14085_v30  ;;  %v7449_v50 = vld [vmem:[%s13868_s1 + $0x4b8] sm:$0xf0]  ;;  %v3586_v53 = vand.u32 2147483647, %v11582_v0 }
 0x2b0   :  { %v3696_v29 = vsel %vm2864_vm15, %v11500_v21, %v3552_v57  ;;  %2525 = vmatmul.bf16.vlgmr.msrb.gmra.mxu2 %v9553_v51  ;;  %v7580_v21 = vor.u32 %v8482_v44, %v7577_v52  ;;  %v7321_v51 = vld [vmem:[%s13868_s1 + $0x3b8] sm:$0xf0]  ;;  %v7452_v57 = vor.u32 %v8450_v19, %v7449_v50  ;;  %v14154_v50 = vld [vmem:[#allocation16_spill] sm:$0xff] }
 0x2b1   :  { %2476 = vmatmul.bf16.vlgmr.msrb.gmra.mxu1 %v14086_v24  ;;  %v11603_v25 = vpack.c.bf16 %v3696_v29, %v3692_v16  ;;  %v7324_v33 = vor.u32 %v8418_v18, %v7321_v51  ;;  %vm11630_vm1 = vcmp.lt.f32.partialorder %v3586_v53, 0.0004427343  ;;  %v8478_v53 = vld [vmem:[%s13868_s1 + $0x58c] sm:$0xf] }
 0x2b2   :  { %2715 = vmatpush.bf16.msra.mxu2 %v7580_v21  ;;  %2666 = vmatpush.bf16.msra.mxu1 %v7452_v57  ;;  %v7561_v57 = vld [vmem:[%s13868_s1 + $0x598] sm:$0xf0] }
 0x2b3   :  { %2574 = vmatmul.bf16.vlgmr.msrb.gmra.mxu3 %v14114_v5  ;;  %v8788_v24 = vpop.eup %8787  ;;  %v3583_v5 = vmul.f32 -0.5, %v11582_v0  ;;  %v2330_v12 = vpop.f32.mrf.mxu2  ;;  %2617 = vmatpush.bf16.msra.mxu0 %v7324_v33 }
 0x2b4   :  { %v3616_v48 = vadd.f32 1.0, %v8788_v24  ;;  %v2331_v32 = vadd.f32 %v2330_v12, %v2282_v43  ;;  %v2234_v35 = vpop.f32.mrf.mxu0  ;;  %v3619_v13 = vmul.f32 -0.5, %v8788_v24  ;;  %v8790_v34 = vpop.eup %8789  ;;  %v3622_v16 = vand.u32 2147483647, %v8788_v24 }
 0x2b5   :  { %v2235_v1 = vadd.f32 %v2234_v35, %v11200_v59  ;;  %v3584_v56 = vadd.f32 1.0, %v3583_v5  ;;  %v3582_v59 = vmul.f32 0.6931472, %v8790_v34 }
 0x2b6   :  { %v2379_v61 = vpop.f32.mrf.mxu3  ;;  %v2283_v20 = vpop.f32.mrf.mxu1  ;;  %8791 = vlog2.f32 %v3616_v48  ;;  %v3620_v43 = vadd.f32 1.0, %v3619_v13  ;;  %vm3623_vm2 = vcmp.lt.f32.partialorder %v3622_v16, 0.0004427343 }
 0x2b7   :  { %v11620_v6 = vadd.f32 %v2379_v61, %v2331_v32  ;;  %v2284_v45 = vadd.f32 %v2283_v20, %v2235_v1  ;;  %v3585_v29 = vmul.f32 %v11582_v0, %v3584_v56  ;;  %v14150_v32 = vld [vmem:[#allocation55_spill] sm:$0xff] }
 0x2b8   :  { %v3621_v48 = vmul.f32 %v8788_v24, %v3620_v43  ;;  %v14151_v20 = vld [vmem:[#allocation39_spill] sm:$0xff]  ;;  %v14152_v24 = vld [vmem:[#allocation14_spill] sm:$0xff] }
 0x2b9   :  { %v3588_v12 = vsel %vm11630_vm1, %v3585_v29, %v3582_v59  ;;  %v14153_v56 = vld [vmem:[#allocation15_spill] sm:$0xff]  ;;  %v7305_v59 = vld [vmem:[%s13868_s1 + $0x398] sm:$0xf0] }
 0x2ba   :  { %v3700_v34 = vsel %vm2868_vm3, %v11519_v23, %v3588_v12  ;;  %v8414_v23 = vld [vmem:[%s13868_s1 + $0x38c] sm:$0xf]  ;;  %v7433_v12 = vld [vmem:[%s13868_s1 + $0x498] sm:$0xf0] }
 0x2bb   :  { %v2332_v44 = vpop.f32.mrf.mxu2  ;;  %v7308_v16 = vor.u32 %v8414_v23, %v7305_v59 }
 0x2bc   :  { %v8792_v52 = vpop.eup %8791  ;;  %v2333_v21 = vadd.f32 %v2332_v44, %v2284_v45  ;;  %v2237_v5 = vpop.f32.mrf.mxu0 }
 0x2bd   :  { %v3618_v33 = vmul.f32 0.6931472, %v8792_v52  ;;  %v2238_v61 = vadd.f32 %v2237_v5, %v14150_v32  ;;  %2618 = vmatpush.bf16.msra.mxu0 %v7308_v16  ;;  %v8446_v5 = vld [vmem:[%s13868_s1 + $0x48c] sm:$0xf] }
 0x2be   :  { %v2381_v51 = vpop.f32.mrf.mxu3  ;;  %v2286_v35 = vpop.f32.mrf.mxu1 }
 0x2bf   :  { %v11637_v13 = vadd.f32 %v2381_v51, %v2333_v21  ;;  %v3624_v0 = vsel %vm3623_vm2, %v3621_v48, %v3618_v33  ;;  %v2287_v1 = vadd.f32 %v2286_v35, %v2238_v61  ;;  %7646 = vmatmul.msk.bf16.gmra.mxu0 %vm1414_vm0, %v14151_v20  ;;  %v7436_v48 = vor.u32 %v8446_v5, %v7433_v12  ;;  %v7417_v5 = vld [vmem:[%s13868_s1 + $0x478] sm:$0xf0] }
 0x2c0   :  { %v3704_v19 = vsel %vm2872_vm4, %v11569_v54, %v3624_v0  ;;  %2530 = vmatmul.bf16.gmra.mxu2 %v14153_v56  ;;  %v7564_v54 = vor.u32 %v8478_v53, %v7561_v57  ;;  %v14156_v56 = vld [vmem:[#allocation18_spill] sm:$0xff]  ;;  %v8474_v53 = vld [vmem:[%s13868_s1 + $0x56c] sm:$0xf] }
 0x2c1   :  { %2481 = vmatmul.bf16.gmra.mxu1 %v14152_v24  ;;  %v11647_v45 = vpack.c.bf16 %v3704_v19, %v3700_v34  ;;  %v14155_v24 = vld [vmem:[#allocation41_spill] sm:$0xff]  ;;  %v8410_v57 = vld [vmem:[%s13868_s1 + $0x36c] sm:$0xf] }
 0x2c2   :  { %2716 = vmatpush.bf16.msra.mxu2 %v7564_v54  ;;  %2667 = vmatpush.bf16.msra.mxu1 %v7436_v48  ;;  %v7289_v54 = vld [vmem:[%s13868_s1 + $0x378] sm:$0xf0] }
 0x2c3   :  { %2579 = vmatmul.bf16.gmra.mxu3 %v14154_v50  ;;  %v2335_v43 = vpop.f32.mrf.mxu2  ;;  %v14157_v50 = vld [vmem:[#allocation19_spill] sm:$0xff] }
 0x2c4   :  { %v2336_v29 = vadd.f32 %v2335_v43, %v2287_v1  ;;  %v2239_v52 = vpop.f32.mrf.mxu0  ;;  %v7292_v43 = vor.u32 %v8410_v57, %v7289_v54 }
 0x2c5   :  { %v2240_v18 = vadd.f32 %v2239_v52, %v11245_v37 }
 0x2c6   :  { %v2384_v44 = vpop.f32.mrf.mxu3  ;;  %v2288_v21 = vpop.f32.mrf.mxu1  ;;  %2619 = vmatpush.bf16.msra.mxu0 %v7292_v43 }
 0x2c7   :  { %v11663_v51 = vadd.f32 %v2384_v44, %v2336_v29  ;;  %v2289_v33 = vadd.f32 %v2288_v21, %v2240_v18  ;;  %v8442_v21 = vld [vmem:[%s13868_s1 + $0x46c] sm:$0xf] }
 0x2cb   :  { %v2337_v32 = vpop.f32.mrf.mxu2 }
 0x2cc   :  { %v2338_v61 = vadd.f32 %v2337_v32, %v2289_v33  ;;  %v2242_v0 = vpop.f32.mrf.mxu0  ;;  %v7420_v33 = vor.u32 %v8442_v21, %v7417_v5  ;;  %v7401_v21 = vld [vmem:[%s13868_s1 + $0x458] sm:$0xf0] }
 0x2cd   :  { %v2243_v37 = vadd.f32 %v2242_v0, %v11263_v15  ;;  %v7545_v15 = vld [vmem:[%s13868_s1 + $0x578] sm:$0xf0] }
 0x2ce   :  { %v2386_v35 = vpop.f32.mrf.mxu3  ;;  %v2291_v1 = vpop.f32.mrf.mxu1  ;;  %v7548_v23 = vor.u32 %v8474_v53, %v7545_v15  ;;  %2668 = vmatpush.bf16.msra.mxu1 %v7420_v33  ;;  %v8470_v53 = vld [vmem:[%s13868_s1 + $0x54c] sm:$0xf] }
 0x2cf   :  { %v11672_v34 = vadd.f32 %v2386_v35, %v2338_v61  ;;  %v2292_v19 = vadd.f32 %v2291_v1, %v2243_v37  ;;  %7647 = vmatmul.msk.bf16.gmra.mxu0 %vm1414_vm0, %v14155_v24  ;;  %v8406_v15 = vld [vmem:[%s13868_s1 + $0x34c] sm:$0xf] }
 0x2d0   :  { %2535 = vmatmul.bf16.gmra.mxu2 %v14157_v50  ;;  %v14160_v50 = vld [vmem:[#allocation21_spill] sm:$0xff] }
 0x2d1   :  { %2486 = vmatmul.bf16.gmra.mxu1 %v14156_v56  ;;  %2717 = vmatpush.bf16.msra.mxu2 %v7548_v23  ;;  %v14159_v56 = vld [vmem:[#allocation20_spill] sm:$0xff]  ;;  %v7273_v23 = vld [vmem:[%s13868_s1 + $0x358] sm:$0xf0] }
 0x2d3   :  { %2584 = vmatmul.bf16.gmra.mxu3 %v9681_v41  ;;  %v2340_v59 = vpop.f32.mrf.mxu2 }
 0x2d4   :  { %v2341_v41 = vadd.f32 %v2340_v59, %v2292_v19  ;;  %v2244_v29 = vpop.f32.mrf.mxu0  ;;  %v14158_v19 = vld [vmem:[#allocation43_spill] sm:$0xff]  ;;  %v7276_v59 = vor.u32 %v8406_v15, %v7273_v23 }
 0x2d5   :  { %v2245_v44 = vadd.f32 %v2244_v29, %v11299_v47 }
 0x2d6   :  { %v2389_v16 = vpop.f32.mrf.mxu3  ;;  %v2293_v52 = vpop.f32.mrf.mxu1  ;;  %2620 = vmatpush.bf16.msra.mxu0 %v7276_v59 }
 0x2d7   :  { %v11692_v18 = vadd.f32 %v2389_v16, %v2341_v41  ;;  %v2294_v12 = vadd.f32 %v2293_v52, %v2245_v44  ;;  %v8438_v52 = vld [vmem:[%s13868_s1 + $0x44c] sm:$0xf] }
 0x2db   :  { %v2342_v48 = vpop.f32.mrf.mxu2 }
 0x2dc   :  { %v2343_v32 = vadd.f32 %v2342_v48, %v2294_v12  ;;  %v2247_v35 = vpop.f32.mrf.mxu0  ;;  %v7404_v12 = vor.u32 %v8438_v52, %v7401_v21  ;;  %v7385_v52 = vld [vmem:[%s13868_s1 + $0x438] sm:$0xf0] }
 0x2dd   :  { %v2248_v47 = vadd.f32 %v2247_v35, %v11317_v40  ;;  %v7529_v40 = vld [vmem:[%s13868_s1 + $0x558] sm:$0xf0] }
 0x2de   :  { %v2391_v61 = vpop.f32.mrf.mxu3  ;;  %v2296_v0 = vpop.f32.mrf.mxu1  ;;  %v7532_v57 = vor.u32 %v8470_v53, %v7529_v40  ;;  %2669 = vmatpush.bf16.msra.mxu1 %v7404_v12  ;;  %v8466_v53 = vld [vmem:[%s13868_s1 + $0x52c] sm:$0xf] }
 0x2df   :  { %v11701_v37 = vadd.f32 %v2391_v61, %v2343_v32  ;;  %v2297_v1 = vadd.f32 %v2296_v0, %v2248_v47  ;;  %7648 = vmatmul.msk.bf16.gmra.mxu0 %vm1414_vm0, %v14158_v19  ;;  %v8402_v40 = vld [vmem:[%s13868_s1 + $0x32c] sm:$0xf] }
 0x2e0   :  { %2540 = vmatmul.bf16.gmra.mxu2 %v14160_v50  ;;  %v14163_v50 = vld [vmem:[#allocation23_spill] sm:$0xff] }
 0x2e1   :  { %2491 = vmatmul.bf16.gmra.mxu1 %v14159_v56  ;;  %2718 = vmatpush.bf16.msra.mxu2 %v7532_v57  ;;  %v14162_v56 = vld [vmem:[#allocation22_spill] sm:$0xff] }
 0x2e2   :  { %v7257_v57 = vld [vmem:[%s13868_s1 + $0x338] sm:$0xf0] }
 0x2e3   :  { %2589 = vmatmul.bf16.gmra.mxu3 %v9735_v2  ;;  %v2345_v54 = vpop.f32.mrf.mxu2 }
 0x2e4   :  { %v2346_v2 = vadd.f32 %v2345_v54, %v2297_v1  ;;  %v2249_v41 = vpop.f32.mrf.mxu0  ;;  %v14161_v1 = vld [vmem:[#allocation46_spill] sm:$0xff]  ;;  %v7260_v54 = vor.u32 %v8402_v40, %v7257_v57 }
 0x2e5   :  { %v2250_v16 = vadd.f32 %v2249_v41, %v11353_v58 }
 0x2e6   :  { %v2394_v43 = vpop.f32.mrf.mxu3  ;;  %v2298_v29 = vpop.f32.mrf.mxu1  ;;  %2621 = vmatpush.bf16.msra.mxu0 %v7260_v54 }
 0x2e7   :  { %v11721_v44 = vadd.f32 %v2394_v43, %v2346_v2  ;;  %v2299_v5 = vadd.f32 %v2298_v29, %v2250_v16  ;;  %v8434_v29 = vld [vmem:[%s13868_s1 + $0x42c] sm:$0xf] }
 0x2eb   :  { %v2347_v33 = vpop.f32.mrf.mxu2 }
 0x2ec   :  { %v2348_v48 = vadd.f32 %v2347_v33, %v2299_v5  ;;  %v2252_v61 = vpop.f32.mrf.mxu0  ;;  %v7388_v5 = vor.u32 %v8434_v29, %v7385_v52  ;;  %v7369_v29 = vld [vmem:[%s13868_s1 + $0x418] sm:$0xf0] }
 0x2ed   :  { %v2253_v58 = vadd.f32 %v2252_v61, %v11371_v4  ;;  %v7513_v4 = vld [vmem:[%s13868_s1 + $0x538] sm:$0xf0] }
 0x2ee   :  { %v2396_v32 = vpop.f32.mrf.mxu3  ;;  %v2301_v35 = vpop.f32.mrf.mxu1  ;;  %v7516_v15 = vor.u32 %v8466_v53, %v7513_v4  ;;  %2670 = vmatpush.bf16.msra.mxu1 %v7388_v5  ;;  %v8462_v53 = vld [vmem:[%s13868_s1 + $0x50c] sm:$0xf] }
 0x2ef   :  { %v11730_v47 = vadd.f32 %v2396_v32, %v2348_v48  ;;  %v2302_v0 = vadd.f32 %v2301_v35, %v2253_v58  ;;  %7649 = vmatmul.msk.bf16.gmra.mxu0 %vm1414_vm0, %v14161_v1  ;;  %v8398_v4 = vld [vmem:[%s13868_s1 + $0x30c] sm:$0xf] }
 0x2f0   :  { %2545 = vmatmul.bf16.gmra.mxu2 %v14163_v50  ;;  %v14166_v50 = vld [vmem:[#allocation25_spill] sm:$0xff] }
 0x2f1   :  { %2496 = vmatmul.bf16.gmra.mxu1 %v14162_v56  ;;  %2719 = vmatpush.bf16.msra.mxu2 %v7516_v15  ;;  %v14165_v56 = vld [vmem:[#allocation24_spill] sm:$0xff]  ;;  %v7241_v15 = vld [vmem:[%s13868_s1 + $0x318] sm:$0xf0] }
 0x2f3   :  { %2594 = vmatmul.bf16.gmra.mxu3 %v9789_v27  ;;  %v2350_v23 = vpop.f32.mrf.mxu2 }
 0x2f4   :  { %v2351_v27 = vadd.f32 %v2350_v23, %v2302_v0  ;;  %v2254_v2 = vpop.f32.mrf.mxu0  ;;  %v14164_v0 = vld [vmem:[#allocation49_spill] sm:$0xff]  ;;  %v7244_v23 = vor.u32 %v8398_v4, %v7241_v15 }
 0x2f5   :  { %v2255_v43 = vadd.f32 %v2254_v2, %v11407_v60 }
 0x2f6   :  { %v2399_v59 = vpop.f32.mrf.mxu3  ;;  %v2303_v41 = vpop.f32.mrf.mxu1  ;;  %2622 = vmatpush.bf16.msra.mxu0 %v7244_v23 }
 0x2f7   :  { %v11750_v16 = vadd.f32 %v2399_v59, %v2351_v27  ;;  %v2304_v21 = vadd.f32 %v2303_v41, %v2255_v43  ;;  %v8430_v41 = vld [vmem:[%s13868_s1 + $0x40c] sm:$0xf] }
 0x2fb   :  { %v2352_v12 = vpop.f32.mrf.mxu2 }
 0x2fc   :  { %v2353_v33 = vadd.f32 %v2352_v12, %v2304_v21  ;;  %v2257_v32 = vpop.f32.mrf.mxu0  ;;  %v7372_v21 = vor.u32 %v8430_v41, %v7369_v29 }
 0x2fd   :  { %v2258_v60 = vadd.f32 %v2257_v32, %v11426_v39  ;;  %v7497_v39 = vld [vmem:[%s13868_s1 + $0x518] sm:$0xf0] }
 0x2fe   :  { %v2401_v48 = vpop.f32.mrf.mxu3  ;;  %v2306_v61 = vpop.f32.mrf.mxu1  ;;  %v7500_v40 = vor.u32 %v8462_v53, %v7497_v39  ;;  %2671 = vmatpush.bf16.msra.mxu1 %v7372_v21  ;;  %v14171_v21 = vld [vmem:[#allocation30_spill] sm:$0xff] }
 0x2ff   :  { %v11759_v58 = vadd.f32 %v2401_v48, %v2353_v33  ;;  %v2307_v35 = vadd.f32 %v2306_v61, %v2258_v60  ;;  %7650 = vmatmul.msk.bf16.gmra.mxu0 %vm1414_vm0, %v14164_v0 }
 0x300   :  { %2550 = vmatmul.bf16.gmra.mxu2 %v14166_v50  ;;  %v14169_v50 = vld [vmem:[#allocation29_spill] sm:$0xff] }
 0x301   :  { %2501 = vmatmul.bf16.gmra.mxu1 %v14165_v56  ;;  %2720 = vmatpush.bf16.msra.mxu2 %v7500_v40  ;;  %v14168_v56 = vld [vmem:[#allocation28_spill] sm:$0xff] }
 0x303   :  { %2599 = vmatmul.bf16.gmra.mxu3 %v14133_v10  ;;  %v2355_v57 = vpop.f32.mrf.mxu2 }
 0x304   :  { %v2356_v10 = vadd.f32 %v2355_v57, %v2307_v35  ;;  %v2259_v27 = vpop.f32.mrf.mxu0  ;;  %v14167_v35 = vld [vmem:[#allocation51_spill] sm:$0xff] }
 0x305   :  { %v2260_v59 = vadd.f32 %v2259_v27, %v11478_v14 }
 0x306   :  { %v2404_v54 = vpop.f32.mrf.mxu3  ;;  %v2308_v2 = vpop.f32.mrf.mxu1 }
 0x307   :  { %v11779_v43 = vadd.f32 %v2404_v54, %v2356_v10  ;;  %v2309_v52 = vadd.f32 %v2308_v2, %v2260_v59 }
 0x30b   :  { %v2357_v5 = vpop.f32.mrf.mxu2 }
 0x30c   :  { %v2358_v12 = vadd.f32 %v2357_v5, %v2309_v52  ;;  %v2262_v48 = vpop.f32.mrf.mxu0  ;;  %v14170_v52 = vld [vmem:[#allocation54_spill] sm:$0xff] }
 0x30d   :  { %v2263_v14 = vadd.f32 %v2262_v48, %v11497_v63 }
 0x30e   :  { %v2406_v33 = vpop.f32.mrf.mxu3  ;;  %v2311_v32 = vpop.f32.mrf.mxu1 }
 0x30f   :  { %v11788_v60 = vadd.f32 %v2406_v33, %v2358_v12  ;;  %v2312_v61 = vadd.f32 %v2311_v32, %v2263_v14  ;;  %7651 = vmatmul.msk.bf16.gmra.mxu0 %vm1414_vm0, %v14167_v35 }
 0x310   :  { %2555 = vmatmul.bf16.gmra.mxu2 %v14169_v50 }
 0x311   :  { %2506 = vmatmul.bf16.gmra.mxu1 %v14168_v56 }
 0x313   :  { %2604 = vmatmul.bf16.gmra.mxu3 %v9897_v17  ;;  %v2360_v53 = vpop.f32.mrf.mxu2 }
 0x314   :  { %v2361_v39 = vadd.f32 %v2360_v53, %v2312_v61  ;;  %v2264_v40 = vpop.f32.mrf.mxu0 }
 0x315   :  { %v2265_v15 = vadd.f32 %v2264_v40, %v11516_v62  ;;  %v14172_v62 = vld [vmem:[#allocation31_spill] sm:$0xff] }
 0x316   :  { %v2409_v4 = vpop.f32.mrf.mxu3  ;;  %v2313_v63 = vpop.f32.mrf.mxu1 }
 0x317   :  { %v11796_v57 = vadd.f32 %v2409_v4, %v2361_v39  ;;  %v2314_v23 = vadd.f32 %v2313_v63, %v2265_v15  ;;  %v9178_v4 = vld [vmem:[%s13869_s2] sm:$0xf] }
 0x318   :  { %v11812_v40 = vperm.slane %v9178_v4, 3 }
 0x31b   :  { %v2362_v10 = vpop.f32.mrf.mxu2 }
 0x31c   :  { %v2363_v54 = vadd.f32 %v2362_v10, %v2314_v23  ;;  %v2267_v59 = vpop.f32.mrf.mxu0  ;;  %v14173_v23 = vld [vmem:[#allocation13_spill] sm:$0xff] }
 0x31d   :  { %v2268_v2 = vadd.f32 %v2267_v59, %v11564_v31 }
 0x31e   :  { %v2411_v27 = vpop.f32.mrf.mxu3  ;;  %v2316_v41 = vpop.f32.mrf.mxu1 }
 0x31f   :  { %v11799_v29 = vadd.f32 %v2411_v27, %v2363_v54  ;;  %v2317_v17 = vadd.f32 %v2316_v41, %v2268_v2  ;;  %7652 = vmatmul.msk.bf16.gmra.mxu0 %vm1414_vm0, %v14170_v52  ;;  %v14174_v54 = vld [vmem:[#allocation34_spill] sm:$0xff]  ;;  %v14175_v27 = vld [vmem:[#allocation35_spill] sm:$0xff] }
 0x320   :  { %2560 = vmatmul.bf16.gmra.mxu2 %v14172_v62 }
 0x321   :  { %2511 = vmatmul.bf16.gmra.mxu1 %v14171_v21 }
 0x323   :  { %2609 = vmatmul.bf16.gmra.mxu3 %v14142_v55  ;;  %v2365_v5 = vpop.f32.mrf.mxu2 }
 0x324   :  { %v2366_v12 = vadd.f32 %v2365_v5, %v2317_v17  ;;  %v2269_v48 = vpop.f32.mrf.mxu0 }
 0x325   :  { %v2270_v14 = vadd.f32 %v2269_v48, %v11593_v36 }
 0x326   :  { %v2414_v33 = vpop.f32.mrf.mxu3  ;;  %v2318_v31 = vpop.f32.mrf.mxu1 }
 0x327   :  { %v11807_v32 = vadd.f32 %v2414_v33, %v2366_v12  ;;  %v2319_v61 = vadd.f32 %v2318_v31, %v2270_v14 }
 0x32b   :  { %v2367_v56 = vpop.f32.mrf.mxu2 }
 0x32c   :  { %v2368_v50 = vadd.f32 %v2367_v56, %v2319_v61  ;;  %v2428_v39 = vpop.f32.mrf.mxu0 }
 0x32d   :  { %v11815_v55 = vadd.f32 %v2428_v39, %v11620_v6 }
 0x32e   :  { %v2416_v53 = vpop.f32.mrf.mxu3  ;;  %v2477_v15 = vpop.f32.mrf.mxu1 }
 0x32f   :  { %v11817_v63 = vadd.f32 %v2416_v53, %v2368_v50  ;;  %v2877_v36 = vmin.f32 %v11815_v55, 20.0  ;;  %2623 = vmatmul.bf16.vlgmr.msra.gmra.mxu0 %v14173_v23  ;;  %v2478_v10 = vadd.f32 %v2477_v15, %v11812_v40  ;;  %v14176_v15 = vld [vmem:[#allocation17_spill] sm:$0xff]  ;;  %vm2813_vm7 = vcmp.gt.f32.partialorder %v11815_v55, 20.0 }
 0x330   :  { %2721 = vmatmul.bf16.vlgmr.msra.gmra.mxu2 %v14175_v27  ;;  %v14177_v23 = vld [vmem:[#allocation37_spill] sm:$0xff] }
 0x331   :  { %2672 = vmatmul.bf16.vlgmr.msra.gmra.mxu1 %v14174_v54  ;;  %v2943_v59 = vmul.f32 1.442695, %v2877_v36 }
 0x333   :  { %7653 = vmatmul.msk.bf16.vlgmr.msra.gmra.mxu3 %vm1414_vm0, %v14085_v30  ;;  %8793 = vpow2.f32 %v2943_v59  ;;  %v2526_v6 = vpop.f32.mrf.mxu2 }
 0x334   :  { %v2527_v2 = vadd.f32 %v2526_v6, %v2478_v10  ;;  %v2430_v17 = vpop.f32.mrf.mxu0  ;;  %v14178_v10 = vld [vmem:[#allocation38_spill] sm:$0xff] }
 0x335   :  { %v11827_v21 = vadd.f32 %v2430_v17, %v11637_v13 }
 0x336   :  { %v2575_v41 = vpop.f32.mrf.mxu3  ;;  %v2479_v62 = vpop.f32.mrf.mxu1 }
 0x337   :  { %v11829_v5 = vadd.f32 %v2575_v41, %v2527_v2  ;;  %v2881_v12 = vmin.f32 %v11827_v21, 20.0  ;;  %v2480_v31 = vadd.f32 %v2479_v62, %v11812_v40  ;;  %vm2817_vm8 = vcmp.gt.f32.partialorder %v11827_v21, 20.0 }
 0x339   :  { %v8794_v33 = vpop.eup %8793  ;;  %v2951_v48 = vmul.f32 1.442695, %v2881_v12 }
 0x33a   :  { %v3085_v14 = vadd.f32 1.0, %v8794_v33  ;;  %v3088_v27 = vmul.f32 -0.5, %v8794_v33 }
 0x33b   :  { %8795 = vpow2.f32 %v2951_v48  ;;  %v2528_v30 = vpop.f32.mrf.mxu2 }
 0x33c   :  { %v2529_v61 = vadd.f32 %v2528_v30, %v2480_v31  ;;  %v2433_v50 = vpop.f32.mrf.mxu0  ;;  %8797 = vlog2.f32 %v3085_v14  ;;  %v3089_v48 = vadd.f32 1.0, %v3088_v27  ;;  %v3091_v30 = vand.u32 2147483647, %v8794_v33 }
 0x33d   :  { %v11834_v53 = vadd.f32 %v2433_v50, %v11663_v51 }
 0x33e   :  { %v2577_v56 = vpop.f32.mrf.mxu3  ;;  %v2482_v13 = vpop.f32.mrf.mxu1  ;;  %vm11853_vm5 = vcmp.lt.f32.partialorder %v3091_v30, 0.0004427343 }
 0x33f   :  { %v11836_v39 = vadd.f32 %v2577_v56, %v2529_v61  ;;  %v2885_v4 = vmin.f32 %v11834_v53, 20.0  ;;  %2628 = vmatmul.bf16.gmra.mxu0 %v14176_v15  ;;  %v2483_v36 = vadd.f32 %v2482_v13, %v11812_v40  ;;  %v3090_v15 = vmul.f32 %v8794_v33, %v3089_v48 }
 0x340   :  { %2726 = vmatmul.bf16.gmra.mxu2 %v14178_v10  ;;  %vm2821_vm11 = vcmp.gt.f32.partialorder %v11834_v53, 20.0 }
 0x341   :  { %2677 = vmatmul.bf16.gmra.mxu1 %v14177_v23  ;;  %v8796_v54 = vpop.eup %8795  ;;  %v2959_v59 = vmul.f32 1.442695, %v2885_v4 }
 0x342   :  { %v3121_v51 = vadd.f32 1.0, %v8796_v54  ;;  %v3124_v6 = vmul.f32 -0.5, %v8796_v54  ;;  %v8798_v41 = vpop.eup %8797  ;;  %v3127_v13 = vand.u32 2147483647, %v8796_v54 }
 0x343   :  { %7654 = vmatmul.msk.bf16.gmra.mxu3 %vm1414_vm0, %v14151_v20  ;;  %8799 = vpow2.f32 %v2959_v59  ;;  %v2531_v2 = vpop.f32.mrf.mxu2  ;;  %v3087_v56 = vmul.f32 0.6931472, %v8798_v41 }
 0x344   :  { %8801 = vlog2.f32 %v3121_v51  ;;  %v2532_v17 = vadd.f32 %v2531_v2, %v2483_v36  ;;  %v2435_v12 = vpop.f32.mrf.mxu0  ;;  %v3125_v50 = vadd.f32 1.0, %v3124_v6  ;;  %vm3128_vm6 = vcmp.lt.f32.partialorder %v3127_v13, 0.0004427343  ;;  %v8031_v13 = vld [vmem:[#allocation2 + $0x2e0] sm:$0xf] }
 0x345   :  { %v11846_v14 = vadd.f32 %v2435_v12, %v11672_v34  ;;  %v3093_v59 = vsel %vm11853_vm5, %v3090_v15, %v3087_v56  ;;  %v8591_v15 = vld [vmem:[#allocation2 + $0x2ec] sm:$0xf0] }
 0x346   :  { %v2580_v62 = vpop.f32.mrf.mxu3  ;;  %v2484_v31 = vpop.f32.mrf.mxu1  ;;  %v3126_v6 = vmul.f32 %v8796_v54, %v3125_v50 }
 0x347   :  { %v11848_v61 = vadd.f32 %v2580_v62, %v2532_v17  ;;  %v2889_v20 = vmin.f32 %v11846_v14, 20.0  ;;  %v2485_v27 = vadd.f32 %v2484_v31, %v11812_v40  ;;  %v3645_v31 = vsel %vm2813_vm7, %v11815_v55, %v3093_v59  ;;  %v8623_v59 = vld [vmem:[#allocation2 + $0x3ec] sm:$0xf0] }
 0x348   :  { %v8032_v55 = vor.u32 %v8591_v15, %v8031_v13  ;;  %vm2825_vm12 = vcmp.gt.f32.partialorder %v11846_v14, 20.0 }
 0x349   :  { %v11851_v4 = vpop.eup %8799  ;;  %v2967_v23 = vmul.f32 1.442695, %v2889_v20 }
 0x34a   :  { %v8802_v36 = vpop.eup %8801  ;;  %v3157_v34 = vadd.f32 1.0, %v11851_v4  ;;  %v3160_v50 = vmul.f32 -0.5, %v11851_v4  ;;  %4615 = vmatpush.bf16.msrb.mxu2 %v8032_v55 }
 0x34b   :  { %v3123_v51 = vmul.f32 0.6931472, %v8802_v36  ;;  %8803 = vpow2.f32 %v2967_v23  ;;  %v2533_v2 = vpop.f32.mrf.mxu2  ;;  %v8527_v23 = vld [vmem:[#allocation2 + $0xec] sm:$0xf0]  ;;  %v8159_v36 = vld [vmem:[#allocation2 + $0x3e0] sm:$0xf] }
 0x34c   :  { %v2534_v41 = vadd.f32 %v2533_v2, %v2485_v27  ;;  %v2438_v17 = vpop.f32.mrf.mxu0  ;;  %8805 = vlog2.f32 %v3157_v34  ;;  %v8559_v2 = vld [vmem:[#allocation2 + $0x1ec] sm:$0xf0] }
 0x34d   :  { %v3129_v62 = vsel %vm3128_vm6, %v3126_v6, %v3123_v51  ;;  %v11864_v12 = vadd.f32 %v2438_v17, %v11692_v18  ;;  %v8160_v6 = vor.u32 %v8623_v59, %v8159_v36 }
 0x34e   :  { %v2582_v33 = vpop.f32.mrf.mxu3  ;;  %v2487_v48 = vpop.f32.mrf.mxu1  ;;  %v3649_v30 = vsel %vm2817_vm8, %v11827_v21, %v3129_v62  ;;  %v7775_v21 = vld [vmem:[#allocation2 + $0xe0] sm:$0xf] }
 0x34f   :  { %v11868_v54 = vadd.f32 %v2582_v33, %v2534_v41  ;;  %v11870_v56 = vpack.c.bf16 %v3649_v30, %v3645_v31  ;;  %v2893_v20 = vmin.f32 %v11864_v12, 20.0  ;;  %2633 = vmatmul.bf16.gmra.mxu0 %v9683_v42  ;;  %v2488_v18 = vadd.f32 %v2487_v48, %v11812_v40  ;;  %v7903_v42 = vld [vmem:[#allocation2 + $0x1e0] sm:$0xf]  ;;  %4664 = vmatpush.bf16.msrb.mxu3 %v8160_v6 }
 0x350   :  { %2731 = vmatmul.bf16.gmra.mxu2 %v14096_v38  ;;  %v7776_v27 = vor.u32 %v8527_v23, %v7775_v21  ;;  %v7904_v38 = vor.u32 %v8559_v2, %v7903_v42  ;;  %v3161_v31 = vadd.f32 1.0, %v3160_v50  ;;  %vm2829_vm15 = vcmp.gt.f32.partialorder %v11864_v12, 20.0 }
 0x351   :  { %2682 = vmatmul.bf16.gmra.mxu1 %v10128_v11  ;;  %v8804_v10 = vpop.eup %8803  ;;  %v2975_v34 = vmul.f32 1.442695, %v2893_v20  ;;  %v3163_v20 = vand.u32 2147483647, %v11851_v4 }
 0x352   :  { %v3193_v51 = vadd.f32 1.0, %v8804_v10  ;;  %v3196_v41 = vmul.f32 -0.5, %v8804_v10  ;;  %4517 = vmatpush.bf16.msrb.mxu0 %v7776_v27  ;;  %v8806_v33 = vpop.eup %8805  ;;  %4566 = vmatpush.bf16.msrb.mxu1 %v7904_v38  ;;  %v3199_v23 = vand.u32 2147483647, %v8804_v10 }
 0x353   :  { %7655 = vmatmul.msk.bf16.gmra.mxu3 %vm1414_vm0, %v14155_v24  ;;  %8807 = vpow2.f32 %v2975_v34  ;;  %v2536_v11 = vpop.f32.mrf.mxu2  ;;  %v3159_v15 = vmul.f32 0.6931472, %v8806_v33  ;;  %vm11890_vm9 = vcmp.lt.f32.partialorder %v3163_v20, 0.0004427343 }
 0x354   :  { %8809 = vlog2.f32 %v3193_v51  ;;  %v2537_v17 = vadd.f32 %v2536_v11, %v2488_v18  ;;  %v2440_v48 = vpop.f32.mrf.mxu0  ;;  %v3197_v55 = vadd.f32 1.0, %v3196_v41  ;;  %v3162_v18 = vmul.f32 %v11851_v4, %v3161_v31 }
 0x355   :  { %v11881_v24 = vadd.f32 %v2440_v48, %v11701_v37  ;;  %vm3200_vm10 = vcmp.lt.f32.partialorder %v3199_v23, 0.0004427343  ;;  %v8143_v23 = vld [vmem:[#allocation2 + $0x3c0] sm:$0xf]  ;;  %v8619_v37 = vld [vmem:[#allocation2 + $0x3cc] sm:$0xf0] }
 0x356   :  { %v2585_v62 = vpop.f32.mrf.mxu3  ;;  %v2489_v30 = vpop.f32.mrf.mxu1  ;;  %v3165_v42 = vsel %vm11890_vm9, %v3162_v18, %v3159_v15  ;;  %v3198_v6 = vmul.f32 %v8804_v10, %v3197_v55  ;;  %v8015_v15 = vld [vmem:[#allocation2 + $0x2c0] sm:$0xf]  ;;  %v8587_v55 = vld [vmem:[#allocation2 + $0x2cc] sm:$0xf0] }
 0x357   :  { %v11884_v13 = vadd.f32 %v2585_v62, %v2537_v17  ;;  %v2897_v21 = vmin.f32 %v11881_v24, 20.0  ;;  %v2490_v59 = vadd.f32 %v2489_v30, %v11812_v40  ;;  %v3653_v62 = vsel %vm2821_vm11, %v11834_v53, %v3165_v42  ;;  %v8555_v42 = vld [vmem:[#allocation2 + $0x1cc] sm:$0xf0] }
 0x358   :  { %v8016_v53 = vor.u32 %v8587_v55, %v8015_v15  ;;  %vm2833_vm1 = vcmp.gt.f32.partialorder %v11881_v24, 20.0 }
 0x359   :  { %v11887_v36 = vpop.eup %8807  ;;  %v2983_v34 = vmul.f32 1.442695, %v2897_v21  ;;  %v8523_v21 = vld [vmem:[#allocation2 + $0xcc] sm:$0xf0] }
 0x35a   :  { %v8810_v50 = vpop.eup %8809  ;;  %v3229_v27 = vadd.f32 1.0, %v11887_v36  ;;  %v3232_v30 = vmul.f32 -0.5, %v11887_v36  ;;  %4616 = vmatpush.bf16.msrb.mxu2 %v8016_v53 }
 0x35b   :  { %v3195_v51 = vmul.f32 0.6931472, %v8810_v50  ;;  %8811 = vpow2.f32 %v2983_v34  ;;  %v2538_v2 = vpop.f32.mrf.mxu2 }
 0x35c   :  { %v2539_v41 = vadd.f32 %v2538_v2, %v2490_v59  ;;  %v2443_v11 = vpop.f32.mrf.mxu0  ;;  %8813 = vlog2.f32 %v3229_v27  ;;  %v8144_v59 = vor.u32 %v8619_v37, %v8143_v23 }
 0x35d   :  { %v3201_v38 = vsel %vm3200_vm10, %v3198_v6, %v3195_v51  ;;  %v11901_v33 = vadd.f32 %v2443_v11, %v11721_v44  ;;  %v3233_v11 = vadd.f32 1.0, %v3232_v30 }
 0x35e   :  { %v2587_v4 = vpop.f32.mrf.mxu3  ;;  %v2492_v17 = vpop.f32.mrf.mxu1  ;;  %v3657_v48 = vsel %vm2825_vm12, %v11846_v14, %v3201_v38  ;;  %v7759_v14 = vld [vmem:[#allocation2 + $0xc0] sm:$0xf]  ;;  %4665 = vmatpush.bf16.msrb.mxu3 %v8144_v59 }
 0x35f   :  { %v11905_v10 = vadd.f32 %v2587_v4, %v2539_v41  ;;  %v11907_v31 = vpack.c.bf16 %v3657_v48, %v3653_v62  ;;  %v2901_v20 = vmin.f32 %v11901_v33, 20.0  ;;  %2638 = vmatmul.bf16.gmra.mxu0 %v9737_v3  ;;  %v2493_v44 = vadd.f32 %v2492_v17, %v11812_v40  ;;  %v7887_v3 = vld [vmem:[#allocation2 + $0x1c0] sm:$0xf] }
 0x360   :  { %2736 = vmatmul.bf16.gmra.mxu2 %v14099_v49  ;;  %v7760_v50 = vor.u32 %v8523_v21, %v7759_v14  ;;  %v7888_v49 = vor.u32 %v8555_v42, %v7887_v3  ;;  %v3235_v17 = vand.u32 2147483647, %v11887_v36  ;;  %vm2837_vm3 = vcmp.gt.f32.partialorder %v11901_v33, 20.0 }
 0x361   :  { %2687 = vmatmul.bf16.gmra.mxu1 %v10187_v8  ;;  %v8812_v18 = vpop.eup %8811  ;;  %v2991_v34 = vmul.f32 1.442695, %v2901_v20 }
 0x362   :  { %v3265_v27 = vadd.f32 1.0, %v8812_v18  ;;  %v3268_v51 = vmul.f32 -0.5, %v8812_v18  ;;  %4518 = vmatpush.bf16.msrb.mxu0 %v7760_v50  ;;  %v8814_v6 = vpop.eup %8813  ;;  %4567 = vmatpush.bf16.msrb.mxu1 %v7888_v49  ;;  %v3271_v55 = vand.u32 2147483647, %v8812_v18  ;;  %vm11927_vm13 = vcmp.lt.f32.partialorder %v3235_v17, 0.0004427343 }
 0x363   :  { %7656 = vmatmul.msk.bf16.gmra.mxu3 %vm1414_vm0, %v14158_v19  ;;  %8815 = vpow2.f32 %v2991_v34  ;;  %v2541_v8 = vpop.f32.mrf.mxu2  ;;  %v3231_v48 = vmul.f32 0.6931472, %v8814_v6  ;;  %v7743_v17 = vld [vmem:[#allocation2 + $0xa0] sm:$0xf] }
 0x364   :  { %8817 = vlog2.f32 %v3265_v27  ;;  %v2542_v2 = vadd.f32 %v2541_v8, %v2493_v44  ;;  %v2445_v4 = vpop.f32.mrf.mxu0  ;;  %v3269_v20 = vadd.f32 1.0, %v3268_v51  ;;  %v3234_v44 = vmul.f32 %v11887_v36, %v3233_v11  ;;  %v7999_v11 = vld [vmem:[#allocation2 + $0x2a0] sm:$0xf] }
 0x365   :  { %v11918_v19 = vadd.f32 %v2445_v4, %v11730_v47  ;;  %vm3272_vm14 = vcmp.lt.f32.partialorder %v3271_v55, 0.0004427343 }
 0x366   :  { %v2590_v41 = vpop.f32.mrf.mxu3  ;;  %v2494_v38 = vpop.f32.mrf.mxu1  ;;  %v3237_v34 = vsel %vm11927_vm13, %v3234_v44, %v3231_v48  ;;  %v3270_v37 = vmul.f32 %v8812_v18, %v3269_v20  ;;  %v8519_v48 = vld [vmem:[#allocation2 + $0xac] sm:$0xf0]  ;;  %v8127_v20 = vld [vmem:[#allocation2 + $0x3a0] sm:$0xf] }
 0x367   :  { %v11921_v62 = vadd.f32 %v2590_v41, %v2542_v2  ;;  %v2905_v15 = vmin.f32 %v11918_v19, 20.0  ;;  %v2495_v23 = vadd.f32 %v2494_v38, %v11812_v40  ;;  %v3661_v49 = vsel %vm2829_vm15, %v11864_v12, %v3237_v34  ;;  %v8583_v38 = vld [vmem:[#allocation2 + $0x2ac] sm:$0xf0] }
 0x368   :  { %v14185_v12 = vld [vmem:[#allocation45_spill] sm:$0xff]  ;;  %v7744_v44 = vor.u32 %v8519_v48, %v7743_v17  ;;  %vm2841_vm4 = vcmp.gt.f32.partialorder %v11918_v19, 20.0 }
 0x369   :  { %v11924_v53 = vpop.eup %8815  ;;  %v2999_v14 = vmul.f32 1.442695, %v2905_v15 }
 0x36a   :  { %v8818_v30 = vpop.eup %8817  ;;  %v3301_v21 = vadd.f32 1.0, %v11924_v53  ;;  %v3304_v41 = vmul.f32 -0.5, %v11924_v53  ;;  %4519 = vmatpush.bf16.msrb.mxu0 %v7744_v44 }
 0x36b   :  { %v3267_v50 = vmul.f32 0.6931472, %v8818_v30  ;;  %8819 = vpow2.f32 %v2999_v14  ;;  %v2543_v3 = vpop.f32.mrf.mxu2  ;;  %v8615_v14 = vld [vmem:[#allocation2 + $0x3ac] sm:$0xf0] }
 0x36c   :  { %v2544_v27 = vadd.f32 %v2543_v3, %v2495_v23  ;;  %v2448_v59 = vpop.f32.mrf.mxu0  ;;  %8821 = vlog2.f32 %v3301_v21  ;;  %v8128_v47 = vor.u32 %v8615_v14, %v8127_v20  ;;  %v8551_v21 = vld [vmem:[#allocation2 + $0x1ac] sm:$0xf0]  ;;  %v7983_v14 = vld [vmem:[#allocation2 + $0x280] sm:$0xf] }
 0x36d   :  { %v3273_v42 = vsel %vm3272_vm14, %v3270_v37, %v3267_v50  ;;  %v11938_v51 = vadd.f32 %v2448_v59, %v11750_v16 }
 0x36e   :  { %v2592_v36 = vpop.f32.mrf.mxu3  ;;  %v2497_v8 = vpop.f32.mrf.mxu1  ;;  %v3665_v6 = vsel %vm2833_vm1, %v11881_v24, %v3273_v42  ;;  %v8000_v24 = vor.u32 %v8583_v38, %v7999_v11  ;;  %4666 = vmatpush.bf16.msrb.mxu3 %v8128_v47  ;;  %v3307_v42 = vand.u32 2147483647, %v11924_v53 }
 0x36f   :  { %v11942_v18 = vadd.f32 %v2592_v36, %v2544_v27  ;;  %v11944_v2 = vpack.c.bf16 %v3665_v6, %v3661_v49  ;;  %v2909_v4 = vmin.f32 %v11938_v51, 20.0  ;;  %2643 = vmatmul.bf16.gmra.mxu0 %v9791_v28  ;;  %v2498_v16 = vadd.f32 %v2497_v8, %v11812_v40  ;;  %v7871_v28 = vld [vmem:[#allocation2 + $0x1a0] sm:$0xf] }
 0x370   :  { %2741 = vmatmul.bf16.gmra.mxu2 %v14185_v12  ;;  %v7872_v34 = vor.u32 %v8551_v21, %v7871_v28  ;;  %v3305_v36 = vadd.f32 1.0, %v3304_v41  ;;  %vm11964_vm2 = vcmp.lt.f32.partialorder %v3307_v42, 0.0004427343  ;;  %v8579_v28 = vld [vmem:[#allocation2 + $0x28c] sm:$0xf0]  ;;  %vm2845_vm7 = vcmp.gt.f32.partialorder %v11938_v51, 20.0 }
 0x371   :  { %2692 = vmatmul.bf16.gmra.mxu1 %v14129_v46  ;;  %v8820_v15 = vpop.eup %8819  ;;  %v3007_v55 = vmul.f32 1.442695, %v2909_v4  ;;  %4617 = vmatpush.bf16.msrb.mxu2 %v8000_v24  ;;  %v7727_v21 = vld [vmem:[#allocation2 + $0x80] sm:$0xf] }
 0x372   :  { %v3337_v30 = vadd.f32 1.0, %v8820_v15  ;;  %v3340_v23 = vmul.f32 -0.5, %v8820_v15  ;;  %v8822_v50 = vpop.eup %8821  ;;  %4568 = vmatpush.bf16.msrb.mxu1 %v7872_v34  ;;  %v3343_v11 = vand.u32 2147483647, %v8820_v15  ;;  %v7984_v34 = vor.u32 %v8579_v28, %v7983_v14  ;;  %v8543_v28 = vld [vmem:[#allocation2 + $0x16c] sm:$0xf0] }
 0x373   :  { %7657 = vmatmul.msk.bf16.gmra.mxu3 %vm1414_vm0, %v14161_v1  ;;  %8823 = vpow2.f32 %v3007_v55  ;;  %v2546_v46 = vpop.f32.mrf.mxu2  ;;  %v3303_v49 = vmul.f32 0.6931472, %v8822_v50  ;;  %v8515_v50 = vld [vmem:[#allocation2 + $0x8c] sm:$0xf0] }
 0x374   :  { %8825 = vlog2.f32 %v3337_v30  ;;  %v2547_v37 = vadd.f32 %v2546_v46, %v2498_v16  ;;  %v2450_v27 = vpop.f32.mrf.mxu0  ;;  %v3341_v6 = vadd.f32 1.0, %v3340_v23  ;;  %v3306_v16 = vmul.f32 %v11924_v53, %v3305_v36 }
 0x375   :  { %v11955_v1 = vadd.f32 %v2450_v27, %v11759_v58  ;;  %vm3344_vm5 = vcmp.lt.f32.partialorder %v3343_v11, 0.0004427343  ;;  %4618 = vmatpush.bf16.msrb.mxu2 %v7984_v34  ;;  %v8575_v58 = vld [vmem:[#allocation2 + $0x26c] sm:$0xf0]  ;;  %v7695_v34 = vld [vmem:[#allocation2 + $0x40] sm:$0xf] }
 0x376   :  { %v2595_v3 = vpop.f32.mrf.mxu3  ;;  %v2499_v59 = vpop.f32.mrf.mxu1  ;;  %v3309_v48 = vsel %vm11964_vm2, %v3306_v16, %v3303_v49  ;;  %v3342_v55 = vmul.f32 %v8820_v15, %v3341_v6  ;;  %v8111_v6 = vld [vmem:[#allocation2 + $0x380] sm:$0xf] }
 0x377   :  { %v11958_v8 = vadd.f32 %v2595_v3, %v2547_v37  ;;  %v2913_v4 = vmin.f32 %v11955_v1, 20.0  ;;  %v2500_v17 = vadd.f32 %v2499_v59, %v11812_v40  ;;  %v7855_v37 = vld [vmem:[#allocation2 + $0x180] sm:$0xf]  ;;  %v8547_v3 = vld [vmem:[#allocation2 + $0x18c] sm:$0xf0]  ;;  %v3669_v27 = vsel %vm2837_vm3, %v11901_v33, %v3309_v48 }
 0x378   :  { %v14188_v16 = vld [vmem:[#allocation47_spill] sm:$0xff]  ;;  %vm2849_vm8 = vcmp.gt.f32.partialorder %v11955_v1, 20.0 }
 0x379   :  { %v11961_v38 = vpop.eup %8823  ;;  %v3015_v12 = vmul.f32 1.442695, %v2913_v4  ;;  %v8611_v4 = vld [vmem:[#allocation2 + $0x38c] sm:$0xf0] }
 0x37a   :  { %v8826_v41 = vpop.eup %8825  ;;  %v3373_v24 = vadd.f32 1.0, %v11961_v38  ;;  %v3376_v42 = vmul.f32 -0.5, %v11961_v38  ;;  %v8112_v33 = vor.u32 %v8611_v4, %v8111_v6 }
 0x37b   :  { %v3339_v20 = vmul.f32 0.6931472, %v8826_v41  ;;  %8827 = vpow2.f32 %v3015_v12  ;;  %v2548_v44 = vpop.f32.mrf.mxu2  ;;  %v14189_v12 = vld [vmem:[#allocation48_spill] sm:$0xff]  ;;  %v7967_v41 = vld [vmem:[#allocation2 + $0x260] sm:$0xf] }
 0x37c   :  { %v11974_v53 = vadd.f32 %v2548_v44, %v2500_v17  ;;  %v2453_v47 = vpop.f32.mrf.mxu0  ;;  %8829 = vlog2.f32 %v3373_v24  ;;  %v7711_v24 = vld [vmem:[#allocation2 + $0x60] sm:$0xf]  ;;  %4667 = vmatpush.bf16.msrb.mxu3 %v8112_v33  ;;  %v8571_v33 = vld [vmem:[#allocation2 + $0x24c] sm:$0xf0] }
 0x37d   :  { %v3345_v23 = vsel %vm3344_vm5, %v3342_v55, %v3339_v20  ;;  %v11979_v46 = vadd.f32 %v2453_v47, %v11779_v43  ;;  %v7728_v43 = vor.u32 %v8515_v50, %v7727_v21  ;;  %v8511_v20 = vld [vmem:[#allocation2 + $0x6c] sm:$0xf0]  ;;  %v7839_v55 = vld [vmem:[#allocation2 + $0x160] sm:$0xf] }
 0x37e   :  { %v11976_v30 = vpop.f32.mrf.mxu3  ;;  %v2502_v15 = vpop.f32.mrf.mxu1  ;;  %v3673_v36 = vsel %vm2841_vm4, %v11918_v19, %v3345_v23  ;;  %v7856_v19 = vor.u32 %v8547_v3, %v7855_v37  ;;  %v7712_v14 = vor.u32 %v8511_v20, %v7711_v24  ;;  %v8507_v50 = vld [vmem:[#allocation2 + $0x4c] sm:$0xf0]  ;;  %v3379_v37 = vand.u32 2147483647, %v11961_v38  ;;  %v7807_v20 = vld [vmem:[#allocation2 + $0x120] sm:$0xf] }
 0x37f   :  { %v11983_v59 = vpack.c.bf16 %v3673_v36, %v3669_v27  ;;  %v2917_v49 = vmin.f32 %v11979_v46, 20.0  ;;  %2648 = vmatmul.bf16.gmra.mxu0 %v14134_v26  ;;  %v2503_v11 = vadd.f32 %v2502_v15, %v11812_v40  ;;  %v7968_v26 = vor.u32 %v8575_v58, %v7967_v41 }
 0x380   :  { %2746 = vmatmul.bf16.gmra.mxu2 %v14189_v12  ;;  %4520 = vmatpush.bf16.msrb.mxu0 %v7728_v43  ;;  %v7840_v15 = vor.u32 %v8543_v28, %v7839_v55  ;;  %v7696_v4 = vor.u32 %v8507_v50, %v7695_v34  ;;  %v7951_v12 = vld [vmem:[#allocation2 + $0x240] sm:$0xf]  ;;  %v8535_v55 = vld [vmem:[#allocation2 + $0x12c] sm:$0xf0]  ;;  %vm12008_vm6 = vcmp.lt.f32.partialorder %v3379_v37, 0.0004427343 }
 0x381   :  { %2697 = vmatmul.bf16.gmra.mxu1 %v14188_v16  ;;  %v11991_v17 = vpop.eup %8827  ;;  %v3023_v48 = vmul.f32 1.442695, %v2917_v49  ;;  %4619 = vmatpush.bf16.msrb.mxu2 %v7968_v26  ;;  %v7823_v49 = vld [vmem:[#allocation2 + $0x140] sm:$0xf]  ;;  %v8539_v16 = vld [vmem:[#allocation2 + $0x14c] sm:$0xf0] }
 0x382   :  { %v3409_v44 = vadd.f32 1.0, %v11991_v17  ;;  %4569 = vmatpush.bf16.msrb.mxu1 %v7856_v19  ;;  %v8830_v47 = vpop.eup %8829  ;;  %v3412_v21 = vmul.f32 -0.5, %v11991_v17  ;;  %v3415_v41 = vand.u32 2147483647, %v11991_v17  ;;  %v7824_v24 = vor.u32 %v8539_v16, %v7823_v49  ;;  %v7679_v26 = vld [vmem:[#allocation2 + $0x20] sm:$0xf] }
 0x383   :  { %7658 = vmatmul.msk.bf16.gmra.mxu3 %vm1414_vm0, %v14164_v0  ;;  %8831 = vpow2.f32 %v3023_v48  ;;  %v2551_v23 = vpop.f32.mrf.mxu2  ;;  %v3377_v0 = vadd.f32 1.0, %v3376_v42  ;;  %v3375_v19 = vmul.f32 0.6931472, %v8830_v47  ;;  %v7952_v48 = vor.u32 %v8571_v33, %v7951_v12  ;;  %v8499_v16 = vld [vmem:[#allocation2 + $0xc] sm:$0xf0] }
 0x384   :  { %8833 = vlog2.f32 %v3409_v44  ;;  %v2552_v3 = vadd.f32 %v2551_v23, %v2503_v11  ;;  %v2455_v36 = vpop.f32.mrf.mxu0  ;;  %4521 = vmatpush.bf16.msrb.mxu0 %v7712_v14  ;;  %v3413_v58 = vadd.f32 1.0, %v3412_v21  ;;  %v7935_v44 = vld [vmem:[#allocation2 + $0x220] sm:$0xf]  ;;  %vm12019_vm9 = vcmp.lt.f32.partialorder %v3415_v41, 0.0004427343 }
 0x385   :  { %v11999_v43 = vadd.f32 %v2455_v36, %v11788_v60  ;;  %v8503_v60 = vld [vmem:[#allocation2 + $0x2c] sm:$0xf0]  ;;  %v3378_v28 = vmul.f32 %v11961_v38, %v3377_v0  ;;  %4620 = vmatpush.bf16.msrb.mxu2 %v7952_v48  ;;  %vm2853_vm12 = vcmp.gt.f32.partialorder %v11979_v46, 20.0 }
 0x386   :  { %v2600_v27 = vpop.f32.mrf.mxu3  ;;  %v2504_v6 = vpop.f32.mrf.mxu1  ;;  %4570 = vmatpush.bf16.msrb.mxu1 %v7840_v15  ;;  %v7680_v21 = vor.u32 %v8503_v60, %v7679_v26  ;;  %v8567_v15 = vld [vmem:[#allocation2 + $0x22c] sm:$0xf0]  ;;  %v3414_v37 = vmul.f32 %v11991_v17, %v3413_v58  ;;  %v7919_v26 = vld [vmem:[#allocation2 + $0x200] sm:$0xf] }
 0x387   :  { %v12002_v42 = vadd.f32 %v2600_v27, %v2552_v3  ;;  %v2921_v11 = vmin.f32 %v11999_v43, 20.0  ;;  %v2505_v3 = vadd.f32 %v2504_v6, %v11812_v40  ;;  %v7808_v27 = vor.u32 %v8535_v55, %v7807_v20  ;;  %v8531_v41 = vld [vmem:[#allocation2 + $0x10c] sm:$0xf0] }
 0x388   :  { %4522 = vmatpush.bf16.msrb.mxu0 %v7696_v4  ;;  %v7936_v36 = vor.u32 %v8567_v15, %v7935_v44  ;;  %v3381_v38 = vsel %vm12008_vm6, %v3378_v28, %v3375_v19  ;;  %v7663_v4 = vld [vmem:[#allocation2] sm:$0xf]  ;;  %v8563_v60 = vld [vmem:[#allocation2 + $0x20c] sm:$0xf0]  ;;  %vm2857_vm13 = vcmp.gt.f32.partialorder %v11999_v43, 20.0 }
 0x389   :  { %v12005_v14 = vpop.eup %8831  ;;  %v3031_v23 = vmul.f32 1.442695, %v2921_v11  ;;  %v7791_v11 = vld [vmem:[#allocation2 + $0x100] sm:$0xf]  ;;  %v7664_v48 = vor.u32 %v8499_v16, %v7663_v4  ;;  %v3677_v20 = vsel %vm2845_vm7, %v11938_v51, %v3381_v38  ;;  %v8607_v47 = vld [vmem:[#allocation2 + $0x36c] sm:$0xf0]  ;;  %v7920_v15 = vor.u32 %v8563_v60, %v7919_v26 }
 0x38a   :  { %v8834_v34 = vpop.eup %8833  ;;  %v3445_v50 = vadd.f32 1.0, %v12005_v14  ;;  %4571 = vmatpush.bf16.msrb.mxu1 %v7824_v24  ;;  %4621 = vmatpush.bf16.msrb.mxu2 %v7936_v36  ;;  %v8095_v28 = vld [vmem:[#allocation2 + $0x360] sm:$0xf] }
 0x38b   :  { %v3411_v0 = vmul.f32 0.6931472, %v8834_v34  ;;  %8835 = vpow2.f32 %v3031_v23  ;;  %v2553_v49 = vpop.f32.mrf.mxu2  ;;  %v7792_v23 = vor.u32 %v8531_v41, %v7791_v11  ;;  %v8096_v51 = vor.u32 %v8607_v47, %v8095_v28 }
 0x38c   :  { %v12023_v6 = vadd.f32 %v2553_v49, %v2505_v3  ;;  %v2458_v19 = vpop.f32.mrf.mxu0  ;;  %4523 = vmatpush.bf16.msrb.mxu0 %v7680_v21  ;;  %8837 = vlog2.f32 %v3445_v50  ;;  %v3448_v34 = vmul.f32 -0.5, %v12005_v14 }
 0x38d   :  { %v3417_v17 = vsel %vm12019_vm9, %v3414_v37, %v3411_v0  ;;  %v12030_v58 = vadd.f32 %v2458_v19, %v11796_v57  ;;  %4668 = vmatpush.bf16.msrb.mxu3 %v8096_v51 }
 0x38e   :  { %v12025_v33 = vpop.f32.mrf.mxu3  ;;  %v2507_v24 = vpop.f32.mrf.mxu1  ;;  %v3681_v55 = vsel %vm2849_vm8, %v11955_v1, %v3417_v17  ;;  %4572 = vmatpush.bf16.msrb.mxu1 %v7808_v27  ;;  %4622 = vmatpush.bf16.msrb.mxu2 %v7920_v15  ;;  %v3449_v0 = vadd.f32 1.0, %v3448_v34 }
 0x38f   :  { %v12038_v44 = vpack.c.bf16 %v3681_v55, %v3677_v20  ;;  %v2925_v57 = vmin.f32 %v12030_v58, 20.0  ;;  %2653 = vmatmul.bf16.gmra.mxu0 %v9899_v22  ;;  %v2508_v21 = vadd.f32 %v2507_v24, %v11812_v40  ;;  %vm2861_vm15 = vcmp.gt.f32.partialorder %v12030_v58, 20.0 }
 0x390   :  { %2751 = vmatmul.bf16.gmra.mxu2 %v14108_v9  ;;  %4524 = vmatpush.bf16.msrb.mxu0 %v7664_v48  ;;  %v3450_v24 = vmul.f32 %v12005_v14, %v3449_v0 }
 0x391   :  { %14194 = vst [vmem:[#allocation27_spill] sm:$0xff] %v12038_v44  ;;  %2702 = vmatmul.bf16.gmra.mxu1 %v10364_v7  ;;  %v8836_v1 = vpop.eup %8835  ;;  %v3039_v50 = vmul.f32 1.442695, %v2925_v57 }
 0x392   :  { %v3481_v22 = vadd.f32 1.0, %v8836_v1  ;;  %4573 = vmatpush.bf16.msrb.mxu1 %v7792_v23  ;;  %v3484_v3 = vmul.f32 -0.5, %v8836_v1  ;;  %v8838_v7 = vpop.eup %8837  ;;  %v3487_v11 = vand.u32 2147483647, %v8836_v1 }
 0x393   :  { %7659 = vmatmul.msk.bf16.gmra.mxu3 %vm1414_vm0, %v14167_v35  ;;  %8839 = vpow2.f32 %v3039_v50  ;;  %v2556_v27 = vpop.f32.mrf.mxu2  ;;  %v3451_v35 = vand.u32 2147483647, %v12005_v14  ;;  %v3447_v16 = vmul.f32 0.6931472, %v8838_v7  ;;  %v8603_v7 = vld [vmem:[#allocation2 + $0x34c] sm:$0xf0] }
 0x394   :  { %8841 = vlog2.f32 %v3481_v22  ;;  %v2557_v9 = vadd.f32 %v2556_v27, %v2508_v21  ;;  %v2460_v38 = vpop.f32.mrf.mxu0  ;;  %v3485_v12 = vadd.f32 1.0, %v3484_v3  ;;  %vm3488_vm11 = vcmp.lt.f32.partialorder %v3487_v11, 0.0004427343  ;;  %v14198_v3 = vld [vmem:[#allocation33_spill] sm:$0xff]  ;;  %v8079_v27 = vld [vmem:[#allocation2 + $0x340] sm:$0xf] }
 0x395   :  { %v12049_v37 = vadd.f32 %v2460_v38, %v11799_v29  ;;  %vm12056_vm10 = vcmp.lt.f32.partialorder %v3451_v35, 0.0004427343  ;;  %v8080_v38 = vor.u32 %v8603_v7, %v8079_v27 }
 0x396   :  { %v2605_v36 = vpop.f32.mrf.mxu3  ;;  %v2509_v49 = vpop.f32.mrf.mxu1  ;;  %v3453_v20 = vsel %vm12056_vm10, %v3450_v24, %v3447_v16  ;;  %v3486_v57 = vmul.f32 %v8836_v1, %v3485_v12 }
 0x397   :  { %v12052_v4 = vadd.f32 %v2605_v36, %v2557_v9  ;;  %v2929_v19 = vmin.f32 %v12049_v37, 20.0  ;;  %v2510_v60 = vadd.f32 %v2509_v49, %v11812_v40  ;;  %v3685_v34 = vsel %vm2853_vm12, %v11979_v46, %v3453_v20  ;;  %v14199_v36 = vld [vmem:[#allocation52_spill] sm:$0xff]  ;;  %4669 = vmatpush.bf16.msrb.mxu3 %v8080_v38 }
 0x398   :  { %vm2865_vm1 = vcmp.gt.f32.partialorder %v12049_v37, 20.0 }
 0x399   :  { %v8840_v17 = vpop.eup %8839  ;;  %v3047_v48 = vmul.f32 1.442695, %v2929_v19 }
 0x39a   :  { %v8842_v41 = vpop.eup %8841  ;;  %v3517_v29 = vadd.f32 1.0, %v8840_v17  ;;  %v3520_v46 = vmul.f32 -0.5, %v8840_v17 }
 0x39b   :  { %v3483_v55 = vmul.f32 0.6931472, %v8842_v41  ;;  %8843 = vpow2.f32 %v3047_v48  ;;  %v2558_v28 = vpop.f32.mrf.mxu2 }
 0x39c   :  { %v12063_v47 = vadd.f32 %v2558_v28, %v2510_v60  ;;  %v2463_v23 = vpop.f32.mrf.mxu0  ;;  %8845 = vlog2.f32 %v3517_v29  ;;  %v3521_v48 = vadd.f32 1.0, %v3520_v46  ;;  %v3523_v29 = vand.u32 2147483647, %v8840_v17 }
 0x39d   :  { %v3489_v21 = vsel %vm3488_vm11, %v3486_v57, %v3483_v55  ;;  %v12070_v51 = vadd.f32 %v2463_v23, %v11807_v32  ;;  %v14200_v32 = vld [vmem:[#allocation53_spill] sm:$0xff] }
 0x39e   :  { %v12065_v14 = vpop.f32.mrf.mxu3  ;;  %v2512_v15 = vpop.f32.mrf.mxu1  ;;  %v3689_v1 = vsel %vm2857_vm13, %v11999_v43, %v3489_v21  ;;  %v3522_v23 = vmul.f32 %v8840_v17, %v3521_v48 }
 0x39f   :  { %v12074_v50 = vpack.c.bf16 %v3689_v1, %v3685_v34  ;;  %v2933_v22 = vmin.f32 %v12070_v51, 20.0  ;;  %2658 = vmatmul.bf16.gmra.mxu0 %v14198_v3  ;;  %v2513_v9 = vadd.f32 %v2512_v15, %v11812_v40  ;;  %vm2869_vm4 = vcmp.gt.f32.partialorder %v12070_v51, 20.0 }
 0x3a0   :  { %2756 = vmatmul.bf16.gmra.mxu2 %v14200_v32 }
 0x3a1   :  { %14197 = vst [vmem:[#allocation32_spill] sm:$0xff] %v12074_v50  ;;  %2707 = vmatmul.bf16.gmra.mxu1 %v14199_v36  ;;  %v8844_v0 = vpop.eup %8843  ;;  %v3055_v49 = vmul.f32 1.442695, %v2933_v22 }
 0x3a2   :  { %v3553_v43 = vadd.f32 1.0, %v8844_v0  ;;  %v3556_v35 = vmul.f32 -0.5, %v8844_v0  ;;  %v8846_v12 = vpop.eup %8845  ;;  %v3559_v57 = vand.u32 2147483647, %v8844_v0 }
 0x3a3   :  { %7660 = vmatmul.msk.bf16.gmra.mxu3 %vm1414_vm0, %v14170_v52  ;;  %8847 = vpow2.f32 %v3055_v49  ;;  %v2561_v16 = vpop.f32.mrf.mxu2  ;;  %v3519_v20 = vmul.f32 0.6931472, %v8846_v12  ;;  %vm12089_vm0 = vcmp.lt.f32.partialorder %v3523_v29, 0.0004427343  ;;  %v14204_v12 = vld [vmem:[#allocation40_spill] sm:$0xff] }
 0x3a4   :  { %8849 = vlog2.f32 %v3553_v43  ;;  %v2562_v19 = vadd.f32 %v2561_v16, %v2513_v9  ;;  %v2465_v24 = vpop.f32.mrf.mxu0  ;;  %v3557_v52 = vadd.f32 1.0, %v3556_v35  ;;  %vm3560_vm14 = vcmp.lt.f32.partialorder %v3559_v57, 0.0004427343  ;;  %v14203_v43 = vld [vmem:[#allocation56_spill] sm:$0xff]  ;;  %v8063_v35 = vld [vmem:[#allocation2 + $0x320] sm:$0xf] }
 0x3a5   :  { %v12084_v41 = vadd.f32 %v2465_v24, %v11817_v63  ;;  %v3525_v22 = vsel %vm12089_vm0, %v3522_v23, %v3519_v20  ;;  %v8599_v16 = vld [vmem:[#allocation2 + $0x32c] sm:$0xf0]  ;;  %v8047_v23 = vld [vmem:[#allocation2 + $0x300] sm:$0xf] }
 0x3a6   :  { %v2610_v11 = vpop.f32.mrf.mxu3  ;;  %v2514_v26 = vpop.f32.mrf.mxu1  ;;  %v3558_v27 = vmul.f32 %v8844_v0, %v3557_v52 }
 0x3a7   :  { %v12086_v60 = vadd.f32 %v2610_v11, %v2562_v19  ;;  %v2937_v55 = vmin.f32 %v12084_v41, 20.0  ;;  %v2515_v63 = vadd.f32 %v2514_v26, %v11812_v40  ;;  %v3693_v40 = vsel %vm2861_vm15, %v12030_v58, %v3525_v22 }
 0x3a8   :  { %v8064_v19 = vor.u32 %v8599_v16, %v8063_v35  ;;  %vm2873_vm5 = vcmp.gt.f32.partialorder %v12084_v41, 20.0 }
 0x3a9   :  { %v8848_v28 = vpop.eup %8847  ;;  %v3063_v21 = vmul.f32 1.442695, %v2937_v55 }
 0x3aa   :  { %v8850_v15 = vpop.eup %8849  ;;  %v3589_v1 = vadd.f32 1.0, %v8848_v28  ;;  %v3592_v24 = vmul.f32 -0.5, %v8848_v28  ;;  %4670 = vmatpush.bf16.msrb.mxu3 %v8064_v19 }
 0x3ab   :  { %v3555_v3 = vmul.f32 0.6931472, %v8850_v15  ;;  %8851 = vpow2.f32 %v3063_v21  ;;  %v2563_v7 = vpop.f32.mrf.mxu2  ;;  %v8595_v21 = vld [vmem:[#allocation2 + $0x30c] sm:$0xf0]  ;;  %v3595_v15 = vand.u32 2147483647, %v8848_v28 }
 0x3ac   :  { %v12096_v9 = vadd.f32 %v2563_v7, %v2515_v63  ;;  %v2624_v36 = vpop.f32.mrf.mxu0  ;;  %8853 = vlog2.f32 %v3589_v1  ;;  %v3593_v55 = vadd.f32 1.0, %v3592_v24  ;;  %v8048_v63 = vor.u32 %v8595_v21, %v8047_v23 }
 0x3ad   :  { %v3561_v32 = vsel %vm3560_vm14, %v3558_v27, %v3555_v3  ;;  %v2625_v0 = vadd.f32 %v2624_v36, %v11829_v5  ;;  %vm12114_vm2 = vcmp.lt.f32.partialorder %v3595_v15, 0.0004427343 }
 0x3ae   :  { %v12098_v17 = vpop.f32.mrf.mxu3  ;;  %v2673_v38 = vpop.f32.mrf.mxu1  ;;  %v3697_v46 = vsel %vm2865_vm1, %v12049_v37, %v3561_v32  ;;  %4671 = vmatpush.bf16.msrb.mxu3 %v8048_v63  ;;  %v3594_v36 = vmul.f32 %v8848_v28, %v3593_v55  ;;  %v14208_v55 = vld [vmem:[#allocation42_spill] sm:$0xff] }
 0x3af   :  { %v12105_v49 = vpack.c.bf16 %v3697_v46, %v3693_v40  ;;  %4525 = vmatmul.bf16.vlgmr.msrb.gmra.mxu0 %v14203_v43  ;;  %v2674_v58 = vadd.f32 %v2673_v38, %v2625_v0 }
 0x3b0   :  { %4623 = vmatmul.bf16.vlgmr.msrb.gmra.mxu2 %v11870_v56 }
 0x3b1   :  { %4574 = vmatmul.bf16.vlgmr.msrb.gmra.mxu1 %v14204_v12  ;;  %v8852_v11 = vpop.eup %8851 }
 0x3b2   :  { %v3625_v48 = vadd.f32 1.0, %v8852_v11  ;;  %v3628_v37 = vmul.f32 -0.5, %v8852_v11  ;;  %v8854_v29 = vpop.eup %8853  ;;  %v3631_v27 = vand.u32 2147483647, %v8852_v11 }
 0x3b3   :  { %v2722_v26 = vpop.f32.mrf.mxu2  ;;  %v3591_v22 = vmul.f32 0.6931472, %v8854_v29 }
 0x3b4   :  { %8855 = vlog2.f32 %v3625_v48  ;;  %v2723_v5 = vadd.f32 %v2722_v26, %v2674_v58  ;;  %v2626_v52 = vpop.f32.mrf.mxu0  ;;  %v3629_v3 = vadd.f32 1.0, %v3628_v37  ;;  %vm3632_vm3 = vcmp.lt.f32.partialorder %v3631_v27, 0.0004427343 }
 0x3b5   :  { %v2627_v1 = vadd.f32 %v2626_v52, %v11836_v39  ;;  %v3597_v0 = vsel %vm12114_vm2, %v3594_v36, %v3591_v22 }
 0x3b6   :  { %v2771_v20 = vpop.f32.mrf.mxu3  ;;  %v2675_v57 = vpop.f32.mrf.mxu1  ;;  %v3630_v39 = vmul.f32 %v8852_v11, %v3629_v3  ;;  %v3701_v37 = vsel %vm2869_vm4, %v12070_v51, %v3597_v0 }
 0x3b7   :  { %v12110_v34 = vadd.f32 %v2771_v20, %v2723_v5  ;;  %v2676_v46 = vadd.f32 %v2675_v57, %v2627_v1  ;;  %v14207_v20 = vld [vmem:[#allocation57_spill] sm:$0xff] }
 0x3b9   :  { %v2878_v7 = vmin.f32 %v12110_v34, 20.0  ;;  %vm2814_vm7 = vcmp.gt.f32.partialorder %v12110_v34, 20.0 }
 0x3ba   :  { %v8856_v32 = vpop.eup %8855 }
 0x3bb   :  { %v2945_v40 = vmul.f32 1.442695, %v2878_v7  ;;  %v3627_v35 = vmul.f32 0.6931472, %v8856_v32  ;;  %v2724_v16 = vpop.f32.mrf.mxu2 }
 0x3bc   :  { %v2725_v19 = vadd.f32 %v2724_v16, %v2676_v46  ;;  %v2629_v48 = vpop.f32.mrf.mxu0 }
 0x3bd   :  { %8857 = vpow2.f32 %v2945_v40  ;;  %v3633_v28 = vsel %vm3632_vm3, %v3630_v39, %v3627_v35  ;;  %v2630_v11 = vadd.f32 %v2629_v48, %v11848_v61 }
 0x3be   :  { %v2773_v24 = vpop.f32.mrf.mxu3  ;;  %v2678_v58 = vpop.f32.mrf.mxu1  ;;  %v3705_v26 = vsel %vm2873_vm5, %v12084_v41, %v3633_v28 }
 0x3bf   :  { %v12124_v29 = vadd.f32 %v2773_v24, %v2725_v19  ;;  %v12127_v5 = vpack.c.bf16 %v3705_v26, %v3701_v37  ;;  %4530 = vmatmul.bf16.gmra.mxu0 %v14207_v20  ;;  %v2679_v21 = vadd.f32 %v2678_v58, %v2630_v11  ;;  %v14209_v26 = vld [vmem:[#allocation58_spill] sm:$0xff]  ;;  %v8589_v11 = vld [vmem:[#allocation2 + $0x2e4] sm:$0xf] }
 0x3c0   :  { %4628 = vmatmul.bf16.gmra.mxu2 %v11907_v31 }
 0x3c1   :  { %v2882_v52 = vmin.f32 %v12124_v29, 20.0  ;;  %4579 = vmatmul.bf16.gmra.mxu1 %v14208_v55  ;;  %vm2818_vm9 = vcmp.gt.f32.partialorder %v12124_v29, 20.0 }
 0x3c3   :  { %v8858_v57 = vpop.eup %8857  ;;  %v2953_v23 = vmul.f32 1.442695, %v2882_v52  ;;  %v2727_v15 = vpop.f32.mrf.mxu2  ;;  %v8033_v52 = vld [vmem:[#allocation2 + $0x2f0] sm:$0xf0] }
 0x3c4   :  { %v3094_v51 = vadd.f32 1.0, %v8858_v57  ;;  %v2728_v41 = vadd.f32 %v2727_v15, %v2679_v21  ;;  %v2631_v63 = vpop.f32.mrf.mxu0  ;;  %v3097_v7 = vmul.f32 -0.5, %v8858_v57  ;;  %v3100_v58 = vand.u32 2147483647, %v8858_v57  ;;  %v14210_v15 = vld [vmem:[#allocation50_spill] sm:$0xff] }
 0x3c5   :  { %8859 = vpow2.f32 %v2953_v23  ;;  %v2632_v3 = vadd.f32 %v2631_v63, %v11868_v54  ;;  %v8525_v23 = vld [vmem:[#allocation2 + $0xe4] sm:$0xf] }
 0x3c6   :  { %v2776_v1 = vpop.f32.mrf.mxu3  ;;  %8861 = vlog2.f32 %v3094_v51  ;;  %v2680_v61 = vpop.f32.mrf.mxu1  ;;  %v3098_v24 = vadd.f32 1.0, %v3097_v7  ;;  %v8621_v63 = vld [vmem:[#allocation2 + $0x3e4] sm:$0xf]  ;;  %v8161_v7 = vld [vmem:[#allocation2 + $0x3f0] sm:$0xf0] }
 0x3c7   :  { %v12133_v22 = vadd.f32 %v2776_v1, %v2728_v41  ;;  %v2681_v38 = vadd.f32 %v2680_v61, %v2632_v3  ;;  %v8036_v41 = vor.u32 %v8589_v11, %v8033_v52  ;;  %v7777_v1 = vld [vmem:[#allocation2 + $0xf0] sm:$0xf0]  ;;  %vm12146_vm6 = vcmp.lt.f32.partialorder %v3100_v58, 0.0004427343 }
 0x3c8   :  { %v3099_v61 = vmul.f32 %v8858_v57, %v3098_v24 }
 0x3c9   :  { %v2886_v27 = vmin.f32 %v12133_v22, 20.0  ;;  %4811 = vmatpush.bf16.msra.mxu2 %v8036_v41  ;;  %v8557_v41 = vld [vmem:[#allocation2 + $0x1e4] sm:$0xf]  ;;  %vm2822_vm11 = vcmp.gt.f32.partialorder %v12133_v22, 20.0 }
 0x3cb   :  { %v8860_v36 = vpop.eup %8859  ;;  %v2961_v32 = vmul.f32 1.442695, %v2886_v27  ;;  %v2729_v0 = vpop.f32.mrf.mxu2  ;;  %v7780_v27 = vor.u32 %v8525_v23, %v7777_v1  ;;  %v7905_v1 = vld [vmem:[#allocation2 + $0x1f0] sm:$0xf0] }
 0x3cc   :  { %v8862_v40 = vpop.eup %8861  ;;  %v3130_v46 = vadd.f32 1.0, %v8860_v36  ;;  %v3133_v35 = vmul.f32 -0.5, %v8860_v36  ;;  %v2730_v39 = vadd.f32 %v2729_v0, %v2681_v38  ;;  %v2634_v19 = vpop.f32.mrf.mxu0  ;;  %v3136_v3 = vand.u32 2147483647, %v8860_v36 }
 0x3cd   :  { %8863 = vpow2.f32 %v2961_v32  ;;  %v3096_v28 = vmul.f32 0.6931472, %v8862_v40  ;;  %v2635_v37 = vadd.f32 %v2634_v19, %v11884_v13  ;;  %4713 = vmatpush.bf16.msra.mxu0 %v7780_v27 }
 0x3ce   :  { %v2778_v16 = vpop.f32.mrf.mxu3  ;;  %8865 = vlog2.f32 %v3130_v46  ;;  %v2683_v48 = vpop.f32.mrf.mxu1  ;;  %v3134_v21 = vadd.f32 1.0, %v3133_v35  ;;  %v8164_v46 = vor.u32 %v8621_v63, %v8161_v7  ;;  %vm3137_vm8 = vcmp.lt.f32.partialorder %v3136_v3, 0.0004427343 }
 0x3cf   :  { %v12137_v54 = vadd.f32 %v2778_v16, %v2730_v39  ;;  %4535 = vmatmul.bf16.gmra.mxu0 %v14209_v26  ;;  %v2684_v40 = vadd.f32 %v2683_v48, %v2635_v37  ;;  %v3102_v35 = vsel %vm12146_vm6, %v3099_v61, %v3096_v28  ;;  %v7908_v61 = vor.u32 %v8557_v41, %v7905_v1  ;;  %v8617_v41 = vld [vmem:[#allocation2 + $0x3c4] sm:$0xf] }
 0x3d0   :  { %4633 = vmatmul.bf16.gmra.mxu2 %v11944_v2  ;;  %v3135_v19 = vmul.f32 %v8860_v36, %v3134_v21  ;;  %4860 = vmatpush.bf16.msra.mxu3 %v8164_v46  ;;  %v3646_v23 = vsel %vm2814_vm7, %v12110_v34, %v3102_v35 }
 0x3d1   :  { %v2890_v51 = vmin.f32 %v12137_v54, 20.0  ;;  %4584 = vmatmul.bf16.gmra.mxu1 %v14210_v15  ;;  %vm2826_vm13 = vcmp.gt.f32.partialorder %v12137_v54, 20.0 }
 0x3d2   :  { %4762 = vmatpush.bf16.msra.mxu1 %v7908_v61 }
 0x3d3   :  { %v12144_v13 = vpop.eup %8863  ;;  %v2969_v38 = vmul.f32 1.442695, %v2890_v51  ;;  %v2732_v57 = vpop.f32.mrf.mxu2 }
 0x3d4   :  { %v8866_v0 = vpop.eup %8865  ;;  %v3166_v39 = vadd.f32 1.0, %v12144_v13  ;;  %v2733_v24 = vadd.f32 %v2732_v57, %v2684_v40  ;;  %v2636_v11 = vpop.f32.mrf.mxu0  ;;  %v3169_v63 = vmul.f32 -0.5, %v12144_v13  ;;  %v3172_v57 = vand.u32 2147483647, %v12144_v13 }
 0x3d5   :  { %v3132_v16 = vmul.f32 0.6931472, %v8866_v0  ;;  %8867 = vpow2.f32 %v2969_v38  ;;  %v2637_v52 = vadd.f32 %v2636_v11, %v11905_v10  ;;  %v8017_v11 = vld [vmem:[#allocation2 + $0x2d0] sm:$0xf0] }
 0x3d6   :  { %v2781_v58 = vpop.f32.mrf.mxu3  ;;  %8869 = vlog2.f32 %v3166_v39  ;;  %v2685_v48 = vpop.f32.mrf.mxu1  ;;  %v3170_v0 = vadd.f32 1.0, %v3169_v63  ;;  %vm12176_vm10 = vcmp.lt.f32.partialorder %v3172_v57, 0.0004427343 }
 0x3d7   :  { %v3138_v37 = vsel %vm3137_vm8, %v3135_v19, %v3132_v16  ;;  %v12155_v28 = vadd.f32 %v2781_v58, %v2733_v24  ;;  %v2686_v7 = vadd.f32 %v2685_v48, %v2637_v52  ;;  %v14213_v24 = vld [vmem:[#allocation59_spill] sm:$0xff] }
 0x3d8   :  { %v3650_v36 = vsel %vm2818_vm9, %v12124_v29, %v3138_v37  ;;  %v8585_v58 = vld [vmem:[#allocation2 + $0x2c4] sm:$0xf]  ;;  %v3171_v1 = vmul.f32 %v12144_v13, %v3170_v0 }
 0x3d9   :  { %v12160_v21 = vpack.c.bf16 %v3650_v36, %v3646_v23  ;;  %v2894_v51 = vmin.f32 %v12155_v28, 20.0  ;;  %v8521_v48 = vld [vmem:[#allocation2 + $0xc4] sm:$0xf]  ;;  %v14214_v23 = vld [vmem:[#allocation12_spill] sm:$0xff]  ;;  %v8020_v36 = vor.u32 %v8585_v58, %v8017_v11  ;;  %vm2830_vm14 = vcmp.gt.f32.partialorder %v12155_v28, 20.0 }
 0x3db   :  { %v8868_v3 = vpop.eup %8867  ;;  %v2977_v27 = vmul.f32 1.442695, %v2894_v51  ;;  %4672 = vmatmul.bf16.vlgmr.msrb.gmra.mxu3 %v12160_v21  ;;  %v2734_v38 = vpop.f32.mrf.mxu2  ;;  %v7761_v51 = vld [vmem:[#allocation2 + $0xd0] sm:$0xf0]  ;;  %4812 = vmatpush.bf16.msra.mxu2 %v8020_v36 }
 0x3dc   :  { %v8870_v32 = vpop.eup %8869  ;;  %v3202_v10 = vadd.f32 1.0, %v8868_v3  ;;  %v3205_v34 = vmul.f32 -0.5, %v8868_v3  ;;  %v2735_v29 = vadd.f32 %v2734_v38, %v2686_v7  ;;  %v2639_v46 = vpop.f32.mrf.mxu0  ;;  %v3208_v63 = vand.u32 2147483647, %v8868_v3 }
 0x3dd   :  { %8871 = vpow2.f32 %v2977_v27  ;;  %v3168_v39 = vmul.f32 0.6931472, %v8870_v32  ;;  %v2640_v19 = vadd.f32 %v2639_v46, %v11921_v62  ;;  %v7764_v61 = vor.u32 %v8521_v48, %v7761_v51  ;;  %v8145_v62 = vld [vmem:[#allocation2 + $0x3d0] sm:$0xf0]  ;;  %v8553_v51 = vld [vmem:[#allocation2 + $0x1c4] sm:$0xf] }
 0x3de   :  { %v2783_v40 = vpop.f32.mrf.mxu3  ;;  %8873 = vlog2.f32 %v3202_v10  ;;  %v2688_v35 = vpop.f32.mrf.mxu1  ;;  %v3206_v37 = vadd.f32 1.0, %v3205_v34  ;;  %v8148_v38 = vor.u32 %v8617_v41, %v8145_v62  ;;  %vm3209_vm12 = vcmp.lt.f32.partialorder %v3208_v63, 0.0004427343  ;;  %v7889_v41 = vld [vmem:[#allocation2 + $0x1d0] sm:$0xf0] }
 0x3df   :  { %v12166_v16 = vadd.f32 %v2783_v40, %v2735_v29  ;;  %4540 = vmatmul.bf16.gmra.mxu0 %v14213_v24  ;;  %v2689_v10 = vadd.f32 %v2688_v35, %v2640_v19  ;;  %v3174_v29 = vsel %vm12176_vm10, %v3171_v1, %v3168_v39  ;;  %v7892_v63 = vor.u32 %v8553_v51, %v7889_v41  ;;  %v7745_v51 = vld [vmem:[#allocation2 + $0xb0] sm:$0xf0]  ;;  %v8613_v41 = vld [vmem:[#allocation2 + $0x3a4] sm:$0xf] }
 0x3e0   :  { %4638 = vmatmul.bf16.gmra.mxu2 %v11983_v59  ;;  %4714 = vmatpush.bf16.msra.mxu0 %v7764_v61  ;;  %v3207_v0 = vmul.f32 %v8868_v3, %v3206_v37 }
 0x3e1   :  { %v2898_v52 = vmin.f32 %v12166_v16, 20.0  ;;  %4589 = vmatmul.bf16.gmra.mxu1 %v14214_v23  ;;  %4861 = vmatpush.bf16.msra.mxu3 %v8148_v38  ;;  %vm2834_vm1 = vcmp.gt.f32.partialorder %v12166_v16, 20.0 }
 0x3e2   :  { %4763 = vmatpush.bf16.msra.mxu1 %v7892_v63 }
 0x3e3   :  { %v12174_v27 = vpop.eup %8871  ;;  %v2985_v32 = vmul.f32 1.442695, %v2898_v52  ;;  %v2737_v13 = vpop.f32.mrf.mxu2  ;;  %v3654_v52 = vsel %vm2822_vm11, %v12133_v22, %v3174_v29 }
 0x3e4   :  { %v8874_v34 = vpop.eup %8873  ;;  %v3238_v40 = vadd.f32 1.0, %v12174_v27  ;;  %v2738_v58 = vadd.f32 %v2737_v13, %v2689_v10  ;;  %v2641_v11 = vpop.f32.mrf.mxu0  ;;  %v3241_v1 = vmul.f32 -0.5, %v12174_v27 }
 0x3e5   :  { %v3204_v46 = vmul.f32 0.6931472, %v8874_v34  ;;  %8875 = vpow2.f32 %v2985_v32  ;;  %v2642_v48 = vadd.f32 %v2641_v11, %v11942_v18  ;;  %v8581_v11 = vld [vmem:[#allocation2 + $0x2a4] sm:$0xf] }
 0x3e6   :  { %v2786_v57 = vpop.f32.mrf.mxu3  ;;  %8877 = vlog2.f32 %v3238_v40  ;;  %v2690_v35 = vpop.f32.mrf.mxu1  ;;  %v3242_v29 = vadd.f32 1.0, %v3241_v1 }
 0x3e7   :  { %v3210_v19 = vsel %vm3209_vm12, %v3207_v0, %v3204_v46  ;;  %v12185_v39 = vadd.f32 %v2786_v57, %v2738_v58  ;;  %v2691_v7 = vadd.f32 %v2690_v35, %v2642_v48  ;;  %v3244_v46 = vand.u32 2147483647, %v12174_v27  ;;  %v14218_v57 = vld [vmem:[#allocation60_spill] sm:$0xff]  ;;  %v8001_v35 = vld [vmem:[#allocation2 + $0x2b0] sm:$0xf0] }
 0x3e8   :  { %v3658_v3 = vsel %vm2826_vm13, %v12137_v54, %v3210_v19  ;;  %v8517_v19 = vld [vmem:[#allocation2 + $0xa4] sm:$0xf]  ;;  %v3243_v1 = vmul.f32 %v12174_v27, %v3242_v29 }
 0x3e9   :  { %v12190_v37 = vpack.c.bf16 %v3658_v3, %v3654_v52  ;;  %v2902_v36 = vmin.f32 %v12185_v39, 20.0  ;;  %v14219_v3 = vld [vmem:[#allocation44_spill] sm:$0xff]  ;;  %vm12206_vm0 = vcmp.lt.f32.partialorder %v3244_v46, 0.0004427343  ;;  %vm2838_vm3 = vcmp.gt.f32.partialorder %v12185_v39, 20.0 }
 0x3eb   :  { %14217 = vst [vmem:[#allocation55_spill] sm:$0xff] %v12190_v37  ;;  %v8876_v61 = vpop.eup %8875  ;;  %v2993_v62 = vmul.f32 1.442695, %v2902_v36  ;;  %4677 = vmatmul.bf16.gmra.mxu3 %v12190_v37  ;;  %v2739_v10 = vpop.f32.mrf.mxu2  ;;  %v8004_v36 = vor.u32 %v8581_v11, %v8001_v35 }
 0x3ec   :  { %v8878_v32 = vpop.eup %8877  ;;  %v3274_v18 = vadd.f32 1.0, %v8876_v61  ;;  %v3277_v22 = vmul.f32 -0.5, %v8876_v61  ;;  %v2740_v54 = vadd.f32 %v2739_v10, %v2691_v7  ;;  %v2644_v34 = vpop.f32.mrf.mxu0  ;;  %v3280_v63 = vand.u32 2147483647, %v8876_v61 }
 0x3ed   :  { %8879 = vpow2.f32 %v2993_v62  ;;  %v3240_v13 = vmul.f32 0.6931472, %v8878_v32  ;;  %v2645_v58 = vadd.f32 %v2644_v34, %v11958_v8  ;;  %v7748_v62 = vor.u32 %v8517_v19, %v7745_v51  ;;  %v8129_v8 = vld [vmem:[#allocation2 + $0x3b0] sm:$0xf0]  ;;  %4813 = vmatpush.bf16.msra.mxu2 %v8004_v36  ;;  %v8549_v36 = vld [vmem:[#allocation2 + $0x1a4] sm:$0xf] }
 0x3ee   :  { %v2788_v38 = vpop.f32.mrf.mxu3  ;;  %8881 = vlog2.f32 %v3274_v18  ;;  %v2693_v40 = vpop.f32.mrf.mxu1  ;;  %v3278_v48 = vadd.f32 1.0, %v3277_v22  ;;  %v8132_v22 = vor.u32 %v8613_v41, %v8129_v8  ;;  %vm3281_vm15 = vcmp.lt.f32.partialorder %v3280_v63, 0.0004427343  ;;  %v7873_v51 = vld [vmem:[#allocation2 + $0x1b0] sm:$0xf0] }
 0x3ef   :  { %v12196_v0 = vadd.f32 %v2788_v38, %v2740_v54  ;;  %4545 = vmatmul.bf16.gmra.mxu0 %v14218_v57  ;;  %v2694_v10 = vadd.f32 %v2693_v40, %v2645_v58  ;;  %v2598_v38 = vadd.f32 %v11976_v30, %v11974_v53  ;;  %v3246_v27 = vsel %vm12206_vm0, %v3243_v1, %v3240_v13 }
 0x3f0   :  { %4643 = vmatmul.bf16.gmra.mxu2 %v12038_v44  ;;  %4715 = vmatpush.bf16.msra.mxu0 %v7748_v62  ;;  %v3279_v46 = vmul.f32 %v8876_v61, %v3278_v48  ;;  %v3662_v58 = vsel %vm2830_vm14, %v12155_v28, %v3246_v27  ;;  %v7876_v62 = vor.u32 %v8549_v36, %v7873_v51  ;;  %v8545_v36 = vld [vmem:[#allocation2 + $0x184] sm:$0xf]  ;;  %v7857_v51 = vld [vmem:[#allocation2 + $0x190] sm:$0xf0] }
 0x3f1   :  { %v2906_v52 = vmin.f32 %v12196_v0, 20.0  ;;  %4594 = vmatmul.bf16.gmra.mxu1 %v14219_v3  ;;  %4862 = vmatpush.bf16.msra.mxu3 %v8132_v22  ;;  %vm2842_vm4 = vcmp.gt.f32.partialorder %v12196_v0, 20.0 }
 0x3f2   :  { %4764 = vmatpush.bf16.msra.mxu1 %v7876_v62  ;;  %v8113_v62 = vld [vmem:[#allocation2 + $0x390] sm:$0xf0] }
 0x3f3   :  { %v12204_v7 = vpop.eup %8879  ;;  %v3001_v18 = vmul.f32 1.442695, %v2906_v52  ;;  %v2742_v29 = vpop.f32.mrf.mxu2 }
 0x3f4   :  { %v8882_v54 = vpop.eup %8881  ;;  %v3310_v34 = vadd.f32 1.0, %v12204_v7  ;;  %v2743_v35 = vadd.f32 %v2742_v29, %v2694_v10  ;;  %v2646_v52 = vpop.f32.mrf.mxu0  ;;  %v3316_v48 = vand.u32 2147483647, %v12204_v7  ;;  %v3313_v1 = vmul.f32 -0.5, %v12204_v7 }
 0x3f5   :  { %v3276_v11 = vmul.f32 0.6931472, %v8882_v54  ;;  %8883 = vpow2.f32 %v3001_v18  ;;  %v2647_v13 = vadd.f32 %v2646_v52, %v2598_v38  ;;  %v8577_v54 = vld [vmem:[#allocation2 + $0x284] sm:$0xf] }
 0x3f6   :  { %v2791_v19 = vpop.f32.mrf.mxu3  ;;  %8885 = vlog2.f32 %v3310_v34  ;;  %v2695_v40 = vpop.f32.mrf.mxu1  ;;  %vm12229_vm2 = vcmp.lt.f32.partialorder %v3316_v48, 0.0004427343  ;;  %v3314_v38 = vadd.f32 1.0, %v3313_v1  ;;  %v14225_v1 = vld [vmem:[#allocation61_spill] sm:$0xff] }
 0x3f7   :  { %v3282_v53 = vsel %vm3281_vm15, %v3279_v46, %v3276_v11  ;;  %v12217_v30 = vadd.f32 %v2791_v19, %v2743_v35  ;;  %v2696_v18 = vadd.f32 %v2695_v40, %v2647_v13  ;;  %v7985_v46 = vld [vmem:[#allocation2 + $0x290] sm:$0xf0]  ;;  %v8513_v35 = vld [vmem:[#allocation2 + $0x84] sm:$0xf] }
 0x3f8   :  { %v3666_v61 = vsel %vm2834_vm1, %v12166_v16, %v3282_v53  ;;  %v7729_v53 = vld [vmem:[#allocation2 + $0x90] sm:$0xf0] }
 0x3f9   :  { %v12222_v41 = vpack.c.bf16 %v3666_v61, %v3662_v58  ;;  %v2910_v63 = vmin.f32 %v12217_v30, 20.0  ;;  %v7988_v61 = vor.u32 %v8577_v54, %v7985_v46  ;;  %v7732_v48 = vor.u32 %v8513_v35, %v7729_v53  ;;  %v7713_v46 = vld [vmem:[#allocation2 + $0x70] sm:$0xf0]  ;;  %v8541_v35 = vld [vmem:[#allocation2 + $0x164] sm:$0xf] }
 0x3fa   :  { %v3315_v54 = vmul.f32 %v12204_v7, %v3314_v38  ;;  %v7841_v53 = vld [vmem:[#allocation2 + $0x170] sm:$0xf0]  ;;  %vm2846_vm7 = vcmp.gt.f32.partialorder %v12217_v30, 20.0 }
 0x3fb   :  { %14222 = vst [vmem:[#allocation39_spill] sm:$0xff] %v12222_v41  ;;  %v12226_v8 = vpop.eup %8883  ;;  %v3009_v32 = vmul.f32 1.442695, %v2910_v63  ;;  %4682 = vmatmul.bf16.gmra.mxu3 %v12222_v41  ;;  %v2744_v22 = vpop.f32.mrf.mxu2  ;;  %v8609_v63 = vld [vmem:[#allocation2 + $0x384] sm:$0xf]  ;;  %4814 = vmatpush.bf16.msra.mxu2 %v7988_v61 }
 0x3fc   :  { %v8886_v28 = vpop.eup %8885  ;;  %v3346_v10 = vadd.f32 1.0, %v12226_v8  ;;  %v3349_v27 = vmul.f32 -0.5, %v12226_v8  ;;  %v2745_v34 = vadd.f32 %v2744_v22, %v2696_v18  ;;  %v2649_v11 = vpop.f32.mrf.mxu0  ;;  %v3352_v52 = vand.u32 2147483647, %v12226_v8  ;;  %v8573_v18 = vld [vmem:[#allocation2 + $0x264] sm:$0xf]  ;;  %4716 = vmatpush.bf16.msra.mxu0 %v7732_v48 }
 0x3fd   :  { %8887 = vpow2.f32 %v3009_v32  ;;  %v12235_v19 = vmul.f32 0.6931472, %v8886_v28  ;;  %v2650_v58 = vadd.f32 %v2649_v11, %v12002_v42  ;;  %v7860_v32 = vor.u32 %v8545_v36, %v7857_v51  ;;  %v14226_v22 = vld [vmem:[#allocation26_spill] sm:$0xff]  ;;  %v8509_v42 = vld [vmem:[#allocation2 + $0x64] sm:$0xf] }
 0x3fe   :  { %v2793_v29 = vpop.f32.mrf.mxu3  ;;  %8889 = vlog2.f32 %v3346_v10  ;;  %v2698_v40 = vpop.f32.mrf.mxu1  ;;  %v3350_v28 = vadd.f32 1.0, %v3349_v27  ;;  %v8505_v48 = vld [vmem:[#allocation2 + $0x44] sm:$0xf]  ;;  %vm12257_vm5 = vcmp.lt.f32.partialorder %v3352_v52, 0.0004427343 }
 0x3ff   :  { %v12238_v13 = vadd.f32 %v2793_v29, %v2745_v34  ;;  %4550 = vmatmul.bf16.gmra.mxu0 %v14225_v1  ;;  %v8116_v34 = vor.u32 %v8609_v63, %v8113_v62  ;;  %v7969_v29 = vld [vmem:[#allocation2 + $0x270] sm:$0xf0]  ;;  %v2699_v51 = vadd.f32 %v2698_v40, %v2650_v58  ;;  %4765 = vmatpush.bf16.msra.mxu1 %v7860_v32 }
 0x400   :  { %4648 = vmatmul.bf16.gmra.mxu2 %v12074_v50  ;;  %v7972_v11 = vor.u32 %v8573_v18, %v7969_v29  ;;  %v7844_v1 = vor.u32 %v8541_v35, %v7841_v53  ;;  %v2603_v63 = vadd.f32 %v12025_v33, %v12023_v6  ;;  %v3318_v7 = vsel %vm12229_vm2, %v3315_v54, %v12235_v19  ;;  %v7953_v54 = vld [vmem:[#allocation2 + $0x250] sm:$0xf0]  ;;  %v8533_v53 = vld [vmem:[#allocation2 + $0x124] sm:$0xf] }
 0x401   :  { %v2914_v10 = vmin.f32 %v12238_v13, 20.0  ;;  %4599 = vmatmul.bf16.gmra.mxu1 %v14226_v22  ;;  %4863 = vmatpush.bf16.msra.mxu3 %v8116_v34  ;;  %v7716_v22 = vor.u32 %v8509_v42, %v7713_v46  ;;  %v3351_v40 = vmul.f32 %v12226_v8, %v3350_v28  ;;  %v8537_v34 = vld [vmem:[#allocation2 + $0x144] sm:$0xf]  ;;  %v3670_v52 = vsel %vm2838_vm3, %v12185_v39, %v3318_v7  ;;  %v7681_v35 = vld [vmem:[#allocation2 + $0x30] sm:$0xf0] }
 0x402   :  { %4815 = vmatpush.bf16.msra.mxu2 %v7972_v11  ;;  %v8569_v42 = vld [vmem:[#allocation2 + $0x244] sm:$0xf]  ;;  %v7937_v39 = vld [vmem:[#allocation2 + $0x230] sm:$0xf0]  ;;  %vm2850_vm8 = vcmp.gt.f32.partialorder %v12238_v13, 20.0 }
 0x403   :  { %v12246_v36 = vpop.eup %8887  ;;  %v3017_v27 = vmul.f32 1.442695, %v2914_v10  ;;  %v2747_v61 = vpop.f32.mrf.mxu2  ;;  %v7697_v10 = vld [vmem:[#allocation2 + $0x50] sm:$0xf0]  ;;  %4717 = vmatpush.bf16.msra.mxu0 %v7716_v22  ;;  %4766 = vmatpush.bf16.msra.mxu1 %v7844_v1  ;;  %v7956_v22 = vor.u32 %v8569_v42, %v7953_v54  ;;  %v8501_v46 = vld [vmem:[#allocation2 + $0x24] sm:$0xf] }
 0x404   :  { %v8890_v50 = vpop.eup %8889  ;;  %v3382_v38 = vadd.f32 1.0, %v12246_v36  ;;  %v2748_v58 = vadd.f32 %v2747_v61, %v2699_v51  ;;  %v2651_v18 = vpop.f32.mrf.mxu0  ;;  %v7700_v28 = vor.u32 %v8505_v48, %v7697_v10  ;;  %v7809_v51 = vld [vmem:[#allocation2 + $0x130] sm:$0xf0]  ;;  %v7684_v61 = vor.u32 %v8501_v46, %v7681_v35  ;;  %v8497_v10 = vld [vmem:[#allocation2 + $0x4] sm:$0xf] }
 0x405   :  { %v3348_v62 = vmul.f32 0.6931472, %v8890_v50  ;;  %8891 = vpow2.f32 %v3017_v27  ;;  %v2652_v33 = vadd.f32 %v2651_v18, %v2603_v63  ;;  %v7825_v50 = vld [vmem:[#allocation2 + $0x150] sm:$0xf0]  ;;  %v8565_v63 = vld [vmem:[#allocation2 + $0x224] sm:$0xf] }
 0x406   :  { %v2796_v32 = vpop.f32.mrf.mxu3  ;;  %8893 = vlog2.f32 %v3382_v38  ;;  %v2700_v16 = vpop.f32.mrf.mxu1  ;;  %v7828_v29 = vor.u32 %v8537_v34, %v7825_v50  ;;  %v3385_v38 = vmul.f32 -0.5, %v12246_v36  ;;  %4816 = vmatpush.bf16.msra.mxu2 %v7956_v22  ;;  %v7793_v46 = vld [vmem:[#allocation2 + $0x110] sm:$0xf0]  ;;  %v8561_v35 = vld [vmem:[#allocation2 + $0x204] sm:$0xf] }
 0x407   :  { %v3354_v8 = vsel %vm12257_vm5, %v3351_v40, %v3348_v62  ;;  %v12263_v19 = vadd.f32 %v2796_v32, %v2748_v58  ;;  %4718 = vmatpush.bf16.msra.mxu0 %v7700_v28  ;;  %v7812_v62 = vor.u32 %v8533_v53, %v7809_v51  ;;  %v7940_v40 = vor.u32 %v8565_v63, %v7937_v39  ;;  %v7665_v28 = vld [vmem:[#allocation2 + $0x10] sm:$0xf0]  ;;  %v14230_v53 = vld [vmem:[#allocation36_spill] sm:$0xff] }
 0x408   :  { %v3674_v11 = vsel %vm2842_vm4, %v12196_v0, %v3354_v8  ;;  %v2701_v0 = vadd.f32 %v2700_v16, %v2652_v33  ;;  %4767 = vmatpush.bf16.msra.mxu1 %v7828_v29  ;;  %v3386_v42 = vadd.f32 1.0, %v3385_v38  ;;  %v3388_v33 = vand.u32 2147483647, %v12246_v36  ;;  %v8529_v29 = vld [vmem:[#allocation2 + $0x104] sm:$0xf] }
 0x409   :  { %v12271_v27 = vpack.c.bf16 %v3674_v11, %v3670_v52  ;;  %v2918_v1 = vmin.f32 %v12263_v19, 20.0  ;;  %v7668_v22 = vor.u32 %v8497_v10, %v7665_v28  ;;  %v8097_v51 = vld [vmem:[#allocation2 + $0x370] sm:$0xf0]  ;;  %v7796_v63 = vor.u32 %v8529_v29, %v7793_v46 }
 0x40a   :  { %4817 = vmatpush.bf16.msra.mxu2 %v7940_v40  ;;  %v7921_v38 = vld [vmem:[#allocation2 + $0x210] sm:$0xf0]  ;;  %vm12290_vm6 = vcmp.lt.f32.partialorder %v3388_v33, 0.0004427343  ;;  %vm2854_vm11 = vcmp.gt.f32.partialorder %v12263_v19, 20.0 }
 0x40b   :  { %14229 = vst [vmem:[#allocation14_spill] sm:$0xff] %v12271_v27  ;;  %v12275_v7 = vpop.eup %8891  ;;  %v3025_v48 = vmul.f32 1.442695, %v2918_v1  ;;  %4687 = vmatmul.bf16.gmra.mxu3 %v12271_v27  ;;  %v2749_v18 = vpop.f32.mrf.mxu2  ;;  %4719 = vmatpush.bf16.msra.mxu0 %v7684_v61  ;;  %v8605_v1 = vld [vmem:[#allocation2 + $0x364] sm:$0xf] }
 0x40c   :  { %v8894_v58 = vpop.eup %8893  ;;  %v3418_v32 = vadd.f32 1.0, %v12275_v7  ;;  %v3421_v34 = vmul.f32 -0.5, %v12275_v7  ;;  %v2750_v6 = vadd.f32 %v2749_v18, %v2701_v0  ;;  %v2654_v8 = vpop.f32.mrf.mxu0  ;;  %4768 = vmatpush.bf16.msra.mxu1 %v7812_v62  ;;  %v7924_v0 = vor.u32 %v8561_v35, %v7921_v38 }
 0x40d   :  { %8895 = vpow2.f32 %v3025_v48  ;;  %v3384_v54 = vmul.f32 0.6931472, %v8894_v58  ;;  %v2655_v11 = vadd.f32 %v2654_v8, %v12052_v4  ;;  %v8100_v48 = vor.u32 %v8605_v1, %v8097_v51 }
 0x40e   :  { %v2798_v50 = vpop.f32.mrf.mxu3  ;;  %8897 = vlog2.f32 %v3418_v32  ;;  %v2703_v16 = vpop.f32.mrf.mxu1  ;;  %v3422_v39 = vadd.f32 1.0, %v3421_v34  ;;  %v3387_v4 = vmul.f32 %v12246_v36, %v3386_v42  ;;  %v3424_v62 = vand.u32 2147483647, %v12275_v7  ;;  %4818 = vmatpush.bf16.msra.mxu2 %v7924_v0 }
 0x40f   :  { %v12281_v52 = vadd.f32 %v2798_v50, %v2750_v6  ;;  %4555 = vmatmul.bf16.gmra.mxu0 %v14230_v53  ;;  %v2704_v18 = vadd.f32 %v2703_v16, %v2655_v11  ;;  %4864 = vmatpush.bf16.msra.mxu3 %v8100_v48  ;;  %v2608_v34 = vadd.f32 %v12065_v14, %v12063_v47 }
 0x410   :  { %4653 = vmatmul.bf16.gmra.mxu2 %v12105_v49  ;;  %4720 = vmatpush.bf16.msra.mxu0 %v7668_v22  ;;  %v3390_v6 = vsel %vm12290_vm6, %v3387_v4, %v3384_v54  ;;  %v3423_v28 = vmul.f32 %v12275_v7, %v3422_v39  ;;  %vm3425_vm9 = vcmp.lt.f32.partialorder %v3424_v62, 0.0004427343 }
 0x411   :  { %v2922_v61 = vmin.f32 %v12281_v52, 20.0  ;;  %4604 = vmatmul.bf16.gmra.mxu1 %v11603_v25  ;;  %v3678_v11 = vsel %vm2846_vm7, %v12217_v30, %v3390_v6  ;;  %v8601_v6 = vld [vmem:[#allocation2 + $0x344] sm:$0xf]  ;;  %vm2858_vm12 = vcmp.gt.f32.partialorder %v12281_v52, 20.0 }
 0x412   :  { %4769 = vmatpush.bf16.msra.mxu1 %v7796_v63 }
 0x413   :  { %v8896_v40 = vpop.eup %8895  ;;  %v3033_v32 = vmul.f32 1.442695, %v2922_v61  ;;  %v2752_v50 = vpop.f32.mrf.mxu2 }
 0x414   :  { %v8898_v10 = vpop.eup %8897  ;;  %v3454_v36 = vadd.f32 1.0, %v8896_v40  ;;  %v2753_v42 = vadd.f32 %v2752_v50, %v2704_v18  ;;  %v2656_v29 = vpop.f32.mrf.mxu0  ;;  %v3457_v35 = vmul.f32 -0.5, %v8896_v40  ;;  %v3460_v58 = vand.u32 2147483647, %v8896_v40 }
 0x415   :  { %v3420_v8 = vmul.f32 0.6931472, %v8898_v10  ;;  %8899 = vpow2.f32 %v3033_v32  ;;  %v2657_v54 = vadd.f32 %v2656_v29, %v2608_v34  ;;  %v14233_v34 = vld [vmem:[#allocation11_spill] sm:$0xff] }
 0x416   :  { %v2801_v33 = vpop.f32.mrf.mxu3  ;;  %v2705_v16 = vpop.f32.mrf.mxu1  ;;  %8901 = vlog2.f32 %v3454_v36  ;;  %v3458_v62 = vadd.f32 1.0, %v3457_v35  ;;  %v8081_v36 = vld [vmem:[#allocation2 + $0x350] sm:$0xf0]  ;;  %vm12318_vm10 = vcmp.lt.f32.partialorder %v3460_v58, 0.0004427343 }
 0x417   :  { %v3426_v47 = vsel %vm3425_vm9, %v3423_v28, %v3420_v8  ;;  %v12301_v14 = vadd.f32 %v2801_v33, %v2753_v42  ;;  %v2706_v63 = vadd.f32 %v2705_v16, %v2657_v54  ;;  %v8084_v28 = vor.u32 %v8601_v6, %v8081_v36  ;;  %v8065_v58 = vld [vmem:[#allocation2 + $0x330] sm:$0xf0] }
 0x418   :  { %v3682_v22 = vsel %vm2850_vm8, %v12238_v13, %v3426_v47  ;;  %v3459_v42 = vmul.f32 %v8896_v40, %v3458_v62 }
 0x419   :  { %v12305_v7 = vpack.c.bf16 %v3682_v22, %v3678_v11  ;;  %v2926_v46 = vmin.f32 %v12301_v14, 20.0  ;;  %4865 = vmatpush.bf16.msra.mxu3 %v8084_v28  ;;  %v2613_v11 = vadd.f32 %v12098_v17, %v12096_v9  ;;  %v8049_v28 = vld [vmem:[#allocation2 + $0x310] sm:$0xf0]  ;;  %vm2862_vm15 = vcmp.gt.f32.partialorder %v12301_v14, 20.0 }
 0x41b   :  { %v8900_v1 = vpop.eup %8899  ;;  %v3041_v51 = vmul.f32 1.442695, %v2926_v46  ;;  %4692 = vmatmul.bf16.gmra.mxu3 %v12305_v7  ;;  %v2754_v39 = vpop.f32.mrf.mxu2 }
 0x41c   :  { %v3490_v38 = vadd.f32 1.0, %v8900_v1  ;;  %v8902_v61 = vpop.eup %8901  ;;  %v3493_v48 = vmul.f32 -0.5, %v8900_v1  ;;  %v2755_v0 = vadd.f32 %v2754_v39, %v2706_v63  ;;  %v2659_v30 = vpop.f32.mrf.mxu0  ;;  %v3496_v33 = vand.u32 2147483647, %v8900_v1 }
 0x41d   :  { %8903 = vpow2.f32 %v3041_v51  ;;  %v2660_v18 = vadd.f32 %v2659_v30, %v12086_v60  ;;  %v3456_v10 = vmul.f32 0.6931472, %v8902_v61 }
 0x41e   :  { %v2803_v4 = vpop.f32.mrf.mxu3  ;;  %8905 = vlog2.f32 %v3490_v38  ;;  %v2708_v13 = vpop.f32.mrf.mxu1  ;;  %v3494_v50 = vadd.f32 1.0, %v3493_v48  ;;  %vm3497_vm13 = vcmp.lt.f32.partialorder %v3496_v33, 0.0004427343 }
 0x41f   :  { %v12309_v32 = vadd.f32 %v2803_v4, %v2755_v0  ;;  %4560 = vmatmul.bf16.gmra.mxu0 %v14233_v34  ;;  %v2709_v47 = vadd.f32 %v2708_v13, %v2660_v18  ;;  %v3462_v22 = vsel %vm12318_vm10, %v3459_v42, %v3456_v10  ;;  %v12334_v0 = vld [vmem:[%s13871_s4] sm:$0xf]  ;;  %v8597_v13 = vld [vmem:[#allocation2 + $0x324] sm:$0xf] }
 0x420   :  { %4658 = vmatmul.bf16.gmra.mxu2 %v12127_v5  ;;  %v3495_v51 = vmul.f32 %v8900_v1, %v3494_v50  ;;  %v3686_v1 = vsel %vm2854_vm11, %v12263_v19, %v3462_v22  ;;  %v12343_v10 = vperm.slane %v12334_v0, 0  ;;  %v8068_v6 = vor.u32 %v8597_v13, %v8065_v58  ;;  %v8593_v19 = vld [vmem:[#allocation2 + $0x304] sm:$0xf] }
 0x421   :  { %v2930_v8 = vmin.f32 %v12309_v32, 20.0  ;;  %4609 = vmatmul.bf16.gmra.mxu1 %v11647_v45  ;;  %v8052_v33 = vor.u32 %v8593_v19, %v8049_v28  ;;  %vm2866_vm1 = vcmp.gt.f32.partialorder %v12309_v32, 20.0 }
 0x422   :  { %4866 = vmatpush.bf16.msra.mxu3 %v8068_v6 }
 0x423   :  { %v12316_v29 = vpop.eup %8903  ;;  %v3049_v60 = vmul.f32 1.442695, %v2930_v8  ;;  %v2757_v40 = vpop.f32.mrf.mxu2 }
 0x424   :  { %v8906_v54 = vpop.eup %8905  ;;  %v3526_v46 = vadd.f32 1.0, %v12316_v29  ;;  %v2758_v63 = vadd.f32 %v2757_v40, %v2709_v47  ;;  %v2661_v39 = vpop.f32.mrf.mxu0  ;;  %v3529_v18 = vmul.f32 -0.5, %v12316_v29 }
 0x425   :  { %v3492_v35 = vmul.f32 0.6931472, %v8906_v54  ;;  %8907 = vpow2.f32 %v3049_v60  ;;  %v2662_v17 = vadd.f32 %v2661_v39, %v2613_v11 }
 0x426   :  { %v2806_v38 = vpop.f32.mrf.mxu3  ;;  %v2710_v61 = vpop.f32.mrf.mxu1  ;;  %8909 = vlog2.f32 %v3526_v46  ;;  %v3530_v11 = vadd.f32 1.0, %v3529_v18  ;;  %4867 = vmatpush.bf16.msra.mxu3 %v8052_v33 }
 0x427   :  { %v3498_v48 = vsel %vm3497_vm13, %v3495_v51, %v3492_v35  ;;  %v12329_v9 = vadd.f32 %v2806_v38, %v2758_v63  ;;  %v2711_v8 = vadd.f32 %v2710_v61, %v2662_v17  ;;  %v3532_v35 = vand.u32 2147483647, %v12316_v29 }
 0x428   :  { %v3690_v4 = vsel %vm2858_vm12, %v12281_v52, %v3498_v48  ;;  %v3531_v48 = vmul.f32 %v12316_v29, %v3530_v11 }
 0x429   :  { %v12338_v30 = vpack.c.bf16 %v3690_v4, %v3686_v1  ;;  %v2934_v62 = vmin.f32 %v12329_v9, 20.0  ;;  %vm12355_vm0 = vcmp.lt.f32.partialorder %v3532_v35, 0.0004427343  ;;  %v8528_v35 = vld [vmem:[#allocation2 + $0xf4] sm:$0xf0]  ;;  %vm2870_vm4 = vcmp.gt.f32.partialorder %v12329_v9, 20.0 }
 0x42b   :  { %v8908_v36 = vpop.eup %8907  ;;  %v3057_v50 = vmul.f32 1.442695, %v2934_v62  ;;  %4697 = vmatmul.bf16.gmra.mxu3 %v12338_v30  ;;  %v2759_v42 = vpop.f32.mrf.mxu2 }
 0x42c   :  { %v3562_v52 = vadd.f32 1.0, %v8908_v36  ;;  %v8910_v16 = vpop.eup %8909  ;;  %v3565_v60 = vmul.f32 -0.5, %v8908_v36  ;;  %v2760_v47 = vadd.f32 %v2759_v42, %v2711_v8  ;;  %v4526_v54 = vpop.f32.mrf.mxu0  ;;  %v3568_v17 = vand.u32 2147483647, %v8908_v36 }
 0x42d   :  { %8911 = vpow2.f32 %v3057_v50  ;;  %v4527_v46 = vadd.f32 %v4526_v54, %v12343_v10  ;;  %v3528_v63 = vmul.f32 0.6931472, %v8910_v16 }
 0x42e   :  { %8913 = vlog2.f32 %v3562_v52  ;;  %v2808_v22 = vpop.f32.mrf.mxu3  ;;  %v4575_v40 = vpop.f32.mrf.mxu1  ;;  %v3566_v39 = vadd.f32 1.0, %v3565_v60  ;;  %vm3569_vm14 = vcmp.lt.f32.partialorder %v3568_v17, 0.0004427343 }
 0x42f   :  { %v12348_v51 = vadd.f32 %v2808_v22, %v2760_v47  ;;  %v4576_v38 = vadd.f32 %v4575_v40, %v4527_v46  ;;  %4721 = vmatmul.bf16.vlgmr.msra.gmra.mxu0 %v14203_v43  ;;  %v3534_v58 = vsel %vm12355_vm0, %v3531_v48, %v3528_v63  ;;  %v8592_v47 = vld [vmem:[#allocation2 + $0x2f4] sm:$0xf0]  ;;  %v7783_v40 = vld [vmem:[#allocation2 + $0xe8] sm:$0xf] }
 0x430   :  { %4819 = vmatmul.bf16.vlgmr.msra.gmra.mxu2 %v11870_v56  ;;  %v3567_v8 = vmul.f32 %v8908_v36, %v3566_v39  ;;  %v3694_v33 = vsel %vm2862_vm15, %v12301_v14, %v3534_v58  ;;  %v8039_v36 = vld [vmem:[#allocation2 + $0x2e8] sm:$0xf]  ;;  %v7784_v14 = vor.u32 %v8528_v35, %v7783_v40 }
 0x431   :  { %v2938_v61 = vmin.f32 %v12348_v51, 20.0  ;;  %4770 = vmatmul.bf16.vlgmr.msra.gmra.mxu1 %v14204_v12  ;;  %v8040_v11 = vor.u32 %v8592_v47, %v8039_v36  ;;  %v8167_v63 = vld [vmem:[#allocation2 + $0x3e8] sm:$0xf]  ;;  %vm2874_vm5 = vcmp.gt.f32.partialorder %v12348_v51, 20.0 }
 0x432   :  { %4909 = vmatpush.bf16.msrb.mxu0 %v7784_v14 }
 0x433   :  { %v8912_v1 = vpop.eup %8911  ;;  %v3065_v62 = vmul.f32 1.442695, %v2938_v61  ;;  %v4624_v6 = vpop.f32.mrf.mxu2  ;;  %5007 = vmatpush.bf16.msrb.mxu2 %v8040_v11  ;;  %v8624_v61 = vld [vmem:[#allocation2 + $0x3f4] sm:$0xf0] }
 0x434   :  { %v8914_v13 = vpop.eup %8913  ;;  %v3598_v18 = vadd.f32 1.0, %v8912_v1  ;;  %v12361_v19 = vadd.f32 %v4624_v6, %v4576_v38  ;;  %v4528_v28 = vpop.f32.mrf.mxu0  ;;  %v3601_v22 = vmul.f32 -0.5, %v8912_v1  ;;  %v8168_v4 = vor.u32 %v8624_v61, %v8167_v63 }
 0x435   :  { %v3564_v50 = vmul.f32 0.6931472, %v8914_v13  ;;  %8915 = vpow2.f32 %v3065_v62  ;;  %v4529_v29 = vadd.f32 %v4528_v28, %v12343_v10  ;;  %v7911_v62 = vld [vmem:[#allocation2 + $0x1e8] sm:$0xf]  ;;  %v8560_v13 = vld [vmem:[#allocation2 + $0x1f4] sm:$0xf0] }
 0x436   :  { %v4577_v52 = vpop.f32.mrf.mxu1  ;;  %8917 = vlog2.f32 %v3598_v18  ;;  %5056 = vmatpush.bf16.msrb.mxu3 %v8168_v4  ;;  %v3604_v28 = vand.u32 2147483647, %v8912_v1 }
 0x437   :  { %v3570_v42 = vsel %vm3569_vm14, %v3567_v8, %v3564_v50  ;;  %v4578_v60 = vadd.f32 %v4577_v52, %v4529_v29  ;;  %v3602_v50 = vadd.f32 1.0, %v3601_v22  ;;  %v7912_v8 = vor.u32 %v8560_v13, %v7911_v62 }
 0x438   :  { %v3698_v16 = vsel %vm2866_vm1, %v12309_v32, %v3570_v42  ;;  %vm3605_vm2 = vcmp.lt.f32.partialorder %v3604_v28, 0.0004427343 }
 0x439   :  { %v12368_v54 = vpack.c.bf16 %v3698_v16, %v3694_v33  ;;  %4958 = vmatpush.bf16.msrb.mxu1 %v7912_v8  ;;  %v3603_v16 = vmul.f32 %v8912_v1, %v3602_v50 }
 0x43b   :  { %v8916_v46 = vpop.eup %8915  ;;  %4702 = vmatmul.bf16.gmra.mxu3 %v12368_v54  ;;  %v4626_v39 = vpop.f32.mrf.mxu2 }
 0x43c   :  { %v3634_v38 = vadd.f32 1.0, %v8916_v46  ;;  %v3637_v32 = vmul.f32 -0.5, %v8916_v46  ;;  %v12371_v48 = vadd.f32 %v4626_v39, %v4578_v60  ;;  %v4531_v17 = vpop.f32.mrf.mxu0  ;;  %v8918_v58 = vpop.eup %8917  ;;  %v3640_v33 = vand.u32 2147483647, %v8916_v46 }
 0x43d   :  { %v4532_v18 = vadd.f32 %v4531_v17, %v12343_v10  ;;  %v3600_v52 = vmul.f32 0.6931472, %v8918_v58 }
 0x43e   :  { %8919 = vlog2.f32 %v3634_v38  ;;  %v4580_v6 = vpop.f32.mrf.mxu1  ;;  %v3638_v42 = vadd.f32 1.0, %v3637_v32  ;;  %vm3641_vm3 = vcmp.lt.f32.partialorder %v3640_v33, 0.0004427343 }
 0x43f   :  { %v4581_v29 = vadd.f32 %v4580_v6, %v4532_v18  ;;  %4726 = vmatmul.bf16.gmra.mxu0 %v14207_v20  ;;  %v3606_v47 = vsel %vm3605_vm2, %v3603_v16, %v3600_v52 }
 0x440   :  { %4824 = vmatmul.bf16.gmra.mxu2 %v11907_v31  ;;  %v3639_v22 = vmul.f32 %v8916_v46, %v3638_v42  ;;  %v3702_v1 = vsel %vm2870_vm4, %v12329_v9, %v3606_v47 }
 0x441   :  { %4775 = vmatmul.bf16.gmra.mxu1 %v14208_v55 }
 0x443   :  { %v4629_v36 = vpop.f32.mrf.mxu2 }
 0x444   :  { %v8920_v60 = vpop.eup %8919  ;;  %v12377_v40 = vadd.f32 %v4629_v36, %v4581_v29  ;;  %v4533_v35 = vpop.f32.mrf.mxu0 }
 0x445   :  { %v3636_v11 = vmul.f32 0.6931472, %v8920_v60  ;;  %v4534_v63 = vadd.f32 %v4533_v35, %v12343_v10 }
 0x446   :  { %v4582_v38 = vpop.f32.mrf.mxu1 }
 0x447   :  { %v3642_v39 = vsel %vm3641_vm3, %v3639_v22, %v3636_v11  ;;  %v4583_v61 = vadd.f32 %v4582_v38, %v4534_v63  ;;  %v8023_v11 = vld [vmem:[#allocation2 + $0x2c8] sm:$0xf]  ;;  %v8588_v22 = vld [vmem:[#allocation2 + $0x2d4] sm:$0xf0] }
 0x448   :  { %v3706_v14 = vsel %vm2874_vm5, %v12348_v51, %v3642_v39  ;;  %v8024_v35 = vor.u32 %v8588_v22, %v8023_v11  ;;  %v7767_v63 = vld [vmem:[#allocation2 + $0xc8] sm:$0xf]  ;;  %v8524_v38 = vld [vmem:[#allocation2 + $0xd4] sm:$0xf0] }
 0x449   :  { %v12384_v32 = vpack.c.bf16 %v3706_v14, %v3702_v1  ;;  %v8151_v39 = vld [vmem:[#allocation2 + $0x3c8] sm:$0xf]  ;;  %v7768_v14 = vor.u32 %v8524_v38, %v7767_v63  ;;  %v8616_v11 = vld [vmem:[#allocation2 + $0x3b4] sm:$0xf0] }
 0x44a   :  { %5008 = vmatpush.bf16.msrb.mxu2 %v8024_v35  ;;  %v7879_v22 = vld [vmem:[#allocation2 + $0x1a8] sm:$0xf]  ;;  %v8552_v35 = vld [vmem:[#allocation2 + $0x1b4] sm:$0xf0] }
 0x44b   :  { %4707 = vmatmul.bf16.gmra.mxu3 %v12384_v32  ;;  %v4631_v46 = vpop.f32.mrf.mxu2  ;;  %4910 = vmatpush.bf16.msrb.mxu0 %v7768_v14  ;;  %v7880_v38 = vor.u32 %v8552_v35, %v7879_v22  ;;  %v8548_v35 = vld [vmem:[#allocation2 + $0x194] sm:$0xf0] }
 0x44c   :  { %v12387_v17 = vadd.f32 %v4631_v46, %v4583_v61  ;;  %v4536_v4 = vpop.f32.mrf.mxu0  ;;  %v8620_v61 = vld [vmem:[#allocation2 + $0x3d4] sm:$0xf0] }
 0x44d   :  { %v4537_v62 = vadd.f32 %v4536_v4, %v12343_v10  ;;  %v8152_v4 = vor.u32 %v8620_v61, %v8151_v39 }
 0x44e   :  { %v4585_v13 = vpop.f32.mrf.mxu1 }
 0x44f   :  { %v4586_v58 = vadd.f32 %v4585_v13, %v4537_v62  ;;  %4731 = vmatmul.bf16.gmra.mxu0 %v14209_v26  ;;  %v8556_v62 = vld [vmem:[#allocation2 + $0x1d4] sm:$0xf0]  ;;  %v8007_v13 = vld [vmem:[#allocation2 + $0x2a8] sm:$0xf]  ;;  %5057 = vmatpush.bf16.msrb.mxu3 %v8152_v4 }
 0x450   :  { %4829 = vmatmul.bf16.gmra.mxu2 %v11944_v2 }
 0x451   :  { %4780 = vmatmul.bf16.gmra.mxu1 %v14210_v15 }
 0x453   :  { %v4634_v9 = vpop.f32.mrf.mxu2 }
 0x454   :  { %v12393_v51 = vadd.f32 %v4634_v9, %v4586_v58  ;;  %v4538_v18 = vpop.f32.mrf.mxu0  ;;  %v8584_v58 = vld [vmem:[#allocation2 + $0x2b4] sm:$0xf0] }
 0x455   :  { %v4539_v6 = vadd.f32 %v4538_v18, %v12343_v10 }
 0x456   :  { %v4587_v50 = vpop.f32.mrf.mxu1 }
 0x457   :  { %v4588_v8 = vadd.f32 %v4587_v50, %v4539_v6  ;;  %v8008_v50 = vor.u32 %v8584_v58, %v8007_v13  ;;  %v8580_v13 = vld [vmem:[#allocation2 + $0x294] sm:$0xf0]  ;;  %v7735_v58 = vld [vmem:[#allocation2 + $0x88] sm:$0xf] }
 0x459   :  { %5009 = vmatpush.bf16.msrb.mxu2 %v8008_v50 }
 0x45b   :  { %4868 = vmatmul.bf16.vlgmr.msra.gmra.mxu3 %v12160_v21  ;;  %v4636_v28 = vpop.f32.mrf.mxu2 }
 0x45c   :  { %v12397_v29 = vadd.f32 %v4636_v28, %v4588_v8  ;;  %v4541_v52 = vpop.f32.mrf.mxu0  ;;  %v7751_v8 = vld [vmem:[#allocation2 + $0xa8] sm:$0xf]  ;;  %v8520_v28 = vld [vmem:[#allocation2 + $0xb4] sm:$0xf0] }
 0x45d   :  { %v4542_v42 = vadd.f32 %v4541_v52, %v12343_v10  ;;  %v8135_v52 = vld [vmem:[#allocation2 + $0x3a8] sm:$0xf] }
 0x45e   :  { %v4590_v33 = vpop.f32.mrf.mxu1  ;;  %v4673_v16 = vpop.f32.mrf.mxu3 }
 0x45f   :  { %v12401_v60 = vadd.f32 %v4673_v16, %v12361_v19  ;;  %v4591_v36 = vadd.f32 %v4590_v33, %v4542_v42  ;;  %4736 = vmatmul.bf16.gmra.mxu0 %v14213_v24  ;;  %v7895_v19 = vld [vmem:[#allocation2 + $0x1c8] sm:$0xf] }
 0x460   :  { %4834 = vmatmul.bf16.gmra.mxu2 %v11983_v59  ;;  %v7896_v6 = vor.u32 %v8556_v62, %v7895_v19  ;;  %v7991_v62 = vld [vmem:[#allocation2 + $0x288] sm:$0xf] }
 0x461   :  { %v5365_v47 = vmin.f32 %v12401_v60, 20.0  ;;  %4785 = vmatmul.bf16.gmra.mxu1 %v14214_v23  ;;  %vm5301_vm6 = vcmp.gt.f32.partialorder %v12401_v60, 20.0 }
 0x462   :  { %4959 = vmatpush.bf16.msrb.mxu1 %v7896_v6 }
 0x463   :  { %v5429_v1 = vmul.f32 1.442695, %v5365_v47  ;;  %v4639_v46 = vpop.f32.mrf.mxu2  ;;  %v7752_v47 = vor.u32 %v8520_v28, %v7751_v8  ;;  %v8516_v8 = vld [vmem:[#allocation2 + $0x94] sm:$0xf0] }
 0x464   :  { %v12407_v9 = vadd.f32 %v4639_v46, %v4591_v36  ;;  %v4543_v18 = vpop.f32.mrf.mxu0  ;;  %v8136_v36 = vor.u32 %v8616_v11, %v8135_v52  ;;  %v7992_v52 = vor.u32 %v8580_v13, %v7991_v62 }
 0x465   :  { %8921 = vpow2.f32 %v5429_v1  ;;  %v4544_v42 = vadd.f32 %v4543_v18, %v12343_v10  ;;  %4911 = vmatpush.bf16.msrb.mxu0 %v7752_v47  ;;  %v7863_v47 = vld [vmem:[#allocation2 + $0x188] sm:$0xf] }
 0x466   :  { %v4592_v33 = vpop.f32.mrf.mxu1  ;;  %v4675_v16 = vpop.f32.mrf.mxu3  ;;  %5058 = vmatpush.bf16.msrb.mxu3 %v8136_v36  ;;  %4960 = vmatpush.bf16.msrb.mxu1 %v7880_v38  ;;  %v7864_v38 = vor.u32 %v8548_v35, %v7863_v47 }
 0x467   :  { %v12411_v63 = vadd.f32 %v4675_v16, %v12371_v48  ;;  %v4593_v39 = vadd.f32 %v4592_v33, %v4544_v42  ;;  %v7736_v42 = vor.u32 %v8516_v8, %v7735_v58  ;;  %v8119_v33 = vld [vmem:[#allocation2 + $0x388] sm:$0xf]  ;;  %v8612_v16 = vld [vmem:[#allocation2 + $0x394] sm:$0xf0]  ;;  %5010 = vmatpush.bf16.msrb.mxu2 %v7992_v52 }
 0x468   :  { %v8120_v22 = vor.u32 %v8612_v16, %v8119_v33 }
 0x469   :  { %v5369_v1 = vmin.f32 %v12411_v63, 20.0  ;;  %4912 = vmatpush.bf16.msrb.mxu0 %v7736_v42  ;;  %vm5305_vm8 = vcmp.gt.f32.partialorder %v12411_v63, 20.0 }
 0x46a   :  { %5059 = vmatpush.bf16.msrb.mxu3 %v8120_v22  ;;  %4961 = vmatpush.bf16.msrb.mxu1 %v7864_v38 }
 0x46b   :  { %v8922_v14 = vpop.eup %8921  ;;  %v5437_v61 = vmul.f32 1.442695, %v5369_v1  ;;  %4873 = vmatmul.bf16.gmra.mxu3 %v12190_v37  ;;  %v4641_v46 = vpop.f32.mrf.mxu2 }
 0x46c   :  { %v5557_v19 = vadd.f32 1.0, %v8922_v14  ;;  %v12415_v4 = vadd.f32 %v4641_v46, %v4593_v39  ;;  %v4546_v48 = vpop.f32.mrf.mxu0  ;;  %v5560_v39 = vmul.f32 -0.5, %v8922_v14  ;;  %v5563_v8 = vand.u32 2147483647, %v8922_v14 }
 0x46d   :  { %8923 = vpow2.f32 %v5437_v61  ;;  %v4547_v18 = vadd.f32 %v4546_v48, %v12343_v10 }
 0x46e   :  { %v4595_v6 = vpop.f32.mrf.mxu1  ;;  %v4678_v50 = vpop.f32.mrf.mxu3  ;;  %8925 = vlog2.f32 %v5557_v19  ;;  %v5561_v58 = vadd.f32 1.0, %v5560_v39  ;;  %vm12435_vm7 = vcmp.lt.f32.partialorder %v5563_v8, 0.0004427343 }
 0x46f   :  { %v12419_v28 = vadd.f32 %v4678_v50, %v12377_v40  ;;  %v4596_v11 = vadd.f32 %v4595_v6, %v4547_v18  ;;  %4741 = vmatmul.bf16.gmra.mxu0 %v14218_v57 }
 0x470   :  { %4839 = vmatmul.bf16.gmra.mxu2 %v12038_v44  ;;  %v5562_v35 = vmul.f32 %v8922_v14, %v5561_v58  ;;  %v7975_v58 = vld [vmem:[#allocation2 + $0x268] sm:$0xf] }
 0x471   :  { %v5373_v36 = vmin.f32 %v12419_v28, 20.0  ;;  %4790 = vmatmul.bf16.gmra.mxu1 %v14219_v3  ;;  %v7799_v44 = vld [vmem:[#allocation2 + $0x108] sm:$0xf]  ;;  %vm5309_vm12 = vcmp.gt.f32.partialorder %v12419_v28, 20.0 }
 0x472   :  { %v7927_v3 = vld [vmem:[#allocation2 + $0x208] sm:$0xf] }
 0x473   :  { %v8924_v40 = vpop.eup %8923  ;;  %v5445_v1 = vmul.f32 1.442695, %v5373_v36  ;;  %v4644_v19 = vpop.f32.mrf.mxu2 }
 0x474   :  { %v5593_v61 = vadd.f32 1.0, %v8924_v40  ;;  %v8926_v46 = vpop.eup %8925  ;;  %v5596_v48 = vmul.f32 -0.5, %v8924_v40  ;;  %v12425_v62 = vadd.f32 %v4644_v19, %v4596_v11  ;;  %v4548_v13 = vpop.f32.mrf.mxu0  ;;  %v5599_v33 = vand.u32 2147483647, %v8924_v40 }
 0x475   :  { %8927 = vpow2.f32 %v5445_v1  ;;  %v4549_v18 = vadd.f32 %v4548_v13, %v12343_v10  ;;  %v5559_v42 = vmul.f32 0.6931472, %v8926_v46  ;;  %v14245_v1 = vld [vmem:[#allocation26_spill] sm:$0xff] }
 0x476   :  { %8929 = vlog2.f32 %v5593_v61  ;;  %v4597_v6 = vpop.f32.mrf.mxu1  ;;  %v4680_v50 = vpop.f32.mrf.mxu3  ;;  %v5597_v47 = vadd.f32 1.0, %v5596_v48  ;;  %vm12443_vm9 = vcmp.lt.f32.partialorder %v5599_v33, 0.0004427343  ;;  %v7719_v33 = vld [vmem:[#allocation2 + $0x68] sm:$0xf] }
 0x477   :  { %v12429_v52 = vadd.f32 %v4680_v50, %v12387_v17  ;;  %v4598_v16 = vadd.f32 %v4597_v6, %v4549_v18  ;;  %v5565_v39 = vsel %vm12435_vm7, %v5562_v35, %v5559_v42  ;;  %v8576_v18 = vld [vmem:[#allocation2 + $0x274] sm:$0xf0]  ;;  %v8103_v35 = vld [vmem:[#allocation2 + $0x368] sm:$0xf] }
 0x478   :  { %v5598_v46 = vmul.f32 %v8924_v40, %v5597_v47  ;;  %v7976_v42 = vor.u32 %v8576_v18, %v7975_v58  ;;  %v12454_v36 = vsel %vm5301_vm6, %v12401_v60, %v5565_v39  ;;  %v14244_v18 = vld [vmem:[#allocation61_spill] sm:$0xff] }
 0x479   :  { %v5377_v22 = vmin.f32 %v12429_v52, 20.0  ;;  %14242 = vst [vmem:[#allocation15_spill] sm:$0xff] %v12454_v36  ;;  %v8540_v39 = vld [vmem:[#allocation2 + $0x154] sm:$0xf0]  ;;  %v7959_v36 = vld [vmem:[#allocation2 + $0x248] sm:$0xf] }
 0x47a   :  { %5011 = vmatpush.bf16.msrb.mxu2 %v7976_v42  ;;  %v7703_v42 = vld [vmem:[#allocation2 + $0x48] sm:$0xf]  ;;  %vm5313_vm13 = vcmp.gt.f32.partialorder %v12429_v52, 20.0 }
 0x47b   :  { %v12432_v11 = vpop.eup %8927  ;;  %v5453_v38 = vmul.f32 1.442695, %v5377_v22  ;;  %4878 = vmatmul.bf16.gmra.mxu3 %v12222_v41  ;;  %v4646_v14 = vpop.f32.mrf.mxu2  ;;  %v8512_v22 = vld [vmem:[#allocation2 + $0x74] sm:$0xf0] }
 0x47c   :  { %v8930_v17 = vpop.eup %8929  ;;  %v5629_v61 = vadd.f32 1.0, %v12432_v11  ;;  %v12448_v48 = vadd.f32 %v4646_v14, %v4598_v16  ;;  %v4551_v13 = vpop.f32.mrf.mxu0  ;;  %v7720_v47 = vor.u32 %v8512_v22, %v7719_v33  ;;  %v8544_v14 = vld [vmem:[#allocation2 + $0x174] sm:$0xf0]  ;;  %v7831_v22 = vld [vmem:[#allocation2 + $0x148] sm:$0xf] }
 0x47d   :  { %v5595_v19 = vmul.f32 0.6931472, %v8930_v17  ;;  %8931 = vpow2.f32 %v5453_v38  ;;  %v4552_v6 = vadd.f32 %v4551_v13, %v12343_v10  ;;  %v8608_v38 = vld [vmem:[#allocation2 + $0x374] sm:$0xf0]  ;;  %v7847_v17 = vld [vmem:[#allocation2 + $0x168] sm:$0xf] }
 0x47e   :  { %v4600_v50 = vpop.f32.mrf.mxu1  ;;  %v4683_v8 = vpop.f32.mrf.mxu3  ;;  %v8104_v60 = vor.u32 %v8608_v38, %v8103_v35  ;;  %8933 = vlog2.f32 %v5629_v61  ;;  %4913 = vmatpush.bf16.msrb.mxu0 %v7720_v47  ;;  %v8508_v33 = vld [vmem:[#allocation2 + $0x54] sm:$0xf0] }
 0x47f   :  { %v5601_v40 = vsel %vm12443_vm9, %v5598_v46, %v5595_v19  ;;  %v12459_v16 = vadd.f32 %v4683_v8, %v12393_v51  ;;  %v4601_v58 = vadd.f32 %v4600_v50, %v4552_v6  ;;  %4746 = vmatmul.bf16.gmra.mxu0 %v14244_v18  ;;  %v14246_v19 = vld [vmem:[#allocation32_spill] sm:$0xff]  ;;  %v7848_v46 = vor.u32 %v8544_v14, %v7847_v17  ;;  %v8572_v17 = vld [vmem:[#allocation2 + $0x254] sm:$0xf0] }
 0x480   :  { %v12464_v13 = vsel %vm5305_vm8, %v12411_v63, %v5601_v40  ;;  %4844 = vmatmul.bf16.gmra.mxu2 %v14246_v19  ;;  %5060 = vmatpush.bf16.msrb.mxu3 %v8104_v60  ;;  %v5632_v6 = vmul.f32 -0.5, %v12432_v11  ;;  %v7704_v38 = vor.u32 %v8508_v33, %v7703_v42  ;;  %v7832_v60 = vor.u32 %v8540_v39, %v7831_v22  ;;  %v7815_v19 = vld [vmem:[#allocation2 + $0x128] sm:$0xf]  ;;  %v8536_v22 = vld [vmem:[#allocation2 + $0x134] sm:$0xf0] }
 0x481   :  { %14243 = vst [vmem:[#allocation16_spill] sm:$0xff] %v12464_v13  ;;  %v5381_v51 = vmin.f32 %v12459_v16, 20.0  ;;  %4795 = vmatmul.bf16.gmra.mxu1 %v14245_v1  ;;  %vm5317_vm14 = vcmp.gt.f32.partialorder %v12459_v16, 20.0 }
 0x482   :  { %4962 = vmatpush.bf16.msrb.mxu1 %v7848_v46  ;;  %4914 = vmatpush.bf16.msrb.mxu0 %v7704_v38  ;;  %v8568_v38 = vld [vmem:[#allocation2 + $0x234] sm:$0xf0]  ;;  %v5633_v1 = vadd.f32 1.0, %v5632_v6  ;;  %v8087_v6 = vld [vmem:[#allocation2 + $0x348] sm:$0xf] }
 0x483   :  { %v5461_v63 = vmul.f32 1.442695, %v5381_v51  ;;  %v12473_v50 = vpop.eup %8931  ;;  %v4649_v8 = vpop.f32.mrf.mxu2  ;;  %v7960_v51 = vor.u32 %v8572_v17, %v7959_v36  ;;  %v7943_v17 = vld [vmem:[#allocation2 + $0x228] sm:$0xf] }
 0x484   :  { %v12475_v35 = vadd.f32 %v4649_v8, %v4601_v58  ;;  %v4553_v40 = vpop.f32.mrf.mxu0  ;;  %v8934_v46 = vpop.eup %8933  ;;  %v5635_v58 = vand.u32 2147483647, %v12432_v11  ;;  %v5665_v8 = vadd.f32 1.0, %v12473_v50  ;;  %v5668_v42 = vmul.f32 -0.5, %v12473_v50 }
 0x485   :  { %8935 = vpow2.f32 %v5461_v63  ;;  %v4554_v61 = vadd.f32 %v4553_v40, %v12343_v10  ;;  %5012 = vmatpush.bf16.msrb.mxu2 %v7960_v51  ;;  %v7687_v63 = vld [vmem:[#allocation2 + $0x28] sm:$0xf]  ;;  %v8504_v40 = vld [vmem:[#allocation2 + $0x34] sm:$0xf0]  ;;  %v5634_v57 = vmul.f32 %v12432_v11, %v5633_v1 }
 0x486   :  { %v4602_v47 = vpop.f32.mrf.mxu1  ;;  %v4685_v14 = vpop.f32.mrf.mxu3  ;;  %4963 = vmatpush.bf16.msrb.mxu1 %v7832_v60  ;;  %v7688_v36 = vor.u32 %v8504_v40, %v7687_v63  ;;  %8937 = vlog2.f32 %v5665_v8  ;;  %v5671_v60 = vand.u32 2147483647, %v12473_v50  ;;  %v7671_v63 = vld [vmem:[#allocation2 + $0x8] sm:$0xf]  ;;  %v8500_v40 = vld [vmem:[#allocation2 + $0x14] sm:$0xf0] }
 0x487   :  { %v12479_v13 = vadd.f32 %v4685_v14, %v12397_v29  ;;  %v4603_v33 = vadd.f32 %v4602_v47, %v4554_v61  ;;  %v7816_v29 = vor.u32 %v8536_v22, %v7815_v19  ;;  %v5631_v14 = vmul.f32 0.6931472, %v8934_v46  ;;  %v8604_v8 = vld [vmem:[#allocation2 + $0x354] sm:$0xf0] }
 0x488   :  { %4915 = vmatpush.bf16.msrb.mxu0 %v7688_v36  ;;  %v7944_v61 = vor.u32 %v8568_v38, %v7943_v17  ;;  %v5669_v47 = vadd.f32 1.0, %v5668_v42  ;;  %v8532_v36 = vld [vmem:[#allocation2 + $0x114] sm:$0xf0]  ;;  %v8088_v38 = vor.u32 %v8604_v8, %v8087_v6  ;;  %vm12496_vm10 = vcmp.lt.f32.partialorder %v5635_v58, 0.0004427343 }
 0x489   :  { %v5385_v39 = vmin.f32 %v12479_v13, 20.0  ;;  %vm5672_vm11 = vcmp.lt.f32.partialorder %v5671_v60, 0.0004427343  ;;  %vm5321_vm1 = vcmp.gt.f32.partialorder %v12479_v13, 20.0  ;;  %v8169_v60 = vld [vmem:[#allocation2 + $0x3f8] sm:$0xf0] }
 0x48a   :  { %4964 = vmatpush.bf16.msrb.mxu1 %v7816_v29  ;;  %5013 = vmatpush.bf16.msrb.mxu2 %v7944_v61  ;;  %v8564_v29 = vld [vmem:[#allocation2 + $0x214] sm:$0xf0]  ;;  %v5670_v1 = vmul.f32 %v12473_v50, %v5669_v47 }
 0x48b   :  { %v5469_v18 = vmul.f32 1.442695, %v5385_v39  ;;  %4883 = vmatmul.bf16.gmra.mxu3 %v12271_v27  ;;  %v12487_v51 = vpop.eup %8935  ;;  %v4651_v41 = vpop.f32.mrf.mxu2  ;;  %v7672_v39 = vor.u32 %v8500_v40, %v7671_v63  ;;  %v7800_v27 = vor.u32 %v8532_v36, %v7799_v44  ;;  %v5637_v44 = vsel %vm12496_vm10, %v5634_v57, %v5631_v14 }
 0x48c   :  { %v12489_v19 = vadd.f32 %v4651_v41, %v4603_v33  ;;  %v4556_v46 = vpop.f32.mrf.mxu0  ;;  %v8938_v37 = vpop.eup %8937  ;;  %v5701_v61 = vadd.f32 1.0, %v12487_v51  ;;  %5061 = vmatpush.bf16.msrb.mxu3 %v8088_v38  ;;  %v5704_v14 = vmul.f32 -0.5, %v12487_v51 }
 0x48d   :  { %8939 = vpow2.f32 %v5469_v18  ;;  %v4557_v42 = vadd.f32 %v4556_v46, %v12343_v10  ;;  %4916 = vmatpush.bf16.msrb.mxu0 %v7672_v39  ;;  %v7928_v18 = vor.u32 %v8564_v29, %v7927_v3  ;;  %v5667_v11 = vmul.f32 0.6931472, %v8938_v37 }
 0x48e   :  { %v4605_v22 = vpop.f32.mrf.mxu1  ;;  %v4688_v17 = vpop.f32.mrf.mxu3  ;;  %8941 = vlog2.f32 %v5701_v61  ;;  %4965 = vmatpush.bf16.msrb.mxu1 %v7800_v27  ;;  %v12511_v37 = vsel %vm5309_vm12, %v12419_v28, %v5637_v44 }
 0x48f   :  { %v12494_v41 = vadd.f32 %v4688_v17, %v12407_v9  ;;  %v4606_v63 = vadd.f32 %v4605_v22, %v4557_v42  ;;  %4751 = vmatmul.bf16.gmra.mxu0 %v14230_v53  ;;  %5014 = vmatpush.bf16.msrb.mxu2 %v7928_v18  ;;  %v5673_v3 = vsel %vm5672_vm11, %v5670_v1, %v5667_v11  ;;  %v5705_v42 = vadd.f32 1.0, %v5704_v14 }
 0x490   :  { %4849 = vmatmul.bf16.gmra.mxu2 %v12105_v49  ;;  %14249 = vst [vmem:[#allocation41_spill] sm:$0xff] %v12511_v37  ;;  %v12514_v50 = vsel %vm5313_vm13, %v12429_v52, %v5673_v3  ;;  %v5707_v17 = vand.u32 2147483647, %v12487_v51 }
 0x491   :  { %v5389_v9 = vmin.f32 %v12494_v41, 20.0  ;;  %4800 = vmatmul.bf16.gmra.mxu1 %v11603_v25  ;;  %14250 = vst [vmem:[#allocation18_spill] sm:$0xff] %v12514_v50  ;;  %v5706_v44 = vmul.f32 %v12487_v51, %v5705_v42  ;;  %vm5325_vm4 = vcmp.gt.f32.partialorder %v12494_v41, 20.0 }
 0x492   :  { %vm12529_vm0 = vcmp.lt.f32.partialorder %v5707_v17, 0.0004427343 }
 0x493   :  { %v8940_v58 = vpop.eup %8939  ;;  %v5477_v57 = vmul.f32 1.442695, %v5389_v9  ;;  %v4654_v47 = vpop.f32.mrf.mxu2 }
 0x494   :  { %v5737_v40 = vadd.f32 1.0, %v8940_v58  ;;  %v5740_v46 = vmul.f32 -0.5, %v8940_v58  ;;  %v12519_v27 = vadd.f32 %v4654_v47, %v4606_v63  ;;  %v4558_v6 = vpop.f32.mrf.mxu0  ;;  %v8942_v36 = vpop.eup %8941  ;;  %v5743_v33 = vand.u32 2147483647, %v8940_v58  ;;  %v8071_v47 = vld [vmem:[#allocation2 + $0x328] sm:$0xf] }
 0x495   :  { %8943 = vpow2.f32 %v5477_v57  ;;  %v4559_v8 = vadd.f32 %v4558_v6, %v12343_v10  ;;  %v5703_v18 = vmul.f32 0.6931472, %v8942_v36 }
 0x496   :  { %v4607_v39 = vpop.f32.mrf.mxu1  ;;  %v4690_v28 = vpop.f32.mrf.mxu3  ;;  %8945 = vlog2.f32 %v5737_v40  ;;  %v5741_v38 = vadd.f32 1.0, %v5740_v46  ;;  %v8600_v40 = vld [vmem:[#allocation2 + $0x334] sm:$0xf0]  ;;  %vm5744_vm15 = vcmp.lt.f32.partialorder %v5743_v33, 0.0004427343 }
 0x497   :  { %v12523_v52 = vadd.f32 %v4690_v28, %v12415_v4  ;;  %v4608_v22 = vadd.f32 %v4607_v39, %v4559_v8  ;;  %v5709_v46 = vsel %vm12529_vm0, %v5706_v44, %v5703_v18  ;;  %v8072_v28 = vor.u32 %v8600_v40, %v8071_v47 }
 0x498   :  { %v5742_v9 = vmul.f32 %v8940_v58, %v5741_v38 }
 0x499   :  { %v5393_v29 = vmin.f32 %v12523_v52, 20.0  ;;  %5062 = vmatpush.bf16.msrb.mxu3 %v8072_v28  ;;  %vm5329_vm5 = vcmp.gt.f32.partialorder %v12523_v52, 20.0 }
 0x49b   :  { %v8944_v61 = vpop.eup %8943  ;;  %v5485_v63 = vmul.f32 1.442695, %v5393_v29  ;;  %4888 = vmatmul.bf16.gmra.mxu3 %v12305_v7  ;;  %v4656_v1 = vpop.f32.mrf.mxu2 }
 0x49c   :  { %v8946_v11 = vpop.eup %8945  ;;  %v5773_v3 = vadd.f32 1.0, %v8944_v61  ;;  %v12533_v57 = vadd.f32 %v4656_v1, %v4608_v22  ;;  %v4561_v14 = vpop.f32.mrf.mxu0  ;;  %v12545_v22 = vsel %vm5317_vm14, %v12459_v16, %v5709_v46  ;;  %v5776_v29 = vmul.f32 -0.5, %v8944_v61 }
 0x49d   :  { %8947 = vpow2.f32 %v5485_v63  ;;  %v5739_v6 = vmul.f32 0.6931472, %v8946_v11  ;;  %v4562_v51 = vadd.f32 %v4561_v14, %v12343_v10  ;;  %14253 = vst [vmem:[#allocation19_spill] sm:$0xff] %v12545_v22  ;;  %v5779_v40 = vand.u32 2147483647, %v8944_v61 }
 0x49e   :  { %v4610_v8 = vpop.f32.mrf.mxu1  ;;  %v4693_v39 = vpop.f32.mrf.mxu3  ;;  %8949 = vlog2.f32 %v5773_v3  ;;  %v5777_v14 = vadd.f32 1.0, %v5776_v29  ;;  %v7913_v22 = vld [vmem:[#allocation2 + $0x1f8] sm:$0xf0] }
 0x49f   :  { %v12541_v58 = vadd.f32 %v4693_v39, %v12425_v62  ;;  %v5745_v36 = vsel %vm5744_vm15, %v5742_v9, %v5739_v6  ;;  %v4611_v42 = vadd.f32 %v4610_v8, %v4562_v51  ;;  %4756 = vmatmul.bf16.gmra.mxu0 %v14233_v34  ;;  %v12563_v39 = vperm.slane %v12334_v0, 1  ;;  %v8622_v62 = vld [vmem:[#allocation2 + $0x3ec] sm:$0xf] }
 0x4a0   :  { %v12548_v17 = vsel %vm5321_vm1, %v12479_v13, %v5745_v36  ;;  %4854 = vmatmul.bf16.gmra.mxu2 %v12127_v5  ;;  %v5778_v28 = vmul.f32 %v8944_v61, %v5777_v14  ;;  %vm12566_vm2 = vcmp.lt.f32.partialorder %v5779_v40, 0.0004427343  ;;  %v8055_v61 = vld [vmem:[#allocation2 + $0x308] sm:$0xf] }
 0x4a1   :  { %14254 = vst [vmem:[#allocation43_spill] sm:$0xff] %v12548_v17  ;;  %v5397_v38 = vmin.f32 %v12541_v58, 20.0  ;;  %4805 = vmatmul.bf16.gmra.mxu1 %v11647_v45  ;;  %vm5333_vm8 = vcmp.gt.f32.partialorder %v12541_v58, 20.0 }
 0x4a3   :  { %v8948_v18 = vpop.eup %8947  ;;  %v5493_v33 = vmul.f32 1.442695, %v5397_v38  ;;  %v4659_v63 = vpop.f32.mrf.mxu2 }
 0x4a4   :  { %v5809_v44 = vadd.f32 1.0, %v8948_v18  ;;  %v8950_v11 = vpop.eup %8949  ;;  %v12555_v16 = vadd.f32 %v4659_v63, %v4611_v42  ;;  %v4563_v13 = vpop.f32.mrf.mxu0  ;;  %v5812_v1 = vmul.f32 -0.5, %v8948_v18  ;;  %v5815_v36 = vand.u32 2147483647, %v8948_v18 }
 0x4a5   :  { %8951 = vpow2.f32 %v5493_v33  ;;  %v4564_v4 = vadd.f32 %v4563_v13, %v12343_v10  ;;  %v5775_v6 = vmul.f32 0.6931472, %v8950_v11  ;;  %v8596_v11 = vld [vmem:[#allocation2 + $0x314] sm:$0xf0] }
 0x4a6   :  { %v4612_v9 = vpop.f32.mrf.mxu1  ;;  %v4695_v3 = vpop.f32.mrf.mxu3  ;;  %8953 = vlog2.f32 %v5809_v44  ;;  %v5813_v8 = vadd.f32 1.0, %v5812_v1  ;;  %v8056_v14 = vor.u32 %v8596_v11, %v8055_v61  ;;  %vm5816_vm3 = vcmp.lt.f32.partialorder %v5815_v36, 0.0004427343 }
 0x4a7   :  { %v12559_v47 = vadd.f32 %v4695_v3, %v12448_v48  ;;  %v4613_v46 = vadd.f32 %v4612_v9, %v4564_v4  ;;  %v5781_v33 = vsel %vm12566_vm2, %v5778_v28, %v5775_v6 }
 0x4a8   :  { %v5814_v1 = vmul.f32 %v8948_v18, %v5813_v8  ;;  %5063 = vmatpush.bf16.msrb.mxu3 %v8056_v14  ;;  %v12582_v18 = vsel %vm5325_vm4, %v12494_v41, %v5781_v33 }
 0x4a9   :  { %v5401_v51 = vmin.f32 %v12559_v47, 20.0  ;;  %14257 = vst [vmem:[#allocation20_spill] sm:$0xff] %v12582_v18  ;;  %vm5337_vm9 = vcmp.gt.f32.partialorder %v12559_v47, 20.0 }
 0x4ab   :  { %v8952_v42 = vpop.eup %8951  ;;  %v5501_v10 = vmul.f32 1.442695, %v5401_v51  ;;  %4893 = vmatmul.bf16.gmra.mxu3 %v12338_v30  ;;  %v4661_v29 = vpop.f32.mrf.mxu2 }
 0x4ac   :  { %v8954_v48 = vpop.eup %8953  ;;  %v5845_v63 = vadd.f32 1.0, %v8952_v42  ;;  %v12572_v44 = vadd.f32 %v4661_v29, %v4613_v46  ;;  %v4722_v0 = vpop.f32.mrf.mxu0 }
 0x4ad   :  { %8955 = vpow2.f32 %v5501_v10  ;;  %v5811_v13 = vmul.f32 0.6931472, %v8954_v48  ;;  %v4723_v9 = vadd.f32 %v4722_v0, %v12563_v39  ;;  %v5848_v10 = vmul.f32 -0.5, %v8952_v42 }
 0x4ae   :  { %v4698_v4 = vpop.f32.mrf.mxu3  ;;  %v4771_v3 = vpop.f32.mrf.mxu1  ;;  %8957 = vlog2.f32 %v5845_v63 }
 0x4af   :  { %v12578_v40 = vadd.f32 %v4698_v4, %v12475_v35  ;;  %v5817_v46 = vsel %vm5816_vm3, %v5814_v1, %v5811_v13  ;;  %v4772_v6 = vadd.f32 %v4771_v3, %v4723_v9  ;;  %4917 = vmatmul.bf16.vlgmr.msrb.gmra.mxu0 %v14203_v43  ;;  %v5849_v13 = vadd.f32 1.0, %v5848_v10  ;;  %v7785_v35 = vld [vmem:[#allocation2 + $0xf8] sm:$0xf0] }
 0x4b0   :  { %v12585_v51 = vsel %vm5329_vm5, %v12523_v52, %v5817_v46  ;;  %5015 = vmatmul.bf16.vlgmr.msrb.gmra.mxu2 %v11870_v56  ;;  %v5851_v4 = vand.u32 2147483647, %v8952_v42 }
 0x4b1   :  { %14258 = vst [vmem:[#allocation21_spill] sm:$0xff] %v12585_v51  ;;  %v5405_v8 = vmin.f32 %v12578_v40, 20.0  ;;  %4966 = vmatmul.bf16.vlgmr.msrb.gmra.mxu1 %v14204_v12  ;;  %v8558_v51 = vld [vmem:[#allocation2 + $0x1ec] sm:$0xf]  ;;  %vm5341_vm12 = vcmp.gt.f32.partialorder %v12578_v40, 20.0 }
 0x4b2   :  { %vm12602_vm6 = vcmp.lt.f32.partialorder %v5851_v4, 0.0004427343 }
 0x4b3   :  { %v8956_v28 = vpop.eup %8955  ;;  %v5509_v36 = vmul.f32 1.442695, %v5405_v8  ;;  %v4820_v38 = vpop.f32.mrf.mxu2  ;;  %v5850_v8 = vmul.f32 %v8952_v42, %v5849_v13 }
 0x4b4   :  { %v5881_v48 = vadd.f32 1.0, %v8956_v28  ;;  %v12592_v41 = vadd.f32 %v4820_v38, %v4772_v6  ;;  %v4724_v52 = vpop.f32.mrf.mxu0  ;;  %v8958_v29 = vpop.eup %8957  ;;  %v5884_v61 = vmul.f32 -0.5, %v8956_v28 }
 0x4b5   :  { %8959 = vpow2.f32 %v5509_v36  ;;  %v4725_v63 = vadd.f32 %v4724_v52, %v12563_v39  ;;  %v5847_v3 = vmul.f32 0.6931472, %v8958_v29 }
 0x4b6   :  { %v4700_v33 = vpop.f32.mrf.mxu3  ;;  %v4773_v0 = vpop.f32.mrf.mxu1  ;;  %8961 = vlog2.f32 %v5881_v48  ;;  %v5885_v14 = vadd.f32 1.0, %v5884_v61 }
 0x4b7   :  { %v12596_v11 = vadd.f32 %v4700_v33, %v12489_v19  ;;  %v4774_v1 = vadd.f32 %v4773_v0, %v4725_v63  ;;  %v5887_v19 = vand.u32 2147483647, %v8956_v28  ;;  %v8590_v33 = vld [vmem:[#allocation2 + $0x2ec] sm:$0xf]  ;;  %v8041_v63 = vld [vmem:[#allocation2 + $0x2f8] sm:$0xf0]  ;;  %v5853_v61 = vsel %vm12602_vm6, %v5850_v8, %v5847_v3 }
 0x4b8   :  { %v8526_v0 = vld [vmem:[#allocation2 + $0xec] sm:$0xf]  ;;  %v5886_v18 = vmul.f32 %v8956_v28, %v5885_v14  ;;  %v7916_v3 = vor.u32 %v8558_v51, %v7913_v22 }
 0x4b9   :  { %v5409_v9 = vmin.f32 %v12596_v11, 20.0  ;;  %vm5888_vm7 = vcmp.lt.f32.partialorder %v5887_v19, 0.0004427343  ;;  %vm5345_vm13 = vcmp.gt.f32.partialorder %v12596_v11, 20.0 }
 0x4ba   :  { %5154 = vmatpush.bf16.msra.mxu1 %v7916_v3 }
 0x4bb   :  { %v12599_v46 = vpop.eup %8959  ;;  %v5517_v6 = vmul.f32 1.442695, %v5409_v9  ;;  %4898 = vmatmul.bf16.gmra.mxu3 %v12368_v54  ;;  %v4822_v38 = vpop.f32.mrf.mxu2  ;;  %v8044_v9 = vor.u32 %v8590_v33, %v8041_v63 }
 0x4bc   :  { %v8962_v36 = vpop.eup %8961  ;;  %v5917_v10 = vadd.f32 1.0, %v12599_v46  ;;  %v12607_v52 = vadd.f32 %v4822_v38, %v4774_v1  ;;  %v4727_v29 = vpop.f32.mrf.mxu0  ;;  %v8172_v38 = vor.u32 %v8622_v62, %v8169_v60  ;;  %v5920_v22 = vmul.f32 -0.5, %v12599_v46 }
 0x4bd   :  { %8963 = vpow2.f32 %v5517_v6  ;;  %v4728_v13 = vadd.f32 %v4727_v29, %v12563_v39  ;;  %v7788_v6 = vor.u32 %v8526_v0, %v7785_v35  ;;  %v5883_v17 = vmul.f32 0.6931472, %v8962_v36  ;;  %5203 = vmatpush.bf16.msra.mxu2 %v8044_v9 }
 0x4be   :  { %v4703_v42 = vpop.f32.mrf.mxu3  ;;  %v4776_v4 = vpop.f32.mrf.mxu1  ;;  %8965 = vlog2.f32 %v5917_v10  ;;  %5252 = vmatpush.bf16.msra.mxu3 %v8172_v38  ;;  %v5921_v33 = vadd.f32 1.0, %v5920_v22  ;;  %v5923_v0 = vand.u32 2147483647, %v12599_v46 }
 0x4bf   :  { %v12613_v1 = vadd.f32 %v4703_v42, %v12519_v27  ;;  %v4777_v48 = vadd.f32 %v4776_v4, %v4728_v13  ;;  %4922 = vmatmul.bf16.gmra.mxu0 %v14207_v20  ;;  %v5889_v60 = vsel %vm5888_vm7, %v5886_v18, %v5883_v17  ;;  %v12622_v27 = vsel %vm5333_vm8, %v12541_v58, %v5853_v61 }
 0x4c0   :  { %5020 = vmatmul.bf16.gmra.mxu2 %v11907_v31  ;;  %5105 = vmatpush.bf16.msra.mxu0 %v7788_v6  ;;  %14261 = vst [vmem:[#allocation46_spill] sm:$0xff] %v12622_v27  ;;  %v12625_v62 = vsel %vm5337_vm9, %v12559_v47, %v5889_v60  ;;  %v5922_v9 = vmul.f32 %v12599_v46, %v5921_v33  ;;  %vm12640_vm10 = vcmp.lt.f32.partialorder %v5923_v0, 0.0004427343 }
 0x4c1   :  { %v5413_v28 = vmin.f32 %v12613_v1, 20.0  ;;  %4971 = vmatmul.bf16.gmra.mxu1 %v14208_v55  ;;  %14262 = vst [vmem:[#allocation22_spill] sm:$0xff] %v12625_v62  ;;  %vm5349_vm14 = vcmp.gt.f32.partialorder %v12613_v1, 20.0  ;;  %v14274_v62 = vld [vmem:[#allocation60_spill] sm:$0xff] }
 0x4c3   :  { %v8964_v51 = vpop.eup %8963  ;;  %v5525_v35 = vmul.f32 1.442695, %v5413_v28  ;;  %v4825_v36 = vpop.f32.mrf.mxu2 }
 0x4c4   :  { %v8966_v8 = vpop.eup %8965  ;;  %v5953_v19 = vadd.f32 1.0, %v8964_v51  ;;  %v12630_v17 = vadd.f32 %v4825_v36, %v4777_v48  ;;  %v4729_v18 = vpop.f32.mrf.mxu0  ;;  %v5956_v58 = vmul.f32 -0.5, %v8964_v51  ;;  %v5959_v6 = vand.u32 2147483647, %v8964_v51 }
 0x4c5   :  { %8967 = vpow2.f32 %v5525_v35  ;;  %v4730_v47 = vadd.f32 %v4729_v18, %v12563_v39  ;;  %v5919_v42 = vmul.f32 0.6931472, %v8966_v8 }
 0x4c6   :  { %v4705_v10 = vpop.f32.mrf.mxu3  ;;  %v4778_v29 = vpop.f32.mrf.mxu1  ;;  %8969 = vlog2.f32 %v5953_v19  ;;  %v5957_v4 = vadd.f32 1.0, %v5956_v58  ;;  %vm5960_vm11 = vcmp.lt.f32.partialorder %v5959_v6, 0.0004427343 }
 0x4c7   :  { %v12634_v63 = vadd.f32 %v4705_v10, %v12533_v57  ;;  %v4779_v61 = vadd.f32 %v4778_v29, %v4730_v47  ;;  %v5925_v60 = vsel %vm12640_vm10, %v5922_v9, %v5919_v42 }
 0x4c8   :  { %v5958_v36 = vmul.f32 %v8964_v51, %v5957_v4  ;;  %v12656_v33 = vsel %vm5341_vm12, %v12578_v40, %v5925_v60 }
 0x4c9   :  { %v5417_v13 = vmin.f32 %v12634_v63, 20.0  ;;  %14265 = vst [vmem:[#allocation23_spill] sm:$0xff] %v12656_v33  ;;  %vm5353_vm15 = vcmp.gt.f32.partialorder %v12634_v63, 20.0  ;;  %v8121_v33 = vld [vmem:[#allocation2 + $0x398] sm:$0xf0] }
 0x4cb   :  { %v8968_v38 = vpop.eup %8967  ;;  %v5533_v48 = vmul.f32 1.442695, %v5417_v13  ;;  %4903 = vmatmul.bf16.gmra.mxu3 %v12384_v32  ;;  %v4827_v28 = vpop.f32.mrf.mxu2 }
 0x4cc   :  { %v8970_v57 = vpop.eup %8969  ;;  %v5989_v22 = vadd.f32 1.0, %v8968_v38  ;;  %v12646_v35 = vadd.f32 %v4827_v28, %v4779_v61  ;;  %v4732_v8 = vpop.f32.mrf.mxu0  ;;  %v5992_v13 = vmul.f32 -0.5, %v8968_v38 }
 0x4cd   :  { %8971 = vpow2.f32 %v5533_v48  ;;  %v5955_v46 = vmul.f32 0.6931472, %v8970_v57  ;;  %v4733_v18 = vadd.f32 %v4732_v8, %v12563_v39 }
 0x4ce   :  { %v4708_v19 = vpop.f32.mrf.mxu3  ;;  %v4781_v58 = vpop.f32.mrf.mxu1  ;;  %8973 = vlog2.f32 %v5989_v22  ;;  %v5993_v22 = vadd.f32 1.0, %v5992_v13 }
 0x4cf   :  { %v12652_v10 = vadd.f32 %v4708_v19, %v12555_v16  ;;  %v5961_v47 = vsel %vm5960_vm11, %v5958_v36, %v5955_v46  ;;  %v4782_v29 = vadd.f32 %v4781_v58, %v4733_v18  ;;  %4927 = vmatmul.bf16.gmra.mxu0 %v14209_v26  ;;  %v5995_v46 = vand.u32 2147483647, %v8968_v38 }
 0x4d0   :  { %v12659_v51 = vsel %vm5345_vm13, %v12596_v11, %v5961_v47  ;;  %5025 = vmatmul.bf16.gmra.mxu2 %v11944_v2 }
 0x4d1   :  { %14266 = vst [vmem:[#allocation49_spill] sm:$0xff] %v12659_v51  ;;  %v5421_v0 = vmin.f32 %v12652_v10, 20.0  ;;  %4976 = vmatmul.bf16.gmra.mxu1 %v14210_v15  ;;  %vm12676_vm0 = vcmp.lt.f32.partialorder %v5995_v46, 0.0004427343  ;;  %vm5357_vm4 = vcmp.gt.f32.partialorder %v12652_v10, 20.0 }
 0x4d3   :  { %v8972_v61 = vpop.eup %8971  ;;  %v5541_v42 = vmul.f32 1.442695, %v5421_v0  ;;  %v4830_v4 = vpop.f32.mrf.mxu2  ;;  %v5994_v0 = vmul.f32 %v8968_v38, %v5993_v22 }
 0x4d4   :  { %v6025_v9 = vadd.f32 1.0, %v8972_v61  ;;  %v12666_v40 = vadd.f32 %v4830_v4, %v4782_v29  ;;  %v4734_v11 = vpop.f32.mrf.mxu0  ;;  %v6028_v6 = vmul.f32 -0.5, %v8972_v61  ;;  %v8974_v48 = vpop.eup %8973  ;;  %v6031_v58 = vand.u32 2147483647, %v8972_v61 }
 0x4d5   :  { %8975 = vpow2.f32 %v5541_v42  ;;  %v4735_v57 = vadd.f32 %v4734_v11, %v12563_v39  ;;  %v5991_v19 = vmul.f32 0.6931472, %v8974_v48 }
 0x4d6   :  { %v4710_v3 = vpop.f32.mrf.mxu3  ;;  %v4783_v28 = vpop.f32.mrf.mxu1  ;;  %8977 = vlog2.f32 %v6025_v9  ;;  %v6029_v18 = vadd.f32 1.0, %v6028_v6  ;;  %vm6032_vm1 = vcmp.lt.f32.partialorder %v6031_v58, 0.0004427343 }
 0x4d7   :  { %v12670_v60 = vadd.f32 %v4710_v3, %v12572_v44  ;;  %v4784_v8 = vadd.f32 %v4783_v28, %v4735_v57  ;;  %v5997_v11 = vsel %vm12676_vm0, %v5994_v0, %v5991_v19 }
 0x4d8   :  { %v6030_v48 = vmul.f32 %v8972_v61, %v6029_v18  ;;  %v12693_v61 = vsel %vm5349_vm14, %v12613_v1, %v5997_v11  ;;  %v8025_v18 = vld [vmem:[#allocation2 + $0x2d8] sm:$0xf0]  ;;  %v8554_v11 = vld [vmem:[#allocation2 + $0x1cc] sm:$0xf] }
 0x4d9   :  { %v5425_v36 = vmin.f32 %v12670_v60, 20.0  ;;  %14269 = vst [vmem:[#allocation24_spill] sm:$0xff] %v12693_v61  ;;  %v7769_v1 = vld [vmem:[#allocation2 + $0xd8] sm:$0xf0]  ;;  %v8550_v61 = vld [vmem:[#allocation2 + $0x1ac] sm:$0xf] }
 0x4da   :  { %vm5361_vm5 = vcmp.gt.f32.partialorder %v12670_v60, 20.0 }
 0x4db   :  { %v12673_v47 = vpop.eup %8975  ;;  %v5549_v29 = vmul.f32 1.442695, %v5425_v36  ;;  %5064 = vmatmul.bf16.vlgmr.msrb.gmra.mxu3 %v12160_v21  ;;  %v4832_v4 = vpop.f32.mrf.mxu2 }
 0x4dc   :  { %v8978_v42 = vpop.eup %8977  ;;  %v12680_v44 = vadd.f32 %v4832_v4, %v4784_v8  ;;  %v4737_v13 = vpop.f32.mrf.mxu0  ;;  %v6061_v8 = vadd.f32 1.0, %v12673_v47  ;;  %v8618_v4 = vld [vmem:[#allocation2 + $0x3cc] sm:$0xf] }
 0x4dd   :  { %v6027_v6 = vmul.f32 0.6931472, %v8978_v42  ;;  %v4738_v38 = vadd.f32 %v4737_v13, %v12563_v39  ;;  %8979 = vpow2.f32 %v5549_v29  ;;  %v6064_v29 = vmul.f32 -0.5, %v12673_v47  ;;  %v8522_v42 = vld [vmem:[#allocation2 + $0xcc] sm:$0xf] }
 0x4de   :  { %v4786_v3 = vpop.f32.mrf.mxu1  ;;  %v4869_v57 = vpop.f32.mrf.mxu3  ;;  %v8153_v13 = vld [vmem:[#allocation2 + $0x3d8] sm:$0xf0]  ;;  %8981 = vlog2.f32 %v6061_v8 }
 0x4df   :  { %v12688_v28 = vadd.f32 %v4869_v57, %v12592_v41  ;;  %v6033_v22 = vsel %vm6032_vm1, %v6030_v48, %v6027_v6  ;;  %v4787_v46 = vadd.f32 %v4786_v3, %v4738_v38  ;;  %4932 = vmatmul.bf16.gmra.mxu0 %v14213_v24  ;;  %v8586_v41 = vld [vmem:[#allocation2 + $0x2cc] sm:$0xf]  ;;  %v8156_v48 = vor.u32 %v8618_v4, %v8153_v13  ;;  %v7897_v38 = vld [vmem:[#allocation2 + $0x1d8] sm:$0xf0] }
 0x4e0   :  { %v12696_v36 = vsel %vm5353_vm15, %v12634_v63, %v6033_v22  ;;  %5030 = vmatmul.bf16.gmra.mxu2 %v11983_v59  ;;  %v8028_v0 = vor.u32 %v8586_v41, %v8025_v18  ;;  %v7772_v63 = vor.u32 %v8522_v42, %v7769_v1  ;;  %v8582_v3 = vld [vmem:[#allocation2 + $0x2ac] sm:$0xf]  ;;  %v8009_v57 = vld [vmem:[#allocation2 + $0x2b8] sm:$0xf0]  ;;  %v7900_v18 = vor.u32 %v8554_v11, %v7897_v38 }
 0x4e1   :  { %14270 = vst [vmem:[#allocation25_spill] sm:$0xff] %v12696_v36  ;;  %v5366_v19 = vmin.f32 %v12688_v28, 20.0  ;;  %4981 = vmatmul.bf16.gmra.mxu1 %v14214_v23  ;;  %v8012_v16 = vor.u32 %v8582_v3, %v8009_v57  ;;  %v7753_v42 = vld [vmem:[#allocation2 + $0xb8] sm:$0xf0]  ;;  %v8614_v1 = vld [vmem:[#allocation2 + $0x3ac] sm:$0xf]  ;;  %5253 = vmatpush.bf16.msra.mxu3 %v8156_v48 }
 0x4e2   :  { %5204 = vmatpush.bf16.msra.mxu2 %v8028_v0  ;;  %5106 = vmatpush.bf16.msra.mxu0 %v7772_v63  ;;  %v8137_v13 = vld [vmem:[#allocation2 + $0x3b8] sm:$0xf0]  ;;  %v6065_v48 = vadd.f32 1.0, %v6064_v29  ;;  %vm5302_vm6 = vcmp.gt.f32.partialorder %v12688_v28, 20.0 }
 0x4e3   :  { %v5431_v9 = vmul.f32 1.442695, %v5366_v19  ;;  %v4835_v6 = vpop.f32.mrf.mxu2  ;;  %v12704_v22 = vpop.eup %8979  ;;  %v8518_v19 = vld [vmem:[#allocation2 + $0xac] sm:$0xf]  ;;  %v7881_v36 = vld [vmem:[#allocation2 + $0x1b8] sm:$0xf0]  ;;  %5155 = vmatpush.bf16.msra.mxu1 %v7900_v18 }
 0x4e4   :  { %v12706_v58 = vadd.f32 %v4835_v6, %v4787_v46  ;;  %v4739_v41 = vpop.f32.mrf.mxu0  ;;  %v7756_v4 = vor.u32 %v8518_v19, %v7753_v42  ;;  %v8140_v46 = vor.u32 %v8614_v1, %v8137_v13  ;;  %v7884_v63 = vor.u32 %v8550_v61, %v7881_v36  ;;  %v8982_v3 = vpop.eup %8981  ;;  %v14271_v19 = vld [vmem:[#allocation55_spill] sm:$0xff]  ;;  %v7993_v29 = vld [vmem:[#allocation2 + $0x298] sm:$0xf0] }
 0x4e5   :  { %8983 = vpow2.f32 %v5431_v9  ;;  %v4740_v8 = vadd.f32 %v4739_v41, %v12563_v39  ;;  %v6097_v6 = vadd.f32 1.0, %v12704_v22  ;;  %v6100_v38 = vmul.f32 -0.5, %v12704_v22 }
 0x4e6   :  { %v4788_v14 = vpop.f32.mrf.mxu1  ;;  %v4871_v0 = vpop.f32.mrf.mxu3  ;;  %5205 = vmatpush.bf16.msra.mxu2 %v8012_v16  ;;  %5107 = vmatpush.bf16.msra.mxu0 %v7756_v4  ;;  %v6067_v41 = vand.u32 2147483647, %v12673_v47  ;;  %v6063_v61 = vmul.f32 0.6931472, %v8982_v3 }
 0x4e7   :  { %v12710_v9 = vadd.f32 %v4871_v0, %v12607_v52  ;;  %v4789_v11 = vadd.f32 %v4788_v14, %v4740_v8  ;;  %5254 = vmatpush.bf16.msra.mxu3 %v8140_v46  ;;  %8985 = vlog2.f32 %v6097_v6  ;;  %5156 = vmatpush.bf16.msra.mxu1 %v7884_v63  ;;  %v6101_v36 = vadd.f32 1.0, %v6100_v38  ;;  %v8578_v8 = vld [vmem:[#allocation2 + $0x28c] sm:$0xf]  ;;  %v7737_v6 = vld [vmem:[#allocation2 + $0x98] sm:$0xf0] }
 0x4e8   :  { %v8514_v0 = vld [vmem:[#allocation2 + $0x8c] sm:$0xf]  ;;  %vm12724_vm2 = vcmp.lt.f32.partialorder %v6067_v41, 0.0004427343  ;;  %v6103_v38 = vand.u32 2147483647, %v12704_v22  ;;  %v7996_v3 = vor.u32 %v8578_v8, %v7993_v29 }
 0x4e9   :  { %v5370_v57 = vmin.f32 %v12710_v9, 20.0  ;;  %vm5306_vm8 = vcmp.gt.f32.partialorder %v12710_v9, 20.0 }
 0x4ea   :  { %5206 = vmatpush.bf16.msra.mxu2 %v7996_v3  ;;  %vm6104_vm3 = vcmp.lt.f32.partialorder %v6103_v38, 0.0004427343 }
 0x4eb   :  { %v12716_v52 = vpop.eup %8983  ;;  %v5439_v18 = vmul.f32 1.442695, %v5370_v57  ;;  %5069 = vmatmul.bf16.gmra.mxu3 %v14271_v19  ;;  %v4837_v16 = vpop.f32.mrf.mxu2  ;;  %v6066_v57 = vmul.f32 %v12673_v47, %v6065_v48  ;;  %v7865_v48 = vld [vmem:[#allocation2 + $0x198] sm:$0xf0] }
 0x4ec   :  { %v5566_v14 = vadd.f32 1.0, %v12716_v52  ;;  %v12720_v42 = vadd.f32 %v4837_v16, %v4789_v11  ;;  %v4742_v1 = vpop.f32.mrf.mxu0  ;;  %v8610_v16 = vld [vmem:[#allocation2 + $0x38c] sm:$0xf] }
 0x4ed   :  { %8987 = vpow2.f32 %v5439_v18  ;;  %v4743_v4 = vadd.f32 %v4742_v1, %v12563_v39  ;;  %v7740_v18 = vor.u32 %v8514_v0, %v7737_v6  ;;  %v8546_v1 = vld [vmem:[#allocation2 + $0x18c] sm:$0xf]  ;;  %v8986_v51 = vpop.eup %8985  ;;  %v8124_v47 = vor.u32 %v8610_v16, %v8121_v33 }
 0x4ee   :  { %v4791_v13 = vpop.f32.mrf.mxu1  ;;  %v4874_v46 = vpop.f32.mrf.mxu3  ;;  %8989 = vlog2.f32 %v5566_v14  ;;  %v6069_v41 = vsel %vm12724_vm2, %v6066_v57, %v6063_v61  ;;  %v14275_v14 = vld [vmem:[#allocation44_spill] sm:$0xff]  ;;  %v7868_v8 = vor.u32 %v8546_v1, %v7865_v48  ;;  %v6099_v29 = vmul.f32 0.6931472, %v8986_v51 }
 0x4ef   :  { %v12730_v11 = vadd.f32 %v4874_v46, %v12630_v17  ;;  %v4792_v27 = vadd.f32 %v4791_v13, %v4743_v4  ;;  %4937 = vmatmul.bf16.gmra.mxu0 %v14274_v62  ;;  %v14276_v17 = vld [vmem:[#allocation27_spill] sm:$0xff]  ;;  %v6102_v0 = vmul.f32 %v12704_v22, %v6101_v36  ;;  %v5569_v46 = vmul.f32 -0.5, %v12716_v52  ;;  %5255 = vmatpush.bf16.msra.mxu3 %v8124_v47 }
 0x4f0   :  { %5035 = vmatmul.bf16.gmra.mxu2 %v14276_v17  ;;  %5108 = vmatpush.bf16.msra.mxu0 %v7740_v18  ;;  %v12743_v51 = vsel %vm5357_vm4, %v12652_v10, %v6069_v41  ;;  %v5572_v10 = vand.u32 2147483647, %v12716_v52  ;;  %v8562_v17 = vld [vmem:[#allocation2 + $0x20c] sm:$0xf] }
 0x4f1   :  { %v5374_v37 = vmin.f32 %v12730_v11, 20.0  ;;  %4986 = vmatmul.bf16.gmra.mxu1 %v14275_v14  ;;  %v6105_v4 = vsel %vm6104_vm3, %v6102_v0, %v6099_v29  ;;  %14277 = vst [vmem:[#allocation51_spill] sm:$0xff] %v12743_v51  ;;  %v5570_v3 = vadd.f32 1.0, %v5569_v46  ;;  %v7721_v46 = vld [vmem:[#allocation2 + $0x78] sm:$0xf0]  ;;  %vm5310_vm12 = vcmp.gt.f32.partialorder %v12730_v11, 20.0 }
 0x4f2   :  { %5157 = vmatpush.bf16.msra.mxu1 %v7868_v8  ;;  %v12746_v22 = vsel %vm5361_vm5, %v12670_v60, %v6105_v4  ;;  %vm12762_vm7 = vcmp.lt.f32.partialorder %v5572_v10, 0.0004427343  ;;  %v14281_v4 = vld [vmem:[#allocation39_spill] sm:$0xff] }
 0x4f3   :  { %v8988_v33 = vpop.eup %8987  ;;  %v5447_v61 = vmul.f32 1.442695, %v5374_v37  ;;  %v4840_v6 = vpop.f32.mrf.mxu2  ;;  %14278 = vst [vmem:[#allocation28_spill] sm:$0xff] %v12746_v22  ;;  %v5571_v29 = vmul.f32 %v12716_v52, %v5570_v3  ;;  %v8606_v37 = vld [vmem:[#allocation2 + $0x36c] sm:$0xf] }
 0x4f4   :  { %v5602_v13 = vadd.f32 1.0, %v8988_v33  ;;  %v8990_v36 = vpop.eup %8989  ;;  %v5605_v57 = vmul.f32 -0.5, %v8988_v33  ;;  %v12748_v63 = vadd.f32 %v4840_v6, %v4792_v27  ;;  %v4744_v38 = vpop.f32.mrf.mxu0  ;;  %v5608_v48 = vand.u32 2147483647, %v8988_v33  ;;  %v14287_v6 = vld [vmem:[#allocation26_spill] sm:$0xff] }
 0x4f5   :  { %8991 = vpow2.f32 %v5447_v61  ;;  %v4745_v18 = vadd.f32 %v4744_v38, %v12563_v39  ;;  %v5568_v47 = vmul.f32 0.6931472, %v8990_v36  ;;  %v8570_v22 = vld [vmem:[#allocation2 + $0x24c] sm:$0xf] }
 0x4f6   :  { %8993 = vlog2.f32 %v5602_v13  ;;  %v4793_v16 = vpop.f32.mrf.mxu1  ;;  %v4876_v1 = vpop.f32.mrf.mxu3  ;;  %v5606_v27 = vadd.f32 1.0, %v5605_v57  ;;  %vm12770_vm9 = vcmp.lt.f32.partialorder %v5608_v48, 0.0004427343  ;;  %v8510_v48 = vld [vmem:[#allocation2 + $0x6c] sm:$0xf] }
 0x4f7   :  { %v12755_v60 = vadd.f32 %v4876_v1, %v12646_v35  ;;  %v4794_v41 = vadd.f32 %v4793_v16, %v4745_v18  ;;  %v5574_v13 = vsel %vm12762_vm7, %v5571_v29, %v5568_v47  ;;  %v8574_v16 = vld [vmem:[#allocation2 + $0x26c] sm:$0xf]  ;;  %v7977_v1 = vld [vmem:[#allocation2 + $0x278] sm:$0xf0] }
 0x4f8   :  { %v5607_v38 = vmul.f32 %v8988_v33, %v5606_v27  ;;  %v7980_v29 = vor.u32 %v8574_v16, %v7977_v1  ;;  %v12781_v51 = vsel %vm5302_vm6, %v12688_v28, %v5574_v13  ;;  %v7724_v27 = vor.u32 %v8510_v48, %v7721_v46  ;;  %v14286_v1 = vld [vmem:[#allocation61_spill] sm:$0xff]  ;;  %v8538_v48 = vld [vmem:[#allocation2 + $0x14c] sm:$0xf]  ;;  %v7833_v13 = vld [vmem:[#allocation2 + $0x158] sm:$0xf0] }
 0x4f9   :  { %v5378_v8 = vmin.f32 %v12755_v60, 20.0  ;;  %14284 = vst [vmem:[#allocation29_spill] sm:$0xff] %v12781_v51  ;;  %v8534_v51 = vld [vmem:[#allocation2 + $0x12c] sm:$0xf]  ;;  %vm5314_vm13 = vcmp.gt.f32.partialorder %v12755_v60, 20.0 }
 0x4fa   :  { %5207 = vmatpush.bf16.msra.mxu2 %v7980_v29  ;;  %5109 = vmatpush.bf16.msra.mxu0 %v7724_v27  ;;  %v7705_v29 = vld [vmem:[#allocation2 + $0x58] sm:$0xf0] }
 0x4fb   :  { %v12759_v0 = vpop.eup %8991  ;;  %v5455_v61 = vmul.f32 1.442695, %v5378_v8  ;;  %5074 = vmatmul.bf16.gmra.mxu3 %v14281_v4  ;;  %v4842_v52 = vpop.f32.mrf.mxu2  ;;  %v8530_v4 = vld [vmem:[#allocation2 + $0x10c] sm:$0xf] }
 0x4fc   :  { %v8994_v35 = vpop.eup %8993  ;;  %v5638_v36 = vadd.f32 1.0, %v12759_v0  ;;  %v12775_v3 = vadd.f32 %v4842_v52, %v4794_v41  ;;  %v4747_v18 = vpop.f32.mrf.mxu0  ;;  %v7849_v52 = vld [vmem:[#allocation2 + $0x178] sm:$0xf0] }
 0x4fd   :  { %v5604_v57 = vmul.f32 0.6931472, %v8994_v35  ;;  %8995 = vpow2.f32 %v5455_v61  ;;  %v4748_v10 = vadd.f32 %v4747_v18, %v12563_v39  ;;  %v8105_v61 = vld [vmem:[#allocation2 + $0x378] sm:$0xf0]  ;;  %v8542_v35 = vld [vmem:[#allocation2 + $0x16c] sm:$0xf] }
 0x4fe   :  { %v4796_v47 = vpop.f32.mrf.mxu1  ;;  %v4879_v8 = vpop.f32.mrf.mxu3  ;;  %v8108_v28 = vor.u32 %v8606_v37, %v8105_v61  ;;  %8997 = vlog2.f32 %v5638_v36 }
 0x4ff   :  { %v5610_v33 = vsel %vm12770_vm9, %v5607_v38, %v5604_v57  ;;  %v12786_v41 = vadd.f32 %v4879_v8, %v12666_v40  ;;  %v4797_v16 = vadd.f32 %v4796_v47, %v4748_v10  ;;  %4942 = vmatmul.bf16.gmra.mxu0 %v14286_v1  ;;  %v14288_v57 = vld [vmem:[#allocation32_spill] sm:$0xff]  ;;  %v7852_v38 = vor.u32 %v8542_v35, %v7849_v52  ;;  %v7961_v35 = vld [vmem:[#allocation2 + $0x258] sm:$0xf0] }
 0x500   :  { %v12791_v18 = vsel %vm5306_vm8, %v12710_v9, %v5610_v33  ;;  %5040 = vmatmul.bf16.gmra.mxu2 %v14288_v57  ;;  %5256 = vmatpush.bf16.msra.mxu3 %v8108_v28  ;;  %v5641_v10 = vmul.f32 -0.5, %v12759_v0  ;;  %v8506_v8 = vld [vmem:[#allocation2 + $0x4c] sm:$0xf]  ;;  %v7836_v28 = vor.u32 %v8538_v48, %v7833_v13  ;;  %v7817_v48 = vld [vmem:[#allocation2 + $0x138] sm:$0xf0] }
 0x501   :  { %14285 = vst [vmem:[#allocation54_spill] sm:$0xff] %v12791_v18  ;;  %v5382_v40 = vmin.f32 %v12786_v41, 20.0  ;;  %4991 = vmatmul.bf16.gmra.mxu1 %v14287_v6  ;;  %v7708_v61 = vor.u32 %v8506_v8, %v7705_v29  ;;  %v14289_v6 = vld [vmem:[#allocation14_spill] sm:$0xff]  ;;  %vm5318_vm14 = vcmp.gt.f32.partialorder %v12786_v41, 20.0 }
 0x502   :  { %5158 = vmatpush.bf16.msra.mxu1 %v7852_v38  ;;  %v5642_v18 = vadd.f32 1.0, %v5641_v10  ;;  %v8602_v10 = vld [vmem:[#allocation2 + $0x34c] sm:$0xf] }
 0x503   :  { %v5463_v9 = vmul.f32 1.442695, %v5382_v40  ;;  %v12800_v47 = vpop.eup %8995  ;;  %v4845_v37 = vpop.f32.mrf.mxu2  ;;  %v7964_v40 = vor.u32 %v8570_v22, %v7961_v35  ;;  %5110 = vmatpush.bf16.msra.mxu0 %v7708_v61  ;;  %v8566_v35 = vld [vmem:[#allocation2 + $0x22c] sm:$0xf]  ;;  %v7945_v61 = vld [vmem:[#allocation2 + $0x238] sm:$0xf0] }
 0x504   :  { %v12802_v46 = vadd.f32 %v4845_v37, %v4797_v16  ;;  %v4749_v33 = vpop.f32.mrf.mxu0  ;;  %v8998_v38 = vpop.eup %8997  ;;  %v5644_v16 = vand.u32 2147483647, %v12759_v0  ;;  %v5674_v37 = vadd.f32 1.0, %v12800_v47  ;;  %v5677_v8 = vmul.f32 -0.5, %v12800_v47 }
 0x505   :  { %8999 = vpow2.f32 %v5463_v9  ;;  %v4750_v36 = vadd.f32 %v4749_v33, %v12563_v39  ;;  %5208 = vmatpush.bf16.msra.mxu2 %v7964_v40  ;;  %v8502_v9 = vld [vmem:[#allocation2 + $0x2c] sm:$0xf]  ;;  %v7689_v33 = vld [vmem:[#allocation2 + $0x38] sm:$0xf0]  ;;  %v5643_v14 = vmul.f32 %v12759_v0, %v5642_v18 }
 0x506   :  { %v4798_v27 = vpop.f32.mrf.mxu1  ;;  %v4881_v52 = vpop.f32.mrf.mxu3  ;;  %5159 = vmatpush.bf16.msra.mxu1 %v7836_v28  ;;  %v7692_v22 = vor.u32 %v8502_v9, %v7689_v33  ;;  %9001 = vlog2.f32 %v5674_v37  ;;  %v5680_v28 = vand.u32 2147483647, %v12800_v47  ;;  %v8498_v9 = vld [vmem:[#allocation2 + $0xc] sm:$0xf]  ;;  %v7673_v33 = vld [vmem:[#allocation2 + $0x18] sm:$0xf0] }
 0x507   :  { %v12806_v50 = vadd.f32 %v4881_v52, %v12680_v44  ;;  %v4799_v29 = vadd.f32 %v4798_v27, %v4750_v36  ;;  %v7820_v44 = vor.u32 %v8534_v51, %v7817_v48  ;;  %v5640_v52 = vmul.f32 0.6931472, %v8998_v38  ;;  %v8089_v37 = vld [vmem:[#allocation2 + $0x358] sm:$0xf0] }
 0x508   :  { %5111 = vmatpush.bf16.msra.mxu0 %v7692_v22  ;;  %v7948_v36 = vor.u32 %v8566_v35, %v7945_v61  ;;  %v5678_v27 = vadd.f32 1.0, %v5677_v8  ;;  %v7801_v22 = vld [vmem:[#allocation2 + $0x118] sm:$0xf0]  ;;  %v8092_v61 = vor.u32 %v8602_v10, %v8089_v37  ;;  %vm12823_vm10 = vcmp.lt.f32.partialorder %v5644_v16, 0.0004427343 }
 0x509   :  { %v5386_v13 = vmin.f32 %v12806_v50, 20.0  ;;  %vm5681_vm11 = vcmp.lt.f32.partialorder %v5680_v28, 0.0004427343  ;;  %vm5322_vm1 = vcmp.gt.f32.partialorder %v12806_v50, 20.0 }
 0x50a   :  { %5160 = vmatpush.bf16.msra.mxu1 %v7820_v44  ;;  %5209 = vmatpush.bf16.msra.mxu2 %v7948_v36  ;;  %v7929_v44 = vld [vmem:[#allocation2 + $0x218] sm:$0xf0]  ;;  %v5679_v18 = vmul.f32 %v12800_v47, %v5678_v27 }
 0x50b   :  { %v5471_v57 = vmul.f32 1.442695, %v5386_v13  ;;  %5079 = vmatmul.bf16.gmra.mxu3 %v14289_v6  ;;  %v12814_v40 = vpop.eup %8999  ;;  %v4847_v1 = vpop.f32.mrf.mxu2  ;;  %v7676_v13 = vor.u32 %v8498_v9, %v7673_v33  ;;  %v7804_v6 = vor.u32 %v8530_v4, %v7801_v22  ;;  %v5646_v4 = vsel %vm12823_vm10, %v5643_v14, %v5640_v52 }
 0x50c   :  { %v12816_v51 = vadd.f32 %v4847_v1, %v4799_v29  ;;  %v4752_v38 = vpop.f32.mrf.mxu0  ;;  %v9002_v62 = vpop.eup %9001  ;;  %v5710_v36 = vadd.f32 1.0, %v12814_v40  ;;  %5257 = vmatpush.bf16.msra.mxu3 %v8092_v61  ;;  %v5713_v52 = vmul.f32 -0.5, %v12814_v40 }
 0x50d   :  { %9003 = vpow2.f32 %v5471_v57  ;;  %v4753_v8 = vadd.f32 %v4752_v38, %v12563_v39  ;;  %5112 = vmatpush.bf16.msra.mxu0 %v7676_v13  ;;  %v7932_v57 = vor.u32 %v8562_v17, %v7929_v44  ;;  %v5676_v0 = vmul.f32 0.6931472, %v9002_v62 }
 0x50e   :  { %v4801_v48 = vpop.f32.mrf.mxu1  ;;  %v4884_v35 = vpop.f32.mrf.mxu3  ;;  %9005 = vlog2.f32 %v5710_v36  ;;  %5161 = vmatpush.bf16.msra.mxu1 %v7804_v6  ;;  %v12838_v62 = vsel %vm5310_vm12, %v12730_v11, %v5646_v4 }
 0x50f   :  { %v12821_v1 = vadd.f32 %v4884_v35, %v12706_v58  ;;  %v4802_v9 = vadd.f32 %v4801_v48, %v4753_v8  ;;  %4947 = vmatmul.bf16.gmra.mxu0 %v14230_v53  ;;  %5210 = vmatpush.bf16.msra.mxu2 %v7932_v57  ;;  %v5682_v17 = vsel %vm5681_vm11, %v5679_v18, %v5676_v0  ;;  %v5714_v8 = vadd.f32 1.0, %v5713_v52 }
 0x510   :  { %5045 = vmatmul.bf16.gmra.mxu2 %v12105_v49  ;;  %v12841_v47 = vsel %vm5314_vm13, %v12755_v60, %v5682_v17  ;;  %v5716_v35 = vand.u32 2147483647, %v12814_v40 }
 0x511   :  { %v5390_v58 = vmin.f32 %v12821_v1, 20.0  ;;  %4996 = vmatmul.bf16.gmra.mxu1 %v11603_v25  ;;  %v5715_v4 = vmul.f32 %v12814_v40, %v5714_v8  ;;  %vm5326_vm4 = vcmp.gt.f32.partialorder %v12821_v1, 20.0 }
 0x512   :  { %vm12856_vm0 = vcmp.lt.f32.partialorder %v5716_v35, 0.0004427343 }
 0x513   :  { %v9004_v16 = vpop.eup %9003  ;;  %v5479_v14 = vmul.f32 1.442695, %v5390_v58  ;;  %v4850_v27 = vpop.f32.mrf.mxu2 }
 0x514   :  { %v5746_v33 = vadd.f32 1.0, %v9004_v16  ;;  %v5749_v38 = vmul.f32 -0.5, %v9004_v16  ;;  %v12846_v6 = vadd.f32 %v4850_v27, %v4802_v9  ;;  %v4754_v10 = vpop.f32.mrf.mxu0  ;;  %v9006_v22 = vpop.eup %9005  ;;  %v5752_v29 = vand.u32 2147483647, %v9004_v16  ;;  %v8598_v27 = vld [vmem:[#allocation2 + $0x32c] sm:$0xf] }
 0x515   :  { %9007 = vpow2.f32 %v5479_v14  ;;  %v4755_v37 = vadd.f32 %v4754_v10, %v12563_v39  ;;  %v5712_v57 = vmul.f32 0.6931472, %v9006_v22 }
 0x516   :  { %v4803_v13 = vpop.f32.mrf.mxu1  ;;  %v4886_v11 = vpop.f32.mrf.mxu3  ;;  %9009 = vlog2.f32 %v5746_v33  ;;  %v5750_v61 = vadd.f32 1.0, %v5749_v38  ;;  %v8073_v33 = vld [vmem:[#allocation2 + $0x338] sm:$0xf0]  ;;  %vm5753_vm15 = vcmp.lt.f32.partialorder %v5752_v29, 0.0004427343 }
 0x517   :  { %v12850_v60 = vadd.f32 %v4886_v11, %v12720_v42  ;;  %v4804_v48 = vadd.f32 %v4803_v13, %v4755_v37  ;;  %v5718_v38 = vsel %vm12856_vm0, %v5715_v4, %v5712_v57  ;;  %v8076_v11 = vor.u32 %v8598_v27, %v8073_v33 }
 0x518   :  { %v5751_v58 = vmul.f32 %v9004_v16, %v5750_v61 }
 0x519   :  { %v5394_v44 = vmin.f32 %v12850_v60, 20.0  ;;  %5258 = vmatpush.bf16.msra.mxu3 %v8076_v11  ;;  %vm5330_vm5 = vcmp.gt.f32.partialorder %v12850_v60, 20.0 }
 0x51b   :  { %v9008_v36 = vpop.eup %9007  ;;  %v5487_v9 = vmul.f32 1.442695, %v5394_v44  ;;  %5084 = vmatmul.bf16.gmra.mxu3 %v12305_v7  ;;  %v4852_v18 = vpop.f32.mrf.mxu2 }
 0x51c   :  { %v9010_v0 = vpop.eup %9009  ;;  %v5782_v17 = vadd.f32 1.0, %v9008_v36  ;;  %v12860_v14 = vadd.f32 %v4852_v18, %v4804_v48  ;;  %v4757_v52 = vpop.f32.mrf.mxu0  ;;  %v12872_v48 = vsel %vm5318_vm14, %v12786_v41, %v5718_v38  ;;  %v5785_v44 = vmul.f32 -0.5, %v9008_v36 }
 0x51d   :  { %9011 = vpow2.f32 %v5487_v9  ;;  %v5748_v10 = vmul.f32 0.6931472, %v9010_v0  ;;  %v4758_v40 = vadd.f32 %v4757_v52, %v12563_v39  ;;  %14294 = vst [vmem:[#allocation30_spill] sm:$0xff] %v12872_v48  ;;  %v5788_v33 = vand.u32 2147483647, %v9008_v36  ;;  %v8633_v48 = vld [vmem:[#allocation5 + $0x40] sm:$0xff] }
 0x51e   :  { %v4806_v37 = vpop.f32.mrf.mxu1  ;;  %v4889_v13 = vpop.f32.mrf.mxu3  ;;  %9013 = vlog2.f32 %v5782_v17  ;;  %v5786_v52 = vadd.f32 1.0, %v5785_v44 }
 0x51f   :  { %v12868_v16 = vadd.f32 %v4889_v13, %v12748_v63  ;;  %v5754_v22 = vsel %vm5753_vm15, %v5751_v58, %v5748_v10  ;;  %v4807_v8 = vadd.f32 %v4806_v37, %v4758_v40  ;;  %4952 = vmatmul.bf16.gmra.mxu0 %v14233_v34  ;;  %vm12890_vm2 = vcmp.lt.f32.partialorder %v5788_v33, 0.0004427343 }
 0x520   :  { %v12875_v35 = vsel %vm5322_vm1, %v12806_v50, %v5754_v22  ;;  %5050 = vmatmul.bf16.gmra.mxu2 %v12127_v5  ;;  %v5787_v13 = vmul.f32 %v9008_v36, %v5786_v52  ;;  %v8594_v36 = vld [vmem:[#allocation2 + $0x30c] sm:$0xf] }
 0x521   :  { %14295 = vst [vmem:[#allocation31_spill] sm:$0xff] %v12875_v35  ;;  %v5398_v61 = vmin.f32 %v12868_v16, 20.0  ;;  %5001 = vmatmul.bf16.gmra.mxu1 %v11647_v45  ;;  %vm5334_vm8 = vcmp.gt.f32.partialorder %v12868_v16, 20.0  ;;  %v8641_v35 = vld [vmem:[#allocation5 + $0x80] sm:$0xff] }
 0x523   :  { %v9012_v57 = vpop.eup %9011  ;;  %v5495_v29 = vmul.f32 1.442695, %v5398_v61  ;;  %v4855_v9 = vpop.f32.mrf.mxu2 }
 0x524   :  { %v5818_v4 = vadd.f32 1.0, %v9012_v57  ;;  %v9014_v0 = vpop.eup %9013  ;;  %v12882_v41 = vadd.f32 %v4855_v9, %v4807_v8  ;;  %v4759_v50 = vpop.f32.mrf.mxu0  ;;  %v5821_v18 = vmul.f32 -0.5, %v9012_v57  ;;  %v5824_v11 = vand.u32 2147483647, %v9012_v57 }
 0x525   :  { %9015 = vpow2.f32 %v5495_v29  ;;  %v4760_v42 = vadd.f32 %v4759_v50, %v12563_v39  ;;  %v5784_v10 = vmul.f32 0.6931472, %v9014_v0  ;;  %v8057_v0 = vld [vmem:[#allocation2 + $0x318] sm:$0xf0] }
 0x526   :  { %v4808_v58 = vpop.f32.mrf.mxu1  ;;  %v4891_v17 = vpop.f32.mrf.mxu3  ;;  %9017 = vlog2.f32 %v5818_v4  ;;  %v5822_v37 = vadd.f32 1.0, %v5821_v18  ;;  %vm5825_vm3 = vcmp.lt.f32.partialorder %v5824_v11, 0.0004427343 }
 0x527   :  { %v12886_v27 = vadd.f32 %v4891_v17, %v12775_v3  ;;  %v4809_v38 = vadd.f32 %v4808_v58, %v4760_v42  ;;  %v5790_v3 = vsel %vm12890_vm2, %v5787_v13, %v5784_v10  ;;  %v8060_v17 = vor.u32 %v8594_v36, %v8057_v0 }
 0x528   :  { %v5823_v18 = vmul.f32 %v9012_v57, %v5822_v37 }
 0x529   :  { %v5402_v40 = vmin.f32 %v12886_v27, 20.0  ;;  %5259 = vmatpush.bf16.msra.mxu3 %v8060_v17  ;;  %vm5338_vm9 = vcmp.gt.f32.partialorder %v12886_v27, 20.0 }
 0x52b   :  { %v9016_v22 = vpop.eup %9015  ;;  %v5503_v8 = vmul.f32 1.442695, %v5402_v40  ;;  %5089 = vmatmul.bf16.gmra.mxu3 %v12338_v30  ;;  %v4857_v44 = vpop.f32.mrf.mxu2 }
 0x52c   :  { %v9018_v61 = vpop.eup %9017  ;;  %v5854_v29 = vadd.f32 1.0, %v9016_v22  ;;  %v12896_v9 = vadd.f32 %v4857_v44, %v4809_v38  ;;  %v12898_v4 = vpop.f32.mrf.mxu0  ;;  %v12909_v38 = vsel %vm5326_vm4, %v12821_v1, %v5790_v3  ;;  %v5860_v44 = vand.u32 2147483647, %v9016_v22 }
 0x52d   :  { %9019 = vpow2.f32 %v5503_v8  ;;  %v5820_v50 = vmul.f32 0.6931472, %v9018_v61  ;;  %14298 = vst [vmem:[#allocation13_spill] sm:$0xff] %v12909_v38  ;;  %v8628_v38 = vld [vmem:[#allocation5 + $0x18] sm:$0xff] }
 0x52e   :  { %v4894_v42 = vpop.f32.mrf.mxu3  ;;  %v12900_v58 = vpop.f32.mrf.mxu1  ;;  %9021 = vlog2.f32 %v5854_v29  ;;  %vm12932_vm6 = vcmp.lt.f32.partialorder %v5860_v44, 0.0004427343 }
 0x52f   :  { %v12905_v52 = vadd.f32 %v4894_v42, %v12802_v46  ;;  %v5826_v33 = vsel %vm5825_vm3, %v5823_v18, %v5820_v50  ;;  %5113 = vmatmul.bf16.vlgmr.msra.gmra.mxu0 %v14203_v43  ;;  %v5857_v43 = vmul.f32 -0.5, %v9016_v22 }
 0x530   :  { %v12912_v57 = vsel %vm5330_vm5, %v12850_v60, %v5826_v33  ;;  %5211 = vmatmul.bf16.vlgmr.msra.gmra.mxu2 %v11870_v56 }
 0x531   :  { %14299 = vst [vmem:[#allocation34_spill] sm:$0xff] %v12912_v57  ;;  %v5406_v10 = vmin.f32 %v12905_v52, 20.0  ;;  %5162 = vmatmul.bf16.vlgmr.msra.gmra.mxu1 %v14204_v12  ;;  %v5858_v12 = vadd.f32 1.0, %v5857_v43  ;;  %vm5342_vm12 = vcmp.gt.f32.partialorder %v12905_v52, 20.0  ;;  %v8636_v57 = vld [vmem:[#allocation5 + $0x58] sm:$0xff] }
 0x533   :  { %v9020_v40 = vpop.eup %9019  ;;  %v5511_v37 = vmul.f32 1.442695, %v5406_v10  ;;  %v12919_v13 = vpop.f32.mrf.mxu2  ;;  %v5859_v42 = vmul.f32 %v9016_v22, %v5858_v12 }
 0x534   :  { %v5890_v1 = vadd.f32 1.0, %v9020_v40  ;;  %v12921_v11 = vpop.f32.mrf.mxu0  ;;  %v5893_v60 = vmul.f32 -0.5, %v9020_v40  ;;  %v9022_v8 = vpop.eup %9021  ;;  %v5896_v0 = vand.u32 2147483647, %v9020_v40 }
 0x535   :  { %9023 = vpow2.f32 %v5511_v37  ;;  %v5856_v29 = vmul.f32 0.6931472, %v9022_v8 }
 0x536   :  { %v4896_v39 = vpop.f32.mrf.mxu3  ;;  %v12923_v61 = vpop.f32.mrf.mxu1  ;;  %9025 = vlog2.f32 %v5890_v1  ;;  %v5894_v36 = vadd.f32 1.0, %v5893_v60  ;;  %vm5897_vm7 = vcmp.lt.f32.partialorder %v5896_v0, 0.0004427343 }
 0x537   :  { %v12926_v56 = vadd.f32 %v4896_v39, %v12816_v51  ;;  %v5862_v43 = vsel %vm12932_vm6, %v5859_v42, %v5856_v29 }
 0x538   :  { %v5895_v60 = vmul.f32 %v9020_v40, %v5894_v36  ;;  %v12949_v44 = vsel %vm5334_vm8, %v12868_v16, %v5862_v43 }
 0x539   :  { %v5410_v3 = vmin.f32 %v12926_v56, 20.0  ;;  %14302 = vst [vmem:[#allocation35_spill] sm:$0xff] %v12949_v44  ;;  %vm5346_vm13 = vcmp.gt.f32.partialorder %v12926_v56, 20.0 }
 0x53b   :  { %v9024_v50 = vpop.eup %9023  ;;  %v5519_v18 = vmul.f32 1.442695, %v5410_v3  ;;  %5094 = vmatmul.bf16.gmra.mxu3 %v12368_v54  ;;  %v12930_v33 = vpop.f32.mrf.mxu2 }
 0x53c   :  { %v9026_v17 = vpop.eup %9025  ;;  %v5926_v51 = vadd.f32 1.0, %v9024_v50  ;;  %v12936_v37 = vpop.f32.mrf.mxu0  ;;  %v5929_v0 = vmul.f32 -0.5, %v9024_v50 }
 0x53d   :  { %9027 = vpow2.f32 %v5519_v18  ;;  %v5892_v1 = vmul.f32 0.6931472, %v9026_v17 }
 0x53e   :  { %v4899_v8 = vpop.f32.mrf.mxu3  ;;  %v12940_v39 = vpop.f32.mrf.mxu1  ;;  %9029 = vlog2.f32 %v5926_v51  ;;  %v5932_v51 = vand.u32 2147483647, %v9024_v50 }
 0x53f   :  { %v12945_v22 = vadd.f32 %v4899_v8, %v12846_v6  ;;  %v5898_v12 = vsel %vm5897_vm7, %v5895_v60, %v5892_v1  ;;  %5118 = vmatmul.bf16.gmra.mxu0 %v14207_v20 }
 0x540   :  { %v12952_v3 = vsel %vm5338_vm9, %v12886_v27, %v5898_v12  ;;  %5216 = vmatmul.bf16.gmra.mxu2 %v11907_v31  ;;  %vm12972_vm10 = vcmp.lt.f32.partialorder %v5932_v51, 0.0004427343 }
 0x541   :  { %14303 = vst [vmem:[#allocation17_spill] sm:$0xff] %v12952_v3  ;;  %v5414_v40 = vmin.f32 %v12945_v22, 20.0  ;;  %5167 = vmatmul.bf16.gmra.mxu1 %v14208_v55  ;;  %v5930_v55 = vadd.f32 1.0, %v5929_v0  ;;  %vm5350_vm15 = vcmp.gt.f32.partialorder %v12945_v22, 20.0 }
 0x543   :  { %v9028_v29 = vpop.eup %9027  ;;  %v5527_v36 = vmul.f32 1.442695, %v5414_v40  ;;  %v12959_v20 = vpop.f32.mrf.mxu2 }
 0x544   :  { %v5962_v16 = vadd.f32 1.0, %v9028_v29  ;;  %v12961_v18 = vpop.f32.mrf.mxu0  ;;  %v5965_v27 = vmul.f32 -0.5, %v9028_v29  ;;  %v9030_v42 = vpop.eup %9029  ;;  %v5968_v8 = vand.u32 2147483647, %v9028_v29 }
 0x545   :  { %9031 = vpow2.f32 %v5527_v36  ;;  %v5928_v1 = vmul.f32 0.6931472, %v9030_v42  ;;  %v5931_v36 = vmul.f32 %v9024_v50, %v5930_v55 }
 0x546   :  { %v4901_v17 = vpop.f32.mrf.mxu3  ;;  %v12963_v10 = vpop.f32.mrf.mxu1  ;;  %9033 = vlog2.f32 %v5962_v16  ;;  %v5966_v60 = vadd.f32 1.0, %v5965_v27  ;;  %vm5969_vm11 = vcmp.lt.f32.partialorder %v5968_v8, 0.0004427343 }
 0x547   :  { %v12966_v31 = vadd.f32 %v4901_v17, %v12860_v14  ;;  %v5934_v27 = vsel %vm12972_vm10, %v5931_v36, %v5928_v1 }
 0x548   :  { %v5967_v17 = vmul.f32 %v9028_v29, %v5966_v60  ;;  %v12989_v51 = vsel %vm5342_vm12, %v12905_v52, %v5934_v27 }
 0x549   :  { %v5418_v43 = vmin.f32 %v12966_v31, 20.0  ;;  %14306 = vst [vmem:[#allocation37_spill] sm:$0xff] %v12989_v51  ;;  %vm5354_vm1 = vcmp.gt.f32.partialorder %v12966_v31, 20.0 }
 0x54b   :  { %v9032_v12 = vpop.eup %9031  ;;  %v5535_v40 = vmul.f32 1.442695, %v5418_v43  ;;  %5099 = vmatmul.bf16.gmra.mxu3 %v12384_v32  ;;  %v12970_v46 = vpop.f32.mrf.mxu2 }
 0x54c   :  { %v9034_v6 = vpop.eup %9033  ;;  %v5998_v14 = vadd.f32 1.0, %v9032_v12  ;;  %v12976_v0 = vpop.f32.mrf.mxu0  ;;  %v6001_v8 = vmul.f32 -0.5, %v9032_v12  ;;  %v6004_v27 = vand.u32 2147483647, %v9032_v12 }
 0x54d   :  { %9035 = vpow2.f32 %v5535_v40  ;;  %v5964_v42 = vmul.f32 0.6931472, %v9034_v6 }
 0x54e   :  { %v4904_v43 = vpop.f32.mrf.mxu3  ;;  %v12980_v63 = vpop.f32.mrf.mxu1  ;;  %9037 = vlog2.f32 %v5998_v14  ;;  %vm6005_vm0 = vcmp.lt.f32.partialorder %v6004_v27, 0.0004427343  ;;  %v8632_v27 = vld [vmem:[#allocation5 + $0x38] sm:$0xff] }
 0x54f   :  { %v12985_v50 = vadd.f32 %v4904_v43, %v12882_v41  ;;  %v5970_v55 = vsel %vm5969_vm11, %v5967_v17, %v5964_v42  ;;  %5123 = vmatmul.bf16.gmra.mxu0 %v14209_v26 }
 0x550   :  { %v12992_v6 = vsel %vm5346_vm13, %v12926_v56, %v5970_v55  ;;  %5221 = vmatmul.bf16.gmra.mxu2 %v11944_v2  ;;  %6489 = vmatpush.bf16.msrb.mxu0 %v8632_v27 }
 0x551   :  { %14307 = vst [vmem:[#allocation38_spill] sm:$0xff] %v12992_v6  ;;  %v5422_v29 = vmin.f32 %v12985_v50, 20.0  ;;  %5172 = vmatmul.bf16.gmra.mxu1 %v14210_v15  ;;  %v6002_v15 = vadd.f32 1.0, %v6001_v8  ;;  %vm5358_vm4 = vcmp.gt.f32.partialorder %v12985_v50, 20.0 }
 0x553   :  { %v9036_v1 = vpop.eup %9035  ;;  %v5543_v60 = vmul.f32 1.442695, %v5422_v29  ;;  %v12999_v26 = vpop.f32.mrf.mxu2  ;;  %v6003_v41 = vmul.f32 %v9032_v12, %v6002_v15 }
 0x554   :  { %v6034_v52 = vadd.f32 1.0, %v9036_v1  ;;  %v13001_v40 = vpop.f32.mrf.mxu0  ;;  %v6037_v56 = vmul.f32 -0.5, %v9036_v1  ;;  %v9038_v36 = vpop.eup %9037  ;;  %v6040_v55 = vand.u32 2147483647, %v9036_v1 }
 0x555   :  { %9039 = vpow2.f32 %v5543_v60  ;;  %v6000_v17 = vmul.f32 0.6931472, %v9038_v36 }
 0x556   :  { %v4906_v16 = vpop.f32.mrf.mxu3  ;;  %v13003_v14 = vpop.f32.mrf.mxu1  ;;  %9041 = vlog2.f32 %v6034_v52  ;;  %v6038_v43 = vadd.f32 1.0, %v6037_v56  ;;  %vm6041_vm14 = vcmp.lt.f32.partialorder %v6040_v55, 0.0004427343 }
 0x557   :  { %v13006_v2 = vadd.f32 %v4906_v16, %v12896_v9  ;;  %v6006_v8 = vsel %vm6005_vm0, %v6003_v41, %v6000_v17 }
 0x558   :  { %v6039_v6 = vmul.f32 %v9036_v1, %v6038_v43  ;;  %v13022_v12 = vsel %vm5350_vm15, %v12945_v22, %v6006_v8  ;;  %v8648_v22 = vld [vmem:[#allocation5 + $0xb8] sm:$0xff] }
 0x559   :  { %v5426_v42 = vmin.f32 %v13006_v2, 20.0  ;;  %14308 = vst [vmem:[#allocation45_spill] sm:$0xff] %v13022_v12  ;;  %6587 = vmatpush.bf16.msrb.mxu2 %v8648_v22  ;;  %vm5362_vm5 = vcmp.gt.f32.partialorder %v13006_v2, 20.0 }
 0x55b   :  { %v9040_v29 = vpop.eup %9039  ;;  %v5551_v60 = vmul.f32 1.442695, %v5426_v42  ;;  %5260 = vmatmul.bf16.vlgmr.msra.gmra.mxu3 %v12160_v21  ;;  %v13010_v51 = vpop.f32.mrf.mxu2  ;;  %v8656_v42 = vld [vmem:[#allocation5 + $0xf8] sm:$0xff] }
 0x55c   :  { %v9042_v28 = vpop.eup %9041  ;;  %v6070_v52 = vadd.f32 1.0, %v9040_v29  ;;  %v13012_v9 = vpop.f32.mrf.mxu0  ;;  %v6073_v1 = vmul.f32 -0.5, %v9040_v29  ;;  %6636 = vmatpush.bf16.msrb.mxu3 %v8656_v42 }
 0x55d   :  { %9043 = vpow2.f32 %v5551_v60  ;;  %v6036_v16 = vmul.f32 0.6931472, %v9042_v28  ;;  %v6076_v60 = vand.u32 2147483647, %v9040_v29 }
 0x55e   :  { %v13014_v44 = vpop.f32.mrf.mxu1  ;;  %v13016_v56 = vpop.f32.mrf.mxu3  ;;  %9045 = vlog2.f32 %v6070_v52  ;;  %v6074_v55 = vadd.f32 1.0, %v6073_v1 }
 0x55f   :  { %v6042_v21 = vsel %vm6041_vm14, %v6039_v6, %v6036_v16  ;;  %5128 = vmatmul.bf16.gmra.mxu0 %v14213_v24  ;;  %vm6077_vm2 = vcmp.lt.f32.partialorder %v6076_v60, 0.0004427343  ;;  %v8647_v60 = vld [vmem:[#allocation5 + $0xb0] sm:$0xff] }
 0x560   :  { %v13025_v36 = vsel %vm5354_vm1, %v12966_v31, %v6042_v21  ;;  %5226 = vmatmul.bf16.gmra.mxu2 %v11983_v59  ;;  %v8640_v59 = vld [vmem:[#allocation5 + $0x78] sm:$0xff]  ;;  %v6075_v21 = vmul.f32 %v9040_v29, %v6074_v55  ;;  %v14310_v29 = vld [vmem:[#allocation60_spill] sm:$0xff] }
 0x561   :  { %14309 = vst [vmem:[#allocation47_spill] sm:$0xff] %v13025_v36  ;;  %5177 = vmatmul.bf16.gmra.mxu1 %v14214_v23  ;;  %6588 = vmatpush.bf16.msrb.mxu2 %v8647_v60 }
 0x562   :  { %6538 = vmatpush.bf16.msrb.mxu1 %v8640_v59 }
 0x563   :  { %v9044_v41 = vpop.eup %9043  ;;  %v13031_v15 = vpop.f32.mrf.mxu2 }
 0x564   :  { %v6106_v6 = vadd.f32 1.0, %v9044_v41  ;;  %v13033_v24 = vpop.f32.mrf.mxu0  ;;  %v6109_v31 = vmul.f32 -0.5, %v9044_v41  ;;  %v9046_v17 = vpop.eup %9045  ;;  %v6112_v16 = vand.u32 2147483647, %v9044_v41 }
 0x565   :  { %v6072_v52 = vmul.f32 0.6931472, %v9046_v17 }
 0x566   :  { %v13035_v43 = vpop.f32.mrf.mxu1  ;;  %v13037_v23 = vpop.f32.mrf.mxu3  ;;  %9047 = vlog2.f32 %v6106_v6  ;;  %v6110_v8 = vadd.f32 1.0, %v6109_v31  ;;  %vm6113_vm3 = vcmp.lt.f32.partialorder %v6112_v16, 0.0004427343 }
 0x567   :  { %v6078_v3 = vsel %vm6077_vm2, %v6075_v21, %v6072_v52  ;;  %v8631_v52 = vld [vmem:[#allocation5 + $0x30] sm:$0xff] }
 0x568   :  { %v6111_v22 = vmul.f32 %v9044_v41, %v6110_v8  ;;  %v13052_v42 = vsel %vm5358_vm4, %v12985_v50, %v6078_v3  ;;  %v14314_v41 = vld [vmem:[#allocation27_spill] sm:$0xff]  ;;  %v8655_v8 = vld [vmem:[#allocation5 + $0xf0] sm:$0xff]  ;;  %6490 = vmatpush.bf16.msrb.mxu0 %v8631_v52 }
 0x569   :  { %14311 = vst [vmem:[#allocation48_spill] sm:$0xff] %v13052_v42  ;;  %v8639_v50 = vld [vmem:[#allocation5 + $0x70] sm:$0xff]  ;;  %6637 = vmatpush.bf16.msrb.mxu3 %v8655_v8  ;;  %v8629_v8 = vld [vmem:[#allocation5 + $0x20] sm:$0xff] }
 0x56a   :  { %6539 = vmatpush.bf16.msrb.mxu1 %v8639_v50  ;;  %v8637_v50 = vld [vmem:[#allocation5 + $0x60] sm:$0xff] }
 0x56b   :  { %5265 = vmatmul.bf16.gmra.mxu3 %v14271_v19  ;;  %v13040_v12 = vpop.f32.mrf.mxu2  ;;  %v8645_v42 = vld [vmem:[#allocation5 + $0xa0] sm:$0xff] }
 0x56c   :  { %v9048_v28 = vpop.eup %9047  ;;  %v13042_v36 = vpop.f32.mrf.mxu0 }
 0x56d   :  { %v6108_v6 = vmul.f32 0.6931472, %v9048_v28  ;;  %v14313_v28 = vld [vmem:[#allocation44_spill] sm:$0xff] }
 0x56e   :  { %v13044_v27 = vpop.f32.mrf.mxu1  ;;  %v13046_v1 = vpop.f32.mrf.mxu3 }
 0x56f   :  { %v6114_v19 = vsel %vm6113_vm3, %v6111_v22, %v6108_v6  ;;  %5133 = vmatmul.bf16.gmra.mxu0 %v14310_v29  ;;  %v8630_v6 = vld [vmem:[#allocation5 + $0x28] sm:$0xff] }
 0x570   :  { %v13055_v31 = vsel %vm5362_vm5, %v13006_v2, %v6114_v19  ;;  %5231 = vmatmul.bf16.gmra.mxu2 %v14314_v41  ;;  %v13072_v2 = vld [vmem:[%s13871_s4] sm:$0xf]  ;;  %v8638_v22 = vld [vmem:[#allocation5 + $0x68] sm:$0xff]  ;;  %6491 = vmatpush.bf16.msrb.mxu0 %v8630_v6  ;;  %v14317_v6 = vld [vmem:[#allocation61_spill] sm:$0xff] }
 0x571   :  { %14312 = vst [vmem:[#allocation33_spill] sm:$0xff] %v13055_v31  ;;  %5182 = vmatmul.bf16.gmra.mxu1 %v14313_v28  ;;  %v13075_v21 = vperm.slane %v13072_v2, 2  ;;  %v8646_v19 = vld [vmem:[#allocation5 + $0xa8] sm:$0xff] }
 0x572   :  { %14315 = vst [vmem:[#allocation52_spill] sm:$0xff] %v13072_v2  ;;  %v14316_v28 = vld [vmem:[#allocation39_spill] sm:$0xff]  ;;  %6540 = vmatpush.bf16.msrb.mxu1 %v8638_v22  ;;  %6589 = vmatpush.bf16.msrb.mxu2 %v8646_v19  ;;  %v8644_v2 = vld [vmem:[#allocation5 + $0x98] sm:$0xff] }
 0x573   :  { %v13061_v59 = vpop.f32.mrf.mxu2  ;;  %v4921_v29 = vadd.f32 %v12921_v11, %v13075_v21  ;;  %v4919_v60 = vadd.f32 %v12898_v4, %v13075_v21  ;;  %v14318_v4 = vld [vmem:[#allocation26_spill] sm:$0xff] }
 0x574   :  { %v13063_v55 = vpop.f32.mrf.mxu0  ;;  %6492 = vmatpush.bf16.msrb.mxu0 %v8629_v8 }
 0x575   :  { %v4970_v31 = vadd.f32 %v12923_v61, %v4921_v29  ;;  %v4968_v22 = vadd.f32 %v12900_v58, %v4919_v60  ;;  %v8627_v60 = vld [vmem:[#allocation5 + $0x10] sm:$0xff] }
 0x576   :  { %v13065_v16 = vpop.f32.mrf.mxu1  ;;  %v13067_v3 = vpop.f32.mrf.mxu3  ;;  %6541 = vmatpush.bf16.msrb.mxu1 %v8637_v50  ;;  %6590 = vmatpush.bf16.msrb.mxu2 %v8645_v42  ;;  %v8635_v50 = vld [vmem:[#allocation5 + $0x50] sm:$0xff] }
 0x577   :  { %v5019_v19 = vadd.f32 %v12930_v33, %v4970_v31  ;;  %v5017_v61 = vadd.f32 %v12919_v13, %v4968_v22  ;;  %v8654_v31 = vld [vmem:[#allocation5 + $0xe8] sm:$0xff]  ;;  %v8643_v42 = vld [vmem:[#allocation5 + $0x90] sm:$0xff] }
 0x578   :  { %6493 = vmatpush.bf16.msrb.mxu0 %v8628_v38  ;;  %6638 = vmatpush.bf16.msrb.mxu3 %v8654_v31  ;;  %v8642_v22 = vld [vmem:[#allocation5 + $0x88] sm:$0xff] }
 0x579   :  { %v13098_v29 = vadd.f32 %v13037_v23, %v5019_v19  ;;  %v13103_v58 = vadd.f32 %v13016_v56, %v5017_v61  ;;  %v8626_v56 = vld [vmem:[#allocation5 + $0x8] sm:$0xff]  ;;  %v4926_v19 = vadd.f32 %v12961_v18, %v13075_v21  ;;  %v4924_v61 = vadd.f32 %v12936_v37, %v13075_v21 }
 0x57a   :  { %6542 = vmatpush.bf16.msrb.mxu1 %v8636_v57  ;;  %6591 = vmatpush.bf16.msrb.mxu2 %v8644_v2  ;;  %v8634_v23 = vld [vmem:[#allocation5 + $0x48] sm:$0xff] }
 0x57b   :  { %5270 = vmatmul.bf16.gmra.mxu3 %v14316_v28  ;;  %v13080_v41 = vpop.f32.mrf.mxu2  ;;  %v14319_v28 = vld [vmem:[#allocation32_spill] sm:$0xff]  ;;  %v5371_v13 = vmin.f32 %v13098_v29, 20.0  ;;  %v5367_v38 = vmin.f32 %v13103_v58, 20.0  ;;  %v4975_v18 = vadd.f32 %v12963_v10, %v4926_v19  ;;  %v4931_v19 = vadd.f32 %v13001_v40, %v13075_v21 }
 0x57c   :  { %v13084_v52 = vpop.f32.mrf.mxu0  ;;  %6494 = vmatpush.bf16.msrb.mxu0 %v8627_v60  ;;  %vm5307_vm8 = vcmp.gt.f32.partialorder %v13098_v29, 20.0  ;;  %vm5303_vm9 = vcmp.gt.f32.partialorder %v13103_v58, 20.0 }
 0x57d   :  { %v5433_v31 = vmul.f32 1.442695, %v5367_v38  ;;  %v5024_v37 = vadd.f32 %v12970_v46, %v4975_v18  ;;  %v8653_v46 = vld [vmem:[#allocation5 + $0xe0] sm:$0xff]  ;;  %v4980_v18 = vadd.f32 %v13003_v14, %v4931_v19  ;;  %v8652_v19 = vld [vmem:[#allocation5 + $0xd8] sm:$0xff] }
 0x57e   :  { %v13086_v17 = vpop.f32.mrf.mxu3  ;;  %v13089_v11 = vpop.f32.mrf.mxu1  ;;  %6543 = vmatpush.bf16.msrb.mxu1 %v8635_v50  ;;  %6592 = vmatpush.bf16.msrb.mxu2 %v8643_v42  ;;  %v8625_v50 = vld [vmem:[#allocation5] sm:$0xff] }
 0x57f   :  { %5138 = vmatmul.bf16.gmra.mxu0 %v14317_v6  ;;  %6639 = vmatpush.bf16.msrb.mxu3 %v8653_v46  ;;  %v5029_v40 = vadd.f32 %v13010_v51, %v4980_v18 }
 0x580   :  { %5236 = vmatmul.bf16.gmra.mxu2 %v14319_v28  ;;  %v14320_v28 = vld [vmem:[#allocation14_spill] sm:$0xff]  ;;  %6495 = vmatpush.bf16.msrb.mxu0 %v8626_v56  ;;  %v13132_v56 = vadd.f32 %v13067_v3, %v5024_v37 }
 0x581   :  { %5187 = vmatmul.bf16.gmra.mxu1 %v14318_v4  ;;  %v5441_v4 = vmul.f32 1.442695, %v5371_v13  ;;  %v4973_v13 = vadd.f32 %v12940_v39, %v4924_v61 }
 0x582   :  { %6544 = vmatpush.bf16.msrb.mxu1 %v8634_v23  ;;  %6593 = vmatpush.bf16.msrb.mxu2 %v8642_v22  ;;  %vm5315_vm12 = vcmp.gt.f32.partialorder %v13132_v56, 20.0 }
 0x583   :  { %v13100_v8 = vpop.f32.mrf.mxu2  ;;  %9049 = vpow2.f32 %v5441_v4  ;;  %v5022_v38 = vadd.f32 %v12959_v20, %v4973_v13  ;;  %6640 = vmatpush.bf16.msrb.mxu3 %v8652_v19 }
 0x584   :  { %v13105_v33 = vpop.f32.mrf.mxu0  ;;  %6496 = vmatpush.bf16.msrb.mxu0 %v8625_v50  ;;  %9051 = vpow2.f32 %v5433_v31 }
 0x586   :  { %v13107_v6 = vpop.f32.mrf.mxu3  ;;  %v13111_v57 = vpop.f32.mrf.mxu1  ;;  %6545 = vmatpush.bf16.msrb.mxu1 %v8633_v48  ;;  %6594 = vmatpush.bf16.msrb.mxu2 %v8641_v35  ;;  %v13139_v48 = vadd.f32 %v13046_v1, %v5022_v38  ;;  %v4929_v1 = vadd.f32 %v12976_v0, %v13075_v21 }
 0x588   :  { %v5375_v3 = vmin.f32 %v13139_v48, 20.0  ;;  %vm5311_vm13 = vcmp.gt.f32.partialorder %v13139_v48, 20.0 }
 0x58b   :  { %5275 = vmatmul.bf16.gmra.mxu3 %v14320_v28  ;;  %v13116_v2 = vpop.f32.mrf.mxu2  ;;  %v5449_v28 = vmul.f32 1.442695, %v5375_v3 }
 0x58c   :  { %v13120_v60 = vpop.f32.mrf.mxu0 }
 0x58e   :  { %v13122_v42 = vpop.f32.mrf.mxu3  ;;  %v13134_v10 = vpop.f32.mrf.mxu1 }
 0x58f   :  { %5143 = vmatmul.bf16.gmra.mxu0 %v14230_v53  ;;  %v9050_v53 = vpop.eup %9049 }
 0x590   :  { %5241 = vmatmul.bf16.gmra.mxu2 %v12105_v49  ;;  %v5379_v49 = vmin.f32 %v13132_v56, 20.0  ;;  %v5611_v20 = vadd.f32 1.0, %v9050_v53  ;;  %v5614_v13 = vmul.f32 -0.5, %v9050_v53 }
 0x591   :  { %5192 = vmatmul.bf16.gmra.mxu1 %v11603_v25  ;;  %v9052_v25 = vpop.eup %9051 }
 0x592   :  { %v5575_v22 = vadd.f32 1.0, %v9052_v25  ;;  %v5457_v4 = vmul.f32 1.442695, %v5379_v49  ;;  %9053 = vlog2.f32 %v5611_v20  ;;  %v5578_v37 = vmul.f32 -0.5, %v9052_v25 }
 0x593   :  { %v13136_v23 = vpop.f32.mrf.mxu2  ;;  %v5615_v14 = vadd.f32 1.0, %v5614_v13  ;;  %v13168_v49 = vadd.f32 %v13107_v6, %v5029_v40  ;;  %v5617_v20 = vand.u32 2147483647, %v9050_v53 }
 0x594   :  { %v13144_v35 = vpop.f32.mrf.mxu0  ;;  %9055 = vlog2.f32 %v5575_v22  ;;  %v5579_v51 = vadd.f32 1.0, %v5578_v37 }
 0x595   :  { %9057 = vpow2.f32 %v5457_v4  ;;  %v5387_v6 = vmin.f32 %v13168_v49, 20.0  ;;  %vm5618_vm6 = vcmp.lt.f32.partialorder %v5617_v20, 0.0004427343  ;;  %vm5323_vm15 = vcmp.gt.f32.partialorder %v13168_v49, 20.0 }
 0x596   :  { %v13141_v39 = vpop.f32.mrf.mxu3  ;;  %v13152_v61 = vpop.f32.mrf.mxu1  ;;  %9059 = vpow2.f32 %v5449_v28 }
 0x598   :  { %v9054_v38 = vpop.eup %9053 }
 0x599   :  { %v5613_v3 = vmul.f32 0.6931472, %v9054_v38 }
 0x59b   :  { %5280 = vmatmul.bf16.gmra.mxu3 %v12305_v7  ;;  %v13154_v31 = vpop.f32.mrf.mxu2  ;;  %v4978_v7 = vadd.f32 %v12980_v63, %v4929_v1  ;;  %v5616_v1 = vmul.f32 %v9050_v53, %v5615_v14  ;;  %v4936_v53 = vadd.f32 %v13033_v24, %v13075_v21 }
 0x59c   :  { %v13162_v0 = vpop.f32.mrf.mxu0 }
 0x59d   :  { %v5027_v46 = vadd.f32 %v12999_v26, %v4978_v7  ;;  %v5619_v7 = vsel %vm5618_vm6, %v5616_v1, %v5613_v3  ;;  %v4985_v24 = vadd.f32 %v13035_v43, %v4936_v53 }
 0x59e   :  { %v13156_v50 = vpop.f32.mrf.mxu3  ;;  %v13180_v28 = vpop.f32.mrf.mxu1 }
 0x59f   :  { %5148 = vmatmul.bf16.gmra.mxu0 %v14233_v34  ;;  %v9056_v34 = vpop.eup %9055  ;;  %v13173_v22 = vadd.f32 %v13086_v17, %v5027_v46  ;;  %v5580_v17 = vmul.f32 %v9052_v25, %v5579_v51  ;;  %v5473_v46 = vmul.f32 1.442695, %v5387_v6  ;;  %v5034_v1 = vadd.f32 %v13040_v12, %v4985_v24  ;;  %v8651_v24 = vld [vmem:[#allocation5 + $0xd0] sm:$0xff] }
 0x5a0   :  { %5246 = vmatmul.bf16.gmra.mxu2 %v12127_v5  ;;  %v13170_v63 = vpop.eup %9057  ;;  %v5577_v26 = vmul.f32 0.6931472, %v9056_v34  ;;  %v6139_v34 = vsel %vm5307_vm8, %v13098_v29, %v5619_v7  ;;  %v14322_v29 = vld [vmem:[#allocation15_spill] sm:$0xff]  ;;  %6641 = vmatpush.bf16.msrb.mxu3 %v8651_v24 }
 0x5a1   :  { %5197 = vmatmul.bf16.gmra.mxu1 %v11647_v45  ;;  %v5581_v45 = vand.u32 2147483647, %v9052_v25  ;;  %v13177_v5 = vpop.eup %9059  ;;  %v5683_v13 = vadd.f32 1.0, %v13170_v63  ;;  %v5383_v40 = vmin.f32 %v13173_v22, 20.0  ;;  %v4934_v25 = vadd.f32 %v13012_v9, %v13075_v21 }
 0x5a2   :  { %v5647_v37 = vadd.f32 1.0, %v13177_v5  ;;  %v5650_v43 = vmul.f32 -0.5, %v13177_v5  ;;  %v5689_v53 = vand.u32 2147483647, %v13170_v63  ;;  %vm5319_vm1 = vcmp.gt.f32.partialorder %v13173_v22, 20.0 }
 0x5a3   :  { %v13182_v18 = vpop.f32.mrf.mxu2  ;;  %vm5582_vm7 = vcmp.lt.f32.partialorder %v5581_v45, 0.0004427343  ;;  %9061 = vlog2.f32 %v5683_v13  ;;  %v5465_v20 = vmul.f32 1.442695, %v5383_v40  ;;  %v14321_v45 = vld [vmem:[#allocation16_spill] sm:$0xff]  ;;  %v4983_v9 = vadd.f32 %v13014_v44, %v4934_v25  ;;  %v14325_v13 = vld [vmem:[#allocation29_spill] sm:$0xff] }
 0x5a4   :  { %v5583_v38 = vsel %vm5582_vm7, %v5580_v17, %v5577_v26  ;;  %v13190_v14 = vpop.f32.mrf.mxu0  ;;  %9063 = vlog2.f32 %v5647_v37  ;;  %v14323_v26 = vpack.c.bf16 %v14321_v45, %v14322_v29  ;;  %vm13234_vm10 = vcmp.lt.f32.partialorder %v5689_v53, 0.0004427343 }
 0x5a5   :  { %v6135_v51 = vsel %vm5303_vm9, %v13103_v58, %v5583_v38  ;;  %9065 = vpow2.f32 %v5473_v46  ;;  %v14324_v58 = vld [vmem:[#allocation54_spill] sm:$0xff]  ;;  %v5032_v37 = vadd.f32 %v13031_v15, %v4983_v9  ;;  %v13217_v38 = vadd.f32 %v13141_v39, %v5034_v1 }
 0x5a6   :  { %v13175_v4 = vpop.f32.mrf.mxu3  ;;  %v6199_v19 = vpack.c.bf16 %v6139_v34, %v6135_v51  ;;  %9067 = vpow2.f32 %v5465_v20  ;;  %v13207_v6 = vpop.f32.mrf.mxu1  ;;  %v14326_v17 = vpack.c.bf16 %v14324_v58, %v14325_v13  ;;  %v5651_v20 = vadd.f32 1.0, %v5650_v43 }
 0x5a7   :  { %v13223_v34 = vadd.f32 %v13122_v42, %v5032_v37  ;;  %v5653_v15 = vand.u32 2147483647, %v13177_v5  ;;  %v4939_v37 = vadd.f32 %v13042_v36, %v13075_v21  ;;  %vm5331_vm4 = vcmp.gt.f32.partialorder %v13217_v38, 20.0 }
 0x5a8   :  { %v5652_v1 = vmul.f32 %v13177_v5, %v5651_v20 }
 0x5a9   :  { %v9062_v7 = vpop.eup %9061  ;;  %v5391_v9 = vmin.f32 %v13223_v34, 20.0  ;;  %vm13243_vm11 = vcmp.lt.f32.partialorder %v5653_v15, 0.0004427343  ;;  %v4988_v15 = vadd.f32 %v13044_v27, %v4939_v37  ;;  %vm5327_vm5 = vcmp.gt.f32.partialorder %v13223_v34, 20.0 }
 0x5aa   :  { %v9064_v12 = vpop.eup %9063  ;;  %v5685_v51 = vmul.f32 0.6931472, %v9062_v7 }
 0x5ab   :  { %5285 = vmatmul.bf16.gmra.mxu3 %v12338_v30  ;;  %v5686_v30 = vmul.f32 -0.5, %v13170_v63  ;;  %v13213_v40 = vpop.f32.mrf.mxu2  ;;  %v13220_v46 = vpop.eup %9065  ;;  %v5649_v45 = vmul.f32 0.6931472, %v9064_v12 }
 0x5ac   :  { %v13225_v25 = vpop.f32.mrf.mxu0  ;;  %v13230_v39 = vpop.eup %9067  ;;  %v5758_v36 = vmul.f32 -0.5, %v13220_v46 }
 0x5ad   :  { %v5687_v44 = vadd.f32 1.0, %v5686_v30  ;;  %v5395_v30 = vmin.f32 %v13217_v38, 20.0  ;;  %v5655_v5 = vsel %vm13243_vm11, %v5652_v1, %v5649_v45 }
 0x5ae   :  { %v13198_v3 = vpop.f32.mrf.mxu3  ;;  %v13251_v7 = vpop.f32.mrf.mxu1  ;;  %v6143_v20 = vsel %vm5311_vm13, %v13139_v48, %v5655_v5  ;;  %v14334_v48 = vpack.c.bf16 %v12841_v47, %v12838_v62  ;;  %v5759_v27 = vadd.f32 1.0, %v5758_v36 }
 0x5af   :  { %6497 = vmatmul.bf16.vlgmr.msrb.gmra.mxu0 %v14323_v26  ;;  %v5688_v29 = vmul.f32 %v13170_v63, %v5687_v44  ;;  %v5755_v26 = vadd.f32 1.0, %v13220_v46  ;;  %v5719_v63 = vadd.f32 1.0, %v13230_v39  ;;  %v5489_v43 = vmul.f32 1.442695, %v5395_v30  ;;  %v14332_v30 = vld [vmem:[#allocation41_spill] sm:$0xff] }
 0x5b0   :  { %6595 = vmatmul.bf16.vlgmr.msrb.gmra.mxu2 %v6199_v19 }
 0x5b1   :  { %6546 = vmatmul.bf16.vlgmr.msrb.gmra.mxu1 %v14326_v17  ;;  %v5691_v58 = vsel %vm13234_vm10, %v5688_v29, %v5685_v51  ;;  %v4941_v17 = vadd.f32 %v13063_v55, %v13075_v21  ;;  %9069 = vlog2.f32 %v5755_v26  ;;  %v5481_v55 = vmul.f32 1.442695, %v5391_v9 }
 0x5b2   :  { %v6147_v12 = vsel %vm5315_vm12, %v13132_v56, %v5691_v58  ;;  %9071 = vlog2.f32 %v5719_v63  ;;  %v14331_v56 = vld [vmem:[#allocation18_spill] sm:$0xff]  ;;  %v5037_v26 = vadd.f32 %v13061_v59, %v4988_v15 }
 0x5b3   :  { %v13258_v44 = vpop.f32.mrf.mxu2  ;;  %9073 = vpow2.f32 %v5489_v43  ;;  %v6203_v24 = vpack.c.bf16 %v6147_v12, %v6143_v20  ;;  %v14333_v45 = vpack.c.bf16 %v14331_v56, %v14332_v30  ;;  %v5725_v43 = vand.u32 2147483647, %v13230_v39 }
 0x5b4   :  { %v13266_v51 = vpop.f32.mrf.mxu0  ;;  %9075 = vpow2.f32 %v5481_v55  ;;  %v13283_v58 = vadd.f32 %v13156_v50, %v5037_v26  ;;  %v4946_v50 = vadd.f32 %v13105_v33, %v13075_v21  ;;  %v5760_v55 = vmul.f32 %v13220_v46, %v5759_v27 }
 0x5b5   :  { %vm13315_vm14 = vcmp.lt.f32.partialorder %v5725_v43, 0.0004427343 }
 0x5b6   :  { %v13227_v19 = vpop.f32.mrf.mxu3  ;;  %v13288_v62 = vpop.f32.mrf.mxu1  ;;  %v5399_v20 = vmin.f32 %v13283_v58, 20.0  ;;  %v4995_v30 = vadd.f32 %v13111_v57, %v4946_v50  ;;  %v14345_v50 = vld [vmem:[#allocation52_spill] sm:$0xff]  ;;  %vm5335_vm9 = vcmp.gt.f32.partialorder %v13283_v58, 20.0 }
 0x5b7   :  { %v9070_v42 = vpop.eup %9069 }
 0x5b8   :  { %v9072_v1 = vpop.eup %9071  ;;  %v5757_v63 = vmul.f32 0.6931472, %v9070_v42 }
 0x5b9   :  { %v13286_v13 = vpop.eup %9073  ;;  %v5721_v12 = vmul.f32 0.6931472, %v9072_v1 }
 0x5ba   :  { %v13297_v5 = vpop.eup %9075  ;;  %v5830_v27 = vmul.f32 -0.5, %v13286_v13 }
 0x5bb   :  { %5290 = vmatmul.bf16.gmra.mxu3 %v12368_v54  ;;  %v4990_v54 = vadd.f32 %v13065_v16, %v4941_v17  ;;  %v5722_v16 = vmul.f32 -0.5, %v13230_v39  ;;  %v4944_v17 = vadd.f32 %v13084_v52, %v13075_v21  ;;  %v13292_v59 = vpop.f32.mrf.mxu2 }
 0x5bd   :  { %v5039_v29 = vadd.f32 %v13080_v41, %v4990_v54  ;;  %v5761_v41 = vand.u32 2147483647, %v13220_v46  ;;  %v5723_v47 = vadd.f32 1.0, %v5722_v16  ;;  %v5827_v54 = vadd.f32 1.0, %v13286_v13 }
 0x5be   :  { %v13262_v53 = vpop.f32.mrf.mxu3  ;;  %v4993_v15 = vadd.f32 %v13089_v11, %v4944_v17  ;;  %v5791_v46 = vadd.f32 1.0, %v13297_v5  ;;  %v5044_v16 = vadd.f32 %v13116_v2, %v4995_v30  ;;  %v14339_v2 = vld [vmem:[#allocation43_spill] sm:$0xff] }
 0x5bf   :  { %6502 = vmatmul.bf16.gmra.mxu0 %v14333_v45  ;;  %v13280_v9 = vadd.f32 %v13175_v4, %v5039_v29  ;;  %vm13304_vm0 = vcmp.lt.f32.partialorder %v5761_v41, 0.0004427343  ;;  %v5724_v36 = vmul.f32 %v13230_v39, %v5723_v47  ;;  %9077 = vlog2.f32 %v5827_v54  ;;  %v14342_v47 = vld [vmem:[#allocation31_spill] sm:$0xff] }
 0x5c0   :  { %6600 = vmatmul.bf16.gmra.mxu2 %v6203_v24  ;;  %v13309_v24 = vpop.f32.mrf.mxu0  ;;  %v5763_v33 = vsel %vm13304_vm0, %v5760_v55, %v5757_v63  ;;  %v5042_v29 = vadd.f32 %v13100_v8, %v4993_v15  ;;  %9079 = vlog2.f32 %v5791_v46  ;;  %v13336_v26 = vadd.f32 %v13227_v19, %v5044_v16  ;;  %v13338_v8 = vpop.f32.mrf.mxu1  ;;  %v14343_v63 = vld [vmem:[#allocation30_spill] sm:$0xff] }
 0x5c1   :  { %6551 = vmatmul.bf16.gmra.mxu1 %v14334_v48  ;;  %v5403_v37 = vmin.f32 %v13280_v9, 20.0  ;;  %v5727_v39 = vsel %vm13315_vm14, %v5724_v36, %v5721_v12  ;;  %v5497_v48 = vmul.f32 1.442695, %v5399_v20  ;;  %v6155_v11 = vsel %vm5323_vm15, %v13168_v49, %v5763_v33 }
 0x5c2   :  { %v13330_v57 = vadd.f32 %v13198_v3, %v5042_v29  ;;  %v14340_v3 = vld [vmem:[#allocation19_spill] sm:$0xff]  ;;  %v5794_v19 = vmul.f32 -0.5, %v13297_v5  ;;  %v5411_v12 = vmin.f32 %v13336_v26, 20.0  ;;  %v5831_v20 = vadd.f32 1.0, %v5830_v27 }
 0x5c3   :  { %v5505_v45 = vmul.f32 1.442695, %v5403_v37  ;;  %v13341_v1 = vpop.f32.mrf.mxu2  ;;  %v14341_v41 = vpack.c.bf16 %v14339_v2, %v14340_v3  ;;  %v13352_v37 = vperm.slane %v14345_v50, 3  ;;  %v5833_v54 = vand.u32 2147483647, %v13286_v13 }
 0x5c4   :  { %v5407_v43 = vmin.f32 %v13330_v57, 20.0  ;;  %v5795_v33 = vadd.f32 1.0, %v5794_v19  ;;  %v5521_v29 = vmul.f32 1.442695, %v5411_v12  ;;  %v4949_v16 = vadd.f32 %v13120_v60, %v13075_v21 }
 0x5c5   :  { %9081 = vpow2.f32 %v5505_v45  ;;  %v9078_v17 = vpop.eup %9077  ;;  %v5797_v45 = vand.u32 2147483647, %v13297_v5  ;;  %vm13370_vm2 = vcmp.lt.f32.partialorder %v5833_v54, 0.0004427343  ;;  %vm5339_vm7 = vcmp.gt.f32.partialorder %v13280_v9, 20.0 }
 0x5c6   :  { %v13294_v4 = vpop.f32.mrf.mxu3  ;;  %9083 = vpow2.f32 %v5497_v48  ;;  %v9080_v52 = vpop.eup %9079  ;;  %v5829_v15 = vmul.f32 0.6931472, %v9078_v17  ;;  %v5513_v46 = vmul.f32 1.442695, %v5407_v43  ;;  %v5796_v3 = vmul.f32 %v13297_v5, %v5795_v33 }
 0x5c7   :  { %v5793_v48 = vmul.f32 0.6931472, %v9080_v52  ;;  %vm13385_vm3 = vcmp.lt.f32.partialorder %v5797_v45, 0.0004427343  ;;  %v14354_v45 = vld [vmem:[#allocation13_spill] sm:$0xff]  ;;  %vm5343_vm10 = vcmp.gt.f32.partialorder %v13330_v57, 20.0 }
 0x5c8   :  { %v13355_v55 = vpop.f32.mrf.mxu0  ;;  %v13375_v2 = vpop.f32.mrf.mxu1  ;;  %9085 = vpow2.f32 %v5513_v46  ;;  %v14353_v46 = vld [vmem:[#allocation34_spill] sm:$0xff]  ;;  %vm5347_vm13 = vcmp.gt.f32.partialorder %v13336_v26, 20.0 }
 0x5c9   :  { %9087 = vpow2.f32 %v5521_v29 }
 0x5cb   :  { %5295 = vmatmul.bf16.gmra.mxu3 %v12384_v32  ;;  %v6151_v32 = vsel %vm5319_vm1, %v13173_v22, %v5727_v39  ;;  %v14344_v22 = vpack.c.bf16 %v14342_v47, %v14343_v63  ;;  %v13358_v36 = vpop.eup %9081  ;;  %v5115_v39 = vadd.f32 %v13225_v25, %v13352_v37  ;;  %v13383_v60 = vpop.f32.mrf.mxu2  ;;  %v5799_v63 = vsel %vm13385_vm3, %v5796_v3, %v5793_v48  ;;  %v8649_v48 = vld [vmem:[#allocation5 + $0xc0] sm:$0xff] }
 0x5cc   :  { %v6207_v49 = vpack.c.bf16 %v6155_v11, %v6151_v32  ;;  %v13360_v56 = vpop.eup %9083  ;;  %v5832_v11 = vmul.f32 %v13286_v13, %v5831_v20  ;;  %v5899_v27 = vadd.f32 1.0, %v13358_v36  ;;  %v4951_v13 = vadd.f32 %v13144_v35, %v13075_v21 }
 0x5cd   :  { %v5164_v5 = vadd.f32 %v13251_v7, %v5115_v39  ;;  %v6159_v12 = vsel %vm5327_vm5, %v13223_v34, %v5799_v63  ;;  %v5902_v52 = vmul.f32 -0.5, %v13358_v36  ;;  %v14355_v39 = vpack.c.bf16 %v14353_v46, %v14354_v45 }
 0x5ce   :  { %v13332_v42 = vpop.f32.mrf.mxu3  ;;  %v5835_v25 = vsel %vm13370_vm2, %v5832_v11, %v5829_v15  ;;  %9089 = vlog2.f32 %v5899_v27  ;;  %v5000_v7 = vadd.f32 %v13152_v61, %v4951_v13  ;;  %v13407_v54 = vpop.eup %9085  ;;  %v14351_v61 = vld [vmem:[#allocation20_spill] sm:$0xff]  ;;  %v5866_v29 = vmul.f32 -0.5, %v13360_v56 }
 0x5cf   :  { %6507 = vmatmul.bf16.gmra.mxu0 %v14341_v41  ;;  %v5863_v41 = vadd.f32 1.0, %v13360_v56  ;;  %v6163_v35 = vsel %vm5331_vm4, %v13217_v38, %v5835_v25  ;;  %v5213_v19 = vadd.f32 %v13258_v44, %v5164_v5  ;;  %v13416_v34 = vpop.eup %9087  ;;  %v5903_v3 = vadd.f32 1.0, %v5902_v52 }
 0x5d0   :  { %6605 = vmatmul.bf16.gmra.mxu2 %v6207_v49  ;;  %v8650_v49 = vld [vmem:[#allocation5 + $0xc8] sm:$0xff]  ;;  %v13397_v17 = vpop.f32.mrf.mxu0  ;;  %v6211_v38 = vpack.c.bf16 %v6163_v35, %v6159_v12  ;;  %v5049_v44 = vadd.f32 %v13154_v31, %v5000_v7  ;;  %v5935_v25 = vadd.f32 1.0, %v13407_v54  ;;  %v5867_v5 = vadd.f32 1.0, %v5866_v29 }
 0x5d1   :  { %6556 = vmatmul.bf16.gmra.mxu1 %v14344_v22  ;;  %6642 = vmatpush.bf16.msrb.mxu3 %v8650_v49  ;;  %v4998_v22 = vadd.f32 %v13134_v10, %v4949_v16  ;;  %9091 = vlog2.f32 %v5863_v41  ;;  %v5117_v10 = vadd.f32 %v13266_v51, %v13352_v37  ;;  %v13429_v49 = vpop.f32.mrf.mxu1  ;;  %v4956_v41 = vadd.f32 %v13190_v14, %v13075_v21 }
 0x5d2   :  { %v13426_v11 = vadd.f32 %v13294_v4, %v5049_v44  ;;  %v5971_v4 = vadd.f32 1.0, %v13416_v34 }
 0x5d3   :  { %v5047_v43 = vadd.f32 %v13136_v23, %v4998_v22  ;;  %v14350_v23 = vld [vmem:[#allocation21_spill] sm:$0xff]  ;;  %v5166_v32 = vadd.f32 %v13288_v62, %v5117_v10  ;;  %v13435_v47 = vpop.f32.mrf.mxu2 }
 0x5d4   :  { %v14352_v15 = vpack.c.bf16 %v14350_v23, %v14351_v61  ;;  %v9090_v31 = vpop.eup %9089  ;;  %v5419_v22 = vmin.f32 %v13426_v11, 20.0  ;;  %v5938_v23 = vmul.f32 -0.5, %v13407_v54  ;;  %vm5355_vm5 = vcmp.gt.f32.partialorder %v13426_v11, 20.0 }
 0x5d5   :  { %v13411_v33 = vadd.f32 %v13262_v53, %v5047_v43  ;;  %v4954_v53 = vadd.f32 %v13162_v0, %v13075_v21  ;;  %6643 = vmatpush.bf16.msrb.mxu3 %v8649_v48  ;;  %v5905_v0 = vand.u32 2147483647, %v13358_v36  ;;  %v5215_v62 = vadd.f32 %v13292_v59, %v5166_v32 }
 0x5d6   :  { %v13362_v30 = vpop.f32.mrf.mxu3  ;;  %v5901_v63 = vmul.f32 0.6931472, %v9090_v31  ;;  %v5869_v43 = vand.u32 2147483647, %v13360_v56  ;;  %v5120_v21 = vadd.f32 %v13309_v24, %v13352_v37  ;;  %v5868_v24 = vmul.f32 %v13360_v56, %v5867_v5 }
 0x5d7   :  { %v9092_v16 = vpop.eup %9091  ;;  %v5415_v13 = vmin.f32 %v13411_v33, 20.0  ;;  %v5003_v59 = vadd.f32 %v13180_v28, %v4954_v53  ;;  %vm13450_vm6 = vcmp.lt.f32.partialorder %v5905_v0, 0.0004427343  ;;  %v14361_v0 = vld [vmem:[#allocation46_spill] sm:$0xff]  ;;  %vm5351_vm4 = vcmp.gt.f32.partialorder %v13411_v33, 20.0 }
 0x5d8   :  { %v13444_v14 = vpop.f32.mrf.mxu0  ;;  %vm13460_vm8 = vcmp.lt.f32.partialorder %v5869_v43, 0.0004427343 }
 0x5d9   :  { %v5529_v12 = vmul.f32 1.442695, %v5415_v13  ;;  %v5052_v29 = vadd.f32 %v13182_v18, %v5003_v59  ;;  %v13477_v31 = vpop.f32.mrf.mxu1  ;;  %v5122_v18 = vadd.f32 %v13355_v55, %v13352_v37  ;;  %v14360_v13 = vld [vmem:[#allocation22_spill] sm:$0xff]  ;;  %v14363_v55 = vld [vmem:[#allocation17_spill] sm:$0xff] }
 0x5de   :  { %v5261_v50 = vpop.f32.mrf.mxu3 }
 0x5df   :  { %v13404_v20 = vadd.f32 %v5261_v50, %v5213_v19  ;;  %6512 = vmatmul.bf16.gmra.mxu0 %v14352_v15  ;;  %v5865_v19 = vmul.f32 0.6931472, %v9092_v16  ;;  %v5904_v50 = vmul.f32 %v13358_v36, %v5903_v3  ;;  %v5537_v36 = vmul.f32 1.442695, %v5419_v22  ;;  %v13479_v16 = vpop.f32.mrf.mxu2  ;;  %v14364_v22 = vld [vmem:[#allocation35_spill] sm:$0xff] }
 0x5e0   :  { %6610 = vmatmul.bf16.gmra.mxu2 %v6211_v38  ;;  %v5005_v38 = vadd.f32 %v13207_v6, %v4956_v41  ;;  %v5169_v6 = vadd.f32 %v13338_v8, %v5120_v21  ;;  %v5939_v3 = vadd.f32 1.0, %v5938_v23  ;;  %v13488_v41 = vadd.f32 %v13332_v42, %v5052_v29  ;;  %v13494_v5 = vpop.f32.mrf.mxu0 }
 0x5e1   :  { %v5368_v51 = vmin.f32 %v13404_v20, 20.0  ;;  %6561 = vmatmul.bf16.gmra.mxu1 %v14355_v39  ;;  %v5907_v44 = vsel %vm13450_vm6, %v5904_v50, %v5901_v63  ;;  %v5871_v56 = vsel %vm13460_vm8, %v5868_v24, %v5865_v19  ;;  %vm5304_vm15 = vcmp.gt.f32.partialorder %v13404_v20, 20.0 }
 0x5e2   :  { %v6171_v45 = vsel %vm5339_vm7, %v13280_v9, %v5907_v44  ;;  %v5054_v48 = vadd.f32 %v13213_v40, %v5005_v38  ;;  %v5218_v8 = vadd.f32 %v13341_v1, %v5169_v6  ;;  %v5941_v9 = vand.u32 2147483647, %v13407_v54 }
 0x5e3   :  { %v5435_v27 = vmul.f32 1.442695, %v5368_v51  ;;  %v5974_v51 = vmul.f32 -0.5, %v13416_v34  ;;  %v5940_v21 = vmul.f32 %v13407_v54, %v5939_v3  ;;  %v5423_v44 = vmin.f32 %v13488_v41, 20.0 }
 0x5e4   :  { %v13504_v43 = vadd.f32 %v13362_v30, %v5054_v48  ;;  %vm13507_vm11 = vcmp.lt.f32.partialorder %v5941_v9, 0.0004427343  ;;  %v5125_v6 = vadd.f32 %v13397_v17, %v13352_v37 }
 0x5e5   :  { %9093 = vpow2.f32 %v5435_v27  ;;  %v6167_v27 = vsel %vm5335_vm9, %v13283_v58, %v5871_v56  ;;  %v5975_v1 = vadd.f32 1.0, %v5974_v51  ;;  %v5977_v58 = vand.u32 2147483647, %v13416_v34 }
 0x5e6   :  { %v5263_v35 = vpop.f32.mrf.mxu3  ;;  %9095 = vlog2.f32 %v5935_v25  ;;  %v6215_v40 = vpack.c.bf16 %v6171_v45, %v6167_v27  ;;  %v5545_v29 = vmul.f32 1.442695, %v5423_v44 }
 0x5e7   :  { %v13446_v7 = vadd.f32 %v5263_v35, %v5215_v62  ;;  %9097 = vlog2.f32 %v5971_v4  ;;  %v14362_v4 = vpack.c.bf16 %v14360_v13, %v14361_v0  ;;  %v14365_v35 = vpack.c.bf16 %v14363_v55, %v14364_v22 }
 0x5e8   :  { %9099 = vpow2.f32 %v5529_v12  ;;  %v5171_v12 = vadd.f32 %v13375_v2, %v5122_v18  ;;  %vm13519_vm12 = vcmp.lt.f32.partialorder %v5977_v58, 0.0004427343  ;;  %v5174_v18 = vadd.f32 %v13429_v49, %v5125_v6 }
 0x5e9   :  { %v5372_v52 = vmin.f32 %v13446_v7, 20.0  ;;  %vm5308_vm1 = vcmp.gt.f32.partialorder %v13446_v7, 20.0 }
 0x5ea   :  { %v5220_v28 = vadd.f32 %v13383_v60, %v5171_v12  ;;  %v5223_v58 = vadd.f32 %v13435_v47, %v5174_v18 }
 0x5eb   :  { %v13465_v61 = vpop.eup %9093  ;;  %v5443_v15 = vmul.f32 1.442695, %v5372_v52  ;;  %v5976_v52 = vmul.f32 %v13416_v34, %v5975_v1 }
 0x5ec   :  { %v5584_v46 = vadd.f32 1.0, %v13465_v61  ;;  %v9096_v39 = vpop.eup %9095  ;;  %v5587_v10 = vmul.f32 -0.5, %v13465_v61  ;;  %v5590_v48 = vand.u32 2147483647, %v13465_v61 }
 0x5ed   :  { %9101 = vpow2.f32 %v5443_v15  ;;  %v9098_v53 = vpop.eup %9097  ;;  %v5937_v62 = vmul.f32 0.6931472, %v9096_v39  ;;  %v5427_v15 = vmin.f32 %v13504_v43, 20.0 }
 0x5ee   :  { %9103 = vpow2.f32 %v5537_v36  ;;  %v5266_v32 = vpop.f32.mrf.mxu3  ;;  %v5973_v19 = vmul.f32 0.6931472, %v9098_v53  ;;  %v13500_v42 = vpop.eup %9099  ;;  %v5588_v60 = vadd.f32 1.0, %v5587_v10  ;;  %vm13552_vm0 = vcmp.lt.f32.partialorder %v5590_v48, 0.0004427343 }
 0x5ef   :  { %v13485_v25 = vadd.f32 %v5266_v32, %v5218_v8  ;;  %9105 = vlog2.f32 %v5584_v46  ;;  %6517 = vmatmul.bf16.gmra.mxu0 %v14362_v4  ;;  %v5943_v54 = vsel %vm13507_vm11, %v5940_v21, %v5937_v62  ;;  %v6007_v51 = vadd.f32 1.0, %v13500_v42  ;;  %v13531_v46 = vpop.f32.mrf.mxu1  ;;  %v13537_v8 = vpop.f32.mrf.mxu2 }
 0x5f0   :  { %6615 = vmatmul.bf16.gmra.mxu2 %v6215_v40  ;;  %v5979_v23 = vsel %vm13519_vm12, %v5976_v52, %v5973_v19  ;;  %v6175_v17 = vsel %vm5343_vm10, %v13330_v57, %v5943_v54  ;;  %v6010_v9 = vmul.f32 -0.5, %v13500_v42  ;;  %v5553_v40 = vmul.f32 1.442695, %v5427_v15  ;;  %v13549_v4 = vpop.f32.mrf.mxu0  ;;  %v14373_v52 = vld [vmem:[#allocation23_spill] sm:$0xff] }
 0x5f1   :  { %v5376_v63 = vmin.f32 %v13485_v25, 20.0  ;;  %6566 = vmatmul.bf16.gmra.mxu1 %v14365_v35  ;;  %v6179_v53 = vsel %vm5347_vm13, %v13336_v26, %v5979_v23  ;;  %v5589_v0 = vmul.f32 %v13465_v61, %v5588_v60  ;;  %v5127_v35 = vadd.f32 %v13444_v14, %v13352_v37  ;;  %v14376_v23 = vld [vmem:[#allocation37_spill] sm:$0xff] }
 0x5f2   :  { %v6219_v62 = vpack.c.bf16 %v6179_v53, %v6175_v17  ;;  %v6013_v14 = vand.u32 2147483647, %v13500_v42  ;;  %vm5312_vm8 = vcmp.gt.f32.partialorder %v13485_v25, 20.0  ;;  %v14388_v53 = vld [vmem:[#allocation45_spill] sm:$0xff]  ;;  %vm5363_vm12 = vcmp.gt.f32.partialorder %v13504_v43, 20.0 }
 0x5f3   :  { %v9102_v59 = vpop.eup %9101  ;;  %v5451_v38 = vmul.f32 1.442695, %v5376_v63  ;;  %v5176_v60 = vadd.f32 %v13477_v31, %v5127_v35  ;;  %vm5359_vm13 = vcmp.gt.f32.partialorder %v13488_v41, 20.0 }
 0x5f4   :  { %v13514_v24 = vpop.eup %9103  ;;  %v5620_v30 = vadd.f32 1.0, %v9102_v59  ;;  %v5623_v2 = vmul.f32 -0.5, %v9102_v59  ;;  %v5626_v1 = vand.u32 2147483647, %v9102_v59  ;;  %vm13587_vm2 = vcmp.lt.f32.partialorder %v6013_v14, 0.0004427343 }
 0x5f5   :  { %9107 = vpow2.f32 %v5451_v38  ;;  %v9106_v34 = vpop.eup %9105  ;;  %v6043_v39 = vadd.f32 1.0, %v13514_v24  ;;  %v6046_v47 = vmul.f32 -0.5, %v13514_v24  ;;  %v14372_v38 = vld [vmem:[#allocation49_spill] sm:$0xff] }
 0x5f6   :  { %9109 = vlog2.f32 %v5620_v30  ;;  %v5268_v56 = vpop.f32.mrf.mxu3  ;;  %v5586_v32 = vmul.f32 0.6931472, %v9106_v34  ;;  %v5624_v27 = vadd.f32 1.0, %v5623_v2  ;;  %vm5627_vm14 = vcmp.lt.f32.partialorder %v5626_v1, 0.0004427343  ;;  %v14375_v2 = vld [vmem:[#allocation38_spill] sm:$0xff] }
 0x5f7   :  { %v13533_v45 = vadd.f32 %v5268_v56, %v5220_v28  ;;  %9111 = vlog2.f32 %v6007_v51  ;;  %v14374_v44 = vpack.c.bf16 %v14372_v38, %v14373_v52  ;;  %v13572_v54 = vpop.f32.mrf.mxu1  ;;  %v14377_v34 = vpack.c.bf16 %v14375_v2, %v14376_v23  ;;  %v13580_v6 = vpop.f32.mrf.mxu2 }
 0x5f8   :  { %9113 = vlog2.f32 %v6043_v39  ;;  %v5592_v55 = vsel %vm13552_vm0, %v5589_v0, %v5586_v32  ;;  %v5625_v61 = vmul.f32 %v9102_v59, %v5624_v27  ;;  %v6047_v15 = vadd.f32 1.0, %v6046_v47 }
 0x5f9   :  { %v5380_v3 = vmin.f32 %v13533_v45, 20.0  ;;  %9115 = vpow2.f32 %v5545_v29  ;;  %v6136_v10 = vsel %vm5304_vm15, %v13404_v20, %v5592_v55  ;;  %v6011_v20 = vadd.f32 1.0, %v6010_v9  ;;  %v13592_v9 = vpop.f32.mrf.mxu0 }
 0x5fa   :  { %v6049_v56 = vand.u32 2147483647, %v13514_v24  ;;  %v5130_v1 = vadd.f32 %v13494_v5, %v13352_v37  ;;  %vm5316_vm9 = vcmp.gt.f32.partialorder %v13533_v45, 20.0 }
 0x5fb   :  { %v13546_v13 = vpop.eup %9107  ;;  %v5459_v57 = vmul.f32 1.442695, %v5380_v3  ;;  %v5225_v3 = vadd.f32 %v13479_v16, %v5176_v60  ;;  %v6012_v31 = vmul.f32 %v13500_v42, %v6011_v20 }
 0x5fc   :  { %v9110_v26 = vpop.eup %9109  ;;  %v5656_v49 = vadd.f32 1.0, %v13546_v13  ;;  %v5659_v48 = vmul.f32 -0.5, %v13546_v13  ;;  %vm13598_vm3 = vcmp.lt.f32.partialorder %v6049_v56, 0.0004427343  ;;  %v14385_v56 = vld [vmem:[#allocation24_spill] sm:$0xff] }
 0x5fd   :  { %v5622_v22 = vmul.f32 0.6931472, %v9110_v26  ;;  %9117 = vpow2.f32 %v5459_v57  ;;  %v9112_v12 = vpop.eup %9111  ;;  %v6048_v57 = vmul.f32 %v13514_v24, %v6047_v15  ;;  %v5662_v24 = vand.u32 2147483647, %v13546_v13  ;;  %v14384_v15 = vld [vmem:[#allocation25_spill] sm:$0xff] }
 0x5fe   :  { %9119 = vpow2.f32 %v5553_v40  ;;  %v5271_v19 = vpop.f32.mrf.mxu3  ;;  %v9114_v30 = vpop.eup %9113  ;;  %v6009_v29 = vmul.f32 0.6931472, %v9112_v12 }
 0x5ff   :  { %v5628_v21 = vsel %vm5627_vm14, %v5625_v61, %v5622_v22  ;;  %v13564_v50 = vadd.f32 %v5271_v19, %v5223_v58  ;;  %6522 = vmatmul.bf16.gmra.mxu0 %v14374_v44  ;;  %9121 = vlog2.f32 %v5656_v49  ;;  %v6045_v32 = vmul.f32 0.6931472, %v9114_v30  ;;  %v13619_v12 = vpop.f32.mrf.mxu1  ;;  %v13624_v14 = vpop.f32.mrf.mxu2 }
 0x600   :  { %v6140_v59 = vsel %vm5308_vm1, %v13446_v7, %v5628_v21  ;;  %6620 = vmatmul.bf16.gmra.mxu2 %v6219_v62  ;;  %v13578_v7 = vpop.eup %9115  ;;  %v6015_v16 = vsel %vm13587_vm2, %v6012_v31, %v6009_v29  ;;  %v5660_v58 = vadd.f32 1.0, %v5659_v48  ;;  %v5179_v61 = vadd.f32 %v13531_v46, %v5130_v1  ;;  %v14387_v48 = vld [vmem:[#allocation47_spill] sm:$0xff] }
 0x601   :  { %v6200_v36 = vpack.c.bf16 %v6140_v59, %v6136_v10  ;;  %v5384_v28 = vmin.f32 %v13564_v50, 20.0  ;;  %6571 = vmatmul.bf16.gmra.mxu1 %v14377_v34  ;;  %v6051_v5 = vsel %vm13598_vm3, %v6048_v57, %v6045_v32  ;;  %v6079_v63 = vadd.f32 1.0, %v13578_v7  ;;  %v13637_v23 = vpop.f32.mrf.mxu0 }
 0x602   :  { %v6183_v35 = vsel %vm5351_vm4, %v13411_v33, %v6015_v16  ;;  %v6082_v47 = vmul.f32 -0.5, %v13578_v7  ;;  %v6187_v59 = vsel %vm5355_vm5, %v13426_v11, %v6051_v5  ;;  %v5661_v38 = vmul.f32 %v13546_v13, %v5660_v58 }
 0x603   :  { %v9118_v51 = vpop.eup %9117  ;;  %v5467_v39 = vmul.f32 1.442695, %v5384_v28  ;;  %6644 = vmatmul.bf16.vlgmr.msrb.gmra.mxu3 %v6200_v36  ;;  %v5228_v44 = vadd.f32 %v13537_v8, %v5179_v61  ;;  %vm13626_vm6 = vcmp.lt.f32.partialorder %v5662_v24, 0.0004427343  ;;  %v5132_v13 = vadd.f32 %v13549_v4, %v13352_v37 }
 0x604   :  { %v13585_v17 = vpop.eup %9119  ;;  %v5692_v27 = vadd.f32 1.0, %v9118_v51  ;;  %v5695_v18 = vmul.f32 -0.5, %v9118_v51  ;;  %v5698_v19 = vand.u32 2147483647, %v9118_v51  ;;  %v6223_v8 = vpack.c.bf16 %v6187_v59, %v6183_v35 }
 0x605   :  { %9123 = vpow2.f32 %v5467_v39  ;;  %v9122_v40 = vpop.eup %9121  ;;  %v6115_v42 = vadd.f32 1.0, %v13585_v17  ;;  %v6118_v2 = vmul.f32 -0.5, %v13585_v17  ;;  %v14389_v32 = vpack.c.bf16 %v14387_v48, %v14388_v53 }
 0x606   :  { %v5273_v0 = vpop.f32.mrf.mxu3  ;;  %9125 = vlog2.f32 %v5692_v27  ;;  %v5658_v55 = vmul.f32 0.6931472, %v9122_v40  ;;  %v5696_v22 = vadd.f32 1.0, %v5695_v18  ;;  %vm5699_vm7 = vcmp.lt.f32.partialorder %v5698_v19, 0.0004427343 }
 0x607   :  { %v13602_v26 = vadd.f32 %v5273_v0, %v5225_v3  ;;  %9127 = vlog2.f32 %v6115_v42  ;;  %v6083_v31 = vadd.f32 1.0, %v6082_v47  ;;  %v6119_v18 = vadd.f32 1.0, %v6118_v2  ;;  %v5185_v42 = vpop.f32.mrf.mxu1 }
 0x608   :  { %9129 = vlog2.f32 %v6079_v63  ;;  %v5664_v30 = vsel %vm13626_vm6, %v5661_v38, %v5658_v55  ;;  %v5697_v36 = vmul.f32 %v9118_v51, %v5696_v22  ;;  %v14386_v51 = vpack.c.bf16 %v14384_v15, %v14385_v56 }
 0x609   :  { %v5388_v49 = vmin.f32 %v13602_v26, 20.0  ;;  %v6144_v4 = vsel %vm5312_vm8, %v13485_v25, %v5664_v30  ;;  %v5181_v1 = vadd.f32 %v13572_v54, %v5132_v13  ;;  %v6121_v25 = vand.u32 2147483647, %v13585_v17 }
 0x60a   :  { %v6085_v57 = vand.u32 2147483647, %v13578_v7  ;;  %v5135_v54 = vadd.f32 %v13592_v9, %v13352_v37  ;;  %v6120_v22 = vmul.f32 %v13585_v17, %v6119_v18  ;;  %v6084_v35 = vmul.f32 %v13578_v7, %v6083_v31  ;;  %v5139_v17 = vpop.f32.mrf.mxu0 }
 0x60b   :  { %v13617_v21 = vpop.eup %9123  ;;  %v5475_v10 = vmul.f32 1.442695, %v5388_v49  ;;  %v5230_v58 = vadd.f32 %v13580_v6, %v5181_v1  ;;  %v5234_v49 = vpop.f32.mrf.mxu2  ;;  %vm13662_vm10 = vcmp.lt.f32.partialorder %v6121_v25, 0.0004427343  ;;  %vm5320_vm15 = vcmp.gt.f32.partialorder %v13564_v50, 20.0 }
 0x60c   :  { %v9126_v52 = vpop.eup %9125  ;;  %v5728_v46 = vadd.f32 1.0, %v13617_v21  ;;  %vm13666_vm11 = vcmp.lt.f32.partialorder %v6085_v57, 0.0004427343  ;;  %vm5324_vm1 = vcmp.gt.f32.partialorder %v13602_v26, 20.0 }
 0x60d   :  { %9131 = vpow2.f32 %v5475_v10  ;;  %v5694_v11 = vmul.f32 0.6931472, %v9126_v52  ;;  %v9128_v39 = vpop.eup %9127  ;;  %v5734_v10 = vand.u32 2147483647, %v13617_v21 }
 0x60e   :  { %v5276_v28 = vpop.f32.mrf.mxu3  ;;  %9133 = vlog2.f32 %v5728_v46  ;;  %v9130_v3 = vpop.eup %9129  ;;  %v6117_v62 = vmul.f32 0.6931472, %v9128_v39  ;;  %v14396_v39 = vld [vmem:[#allocation28_spill] sm:$0xff] }
 0x60f   :  { %v13640_v34 = vadd.f32 %v5276_v28, %v5228_v44  ;;  %v5700_v20 = vsel %vm5699_vm7, %v5697_v36, %v5694_v11  ;;  %6527 = vmatmul.bf16.gmra.mxu0 %v14386_v51  ;;  %v6081_v5 = vmul.f32 0.6931472, %v9130_v3  ;;  %v5184_v44 = vadd.f32 %v13619_v12, %v5135_v54  ;;  %v14400_v3 = vld [vmem:[#allocation48_spill] sm:$0xff] }
 0x610   :  { %v6148_v60 = vsel %vm5316_vm9, %v13533_v45, %v5700_v20  ;;  %6625 = vmatmul.bf16.gmra.mxu2 %v6223_v8  ;;  %v5731_v45 = vmul.f32 -0.5, %v13617_v21  ;;  %v6123_v9 = vsel %vm13662_vm10, %v6120_v22, %v6117_v62  ;;  %vm13683_vm0 = vcmp.lt.f32.partialorder %v5734_v10, 0.0004427343 }
 0x611   :  { %v5392_v29 = vmin.f32 %v13640_v34, 20.0  ;;  %6576 = vmatmul.bf16.gmra.mxu1 %v14389_v32  ;;  %v6204_v27 = vpack.c.bf16 %v6148_v60, %v6144_v4  ;;  %v6087_v7 = vsel %vm13666_vm11, %v6084_v35, %v6081_v5  ;;  %v6195_v11 = vsel %vm5363_vm12, %v13504_v43, %v6123_v9 }
 0x612   :  { %v5732_v6 = vadd.f32 1.0, %v5731_v45  ;;  %v5233_v28 = vadd.f32 %v13624_v14, %v5184_v44  ;;  %v6191_v8 = vsel %vm5359_vm13, %v13488_v41, %v6087_v7  ;;  %v5137_v43 = vadd.f32 %v13637_v23, %v13352_v37  ;;  %v5188_v14 = vpop.f32.mrf.mxu1 }
 0x613   :  { %v9132_v40 = vpop.eup %9131  ;;  %v5483_v0 = vmul.f32 1.442695, %v5392_v29  ;;  %6649 = vmatmul.bf16.gmra.mxu3 %v6204_v27  ;;  %v6227_v51 = vpack.c.bf16 %v6195_v11, %v6191_v8  ;;  %v5237_v60 = vpop.f32.mrf.mxu2  ;;  %v14397_v29 = vld [vmem:[#allocation51_spill] sm:$0xff]  ;;  %v14399_v27 = vld [vmem:[#allocation33_spill] sm:$0xff]  ;;  %vm5328_vm4 = vcmp.gt.f32.partialorder %v13640_v34, 20.0 }
 0x614   :  { %v5764_v16 = vadd.f32 1.0, %v9132_v40  ;;  %v5767_v24 = vmul.f32 -0.5, %v9132_v40  ;;  %v9134_v63 = vpop.eup %9133  ;;  %v5770_v33 = vand.u32 2147483647, %v9132_v40  ;;  %v5733_v36 = vmul.f32 %v13617_v21, %v5732_v6 }
 0x615   :  { %9135 = vpow2.f32 %v5483_v0  ;;  %v5730_v38 = vmul.f32 0.6931472, %v9134_v63  ;;  %v14398_v48 = vpack.c.bf16 %v14396_v39, %v14397_v29  ;;  %v14401_v31 = vpack.c.bf16 %v14399_v27, %v14400_v3  ;;  %v5141_v0 = vpop.f32.mrf.mxu0 }
 0x616   :  { %v5278_v55 = vpop.f32.mrf.mxu3  ;;  %9137 = vlog2.f32 %v5764_v16  ;;  %v5768_v52 = vadd.f32 1.0, %v5767_v24  ;;  %vm5771_vm14 = vcmp.lt.f32.partialorder %v5770_v33, 0.0004427343  ;;  %v5186_v1 = vadd.f32 %v5185_v42, %v5137_v43 }
 0x617   :  { %v13659_v61 = vadd.f32 %v5278_v55, %v5230_v58  ;;  %v5736_v12 = vsel %vm13683_vm0, %v5733_v36, %v5730_v38  ;;  %v5140_v16 = vadd.f32 %v5139_v17, %v13352_v37  ;;  %v5142_v33 = vadd.f32 %v5141_v0, %v13352_v37 }
 0x618   :  { %v5769_v56 = vmul.f32 %v9132_v40, %v5768_v52  ;;  %v6152_v53 = vsel %vm5320_vm15, %v13564_v50, %v5736_v12  ;;  %v5235_v62 = vadd.f32 %v5234_v49, %v5186_v1 }
 0x619   :  { %v5396_v59 = vmin.f32 %v13659_v61, 20.0  ;;  %v5189_v35 = vadd.f32 %v5188_v14, %v5140_v16  ;;  %vm5332_vm5 = vcmp.gt.f32.partialorder %v13659_v61, 20.0 }
 0x61a   :  { %v5190_v54 = vpop.f32.mrf.mxu1 }
 0x61b   :  { %v9136_v46 = vpop.eup %9135  ;;  %v5491_v30 = vmul.f32 1.442695, %v5396_v59  ;;  %v5239_v19 = vpop.f32.mrf.mxu2  ;;  %v5238_v59 = vadd.f32 %v5237_v60, %v5189_v35 }
 0x61c   :  { %v9138_v13 = vpop.eup %9137  ;;  %v5800_v20 = vadd.f32 1.0, %v9136_v46  ;;  %v5803_v45 = vmul.f32 -0.5, %v9136_v46  ;;  %v5806_v63 = vand.u32 2147483647, %v9136_v46 }
 0x61d   :  { %9139 = vpow2.f32 %v5491_v30  ;;  %v5766_v15 = vmul.f32 0.6931472, %v9138_v13  ;;  %v5144_v7 = vpop.f32.mrf.mxu0 }
 0x61e   :  { %v5281_v21 = vpop.f32.mrf.mxu3  ;;  %9141 = vlog2.f32 %v5800_v20  ;;  %v5804_v24 = vadd.f32 1.0, %v5803_v45  ;;  %vm5807_vm2 = vcmp.lt.f32.partialorder %v5806_v63, 0.0004427343  ;;  %v5191_v20 = vadd.f32 %v5190_v54, %v5142_v33 }
 0x61f   :  { %v13693_v41 = vadd.f32 %v5281_v21, %v5233_v28  ;;  %v5772_v4 = vsel %vm5771_vm14, %v5769_v56, %v5766_v15  ;;  %6532 = vmatmul.bf16.gmra.mxu0 %v14398_v48 }
 0x620   :  { %v6156_v23 = vsel %vm5324_vm1, %v13602_v26, %v5772_v4  ;;  %6630 = vmatmul.bf16.gmra.mxu2 %v6227_v51  ;;  %v5805_v9 = vmul.f32 %v9136_v46, %v5804_v24  ;;  %v5240_v51 = vadd.f32 %v5239_v19, %v5191_v20 }
 0x621   :  { %v5400_v32 = vmin.f32 %v13693_v41, 20.0  ;;  %6581 = vmatmul.bf16.gmra.mxu1 %v14401_v31  ;;  %v6208_v18 = vpack.c.bf16 %v6156_v23, %v6152_v53  ;;  %vm5336_vm8 = vcmp.gt.f32.partialorder %v13693_v41, 20.0 }
 0x622   :  { %v5193_v12 = vpop.f32.mrf.mxu1 }
 0x623   :  { %v9140_v40 = vpop.eup %9139  ;;  %v5499_v25 = vmul.f32 1.442695, %v5400_v32  ;;  %6654 = vmatmul.bf16.gmra.mxu3 %v6208_v18  ;;  %v5242_v43 = vpop.f32.mrf.mxu2 }
 0x624   :  { %v5836_v57 = vadd.f32 1.0, %v9140_v40  ;;  %v5839_v50 = vmul.f32 -0.5, %v9140_v40  ;;  %v9142_v26 = vpop.eup %9141  ;;  %v5842_v6 = vand.u32 2147483647, %v9140_v40 }
 0x625   :  { %9143 = vpow2.f32 %v5499_v25  ;;  %v5802_v55 = vmul.f32 0.6931472, %v9142_v26 }
 0x626   :  { %v5283_v58 = vpop.f32.mrf.mxu3  ;;  %9145 = vlog2.f32 %v5836_v57  ;;  %v5840_v22 = vadd.f32 1.0, %v5839_v50  ;;  %vm5843_vm3 = vcmp.lt.f32.partialorder %v5842_v6, 0.0004427343 }
 0x627   :  { %v13705_v5 = vadd.f32 %v5283_v58, %v5235_v62  ;;  %v5808_v38 = vsel %vm5807_vm2, %v5805_v9, %v5802_v55 }
 0x628   :  { %v5841_v44 = vmul.f32 %v9140_v40, %v5840_v22  ;;  %v6160_v36 = vsel %vm5328_vm4, %v13640_v34, %v5808_v38  ;;  %v5145_v34 = vadd.f32 %v5144_v7, %v13352_v37 }
 0x629   :  { %v5404_v42 = vmin.f32 %v13705_v5, 20.0  ;;  %vm5340_vm9 = vcmp.gt.f32.partialorder %v13705_v5, 20.0 }
 0x62a   :  { %v5194_v27 = vadd.f32 %v5193_v12, %v5145_v34  ;;  %v5195_v57 = vpop.f32.mrf.mxu1 }
 0x62b   :  { %v9144_v49 = vpop.eup %9143  ;;  %v5507_v47 = vmul.f32 1.442695, %v5404_v42  ;;  %v5244_v58 = vpop.f32.mrf.mxu2 }
 0x62c   :  { %v9146_v10 = vpop.eup %9145  ;;  %v5872_v17 = vadd.f32 1.0, %v9144_v49  ;;  %v5875_v56 = vmul.f32 -0.5, %v9144_v49  ;;  %v5878_v48 = vand.u32 2147483647, %v9144_v49  ;;  %v5243_v0 = vadd.f32 %v5242_v43, %v5194_v27 }
 0x62d   :  { %9147 = vpow2.f32 %v5507_v47  ;;  %v5838_v52 = vmul.f32 0.6931472, %v9146_v10 }
 0x62e   :  { %v5286_v30 = vpop.f32.mrf.mxu3  ;;  %9149 = vlog2.f32 %v5872_v17  ;;  %v5876_v29 = vadd.f32 1.0, %v5875_v56  ;;  %vm13720_vm6 = vcmp.lt.f32.partialorder %v5878_v48, 0.0004427343 }
 0x62f   :  { %v13711_v11 = vadd.f32 %v5286_v30, %v5238_v59  ;;  %v5844_v46 = vsel %vm5843_vm3, %v5841_v44, %v5838_v52 }
 0x630   :  { %v6164_v13 = vsel %vm5332_vm5, %v13659_v61, %v5844_v46  ;;  %v5146_v61 = vpop.f32.mrf.mxu0  ;;  %v5877_v40 = vmul.f32 %v9144_v49, %v5876_v29 }
 0x631   :  { %v5408_v28 = vmin.f32 %v13711_v11, 20.0  ;;  %v6212_v8 = vpack.c.bf16 %v6164_v13, %v6160_v36  ;;  %v5147_v16 = vadd.f32 %v5146_v61, %v13352_v37  ;;  %vm5344_vm12 = vcmp.gt.f32.partialorder %v13711_v11, 20.0 }
 0x632   :  { %v5198_v44 = vpop.f32.mrf.mxu1 }
 0x633   :  { %v9148_v2 = vpop.eup %9147  ;;  %v5515_v15 = vmul.f32 1.442695, %v5408_v28  ;;  %6659 = vmatmul.bf16.gmra.mxu3 %v6212_v8  ;;  %v5196_v49 = vadd.f32 %v5195_v57, %v5147_v16  ;;  %v5247_v33 = vpop.f32.mrf.mxu2 }
 0x634   :  { %v5908_v21 = vadd.f32 1.0, %v9148_v2  ;;  %v5911_v14 = vmul.f32 -0.5, %v9148_v2  ;;  %v9150_v4 = vpop.eup %9149  ;;  %v5914_v3 = vand.u32 2147483647, %v9148_v2 }
 0x635   :  { %9151 = vpow2.f32 %v5515_v15  ;;  %v5874_v23 = vmul.f32 0.6931472, %v9150_v4  ;;  %v5245_v59 = vadd.f32 %v5244_v58, %v5196_v49 }
 0x636   :  { %v5288_v60 = vpop.f32.mrf.mxu3  ;;  %9153 = vlog2.f32 %v5908_v21  ;;  %v5912_v32 = vadd.f32 1.0, %v5911_v14  ;;  %vm5915_vm7 = vcmp.lt.f32.partialorder %v5914_v3, 0.0004427343 }
 0x637   :  { %v13717_v39 = vadd.f32 %v5288_v60, %v5240_v51  ;;  %v5880_v62 = vsel %vm13720_vm6, %v5877_v40, %v5874_v23 }
 0x638   :  { %v5913_v26 = vmul.f32 %v9148_v2, %v5912_v32  ;;  %v6168_v42 = vsel %vm5336_vm8, %v13693_v41, %v5880_v62  ;;  %v5149_v22 = vpop.f32.mrf.mxu0 }
 0x639   :  { %v5412_v53 = vmin.f32 %v13717_v39, 20.0  ;;  %v5150_v38 = vadd.f32 %v5149_v22, %v13352_v37  ;;  %vm5348_vm13 = vcmp.gt.f32.partialorder %v13717_v39, 20.0 }
 0x63a   :  { %v5200_v27 = vpop.f32.mrf.mxu1 }
 0x63b   :  { %v9152_v31 = vpop.eup %9151  ;;  %v5523_v18 = vmul.f32 1.442695, %v5412_v53  ;;  %v5199_v28 = vadd.f32 %v5198_v44, %v5150_v38  ;;  %v5249_v3 = vpop.f32.mrf.mxu2 }
 0x63c   :  { %v9154_v1 = vpop.eup %9153  ;;  %v5944_v45 = vadd.f32 1.0, %v9152_v31  ;;  %v5947_v9 = vmul.f32 -0.5, %v9152_v31  ;;  %v5950_v30 = vand.u32 2147483647, %v9152_v31 }
 0x63d   :  { %9155 = vpow2.f32 %v5523_v18  ;;  %v5910_v50 = vmul.f32 0.6931472, %v9154_v1  ;;  %v5248_v43 = vadd.f32 %v5247_v33, %v5199_v28 }
 0x63e   :  { %v5291_v24 = vpop.f32.mrf.mxu3  ;;  %9157 = vlog2.f32 %v5944_v45  ;;  %v5948_v52 = vadd.f32 1.0, %v5947_v9  ;;  %vm5951_vm10 = vcmp.lt.f32.partialorder %v5950_v30, 0.0004427343 }
 0x63f   :  { %v13729_v63 = vadd.f32 %v5291_v24, %v5243_v0  ;;  %v5916_v54 = vsel %vm5915_vm7, %v5913_v26, %v5910_v50 }
 0x640   :  { %v6172_v55 = vsel %vm5340_vm9, %v13705_v5, %v5916_v54  ;;  %v5151_v20 = vpop.f32.mrf.mxu0  ;;  %v5949_v15 = vmul.f32 %v9152_v31, %v5948_v52 }
 0x641   :  { %v5416_v35 = vmin.f32 %v13729_v63, 20.0  ;;  %v6216_v19 = vpack.c.bf16 %v6172_v55, %v6168_v42  ;;  %v5152_v34 = vadd.f32 %v5151_v20, %v13352_v37  ;;  %vm5352_vm15 = vcmp.gt.f32.partialorder %v13729_v63, 20.0 }
 0x643   :  { %v9156_v6 = vpop.eup %9155  ;;  %v5531_v47 = vmul.f32 1.442695, %v5416_v35  ;;  %6664 = vmatmul.bf16.gmra.mxu3 %v6216_v19  ;;  %v5201_v31 = vadd.f32 %v5200_v27, %v5152_v34 }
 0x644   :  { %v5980_v10 = vadd.f32 1.0, %v9156_v6  ;;  %v5983_v17 = vmul.f32 -0.5, %v9156_v6  ;;  %v9158_v7 = vpop.eup %9157  ;;  %v5986_v8 = vand.u32 2147483647, %v9156_v6 }
 0x645   :  { %9159 = vpow2.f32 %v5531_v47  ;;  %v5946_v36 = vmul.f32 0.6931472, %v9158_v7  ;;  %v5250_v0 = vadd.f32 %v5249_v3, %v5201_v31  ;;  %v6547_v7 = vpop.f32.mrf.mxu1 }
 0x646   :  { %v5293_v41 = vpop.f32.mrf.mxu3  ;;  %9161 = vlog2.f32 %v5980_v10  ;;  %v5984_v13 = vadd.f32 1.0, %v5983_v17  ;;  %vm5987_vm11 = vcmp.lt.f32.partialorder %v5986_v8, 0.0004427343 }
 0x647   :  { %v13735_v5 = vadd.f32 %v5293_v41, %v5245_v59  ;;  %v5952_v51 = vsel %vm5951_vm10, %v5949_v15, %v5946_v36  ;;  %v6596_v41 = vpop.f32.mrf.mxu2 }
 0x648   :  { %v5985_v4 = vmul.f32 %v9156_v6, %v5984_v13  ;;  %v6176_v48 = vsel %vm5344_vm12, %v13711_v11, %v5952_v51  ;;  %v6498_v49 = vpop.f32.mrf.mxu0 }
 0x649   :  { %v5420_v46 = vmin.f32 %v13735_v5, 20.0  ;;  %vm5356_vm1 = vcmp.gt.f32.partialorder %v13735_v5, 20.0 }
 0x64b   :  { %v9160_v2 = vpop.eup %9159  ;;  %v5539_v12 = vmul.f32 1.442695, %v5420_v46 }
 0x64c   :  { %v9162_v56 = vpop.eup %9161  ;;  %v6016_v21 = vadd.f32 1.0, %v9160_v2  ;;  %v6019_v40 = vmul.f32 -0.5, %v9160_v2  ;;  %v6022_v62 = vand.u32 2147483647, %v9160_v2 }
 0x64d   :  { %9163 = vpow2.f32 %v5539_v12  ;;  %v5982_v14 = vmul.f32 0.6931472, %v9162_v56 }
 0x64e   :  { %v5296_v60 = vpop.f32.mrf.mxu3  ;;  %9165 = vlog2.f32 %v6016_v21  ;;  %vm6023_vm0 = vcmp.lt.f32.partialorder %v6022_v62, 0.0004427343 }
 0x64f   :  { %v13741_v61 = vadd.f32 %v5296_v60, %v5248_v43  ;;  %v5988_v29 = vsel %vm5987_vm11, %v5985_v4, %v5982_v14  ;;  %v6598_v56 = vpop.f32.mrf.mxu2 }
 0x650   :  { %v6180_v53 = vsel %vm5348_vm13, %v13717_v39, %v5988_v29  ;;  %v6020_v39 = vadd.f32 1.0, %v6019_v40  ;;  %v6500_v46 = vpop.f32.mrf.mxu0  ;;  %v13755_v29 = vld [vmem:[%s13873_s6] ss:$0 sm:$0xff]  ;;  %s9264_s6 = smov [#allocation7]  }
 0x651   :  { %v5424_v23 = vmin.f32 %v13741_v61, 20.0  ;;  %v6220_v32 = vpack.c.bf16 %v6180_v53, %v6176_v48  ;;  %vm5360_vm4 = vcmp.gt.f32.partialorder %v13741_v61, 20.0  ;;  %v6499_v53 = vadd.f32 %v13755_v29, %v6498_v49  ;;  %s6832_s3 = sshll.u32 %s9264_s6, 4  ;;  %s6833_s3 = int_to_ptr.vmem [resolvable:$true] %s6832_s3 }
 0x652   :  { %v6021_v42 = vmul.f32 %v9160_v2, %v6020_v39  ;;  %v6501_v31 = vadd.f32 %v13755_v29, %v6500_v46 }
 0x653   :  { %v9164_v37 = vpop.eup %9163  ;;  %v5547_v18 = vmul.f32 1.442695, %v5424_v23  ;;  %6669 = vmatmul.bf16.gmra.mxu3 %v6220_v32  ;;  %v6548_v27 = vadd.f32 %v6547_v7, %v6499_v53 }
 0x654   :  { %v6052_v1 = vadd.f32 1.0, %v9164_v37  ;;  %v6055_v25 = vmul.f32 -0.5, %v9164_v37  ;;  %v9166_v45 = vpop.eup %9165  ;;  %v6058_v58 = vand.u32 2147483647, %v9164_v37 }
 0x655   :  { %9167 = vpow2.f32 %v5547_v18  ;;  %v6018_v26 = vmul.f32 0.6931472, %v9166_v45  ;;  %v6597_v3 = vadd.f32 %v6596_v41, %v6548_v27 }
 0x656   :  { %v5298_v57 = vpop.f32.mrf.mxu3  ;;  %9169 = vlog2.f32 %v6052_v1  ;;  %v6056_v16 = vadd.f32 1.0, %v6055_v25  ;;  %vm6059_vm14 = vcmp.lt.f32.partialorder %v6058_v58, 0.0004427343 }
 0x657   :  { %v5299_v11 = vadd.f32 %v5298_v57, %v5250_v0  ;;  %v6024_v35 = vsel %vm6023_vm0, %v6021_v42, %v6018_v26  ;;  %v6601_v60 = vpop.f32.mrf.mxu2 }
 0x658   :  { %v6057_v6 = vmul.f32 %v9164_v37, %v6056_v16  ;;  %v6184_v9 = vsel %vm5352_vm15, %v13729_v63, %v6024_v35  ;;  %v6503_v4 = vpop.f32.mrf.mxu0 }
 0x659   :  { %v5428_v50 = vmin.f32 %v5299_v11, 20.0  ;;  %vm5364_vm5 = vcmp.gt.f32.partialorder %v5299_v11, 20.0  ;;  %v6504_v57 = vadd.f32 %v13755_v29, %v6503_v4 }
 0x65b   :  { %v9168_v24 = vpop.eup %9167  ;;  %v5555_v54 = vmul.f32 1.442695, %v5428_v50 }
 0x65c   :  { %v9170_v55 = vpop.eup %9169  ;;  %v6088_v22 = vadd.f32 1.0, %v9168_v24  ;;  %v6091_v38 = vmul.f32 -0.5, %v9168_v24  ;;  %v6094_v36 = vand.u32 2147483647, %v9168_v24 }
 0x65d   :  { %9171 = vpow2.f32 %v5555_v54  ;;  %v6054_v19 = vmul.f32 0.6931472, %v9170_v55 }
 0x65e   :  { %9173 = vlog2.f32 %v6088_v22  ;;  %v6092_v30 = vadd.f32 1.0, %v6091_v38  ;;  %vm6095_vm2 = vcmp.lt.f32.partialorder %v6094_v36, 0.0004427343 }
 0x65f   :  { %v6060_v47 = vsel %vm6059_vm14, %v6057_v6, %v6054_v19  ;;  %v6603_v32 = vpop.f32.mrf.mxu2 }
 0x660   :  { %v6188_v10 = vsel %vm5356_vm1, %v13735_v5, %v6060_v47  ;;  %v6093_v63 = vmul.f32 %v9168_v24, %v6092_v30  ;;  %v6549_v5 = vpop.f32.mrf.mxu1  ;;  %v6505_v48 = vpop.f32.mrf.mxu0 }
 0x661   :  { %v6224_v59 = vpack.c.bf16 %v6188_v10, %v6184_v9  ;;  %v6550_v40 = vadd.f32 %v6549_v5, %v6501_v31  ;;  %v6506_v24 = vadd.f32 %v13755_v29, %v6505_v48 }
 0x663   :  { %v9172_v17 = vpop.eup %9171  ;;  %6674 = vmatmul.bf16.gmra.mxu3 %v6224_v59  ;;  %v6599_v25 = vadd.f32 %v6598_v56, %v6550_v40 }
 0x664   :  { %v6124_v52 = vadd.f32 1.0, %v9172_v17  ;;  %v6127_v44 = vmul.f32 -0.5, %v9172_v17  ;;  %v9174_v33 = vpop.eup %9173  ;;  %v6130_v8 = vand.u32 2147483647, %v9172_v17 }
 0x665   :  { %v6090_v13 = vmul.f32 0.6931472, %v9174_v33 }
 0x666   :  { %9175 = vlog2.f32 %v6124_v52  ;;  %v6128_v28 = vadd.f32 1.0, %v6127_v44  ;;  %vm6131_vm3 = vcmp.lt.f32.partialorder %v6130_v8, 0.0004427343 }
 0x667   :  { %v6096_v20 = vsel %vm6095_vm2, %v6093_v63, %v6090_v13  ;;  %v6606_v0 = vpop.f32.mrf.mxu2 }
 0x668   :  { %v6129_v15 = vmul.f32 %v9172_v17, %v6128_v28  ;;  %v6192_v21 = vsel %vm5360_vm4, %v13741_v61, %v6096_v20  ;;  %v6552_v34 = vpop.f32.mrf.mxu1  ;;  %v6508_v37 = vpop.f32.mrf.mxu0 }
 0x669   :  { %v6553_v62 = vadd.f32 %v6552_v34, %v6504_v57  ;;  %v6509_v19 = vadd.f32 %v13755_v29, %v6508_v37 }
 0x66b   :  { %v6602_v50 = vadd.f32 %v6601_v60, %v6553_v62 }
 0x66c   :  { %v9176_v2 = vpop.eup %9175 }
 0x66d   :  { %v6126_v12 = vmul.f32 0.6931472, %v9176_v2 }
 0x66f   :  { %v6132_v43 = vsel %vm6131_vm3, %v6129_v15, %v6126_v12  ;;  %v6608_v16 = vpop.f32.mrf.mxu2 }
 0x670   :  { %v6196_v51 = vsel %vm5364_vm5, %v5299_v11, %v6132_v43  ;;  %v6554_v23 = vpop.f32.mrf.mxu1  ;;  %v6510_v39 = vpop.f32.mrf.mxu0 }
 0x671   :  { %v6228_v14 = vpack.c.bf16 %v6196_v51, %v6192_v21  ;;  %v6555_v55 = vadd.f32 %v6554_v23, %v6506_v24  ;;  %v6511_v7 = vadd.f32 %v13755_v29, %v6510_v39 }
 0x673   :  { %6679 = vmatmul.bf16.gmra.mxu3 %v6228_v14  ;;  %v6604_v22 = vadd.f32 %v6603_v32, %v6555_v55 }
 0x677   :  { %v6611_v47 = vpop.f32.mrf.mxu2 }
 0x678   :  { %v6557_v1 = vpop.f32.mrf.mxu1  ;;  %v6513_v42 = vpop.f32.mrf.mxu0 }
 0x679   :  { %v6558_v9 = vadd.f32 %v6557_v1, %v6509_v19  ;;  %v6514_v36 = vadd.f32 %v13755_v29, %v6513_v42 }
 0x67b   :  { %v6607_v59 = vadd.f32 %v6606_v0, %v6558_v9 }
 0x67f   :  { %v6613_v52 = vpop.f32.mrf.mxu2 }
 0x680   :  { %v6559_v26 = vpop.f32.mrf.mxu1  ;;  %v6515_v10 = vpop.f32.mrf.mxu0 }
 0x681   :  { %v6560_v44 = vadd.f32 %v6559_v26, %v6511_v7  ;;  %v6516_v20 = vadd.f32 %v13755_v29, %v6515_v10 }
 0x683   :  { %v6609_v33 = vadd.f32 %v6608_v16, %v6560_v44 }
 0x686   :  { %v6645_v61 = vpop.f32.mrf.mxu3 }
 0x687   :  { %v6646_v18 = vadd.f32 %v6645_v61, %v6597_v3  ;;  %v6616_v63 = vpop.f32.mrf.mxu2 }
 0x688   :  { %v6562_v6 = vpop.f32.mrf.mxu1  ;;  %v6518_v30 = vpop.f32.mrf.mxu0 }
 0x689   :  { %6685 = vxpose.xlu0.b32.start [1/16] %v6646_v18, 128  ;;  %v6563_v28 = vadd.f32 %v6562_v6, %v6514_v36  ;;  %v6519_v4 = vadd.f32 %v13755_v29, %v6518_v30 }
 0x68b   :  { %v6612_v2 = vadd.f32 %v6611_v47, %v6563_v28 }
 0x68e   :  { %v6647_v45 = vpop.f32.mrf.mxu3 }
 0x68f   :  { %v6648_v11 = vadd.f32 %v6647_v45, %v6599_v25  ;;  %v6618_v51 = vpop.f32.mrf.mxu2 }
 0x690   :  { %v6564_v41 = vpop.f32.mrf.mxu1  ;;  %v6520_v15 = vpop.f32.mrf.mxu0 }
 0x691   :  { %6686 = vxpose.xlu0.b32.cont [2/16] %v6648_v11, 128  ;;  %v6565_v56 = vadd.f32 %v6564_v41, %v6516_v20  ;;  %v6521_v32 = vadd.f32 %v13755_v29, %v6520_v15 }
 0x693   :  { %v6614_v43 = vadd.f32 %v6613_v52, %v6565_v56 }
 0x696   :  { %v6650_v58 = vpop.f32.mrf.mxu3 }
 0x697   :  { %v6651_v54 = vadd.f32 %v6650_v58, %v6602_v50  ;;  %v6621_v37 = vpop.f32.mrf.mxu2 }
 0x698   :  { %v6567_v8 = vpop.f32.mrf.mxu1  ;;  %v6523_v60 = vpop.f32.mrf.mxu0 }
 0x699   :  { %6687 = vxpose.xlu0.b32.cont [3/16] %v6651_v54, 128  ;;  %v6568_v48 = vadd.f32 %v6567_v8, %v6519_v4  ;;  %v6524_v1 = vadd.f32 %v13755_v29, %v6523_v60 }
 0x69b   :  { %v6617_v53 = vadd.f32 %v6616_v63, %v6568_v48 }
 0x69e   :  { %v6652_v35 = vpop.f32.mrf.mxu3 }
 0x69f   :  { %v6653_v49 = vadd.f32 %v6652_v35, %v6604_v22  ;;  %v6623_v45 = vpop.f32.mrf.mxu2 }
 0x6a0   :  { %v6569_v21 = vpop.f32.mrf.mxu1  ;;  %v6525_v31 = vpop.f32.mrf.mxu0 }
 0x6a1   :  { %6688 = vxpose.xlu0.b32.cont [4/16] %v6653_v49, 128  ;;  %v6570_v61 = vadd.f32 %v6569_v21, %v6521_v32  ;;  %v6526_v50 = vadd.f32 %v13755_v29, %v6525_v31 }
 0x6a3   :  { %v6619_v18 = vadd.f32 %v6618_v51, %v6570_v61 }
 0x6a6   :  { %v6655_v17 = vpop.f32.mrf.mxu3 }
 0x6a7   :  { %v6656_v38 = vadd.f32 %v6655_v17, %v6607_v59  ;;  %v6626_v24 = vpop.f32.mrf.mxu2 }
 0x6a8   :  { %v6572_v27 = vpop.f32.mrf.mxu1  ;;  %v6528_v39 = vpop.f32.mrf.mxu0 }
 0x6a9   :  { %6689 = vxpose.xlu0.b32.cont [5/16] %v6656_v38, 128  ;;  %v6573_v57 = vadd.f32 %v6572_v27, %v6524_v1  ;;  %v6529_v55 = vadd.f32 %v13755_v29, %v6528_v39 }
 0x6ab   :  { %v6622_v11 = vadd.f32 %v6621_v37, %v6573_v57 }
 0x6ae   :  { %v6657_v46 = vpop.f32.mrf.mxu3 }
 0x6af   :  { %v6658_v13 = vadd.f32 %v6657_v46, %v6609_v33  ;;  %v6628_v47 = vpop.f32.mrf.mxu2 }
 0x6b0   :  { %v6574_v25 = vpop.f32.mrf.mxu1  ;;  %v6530_v35 = vpop.f32.mrf.mxu0 }
 0x6b1   :  { %6690 = vxpose.xlu0.b32.cont [6/16] %v6658_v13, 128  ;;  %v6575_v16 = vadd.f32 %v6574_v25, %v6526_v50  ;;  %v6531_v10 = vadd.f32 %v13755_v29, %v6530_v35 }
 0x6b3   :  { %v6624_v54 = vadd.f32 %v6623_v45, %v6575_v16 }
 0x6b6   :  { %v6660_v5 = vpop.f32.mrf.mxu3 }
 0x6b7   :  { %v6661_v12 = vadd.f32 %v6660_v5, %v6612_v2  ;;  %v6631_v30 = vpop.f32.mrf.mxu2 }
 0x6b8   :  { %v6577_v58 = vpop.f32.mrf.mxu1  ;;  %v6533_v17 = vpop.f32.mrf.mxu0 }
 0x6b9   :  { %6691 = vxpose.xlu0.b32.cont [7/16] %v6661_v12, 128  ;;  %v6578_v19 = vadd.f32 %v6577_v58, %v6529_v55  ;;  %v6534_v52 = vadd.f32 %v13755_v29, %v6533_v17 }
 0x6bb   :  { %v6627_v6 = vadd.f32 %v6626_v24, %v6578_v19  ;;  %v6738_v24 = vlaneseq }
 0x6bd   :  { %v6739_v55 = vshrl.u32 %v6738_v24, 7 }
 0x6be   :  { %v6662_v14 = vpop.f32.mrf.mxu3 }
 0x6bf   :  { %v6663_v34 = vadd.f32 %v6662_v14, %v6614_v43  ;;  %v6633_v5 = vpop.f32.mrf.mxu2  ;;  %v6740_v19 = vadd.s32 8, %v6739_v55  ;;  %v6746_v17 = vadd.s32 56, %v6739_v55 }
 0x6c0   :  { %v6579_v49 = vpop.f32.mrf.mxu1  ;;  %v6535_v36 = vpop.f32.mrf.mxu0 }
 0x6c1   :  { %6692 = vxpose.xlu0.b32.cont [8/16] %v6663_v34, 128  ;;  %v6580_v7 = vadd.f32 %v6579_v49, %v6531_v10  ;;  %v6536_v8 = vadd.f32 %v13755_v29, %v6535_v36  ;;  %v6741_v49 = vadd.s32 16, %v6739_v55  ;;  %v6744_v10 = vadd.s32 40, %v6739_v55 }
 0x6c2   :  { %v6754_v36 = vadd.s32 120, %v6739_v55 }
 0x6c3   :  { %v6629_v38 = vadd.f32 %v6628_v47, %v6580_v7  ;;  %v6742_v47 = vadd.s32 24, %v6739_v55  ;;  %v6747_v7 = vadd.s32 64, %v6739_v55 }
 0x6c6   :  { %v6665_v23 = vpop.f32.mrf.mxu3 }
 0x6c7   :  { %v6666_v3 = vadd.f32 %v6665_v23, %v6617_v53 }
 0x6c8   :  { %v6582_v33 = vpop.f32.mrf.mxu1 }
 0x6c9   :  { %6693 = vxpose.xlu0.b32.cont [9/16] %v6666_v3, 128  ;;  %v6583_v46 = vadd.f32 %v6582_v33, %v6534_v52  ;;  %v6749_v52 = vadd.s32 80, %v6739_v55  ;;  %v6751_v33 = vadd.s32 96, %v6739_v55 }
 0x6cb   :  { %v6632_v13 = vadd.f32 %v6631_v30, %v6583_v46  ;;  %v6752_v30 = vadd.s32 104, %v6739_v55  ;;  %v6753_v46 = vadd.s32 112, %v6739_v55 }
 0x6ce   :  { %v6667_v40 = vpop.f32.mrf.mxu3 }
 0x6cf   :  { %v6668_v0 = vadd.f32 %v6667_v40, %v6619_v18 }
 0x6d0   :  { %v6584_v2 = vpop.f32.mrf.mxu1 }
 0x6d1   :  { %6694 = vxpose.xlu0.b32.cont [10/16] %v6668_v0, 128  ;;  %v6585_v20 = vadd.f32 %v6584_v2, %v6536_v8 }
 0x6d3   :  { %v6634_v12 = vadd.f32 %v6633_v5, %v6585_v20 }
 0x6d6   :  { %v6670_v62 = vpop.f32.mrf.mxu3 }
 0x6d7   :  { %v6671_v26 = vadd.f32 %v6670_v62, %v6622_v11 }
 0x6d9   :  { %6695 = vxpose.xlu0.b32.cont [11/16] %v6671_v26, 128 }
 0x6de   :  { %v6672_v42 = vpop.f32.mrf.mxu3 }
 0x6df   :  { %v6673_v22 = vadd.f32 %v6672_v42, %v6624_v54 }
 0x6e1   :  { %6696 = vxpose.xlu0.b32.cont [12/16] %v6673_v22, 128 }
 0x6e6   :  { %v6675_v9 = vpop.f32.mrf.mxu3 }
 0x6e7   :  { %v6676_v59 = vadd.f32 %v6675_v9, %v6627_v6  ;;  %v6743_v9 = vadd.s32 32, %v6739_v55 }
 0x6e9   :  { %6697 = vxpose.xlu0.b32.cont [13/16] %v6676_v59, 128  ;;  %v6745_v59 = vadd.s32 48, %v6739_v55 }
 0x6ee   :  { %v6677_v41 = vpop.f32.mrf.mxu3 }
 0x6ef   :  { %v6678_v44 = vadd.f32 %v6677_v41, %v6629_v38  ;;  %v6748_v41 = vadd.s32 72, %v6739_v55 }
 0x6f1   :  { %6698 = vxpose.xlu0.b32.cont [14/16] %v6678_v44, 128  ;;  %v6750_v44 = vadd.s32 88, %v6739_v55 }
 0x6f6   :  { %v6680_v28 = vpop.f32.mrf.mxu3 }
 0x6f7   :  { %v6681_v63 = vadd.f32 %v6680_v28, %v6632_v13 }
 0x6f9   :  { %6699 = vxpose.xlu0.b32.cont [15/16] %v6681_v63, 128 }
 0x6fe   :  { %v6682_v15 = vpop.f32.mrf.mxu3 }
 0x6ff   :  { %v6683_v56 = vadd.f32 %v6682_v15, %v6634_v12 }
 0x701   :  { %6700 = vxpose.xlu0.b32.end [16/16] %v6683_v56, 128 }
 0x72d   :  { %v13773_v43 = vpop.trf.xlu0 }
 0x735   :  { %v13775_v21 = vpop.trf.xlu0 }
 0x73d   :  { %v13777_v51 = vpop.trf.xlu0 }
 0x745   :  { %v13779_v14 = vpop.trf.xlu0 }
 0x74d   :  { %v13781_v4 = vpop.trf.xlu0 }
 0x74e   :  { %v6717_v31 = vmax.f32 %v13773_v43, %v13781_v4 }
 0x755   :  { %v13783_v29 = vpop.trf.xlu0 }
 0x756   :  { %v6718_v61 = vmax.f32 %v13775_v21, %v13783_v29 }
 0x75d   :  { %v13785_v34 = vpop.trf.xlu0 }
 0x75e   :  { %v6719_v18 = vmax.f32 %v13777_v51, %v13785_v34 }
 0x765   :  { %v13787_v60 = vpop.trf.xlu0 }
 0x766   :  { %v6720_v40 = vmax.f32 %v13779_v14, %v13787_v60 }
 0x76d   :  { %v13789_v48 = vpop.trf.xlu0 }
 0x76e   :  { %v6721_v0 = vmax.f32 %v6717_v31, %v13789_v48 }
 0x775   :  { %v13791_v53 = vpop.trf.xlu0 }
 0x776   :  { %v6722_v1 = vmax.f32 %v6718_v61, %v13791_v53 }
 0x77d   :  { %v13793_v23 = vpop.trf.xlu0 }
 0x77e   :  { %v6723_v25 = vmax.f32 %v6719_v18, %v13793_v23 }
 0x785   :  { %v13795_v32 = vpop.trf.xlu0 }
 0x786   :  { %v6724_v45 = vmax.f32 %v6720_v40, %v13795_v32 }
 0x78d   :  { %v13797_v27 = vpop.trf.xlu0 }
 0x78e   :  { %v6725_v39 = vmax.f32 %v6721_v0, %v13797_v27 }
 0x795   :  { %v13799_v3 = vpop.trf.xlu0 }
 0x796   :  { %v6726_v57 = vmax.f32 %v6722_v1, %v13799_v3 }
 0x798   :  { %v6729_v26 = vmax.f32 %v6725_v39, %v6726_v57 }
 0x79d   :  { %v13801_v37 = vpop.trf.xlu0 }
 0x79e   :  { %v6727_v62 = vmax.f32 %v6723_v25, %v13801_v37 }
 0x7a5   :  { %v6716_v11 = vpop.trf.xlu0 }
 0x7a6   :  { %v6728_v50 = vmax.f32 %v6724_v45, %v6716_v11 }
 0x7a8   :  { %v6730_v16 = vmax.f32 %v6727_v62, %v6728_v50 }
 0x7aa   :  { %v6731_v58 = vmax.f32 %v6729_v26, %v6730_v16 }
 0x7ac   :  { %v6732_v54 = vrot.slane %v6731_v58, 4 }
 0x7ae   :  { %v6733_v42 = vmax.f32 %v6731_v58, %v6732_v54 }
 0x7b0   :  { %v6734_v22 = vrot.slane %v6733_v42, 2 }
 0x7b2   :  { %v6735_v35 = vmax.f32 %v6733_v42, %v6734_v22 }
 0x7b4   :  { %v6736_v6 = vrot.slane %v6735_v35, 1 }
 0x7b6   :  { %v6737_v38 = vmax.f32 %v6735_v35, %v6736_v6 }
 0x7b8   :  { %vm6755_vm6 = vcmp.eq.f32.partialorder %v13773_v43, %v6737_v38  ;;  %vm6756_vm7 = vcmp.eq.f32.partialorder %v13775_v21, %v6737_v38  ;;  %vm6757_vm8 = vcmp.eq.f32.partialorder %v13777_v51, %v6737_v38  ;;  %vm6758_vm9 = vcmp.eq.f32.partialorder %v13779_v14, %v6737_v38 }
 0x7b9   :  { %vm6759_vm10 = vcmp.eq.f32.partialorder %v13781_v4, %v6737_v38  ;;  %vm6760_vm11 = vcmp.eq.f32.partialorder %v13783_v29, %v6737_v38  ;;  %vm6761_vm12 = vcmp.eq.f32.partialorder %v13785_v34, %v6737_v38  ;;  %vm6762_vm13 = vcmp.eq.f32.partialorder %v13787_v60, %v6737_v38 }
 0x7ba   :  { %vm6763_vm0 = vcmp.eq.f32.partialorder %v13789_v48, %v6737_v38  ;;  %vm6764_vm14 = vcmp.eq.f32.partialorder %v13791_v53, %v6737_v38  ;;  %vm6765_vm15 = vcmp.eq.f32.partialorder %v13793_v23, %v6737_v38  ;;  %vm6766_vm1 = vcmp.eq.f32.partialorder %v13795_v32, %v6737_v38 }
 0x7bb   :  { %vm6767_vm2 = vcmp.eq.f32.partialorder %v13797_v27, %v6737_v38  ;;  %vm6768_vm3 = vcmp.eq.f32.partialorder %v13799_v3, %v6737_v38  ;;  %vm6769_vm4 = vcmp.eq.f32.partialorder %v13801_v37, %v6737_v38  ;;  %vm6770_vm5 = vcmp.eq.f32.partialorder %v6716_v11, %v6737_v38 }
 0x7bc   :  { %v6771_v13 = vsel %vm6755_vm6, %v6739_v55, 128  ;;  %v6772_v28 = vsel %vm6756_vm7, %v6740_v19, 128  ;;  %v6773_v8 = vsel %vm6757_vm8, %v6741_v49, 128  ;;  %v6774_v63 = vsel %vm6758_vm9, %v6742_v47, 128 }
 0x7bd   :  { %v6775_v2 = vsel %vm6759_vm10, %v6743_v9, 128  ;;  %v6776_v5 = vsel %vm6760_vm11, %v6744_v10, 128  ;;  %v6777_v20 = vsel %vm6761_vm12, %v6745_v59, 128  ;;  %v6778_v12 = vsel %vm6762_vm13, %v6746_v17, 128 }
 0x7be   :  { %v6779_v15 = vsel %vm6763_vm0, %v6747_v7, 128  ;;  %v6780_v56 = vsel %vm6764_vm14, %v6748_v41, 128  ;;  %v6781_v43 = vsel %vm6765_vm15, %v6749_v52, 128  ;;  %v6782_v21 = vsel %vm6766_vm1, %v6750_v44, 128 }
 0x7bf   :  { %v6783_v51 = vsel %vm6767_vm2, %v6751_v33, 128  ;;  %v6784_v14 = vsel %vm6768_vm3, %v6752_v30, 128  ;;  %v6785_v4 = vsel %vm6769_vm4, %v6753_v46, 128  ;;  %v6786_v29 = vsel %vm6770_vm5, %v6754_v36, 128 }
 0x7c0   :  { %vm6787_vm6 = vcmp.lt.s32.totalorder %v6771_v13, %v6775_v2  ;;  %vm6789_vm7 = vcmp.lt.s32.totalorder %v6772_v28, %v6776_v5  ;;  %vm6791_vm8 = vcmp.lt.s32.totalorder %v6773_v8, %v6777_v20  ;;  %vm6793_vm9 = vcmp.lt.s32.totalorder %v6774_v63, %v6778_v12 }
 0x7c1   :  { %v6788_v34 = vsel %vm6787_vm6, %v6771_v13, %v6775_v2  ;;  %v6790_v60 = vsel %vm6789_vm7, %v6772_v28, %v6776_v5  ;;  %v6792_v48 = vsel %vm6791_vm8, %v6773_v8, %v6777_v20  ;;  %v6794_v53 = vsel %vm6793_vm9, %v6774_v63, %v6778_v12 }
 0x7c2   :  { %vm6795_vm10 = vcmp.lt.s32.totalorder %v6788_v34, %v6779_v15  ;;  %vm6797_vm11 = vcmp.lt.s32.totalorder %v6790_v60, %v6780_v56  ;;  %vm6799_vm12 = vcmp.lt.s32.totalorder %v6792_v48, %v6781_v43  ;;  %vm6801_vm13 = vcmp.lt.s32.totalorder %v6794_v53, %v6782_v21 }
 0x7c3   :  { %v6796_v23 = vsel %vm6795_vm10, %v6788_v34, %v6779_v15  ;;  %v6798_v32 = vsel %vm6797_vm11, %v6790_v60, %v6780_v56  ;;  %v6800_v27 = vsel %vm6799_vm12, %v6792_v48, %v6781_v43  ;;  %v6802_v3 = vsel %vm6801_vm13, %v6794_v53, %v6782_v21 }
 0x7c4   :  { %vm6803_vm0 = vcmp.lt.s32.totalorder %v6796_v23, %v6783_v51  ;;  %vm6805_vm14 = vcmp.lt.s32.totalorder %v6798_v32, %v6784_v14  ;;  %vm6807_vm15 = vcmp.lt.s32.totalorder %v6800_v27, %v6785_v4  ;;  %vm6809_vm1 = vcmp.lt.s32.totalorder %v6802_v3, %v6786_v29 }
 0x7c5   :  { %v6804_v37 = vsel %vm6803_vm0, %v6796_v23, %v6783_v51  ;;  %v6806_v61 = vsel %vm6805_vm14, %v6798_v32, %v6784_v14  ;;  %v6808_v31 = vsel %vm6807_vm15, %v6800_v27, %v6785_v4  ;;  %v6810_v18 = vsel %vm6809_vm1, %v6802_v3, %v6786_v29 }
 0x7c6   :  { %vm6811_vm2 = vcmp.lt.s32.totalorder %v6804_v37, %v6806_v61  ;;  %vm6813_vm3 = vcmp.lt.s32.totalorder %v6808_v31, %v6810_v18 }
 0x7c7   :  { %v6812_v40 = vsel %vm6811_vm2, %v6804_v37, %v6806_v61  ;;  %v6814_v1 = vsel %vm6813_vm3, %v6808_v31, %v6810_v18 }
 0x7c8   :  { %vm6815_vm4 = vcmp.lt.s32.totalorder %v6812_v40, %v6814_v1 }
 0x7c9   :  { %v6816_v0 = vsel %vm6815_vm4, %v6812_v40, %v6814_v1 }
 0x7ca   :  { %v6817_v25 = vrot.slane %v6816_v0, 4 }
 0x7cc   :  { %vm6818_vm5 = vcmp.lt.s32.totalorder %v6816_v0, %v6817_v25 }
 0x7cd   :  { %v6819_v45 = vsel %vm6818_vm5, %v6816_v0, %v6817_v25 }
 0x7ce   :  { %v6820_v57 = vrot.slane %v6819_v45, 2 }
 0x7d0   :  { %vm6821_vm6 = vcmp.lt.s32.totalorder %v6819_v45, %v6820_v57 }
 0x7d1   :  { %v6822_v11 = vsel %vm6821_vm6, %v6819_v45, %v6820_v57 }
 0x7d2   :  { %v6823_v39 = vrot.slane %v6822_v11, 1 }
 0x7d4   :  { %vm6824_vm7 = vcmp.lt.s32.totalorder %v6822_v11, %v6823_v39 }
 0x7d5   :  { %v6825_v62 = vsel %vm6824_vm7, %v6822_v11, %v6823_v39 }
 0x7d6   :  { %6826 = vst [vmem:[#allocation7] sm:$0x1] %v6825_v62 }
 0x7d7   :  { %6837 = dma.vmem_to_hbm [thread:$0]  %s6833_s3, 16, %s6835_s5, [#allocation4]  }
 0x7d8   :  { %9256 = dma.done.wait [#allocation4], 16  }
 0x7d9   :  { %9257 = vsyncadd [#allocation4], 4294967280 }
 0x7da   :  { %6842 = vsyncpa [#allocation3], 1 }
 0x7db   :  { %6843 = vsyncpa [#allocation6], 1 }
 0x7dc   :  { %6844 = vsyncpa [#allocation4], 1 }

</bundles_post_ra>
